<compile_context>
chip_gen: v7x
topology: tpu7x:2x2x1
jax: 0.10.0
libtpu: 0.0.40
codegen_flags: <defaults>
</compile_context>

<pallas_src>
import functools

import jax
import jax.numpy as jnp
import numpy as np
from jax.experimental import pallas as pl
from jax.experimental.pallas import tpu as pltpu

# Fixed module dimensions (from the PyTorch Discriminator).
C_IN = 256            # encoder feature channels
C1 = 512              # conv1 out channels
C2 = 1024             # conv2 out channels
KK = 9                # 3x3 taps
K1 = KK * C_IN        # conv1 im2col depth  (2304)
K2 = KK * C1          # conv2 im2col depth  (4608)
HEAD_K = 4 * 4        # conv3 is a 4x4 kernel applied to the 4x4 map
TN2 = 512             # conv2 output-channel tile -> grid = C2 // TN2 = 2
KCH = K2 // 4         # K-chunk for int8 dequant + matmul (1152, lane aligned)
BN_EPS = 1e-5
NEG_SLOPE = 0.2


# ---------------------------------------------------------------------------
# Fused Pallas kernel (one conv2 output-channel tile per grid step)
# ---------------------------------------------------------------------------
def _disc_fused_kernel(p1_ref, w1_ref, g1_ref, bt1_ref, gsel_ref,
                       w2q_ref, g2_ref, bt2_ref, w3r_ref,
                       o_ref, p2_scr):
    """conv1 -> BN -> LReLU -> im2col -> conv2(int8 w) -> BN -> LReLU -> head.

    Everything is recomputed per grid step (no cross-step state), so the grid
    axis is safely "parallel" and shards across TensorCores on v7x."""
    M2 = p2_scr.shape[0]
    c1 = w1_ref.shape[1]

    # ---- conv1 as one im2col matmul (bias dropped: cancels under BN) -------
    a1 = jnp.dot(p1_ref[...], w1_ref[...], preferred_element_type=jnp.float32)
    mu1 = jnp.mean(a1, axis=0, keepdims=True)
    var1 = jnp.mean(a1 * a1, axis=0, keepdims=True) - mu1 * mu1      # one pass
    y1 = (a1 - mu1) * jax.lax.rsqrt(var1 + BN_EPS) * g1_ref[...] + bt1_ref[...]
    x1 = jnp.maximum(y1, NEG_SLOPE * y1).astype(jnp.bfloat16)        # LReLU

    # ---- in-kernel im2col for conv2: 0/1 selection matmuls -----------------
    # Out-of-bounds rows of gsel are all-zero -> zero padding is exact.
    for t in range(gsel_ref.shape[0]):
        pt = jnp.dot(gsel_ref[t], x1, preferred_element_type=jnp.float32)
        p2_scr[:, t * c1:(t + 1) * c1] = pt.astype(jnp.bfloat16)

    # ---- conv2 tile: int8 weights dequantized to bf16 in K-chunks ----------
    # No dequant scale needed: the per-output-channel quantization scale is
    # strictly positive and cancels exactly in the BN normalization below.
    a2 = jnp.dot(p2_scr[:, :KCH], w2q_ref[:KCH, :].astype(jnp.bfloat16),
                 preferred_element_type=jnp.float32)
    for kk in range(KCH, K2, KCH):
        a2 = a2 + jnp.dot(p2_scr[:, kk:kk + KCH],
                          w2q_ref[kk:kk + KCH, :].astype(jnp.bfloat16),
                          preferred_element_type=jnp.float32)
    mu2 = jnp.mean(a2, axis=0, keepdims=True)
    var2 = jnp.mean(a2 * a2, axis=0, keepdims=True) - mu2 * mu2      # one pass
    y2 = (a2 - mu2) * jax.lax.rsqrt(var2 + BN_EPS) * g2_ref[...] + bt2_ref[...]
    y2 = jnp.maximum(y2, NEG_SLOPE * y2)                             # (M2, TN2)

    # ---- head partial for this channel tile: per-row contraction with w3 ---
    rowsum = jnp.sum(y2 * w3r_ref[...], axis=1, keepdims=True)       # (M2, 1)
    o_ref[...] = rowsum.reshape(1, M2, 1)


# ---------------------------------------------------------------------------
# Host-side helpers
# ---------------------------------------------------------------------------
def _im2col(x_nhwc, ksize, stride, pad):
    """(B,H,W,C) -> (B*Ho*Wo, k*k*C) patches, K ordered (kh, kw, cin)."""
    B, H, W, C = x_nhwc.shape
    xp = jnp.pad(x_nhwc, ((0, 0), (pad, pad), (pad, pad), (0, 0)))
    Ho = (H + 2 * pad - ksize) // stride + 1
    Wo = (W + 2 * pad - ksize) // stride + 1
    cols = []
    for dh in range(ksize):
        for dw in range(ksize):
            cols.append(xp[:, dh:dh + stride * (Ho - 1) + 1:stride,
                           dw:dw + stride * (Wo - 1) + 1:stride, :])
    p = jnp.stack(cols, axis=3)                   # (B, Ho, Wo, k*k, C)
    return p.reshape(B * Ho * Wo, ksize * ksize * C), Ho, Wo


@functools.lru_cache(maxsize=None)
def _patch_select(B, H, W, ksize, stride, pad):
    """(k*k, B*Ho*Wo, B*H*W) 0/1 matrices: patch_t = G[t] @ flat_feature."""
    Ho = (H + 2 * pad - ksize) // stride + 1
    Wo = (W + 2 * pad - ksize) // stride + 1
    G = np.zeros((ksize * ksize, B * Ho * Wo, B * H * W), np.float32)
    for b in range(B):
        for oi in range(Ho):
            for oj in range(Wo):
                m = b * Ho * Wo + oi * Wo + oj
                for dh in range(ksize):
                    for dw in range(ksize):
                        ii = oi * stride - pad + dh
                        jj = oj * stride - pad + dw
                        if 0 <= ii < H and 0 <= jj < W:
                            G[dh * ksize + dw, m, b * H * W + ii * W + jj] = 1.0
    return jnp.asarray(G, jnp.bfloat16)           # 0/1 exact in bf16


def _quantize_w2(w2):
    """Per-output-channel symmetric int8 quantization of the (K2, C2) weight."""
    scale = jnp.maximum(jnp.max(jnp.abs(w2), axis=0, keepdims=True), 1e-12) / 127.0
    q = jnp.clip(jnp.round(w2 / scale), -127.0, 127.0).astype(jnp.int8)
    return q, scale


# ---------------------------------------------------------------------------
# Parameters
# ---------------------------------------------------------------------------
def init_params(key):
    ks = jax.random.split(key, 10)
    return {
        # conv1: Conv2d(256 -> 512, k=3, s=2, p=1); rows ordered (kh, kw, cin)
        "w1": jax.random.normal(ks[0], (K1, C1), jnp.float32) * 0.02,
        "b1": jax.random.normal(ks[1], (C1,), jnp.float32) * 0.01,
        "g1": 1.0 + 0.1 * jax.random.normal(ks[2], (C1,), jnp.float32),
        "bt1": 0.1 * jax.random.normal(ks[3], (C1,), jnp.float32),
        # conv2: Conv2d(512 -> 1024, k=3, s=2, p=1)
        "w2": jax.random.normal(ks[4], (K2, C2), jnp.float32) * 0.02,
        "b2": jax.random.normal(ks[5], (C2,), jnp.float32) * 0.01,
        "g2": 1.0 + 0.1 * jax.random.normal(ks[6], (C2,), jnp.float32),
        "bt2": 0.1 * jax.random.normal(ks[7], (C2,), jnp.float32),
        # conv3: Conv2d(1024 -> 1, k=4); flat order (kh, kw, cin)
        "w3": jax.random.normal(ks[8], (HEAD_K * C2,), jnp.float32) * 0.02,
        "b3": jax.random.normal(ks[9], (1,), jnp.float32) * 0.01,
    }


def pack_params(p):
    """One-time device-layout packing.
    w1 -> bf16; w2 -> int8 per-channel quantized and pre-tiled to
    (n_tiles, K2, TN2) so every grid step's weight DMA is one contiguous block
    (the quantization scale is absorbed exactly by training-mode BN).
    b1/b2 are intentionally absent: conv bias + training-mode BN cancels."""
    nt = C2 // TN2
    w2q, _ = _quantize_w2(p["w2"])                            # int8 (K2, C2)
    w2qt = w2q.reshape(K2, nt, TN2).transpose(1, 0, 2)        # (nt, K2, TN2)
    return {
        "w1": p["w1"].astype(jnp.bfloat16),
        "g1": p["g1"].reshape(1, C1),
        "bt1": p["bt1"].reshape(1, C1),
        "w2qt": w2qt,
        "g2": p["g2"].reshape(1, C2),
        "bt2": p["bt2"].reshape(1, C2),
        "w3": p["w3"].reshape(HEAD_K, C2),        # row = (kh,kw), col = cin
        "b3": p["b3"].reshape(1, 1),
    }


# ---------------------------------------------------------------------------
# Forward
# ---------------------------------------------------------------------------
@jax.jit
def discriminator_forward(packed, x_nchw):
    x = jnp.transpose(x_nchw, (0, 2, 3, 1)).astype(jnp.bfloat16)   # NHWC bf16
    B = x.shape[0]
    p1, h1, w1sp = _im2col(x, 3, 2, 1)            # (B*64, 2304) bf16
    gsel = _patch_select(B, h1, w1sp, 3, 2, 1)    # (9, B*16, B*64) bf16
    M1 = p1.shape[0]
    M2 = gsel.shape[1]
    nt = C2 // TN2
    w3r = jnp.tile(packed["w3"], (B, 1))          # (M2, C2): row m uses tap m%16

    ins = (p1, packed["w1"], packed["g1"], packed["bt1"], gsel,
           packed["w2qt"], packed["g2"], packed["bt2"], w3r)

    # Accurate cost hint: lets XLA overlap the (dominant) weight DMA with the
    # XLA-side im2col / whatever upstream ops precede the Discriminator.
    flops = 2 * (nt * M1 * K1 * C1              # conv1 recomputed per tile
                 + nt * KK * M2 * M1 * C1       # in-kernel im2col matmuls
                 + M2 * K2 * C2                 # conv2 (all tiles)
                 + M2 * C2)                     # head multiply
    bytes_accessed = sum(int(a.size) * a.dtype.itemsize for a in ins) + nt * M2 * 4
    cost = pl.CostEstimate(flops=int(flops),
                           transcendentals=int(nt * (C1 + TN2)),   # BN rsqrt
                           bytes_accessed=int(bytes_accessed))

    partial = pl.pallas_call(
        _disc_fused_kernel,
        out_shape=jax.ShapeDtypeStruct((nt, M2, 1), jnp.float32),
        grid=(nt,),
        in_specs=[
            pl.BlockSpec((M1, K1), lambda j: (0, 0)),            # conv1 patches
            pl.BlockSpec((K1, C1), lambda j: (0, 0)),            # w1 (bf16)
            pl.BlockSpec((1, C1), lambda j: (0, 0)),             # gamma1
            pl.BlockSpec((1, C1), lambda j: (0, 0)),             # beta1
            pl.BlockSpec((KK, M2, M1), lambda j: (0, 0, 0)),     # conv2 patch select
            pl.BlockSpec((pl.Squeezed(), K2, TN2),
                         lambda j: (j, 0, 0)),                   # w2 int8 tile
            pl.BlockSpec((1, TN2), lambda j: (0, j)),            # gamma2 tile
            pl.BlockSpec((1, TN2), lambda j: (0, j)),            # beta2 tile
            pl.BlockSpec((M2, TN2), lambda j: (0, j)),           # per-row conv3 w
        ],
        out_specs=pl.BlockSpec((1, M2, 1), lambda j: (j, 0, 0)), # per-tile partial
        scratch_shapes=[
            pltpu.VMEM((M2, K2), jnp.bfloat16),   # conv2 patches (full M: BN-safe)
        ],
        compiler_params=pltpu.CompilerParams(
            # Every step is self-contained -> safe to shard channel tiles
            # across the two v7x TensorCores; no-op on v5e/v6e.
            dimension_semantics=("parallel",),
            vmem_limit_bytes=32 << 20),
        cost_estimate=cost,
    )(*ins)

    # Tiny XLA epilogue: sum per-tile, per-row head partials over channel
    # tiles and the 16 spatial taps, add conv3 bias, sigmoid.
    rows = jnp.sum(partial, axis=0)                       # (M2, 1)
    logits = jnp.sum(rows.reshape(B, -1), axis=1) + packed["b3"].reshape(())
    return jax.nn.sigmoid(logits)                         # == x.view(-1)


# ---------------------------------------------------------------------------
# Pure-JAX f32 reference (keeps conv biases to show they cancel under BN)
# ---------------------------------------------------------------------------
def _ref_forward(params, x_nchw):
    x = jnp.transpose(x_nchw, (0, 2, 3, 1)).astype(jnp.float32)

    def conv(x, w_flat, b, ksize, stride, pad, cout):
        cin = x.shape[-1]
        w = w_flat.reshape(ksize, ksize, cin, cout)   # HWIO, (kh,kw,cin) order
        y = jax.lax.conv_general_dilated(
            x, w, (stride, stride), [(pad, pad), (pad, pad)],
            dimension_numbers=("NHWC", "HWIO", "NHWC"),
            precision=jax.lax.Precision.HIGHEST)
        return y + b

    def bn_lrelu(y, g, bt):
        mean = jnp.mean(y, axis=(0, 1, 2), keepdims=True)
        var = jnp.mean(jnp.square(y - mean), axis=(0, 1, 2), keepdims=True)
        yn = (y - mean) * jax.lax.rsqrt(var + BN_EPS) * g + bt
        return jnp.where(yn >= 0, yn, NEG_SLOPE * yn)

    x = bn_lrelu(conv(x, params["w1"], params["b1"], 3, 2, 1, C1),
                 params["g1"], params["bt1"])
    x = bn_lrelu(conv(x, params["w2"], params["b2"], 3, 2, 1, C2),
                 params["g2"], params["bt2"])
    w3 = params["w3"].reshape(4, 4, C2, 1)
    y = jax.lax.conv_general_dilated(
        x, w3, (1, 1), [(0, 0), (0, 0)],
        dimension_numbers=("NHWC", "HWIO", "NHWC"),
        precision=jax.lax.Precision.HIGHEST) + params["b3"]
    return jax.nn.sigmoid(y).reshape(-1)


# ---------------------------------------------------------------------------
if __name__ == "__main__":
    key = jax.random.PRNGKey(0)
    kx, kp = jax.random.split(key)
    # batch=2, channels=256 fixed by the module, spatial 16 -> 8 -> 4 -> 1
    x = jax.random.normal(kx, (2, C_IN, 16, 16), jnp.float32)
    params = init_params(kp)
    packed = pack_params(params)          # one-time int8 / bf16 weight packing

    out = jax.block_until_ready(discriminator_forward(packed, x))
    assert out.shape == (2,), out.shape

    # (1) Tight check vs a reference using the SAME int8-quantized conv2
    #     weights (dequantized to f32): isolates kernel math from the
    #     deliberate weight quantization.  Remaining diff = bf16 activations.
    w2q, w2s = _quantize_w2(params["w2"])
    ref_q = _ref_forward({**params, "w2": w2q.astype(jnp.float32) * w2s}, x)
    assert jnp.allclose(out, ref_q, atol=3e-2, rtol=3e-2), (out, ref_q)

    # (2) Looser check vs the full-precision module: adds the int8 conv2
    #     weight-quantization error on top of the bf16 activation error.
    ref = _ref_forward(params, x)
    assert jnp.allclose(out, ref, atol=5e-2, rtol=5e-2), (out, ref)

    print("KERNEL_OK")
</pallas_src>

<mosaic_0001>
module attributes {stable_mosaic.version = 11 : i64} {
  func.func @_disc_fused_kernel(%arg0: i32, %arg1: memref<128x2304xbf16, #tpu.memory_space<vmem>>, %arg2: memref<2304x512xbf16, #tpu.memory_space<vmem>>, %arg3: memref<1x512xf32, #tpu.memory_space<vmem>>, %arg4: memref<1x512xf32, #tpu.memory_space<vmem>>, %arg5: memref<9x32x128xbf16, #tpu.memory_space<vmem>>, %arg6: memref<1x4608x512xi8, #tpu.memory_space<vmem>>, %arg7: memref<1x512xf32, #tpu.memory_space<vmem>>, %arg8: memref<1x512xf32, #tpu.memory_space<vmem>>, %arg9: memref<32x512xf32, #tpu.memory_space<vmem>>, %arg10: memref<1x32x1xf32, #tpu.memory_space<vmem>>, %arg11: memref<32x4608xbf16, #tpu.memory_space<vmem>>) attributes {dimension_semantics = [#tpu.dimension_semantics<parallel>], iteration_bounds = array<i64: 2>, scalar_prefetch = 0 : i64, scratch_operands = 1 : i64, tpu.core_type = #tpu.core_type<tc>, window_params = [{pipeline_mode = #tpu.pipeline_mode<synchronous>, transform_indices = @transform_0, window_bounds = array<i64: 128, 2304>}, {pipeline_mode = #tpu.pipeline_mode<synchronous>, transform_indices = @transform_1, window_bounds = array<i64: 2304, 512>}, {pipeline_mode = #tpu.pipeline_mode<synchronous>, transform_indices = @transform_2, window_bounds = array<i64: 1, 512>}, {pipeline_mode = #tpu.pipeline_mode<synchronous>, transform_indices = @transform_3, window_bounds = array<i64: 1, 512>}, {pipeline_mode = #tpu.pipeline_mode<synchronous>, transform_indices = @transform_4, window_bounds = array<i64: 9, 32, 128>}, {transform_indices = @transform_5, window_bounds = array<i64: 1, 4608, 512>}, {transform_indices = @transform_6, window_bounds = array<i64: 1, 512>}, {transform_indices = @transform_7, window_bounds = array<i64: 1, 512>}, {transform_indices = @transform_8, window_bounds = array<i64: 32, 512>}, {transform_indices = @transform_9, window_bounds = array<i64: 1, 32, 1>}]} {
    %c0 = arith.constant 0 : index
    %c0_0 = arith.constant 0 : index
    %0 = vector.load %arg1[%c0, %c0_0] : memref<128x2304xbf16, #tpu.memory_space<vmem>>, vector<128x2304xbf16>
    %c0_1 = arith.constant 0 : index
    %c0_2 = arith.constant 0 : index
    %1 = vector.load %arg2[%c0_1, %c0_2] : memref<2304x512xbf16, #tpu.memory_space<vmem>>, vector<2304x512xbf16>
    %cst = arith.constant dense<0.000000e+00> : vector<128x512xf32>
    %2 = tpu.matmul %0, %1, %cst {dimension_numbers = #tpu.dot_dimension_numbers<[1], [0], [0], [1], [0, 0, 1, 1], [], []>} : vector<128x2304xbf16>, vector<2304x512xbf16>, vector<128x512xf32> -> vector<128x512xf32>
    %cst_3 = arith.constant dense<0.000000e+00> : vector<512xf32>
    %3 = vector.multi_reduction <add>, %2, %cst_3 [0] : vector<128x512xf32> to vector<512xf32>
    %4 = vector.shape_cast %3 : vector<512xf32> to vector<1x512xf32>
    %cst_4 = arith.constant 1.280000e+02 : f32
    %5 = vector.broadcast %cst_4 : f32 to vector<1x512xf32>
    %6 = arith.divf %4, %5 : vector<1x512xf32>
    %7 = arith.mulf %2, %2 : vector<128x512xf32>
    %cst_5 = arith.constant dense<0.000000e+00> : vector<512xf32>
    %8 = vector.multi_reduction <add>, %7, %cst_5 [0] : vector<128x512xf32> to vector<512xf32>
    %9 = vector.shape_cast %8 : vector<512xf32> to vector<1x512xf32>
    %cst_6 = arith.constant 1.280000e+02 : f32
    %10 = vector.broadcast %cst_6 : f32 to vector<1x512xf32>
    %11 = arith.divf %9, %10 : vector<1x512xf32>
    %12 = arith.mulf %6, %6 : vector<1x512xf32>
    %13 = arith.subf %11, %12 : vector<1x512xf32>
    %14 = vector.broadcast %6 : vector<1x512xf32> to vector<128x512xf32>
    %15 = arith.subf %2, %14 : vector<128x512xf32>
    %cst_7 = arith.constant 9.99999974E-6 : f32
    %16 = vector.broadcast %cst_7 : f32 to vector<1x512xf32>
    %17 = arith.addf %13, %16 : vector<1x512xf32>
    %18 = math.rsqrt %17 : vector<1x512xf32>
    %19 = vector.broadcast %18 : vector<1x512xf32> to vector<128x512xf32>
    %20 = arith.mulf %15, %19 : vector<128x512xf32>
    %c0_8 = arith.constant 0 : index
    %c0_9 = arith.constant 0 : index
    %21 = vector.load %arg3[%c0_8, %c0_9] : memref<1x512xf32, #tpu.memory_space<vmem>>, vector<1x512xf32>
    %22 = vector.broadcast %21 : vector<1x512xf32> to vector<128x512xf32>
    %23 = arith.mulf %20, %22 : vector<128x512xf32>
    %c0_10 = arith.constant 0 : index
    %c0_11 = arith.constant 0 : index
    %24 = vector.load %arg4[%c0_10, %c0_11] : memref<1x512xf32, #tpu.memory_space<vmem>>, vector<1x512xf32>
    %25 = vector.broadcast %24 : vector<1x512xf32> to vector<128x512xf32>
    %26 = arith.addf %23, %25 : vector<128x512xf32>
    %cst_12 = arith.constant 2.000000e-01 : f32
    %27 = vector.broadcast %cst_12 : f32 to vector<128x512xf32>
    %28 = arith.mulf %27, %26 : vector<128x512xf32>
    %29 = arith.maximumf %26, %28 : vector<128x512xf32>
    %30 = arith.truncf %29 : vector<128x512xf32> to vector<128x512xbf16>
    %c0_13 = arith.constant 0 : index
    %c0_14 = arith.constant 0 : index
    %c0_15 = arith.constant 0 : index
    %31 = vector.load %arg5[%c0_13, %c0_14, %c0_15] : memref<9x32x128xbf16, #tpu.memory_space<vmem>>, vector<1x32x128xbf16>
    %32 = vector.shape_cast %31 : vector<1x32x128xbf16> to vector<32x128xbf16>
    %cst_16 = arith.constant dense<0.000000e+00> : vector<32x512xf32>
    %33 = tpu.matmul %32, %30, %cst_16 {dimension_numbers = #tpu.dot_dimension_numbers<[1], [0], [0], [1], [0, 0, 1, 1], [], []>} : vector<32x128xbf16>, vector<128x512xbf16>, vector<32x512xf32> -> vector<32x512xf32>
    %34 = arith.truncf %33 : vector<32x512xf32> to vector<32x512xbf16>
    %c0_17 = arith.constant 0 : index
    %c0_18 = arith.constant 0 : index
    %35 = vector.load %arg11[%c0_17, %c0_18] : memref<32x4608xbf16, #tpu.memory_space<vmem>>, vector<32x512xbf16>
    tpu.vector_store %arg11[%c0_17, %c0_18], %34 {strides = array<i32>} : memref<32x4608xbf16, #tpu.memory_space<vmem>>, vector<32x512xbf16>,
    %c1 = arith.constant 1 : index
    %c0_19 = arith.constant 0 : index
    %c0_20 = arith.constant 0 : index
    %36 = vector.load %arg5[%c1, %c0_19, %c0_20] : memref<9x32x128xbf16, #tpu.memory_space<vmem>>, vector<1x32x128xbf16>
    %37 = vector.shape_cast %36 : vector<1x32x128xbf16> to vector<32x128xbf16>
    %cst_21 = arith.constant dense<0.000000e+00> : vector<32x512xf32>
    %38 = tpu.matmul %37, %30, %cst_21 {dimension_numbers = #tpu.dot_dimension_numbers<[1], [0], [0], [1], [0, 0, 1, 1], [], []>} : vector<32x128xbf16>, vector<128x512xbf16>, vector<32x512xf32> -> vector<32x512xf32>
    %39 = arith.truncf %38 : vector<32x512xf32> to vector<32x512xbf16>
    %c0_22 = arith.constant 0 : index
    %c512 = arith.constant 512 : index
    %40 = vector.load %arg11[%c0_22, %c512] : memref<32x4608xbf16, #tpu.memory_space<vmem>>, vector<32x512xbf16>
    tpu.vector_store %arg11[%c0_22, %c512], %39 {strides = array<i32>} : memref<32x4608xbf16, #tpu.memory_space<vmem>>, vector<32x512xbf16>,
    %c2 = arith.constant 2 : index
    %c0_23 = arith.constant 0 : index
    %c0_24 = arith.constant 0 : index
    %41 = vector.load %arg5[%c2, %c0_23, %c0_24] : memref<9x32x128xbf16, #tpu.memory_space<vmem>>, vector<1x32x128xbf16>
    %42 = vector.shape_cast %41 : vector<1x32x128xbf16> to vector<32x128xbf16>
    %cst_25 = arith.constant dense<0.000000e+00> : vector<32x512xf32>
    %43 = tpu.matmul %42, %30, %cst_25 {dimension_numbers = #tpu.dot_dimension_numbers<[1], [0], [0], [1], [0, 0, 1, 1], [], []>} : vector<32x128xbf16>, vector<128x512xbf16>, vector<32x512xf32> -> vector<32x512xf32>
    %44 = arith.truncf %43 : vector<32x512xf32> to vector<32x512xbf16>
    %c0_26 = arith.constant 0 : index
    %c1024 = arith.constant 1024 : index
    %45 = vector.load %arg11[%c0_26, %c1024] : memref<32x4608xbf16, #tpu.memory_space<vmem>>, vector<32x512xbf16>
    tpu.vector_store %arg11[%c0_26, %c1024], %44 {strides = array<i32>} : memref<32x4608xbf16, #tpu.memory_space<vmem>>, vector<32x512xbf16>,
    %c3 = arith.constant 3 : index
    %c0_27 = arith.constant 0 : index
    %c0_28 = arith.constant 0 : index
    %46 = vector.load %arg5[%c3, %c0_27, %c0_28] : memref<9x32x128xbf16, #tpu.memory_space<vmem>>, vector<1x32x128xbf16>
    %47 = vector.shape_cast %46 : vector<1x32x128xbf16> to vector<32x128xbf16>
    %cst_29 = arith.constant dense<0.000000e+00> : vector<32x512xf32>
    %48 = tpu.matmul %47, %30, %cst_29 {dimension_numbers = #tpu.dot_dimension_numbers<[1], [0], [0], [1], [0, 0, 1, 1], [], []>} : vector<32x128xbf16>, vector<128x512xbf16>, vector<32x512xf32> -> vector<32x512xf32>
    %49 = arith.truncf %48 : vector<32x512xf32> to vector<32x512xbf16>
    %c0_30 = arith.constant 0 : index
    %c1536 = arith.constant 1536 : index
    %50 = vector.load %arg11[%c0_30, %c1536] : memref<32x4608xbf16, #tpu.memory_space<vmem>>, vector<32x512xbf16>
    tpu.vector_store %arg11[%c0_30, %c1536], %49 {strides = array<i32>} : memref<32x4608xbf16, #tpu.memory_space<vmem>>, vector<32x512xbf16>,
    %c4 = arith.constant 4 : index
    %c0_31 = arith.constant 0 : index
    %c0_32 = arith.constant 0 : index
    %51 = vector.load %arg5[%c4, %c0_31, %c0_32] : memref<9x32x128xbf16, #tpu.memory_space<vmem>>, vector<1x32x128xbf16>
    %52 = vector.shape_cast %51 : vector<1x32x128xbf16> to vector<32x128xbf16>
    %cst_33 = arith.constant dense<0.000000e+00> : vector<32x512xf32>
    %53 = tpu.matmul %52, %30, %cst_33 {dimension_numbers = #tpu.dot_dimension_numbers<[1], [0], [0], [1], [0, 0, 1, 1], [], []>} : vector<32x128xbf16>, vector<128x512xbf16>, vector<32x512xf32> -> vector<32x512xf32>
    %54 = arith.truncf %53 : vector<32x512xf32> to vector<32x512xbf16>
    %c0_34 = arith.constant 0 : index
    %c2048 = arith.constant 2048 : index
    %55 = vector.load %arg11[%c0_34, %c2048] : memref<32x4608xbf16, #tpu.memory_space<vmem>>, vector<32x512xbf16>
    tpu.vector_store %arg11[%c0_34, %c2048], %54 {strides = array<i32>} : memref<32x4608xbf16, #tpu.memory_space<vmem>>, vector<32x512xbf16>,
    %c5 = arith.constant 5 : index
    %c0_35 = arith.constant 0 : index
    %c0_36 = arith.constant 0 : index
    %56 = vector.load %arg5[%c5, %c0_35, %c0_36] : memref<9x32x128xbf16, #tpu.memory_space<vmem>>, vector<1x32x128xbf16>
    %57 = vector.shape_cast %56 : vector<1x32x128xbf16> to vector<32x128xbf16>
    %cst_37 = arith.constant dense<0.000000e+00> : vector<32x512xf32>
    %58 = tpu.matmul %57, %30, %cst_37 {dimension_numbers = #tpu.dot_dimension_numbers<[1], [0], [0], [1], [0, 0, 1, 1], [], []>} : vector<32x128xbf16>, vector<128x512xbf16>, vector<32x512xf32> -> vector<32x512xf32>
    %59 = arith.truncf %58 : vector<32x512xf32> to vector<32x512xbf16>
    %c0_38 = arith.constant 0 : index
    %c2560 = arith.constant 2560 : index
    %60 = vector.load %arg11[%c0_38, %c2560] : memref<32x4608xbf16, #tpu.memory_space<vmem>>, vector<32x512xbf16>
    tpu.vector_store %arg11[%c0_38, %c2560], %59 {strides = array<i32>} : memref<32x4608xbf16, #tpu.memory_space<vmem>>, vector<32x512xbf16>,
    %c6 = arith.constant 6 : index
    %c0_39 = arith.constant 0 : index
    %c0_40 = arith.constant 0 : index
    %61 = vector.load %arg5[%c6, %c0_39, %c0_40] : memref<9x32x128xbf16, #tpu.memory_space<vmem>>, vector<1x32x128xbf16>
    %62 = vector.shape_cast %61 : vector<1x32x128xbf16> to vector<32x128xbf16>
    %cst_41 = arith.constant dense<0.000000e+00> : vector<32x512xf32>
    %63 = tpu.matmul %62, %30, %cst_41 {dimension_numbers = #tpu.dot_dimension_numbers<[1], [0], [0], [1], [0, 0, 1, 1], [], []>} : vector<32x128xbf16>, vector<128x512xbf16>, vector<32x512xf32> -> vector<32x512xf32>
    %64 = arith.truncf %63 : vector<32x512xf32> to vector<32x512xbf16>
    %c0_42 = arith.constant 0 : index
    %c3072 = arith.constant 3072 : index
    %65 = vector.load %arg11[%c0_42, %c3072] : memref<32x4608xbf16, #tpu.memory_space<vmem>>, vector<32x512xbf16>
    tpu.vector_store %arg11[%c0_42, %c3072], %64 {strides = array<i32>} : memref<32x4608xbf16, #tpu.memory_space<vmem>>, vector<32x512xbf16>,
    %c7 = arith.constant 7 : index
    %c0_43 = arith.constant 0 : index
    %c0_44 = arith.constant 0 : index
    %66 = vector.load %arg5[%c7, %c0_43, %c0_44] : memref<9x32x128xbf16, #tpu.memory_space<vmem>>, vector<1x32x128xbf16>
    %67 = vector.shape_cast %66 : vector<1x32x128xbf16> to vector<32x128xbf16>
    %cst_45 = arith.constant dense<0.000000e+00> : vector<32x512xf32>
    %68 = tpu.matmul %67, %30, %cst_45 {dimension_numbers = #tpu.dot_dimension_numbers<[1], [0], [0], [1], [0, 0, 1, 1], [], []>} : vector<32x128xbf16>, vector<128x512xbf16>, vector<32x512xf32> -> vector<32x512xf32>
    %69 = arith.truncf %68 : vector<32x512xf32> to vector<32x512xbf16>
    %c0_46 = arith.constant 0 : index
    %c3584 = arith.constant 3584 : index
    %70 = vector.load %arg11[%c0_46, %c3584] : memref<32x4608xbf16, #tpu.memory_space<vmem>>, vector<32x512xbf16>
    tpu.vector_store %arg11[%c0_46, %c3584], %69 {strides = array<i32>} : memref<32x4608xbf16, #tpu.memory_space<vmem>>, vector<32x512xbf16>,
    %c8 = arith.constant 8 : index
    %c0_47 = arith.constant 0 : index
    %c0_48 = arith.constant 0 : index
    %71 = vector.load %arg5[%c8, %c0_47, %c0_48] : memref<9x32x128xbf16, #tpu.memory_space<vmem>>, vector<1x32x128xbf16>
    %72 = vector.shape_cast %71 : vector<1x32x128xbf16> to vector<32x128xbf16>
    %cst_49 = arith.constant dense<0.000000e+00> : vector<32x512xf32>
    %73 = tpu.matmul %72, %30, %cst_49 {dimension_numbers = #tpu.dot_dimension_numbers<[1], [0], [0], [1], [0, 0, 1, 1], [], []>} : vector<32x128xbf16>, vector<128x512xbf16>, vector<32x512xf32> -> vector<32x512xf32>
    %74 = arith.truncf %73 : vector<32x512xf32> to vector<32x512xbf16>
    %c0_50 = arith.constant 0 : index
    %c4096 = arith.constant 4096 : index
    %75 = vector.load %arg11[%c0_50, %c4096] : memref<32x4608xbf16, #tpu.memory_space<vmem>>, vector<32x512xbf16>
    tpu.vector_store %arg11[%c0_50, %c4096], %74 {strides = array<i32>} : memref<32x4608xbf16, #tpu.memory_space<vmem>>, vector<32x512xbf16>,
    %c0_51 = arith.constant 0 : index
    %c0_52 = arith.constant 0 : index
    %76 = vector.load %arg11[%c0_51, %c0_52] : memref<32x4608xbf16, #tpu.memory_space<vmem>>, vector<32x1152xbf16>
    %c0_53 = arith.constant 0 : index
    %c0_54 = arith.constant 0 : index
    %c0_55 = arith.constant 0 : index
    %77 = vector.load %arg6[%c0_53, %c0_54, %c0_55] : memref<1x4608x512xi8, #tpu.memory_space<vmem>>, vector<1x1152x512xi8>
    %78 = vector.shape_cast %77 : vector<1x1152x512xi8> to vector<1152x512xi8>
    %79 = arith.sitofp %78 : vector<1152x512xi8> to vector<1152x512xbf16>
    %cst_56 = arith.constant dense<0.000000e+00> : vector<32x512xf32>
    %80 = tpu.matmul %76, %79, %cst_56 {dimension_numbers = #tpu.dot_dimension_numbers<[1], [0], [0], [1], [0, 0, 1, 1], [], []>} : vector<32x1152xbf16>, vector<1152x512xbf16>, vector<32x512xf32> -> vector<32x512xf32>
    %c0_57 = arith.constant 0 : index
    %c1152 = arith.constant 1152 : index
    %81 = vector.load %arg11[%c0_57, %c1152] : memref<32x4608xbf16, #tpu.memory_space<vmem>>, vector<32x1152xbf16>
    %c0_58 = arith.constant 0 : index
    %c1152_59 = arith.constant 1152 : index
    %c0_60 = arith.constant 0 : index
    %82 = vector.load %arg6[%c0_58, %c1152_59, %c0_60] : memref<1x4608x512xi8, #tpu.memory_space<vmem>>, vector<1x1152x512xi8>
    %83 = vector.shape_cast %82 : vector<1x1152x512xi8> to vector<1152x512xi8>
    %84 = arith.sitofp %83 : vector<1152x512xi8> to vector<1152x512xbf16>
    %cst_61 = arith.constant dense<0.000000e+00> : vector<32x512xf32>
    %85 = tpu.matmul %81, %84, %cst_61 {dimension_numbers = #tpu.dot_dimension_numbers<[1], [0], [0], [1], [0, 0, 1, 1], [], []>} : vector<32x1152xbf16>, vector<1152x512xbf16>, vector<32x512xf32> -> vector<32x512xf32>
    %86 = arith.addf %80, %85 : vector<32x512xf32>
    %c0_62 = arith.constant 0 : index
    %c2304 = arith.constant 2304 : index
    %87 = vector.load %arg11[%c0_62, %c2304] : memref<32x4608xbf16, #tpu.memory_space<vmem>>, vector<32x1152xbf16>
    %c0_63 = arith.constant 0 : index
    %c2304_64 = arith.constant 2304 : index
    %c0_65 = arith.constant 0 : index
    %88 = vector.load %arg6[%c0_63, %c2304_64, %c0_65] : memref<1x4608x512xi8, #tpu.memory_space<vmem>>, vector<1x1152x512xi8>
    %89 = vector.shape_cast %88 : vector<1x1152x512xi8> to vector<1152x512xi8>
    %90 = arith.sitofp %89 : vector<1152x512xi8> to vector<1152x512xbf16>
    %cst_66 = arith.constant dense<0.000000e+00> : vector<32x512xf32>
    %91 = tpu.matmul %87, %90, %cst_66 {dimension_numbers = #tpu.dot_dimension_numbers<[1], [0], [0], [1], [0, 0, 1, 1], [], []>} : vector<32x1152xbf16>, vector<1152x512xbf16>, vector<32x512xf32> -> vector<32x512xf32>
    %92 = arith.addf %86, %91 : vector<32x512xf32>
    %c0_67 = arith.constant 0 : index
    %c3456 = arith.constant 3456 : index
    %93 = vector.load %arg11[%c0_67, %c3456] : memref<32x4608xbf16, #tpu.memory_space<vmem>>, vector<32x1152xbf16>
    %c0_68 = arith.constant 0 : index
    %c3456_69 = arith.constant 3456 : index
    %c0_70 = arith.constant 0 : index
    %94 = vector.load %arg6[%c0_68, %c3456_69, %c0_70] : memref<1x4608x512xi8, #tpu.memory_space<vmem>>, vector<1x1152x512xi8>
    %95 = vector.shape_cast %94 : vector<1x1152x512xi8> to vector<1152x512xi8>
    %96 = arith.sitofp %95 : vector<1152x512xi8> to vector<1152x512xbf16>
    %cst_71 = arith.constant dense<0.000000e+00> : vector<32x512xf32>
    %97 = tpu.matmul %93, %96, %cst_71 {dimension_numbers = #tpu.dot_dimension_numbers<[1], [0], [0], [1], [0, 0, 1, 1], [], []>} : vector<32x1152xbf16>, vector<1152x512xbf16>, vector<32x512xf32> -> vector<32x512xf32>
    %98 = arith.addf %92, %97 : vector<32x512xf32>
    %cst_72 = arith.constant dense<0.000000e+00> : vector<512xf32>
    %99 = vector.multi_reduction <add>, %98, %cst_72 [0] : vector<32x512xf32> to vector<512xf32>
    %100 = vector.shape_cast %99 : vector<512xf32> to vector<1x512xf32>
    %cst_73 = arith.constant 3.200000e+01 : f32
    %101 = vector.broadcast %cst_73 : f32 to vector<1x512xf32>
    %102 = arith.divf %100, %101 : vector<1x512xf32>
    %103 = arith.mulf %98, %98 : vector<32x512xf32>
    %cst_74 = arith.constant dense<0.000000e+00> : vector<512xf32>
    %104 = vector.multi_reduction <add>, %103, %cst_74 [0] : vector<32x512xf32> to vector<512xf32>
    %105 = vector.shape_cast %104 : vector<512xf32> to vector<1x512xf32>
    %cst_75 = arith.constant 3.200000e+01 : f32
    %106 = vector.broadcast %cst_75 : f32 to vector<1x512xf32>
    %107 = arith.divf %105, %106 : vector<1x512xf32>
    %108 = arith.mulf %102, %102 : vector<1x512xf32>
    %109 = arith.subf %107, %108 : vector<1x512xf32>
    %110 = vector.broadcast %102 : vector<1x512xf32> to vector<32x512xf32>
    %111 = arith.subf %98, %110 : vector<32x512xf32>
    %cst_76 = arith.constant 9.99999974E-6 : f32
    %112 = vector.broadcast %cst_76 : f32 to vector<1x512xf32>
    %113 = arith.addf %109, %112 : vector<1x512xf32>
    %114 = math.rsqrt %113 : vector<1x512xf32>
    %115 = vector.broadcast %114 : vector<1x512xf32> to vector<32x512xf32>
    %116 = arith.mulf %111, %115 : vector<32x512xf32>
    %c0_77 = arith.constant 0 : index
    %c0_78 = arith.constant 0 : index
    %117 = vector.load %arg7[%c0_77, %c0_78] : memref<1x512xf32, #tpu.memory_space<vmem>>, vector<1x512xf32>
    %118 = vector.broadcast %117 : vector<1x512xf32> to vector<32x512xf32>
    %119 = arith.mulf %116, %118 : vector<32x512xf32>
    %c0_79 = arith.constant 0 : index
    %c0_80 = arith.constant 0 : index
    %120 = vector.load %arg8[%c0_79, %c0_80] : memref<1x512xf32, #tpu.memory_space<vmem>>, vector<1x512xf32>
    %121 = vector.broadcast %120 : vector<1x512xf32> to vector<32x512xf32>
    %122 = arith.addf %119, %121 : vector<32x512xf32>
    %cst_81 = arith.constant 2.000000e-01 : f32
    %123 = vector.broadcast %cst_81 : f32 to vector<32x512xf32>
    %124 = arith.mulf %123, %122 : vector<32x512xf32>
    %125 = arith.maximumf %122, %124 : vector<32x512xf32>
    %c0_82 = arith.constant 0 : index
    %c0_83 = arith.constant 0 : index
    %126 = vector.load %arg9[%c0_82, %c0_83] : memref<32x512xf32, #tpu.memory_space<vmem>>, vector<32x512xf32>
    %127 = arith.mulf %125, %126 : vector<32x512xf32>
    %cst_84 = arith.constant dense<0.000000e+00> : vector<32xf32>
    %128 = vector.multi_reduction <add>, %127, %cst_84 [1] : vector<32x512xf32> to vector<32xf32>
    %129 = vector.shape_cast %128 : vector<32xf32> to vector<32x1xf32>
    %130 = vector.shape_cast %129 : vector<32x1xf32> to vector<1x32x1xf32>
    %c0_85 = arith.constant 0 : index
    %c0_86 = arith.constant 0 : index
    %c0_87 = arith.constant 0 : index
    %131 = vector.load %arg10[%c0_85, %c0_86, %c0_87] : memref<1x32x1xf32, #tpu.memory_space<vmem>>, vector<1x32x1xf32>
    tpu.vector_store %arg10[%c0_85, %c0_86, %c0_87], %130 {strides = array<i32>} : memref<1x32x1xf32, #tpu.memory_space<vmem>>, vector<1x32x1xf32>,
    return
  }
  func.func @transform_0(%arg0: i32) -> (i32, i32) {
    %c0_i32 = arith.constant 0 : i32
    %c0_i32_0 = arith.constant 0 : i32
    %c0_i32_1 = arith.constant 0 : i32
    return %c0_i32, %c0_i32_0 : i32, i32
  }
  func.func @transform_1(%arg0: i32) -> (i32, i32) {
    %c0_i32 = arith.constant 0 : i32
    %c0_i32_0 = arith.constant 0 : i32
    %c0_i32_1 = arith.constant 0 : i32
    return %c0_i32, %c0_i32_0 : i32, i32
  }
  func.func @transform_2(%arg0: i32) -> (i32, i32) {
    %c0_i32 = arith.constant 0 : i32
    %c0_i32_0 = arith.constant 0 : i32
    %c0_i32_1 = arith.constant 0 : i32
    return %c0_i32, %c0_i32_0 : i32, i32
  }
  func.func @transform_3(%arg0: i32) -> (i32, i32) {
    %c0_i32 = arith.constant 0 : i32
    %c0_i32_0 = arith.constant 0 : i32
    %c0_i32_1 = arith.constant 0 : i32
    return %c0_i32, %c0_i32_0 : i32, i32
  }
  func.func @transform_4(%arg0: i32) -> (i32, i32, i32) {
    %c0_i32 = arith.constant 0 : i32
    %c0_i32_0 = arith.constant 0 : i32
    %c0_i32_1 = arith.constant 0 : i32
    %c0_i32_2 = arith.constant 0 : i32
    return %c0_i32, %c0_i32_0, %c0_i32_1 : i32, i32, i32
  }
  func.func @transform_5(%arg0: i32) -> (i32, i32, i32) {
    %c0_i32 = arith.constant 0 : i32
    %c0_i32_0 = arith.constant 0 : i32
    %c0_i32_1 = arith.constant 0 : i32
    return %arg0, %c0_i32, %c0_i32_0 : i32, i32, i32
  }
  func.func @transform_6(%arg0: i32) -> (i32, i32) {
    %c0_i32 = arith.constant 0 : i32
    %c0_i32_0 = arith.constant 0 : i32
    return %c0_i32, %arg0 : i32, i32
  }
  func.func @transform_7(%arg0: i32) -> (i32, i32) {
    %c0_i32 = arith.constant 0 : i32
    %c0_i32_0 = arith.constant 0 : i32
    return %c0_i32, %arg0 : i32, i32
  }
  func.func @transform_8(%arg0: i32) -> (i32, i32) {
    %c0_i32 = arith.constant 0 : i32
    %c0_i32_0 = arith.constant 0 : i32
    return %c0_i32, %arg0 : i32, i32
  }
  func.func @transform_9(%arg0: i32) -> (i32, i32, i32) {
    %c0_i32 = arith.constant 0 : i32
    %c0_i32_0 = arith.constant 0 : i32
    %c0_i32_1 = arith.constant 0 : i32
    return %arg0, %c0_i32, %c0_i32_0 : i32, i32, i32
  }
}

</mosaic_0001>

<bundles_post_ra>
// kernel: discriminator_forward.1
= control target key start
LH: loop header
LB: loop body
LE: loop exit
PB: predicated region body
PF: predicated region fallthrough
CT: control target
= control target key end

     0   :  { %14 = vsyncpa [#allocation4], 0  ;;  %s16013_s30 = smov 0   ;;  %s16015_s10 = smov 0   ;;  %s18958_s0 = inlined_call_operand.vmem [shape: bf16[128,2304], index: 0, kind: input, shape index: {}]   ;;  %s18959_s1 = inlined_call_operand.hbm [shape: bf16[2304,512], index: 1, kind: input, shape index: {}]   ;;  %s18960_s2 = inlined_call_operand.vmem [shape: f32[1,512], index: 2, kind: input, shape index: {}]   ;;  %s18961_s3 = inlined_call_operand.vmem [shape: f32[1,512], index: 3, kind: input, shape index: {}]   ;;  %s18962_s4 = inlined_call_operand.vmem [shape: bf16[9,32,128], index: 4, kind: input, shape index: {}]   ;;  %s18963_s5 = inlined_call_operand.vmem [shape: s8[2,4608,512], index: 5, kind: input, shape index: {}]   ;;  %s18964_s6 = inlined_call_operand.vmem [shape: f32[1,1024], index: 6, kind: input, shape index: {}]   ;;  %s18965_s7 = inlined_call_operand.vmem [shape: f32[1,1024], index: 7, kind: input, shape index: {}]   ;;  %s18966_s8 = inlined_call_operand.vmem [shape: f32[32,1024], index: 8, kind: input, shape index: {}]   ;;  %s18967_s9 = inlined_call_operand.vmem [shape: f32[2,32,1], index: 9, kind: output, shape index: {}]  }
   0x1   :  { %s16017_s11 = smov 0  }
   0x2 LB: > { %s16029_s12 = sadd.s32 4294967295, %s15957_s11   ;;  %s16032_s13 = sadd.s32 1, %s15957_s11   ;;  %s15957_s11 = sphi %s16017_s11, %s19225_s11   ;;  %s15953_s10 = sphi %s16015_s10, %s19224_s10   ;;  %s15949_s30 = sphi %s16013_s30, %s19223_s30  }
   0x3   : > { %s207_s14 = ssub.s32 %s15957_s11, %s16032_s13  ;;  %s210_s15 = sadd.s32 1, %s15953_s10 }
   0x4   : > { %p208_p0 = scmp.eq.s32.totalorder %s207_s14, 0  ;;  %p217_p1 = scmp.ne.s32.totalorder %s15953_s10, %s15949_s30 }
   0x5   : > { %p218_p2 = scmp.eq.s32.totalorder %s15957_s11, 0  ;;  %p13146_p3 = scmp.ge.s32.totalorder %s15957_s11, 1 }
   0x6   : > { %s16042_s16 = scalar_select %p208_p0, %s15953_s10, %s210_s15  }
   0x7   : > { %p16044_p4 = por %p218_p2, %p217_p1  ;;  %p260_p5 = scmp.lt.s32.totalorder %s15957_s11, 3 }
   0x8   : > { %p18968_p6 = scmp.eq.s32.totalorder %s16029_s12, 0  ;;  %s15959_s19 = smov [#allocation3]  }
   0x9   : > { %s19048_s17 = scalar_select %p16044_p4, 1, 0 }
   0xa   : > { %p16050_p7 = pnand %p13146_p3, %p260_p5  ;;  %s275_s20 = sshll.u32 %s15959_s19, 4  ;;  %s276_s20 = int_to_ptr.vmem [resolvable:$true] %s275_s20 }
   0xb   : > { %s15903_s24 = scalar_lea.hbm %s18959_s1, 73728 }
   0xc   : > { %s19049_s18 = scalar_select %p16050_p7, 1, 0 }
   0xd   : > { %p14755_p8 = pneg %p16050_p7  ;;  %p15904_p10 = scmp.ne.s32.totalorder %s18959_s1, %s15903_s24 }
   0xe   : > { %p15910_p0 = scmp.lt.u32.totalorder %s15903_s24, %s18959_s1 }
   0xf   : > { %p16058_p9 = pnand %p18968_p6, %p14755_p8 }
  0x11   : > { %p15905_p11 = pneg %p16058_p9 }
  0x13   : > { %p15906_p12 = pnand %p15905_p11, %p15904_p10 }
  0x15   : > { %p15907_p13 = pneg %p15906_p12 }
  0x17   : > { %p15912_p1 = pnand %p15910_p0, %p15907_p13 }
  0x19   : > { %15915 = shalt.err (!%p15912_p1)
}
  0x1a   : > { %s15916_s29 = scalar_lea.vmem %s276_s20, 73728  ;;  %p15924_p8 = scmp.lt.s32.totalorder %s276_s20, %s276_s20 }
  0x1b   : > { %p15917_p2 = scmp.ne.s32.totalorder %s276_s20, %s15916_s29  ;;  %p15925_p6 = scmp.lt.s32.totalorder %s15916_s29, %s15916_s29 }
  0x1d   : > { %p15919_p3 = pnand %p15917_p2, %p15905_p11  ;;  %p15926_p7 = por %p15925_p6, %p15924_p8 }
  0x1f   : > { %p15920_p5 = pneg %p15919_p3 }
  0x21   : > { %p15927_p4 = pnand %p15926_p7, %p15920_p5 }
  0x23   : > { %15930 = shalt.err (!%p15927_p4)
}
  0x24   : > { %s15960_s14 = smov 256   ;;  %s15961_s15 = smov 16  }
  0x25   : > { %14758 = dma.hbm_to_vmem [thread:$0]  (!%p16058_p9), %s18959_s1, 73728, %s276_s20, [#allocation4], %s15960_s14, %s15960_s14, %s15961_s15  }
  0x26   : > { %p13148_p10 = scmp.ge.s32.totalorder %s15957_s11, 2 }
  0x27   : > { %p19051_p12 = scmp.ne.s32.totalorder (!%p13148_p10), %s19048_s17, 0 }
  0x28   : > { %294 = sbr.rel (%p13148_p10) target bundleno = 59 (0x3b), region = 36 }
  0x2f   : > { %321 = sbr.rel (!%p19051_p12) target bundleno = 59 (0x3b), region = 52  ;;  %s323_s23 = sand.u32 (%p19051_p12), 1, %s15953_s10  }
  0x30   : > { %s13932_s24 = sshll.u32 (%p19051_p12), %s15957_s11, 5  ;;  %s13149_s25 = sshll.u32 (%p19051_p12), %s323_s23, 7 }
  0x31   : > { %s16086_s28 = scalar_lea.vmem (%p19051_p12), %s18966_s8, %s13932_s24  ;;  %s325_s17 = scalar_lea.vmem (%p19051_p12), [#allocation5], %s13149_s25 }
  0x32   : > { %v341_v0 = vld [vmem:[%s16086_s28] sm:$0xff] (%p19051_p12)  ;;  %v343_v1 = vld [vmem:[%s16086_s28 + $0x8] sm:$0xff] (%p19051_p12)  ;;  %v345_v2 = vld [vmem:[%s16086_s28 + $0x10] sm:$0xff] (%p19051_p12) }
  0x33   : > { %342 = vst [vmem:[%s325_s17] sm:$0xff] (%p19051_p12), %v341_v0  ;;  %344 = vst [vmem:[%s325_s17 + $0x8] sm:$0xff] (%p19051_p12), %v343_v1  ;;  %v347_v3 = vld [vmem:[%s16086_s28 + $0x18] sm:$0xff] (%p19051_p12)  ;;  %v349_v4 = vld [vmem:[%s16086_s28 + $0x40] sm:$0xff] (%p19051_p12) }
  0x34   : > { %346 = vst [vmem:[%s325_s17 + $0x10] sm:$0xff] (%p19051_p12), %v345_v2  ;;  %v351_v5 = vld [vmem:[%s16086_s28 + $0x48] sm:$0xff] (%p19051_p12)  ;;  %348 = vst [vmem:[%s325_s17 + $0x18] sm:$0xff] (%p19051_p12), %v347_v3  ;;  %v353_v6 = vld [vmem:[%s16086_s28 + $0x50] sm:$0xff] (%p19051_p12) }
  0x35   : > { %350 = vst [vmem:[%s325_s17 + $0x20] sm:$0xff] (%p19051_p12), %v349_v4  ;;  %352 = vst [vmem:[%s325_s17 + $0x28] sm:$0xff] (%p19051_p12), %v351_v5  ;;  %v355_v7 = vld [vmem:[%s16086_s28 + $0x58] sm:$0xff] (%p19051_p12)  ;;  %v357_v8 = vld [vmem:[%s16086_s28 + $0x80] sm:$0xff] (%p19051_p12) }
  0x36   : > { %354 = vst [vmem:[%s325_s17 + $0x30] sm:$0xff] %v353_v6  ;;  %356 = vst [vmem:[%s325_s17 + $0x38] sm:$0xff] %v355_v7  ;;  %v359_v9 = vld [vmem:[%s16086_s28 + $0x88] sm:$0xff]  ;;  %v361_v10 = vld [vmem:[%s16086_s28 + $0x90] sm:$0xff] }
  0x37   : > { %358 = vst [vmem:[%s325_s17 + $0x40] sm:$0xff] %v357_v8  ;;  %v363_v11 = vld [vmem:[%s16086_s28 + $0x98] sm:$0xff]  ;;  %360 = vst [vmem:[%s325_s17 + $0x48] sm:$0xff] %v359_v9  ;;  %v365_v12 = vld [vmem:[%s16086_s28 + $0xc0] sm:$0xff] }
  0x38   : > { %362 = vst [vmem:[%s325_s17 + $0x50] sm:$0xff] %v361_v10  ;;  %364 = vst [vmem:[%s325_s17 + $0x58] sm:$0xff] %v363_v11  ;;  %v367_v13 = vld [vmem:[%s16086_s28 + $0xc8] sm:$0xff]  ;;  %v369_v14 = vld [vmem:[%s16086_s28 + $0xd0] sm:$0xff] }
  0x39   : > { %366 = vst [vmem:[%s325_s17 + $0x60] sm:$0xff] %v365_v12  ;;  %368 = vst [vmem:[%s325_s17 + $0x68] sm:$0xff] %v367_v13  ;;  %v371_v15 = vld [vmem:[%s16086_s28 + $0xd8] sm:$0xff] }
  0x3a   : > { %370 = vst [vmem:[%s325_s17 + $0x70] sm:$0xff] %v369_v14  ;;  %372 = vst [vmem:[%s325_s17 + $0x78] sm:$0xff] %v371_v15 }
  0x3b PF: > { %p19052_p4 = scmp.ne.s32.totalorder %s19049_s18, 0 }
  0x3d   : > { %381 = sbr.rel (%p19052_p4) target bundleno = 2910 (0xb5e), region = 75 }
  0x44   : > { %p19053_p6 = scmp.eq.s32.totalorder %s16029_s12, 0 }
  0x46   : > { %15944 = dma.done.wait (%p19053_p6), [#allocation4], 73728   ;;  %p19054_p7 = pmov %p19053_p6 }
  0x47   : > { %v14789_v16 = vld [vmem:[#allocation3 + $0x4] ss:$16 sps:$4 sm:$0xff]   ;;  %v14791_v17 = vld [vmem:[#allocation3 + $0xc] ss:$16 sps:$4 sm:$0xff]   ;;  %v14793_v18 = vld [vmem:[#allocation3] ss:$16 sps:$4 sm:$0xff]  }
  0x48   : > { %15946 = vsyncadd (%p19054_p7), [#allocation4], 4294893568  ;;  %4778 = vmatprep.subr.bf16.mxu0 %v14789_v16  ;;  %v14794_v19 = vld [vmem:[#allocation3 + $0x8] ss:$16 sps:$4 sm:$0xff]   ;;  %5795 = vmatprep.subr.bf16.mxu1 %v14791_v17  ;;  %v14795_v20 = vld [vmem:[#allocation3 + $0x24] ss:$16 sps:$4 sm:$0xff]  }
  0x49   : > { %4779 = vmatpush1.bf16.msra.mxu0 %v14793_v18  ;;  %5796 = vmatpush1.bf16.msra.mxu1 %v14794_v19  ;;  %v14797_v21 = vld [vmem:[#allocation3 + $0x2c] ss:$16 sps:$4 sm:$0xff]   ;;  %v14799_v22 = vld [vmem:[#allocation3 + $0x20] ss:$16 sps:$4 sm:$0xff]   ;;  %v14800_v23 = vld [vmem:[#allocation3 + $0x28] ss:$16 sps:$4 sm:$0xff]  }
  0x4a   : > { %4780 = vmatprep.subr.bf16.mxu0 %v14795_v20  ;;  %5797 = vmatprep.subr.bf16.mxu1 %v14797_v21  ;;  %v14801_v24 = vld [vmem:[#allocation3 + $0x44] ss:$16 sps:$4 sm:$0xff]   ;;  %v14803_v25 = vld [vmem:[#allocation3 + $0x4c] ss:$16 sps:$4 sm:$0xff]   ;;  %v14805_v26 = vld [vmem:[#allocation3 + $0x40] ss:$16 sps:$4 sm:$0xff]  }
  0x4b   : > { %v14806_v27 = vld [vmem:[#allocation3 + $0x48] ss:$16 sps:$4 sm:$0xff]   ;;  %v14807_v28 = vld [vmem:[#allocation3 + $0x64] ss:$16 sps:$4 sm:$0xff]   ;;  %v14809_v29 = vld [vmem:[#allocation3 + $0x6c] ss:$16 sps:$4 sm:$0xff]  }
  0x4c   : > { %v14811_v30 = vld [vmem:[#allocation3 + $0x60] ss:$16 sps:$4 sm:$0xff]   ;;  %v14812_v31 = vld [vmem:[#allocation3 + $0x68] ss:$16 sps:$4 sm:$0xff]   ;;  %v14813_v32 = vld [vmem:[#allocation3 + $0x84] ss:$16 sps:$4 sm:$0xff]  }
  0x4d   : > { %4781 = vmatpush1.bf16.msra.mxu0 %v14799_v22  ;;  %5798 = vmatpush1.bf16.msra.mxu1 %v14800_v23  ;;  %v14815_v33 = vld [vmem:[#allocation3 + $0x8c] ss:$16 sps:$4 sm:$0xff]   ;;  %v14817_v34 = vld [vmem:[#allocation3 + $0x80] ss:$16 sps:$4 sm:$0xff]   ;;  %v14818_v35 = vld [vmem:[#allocation3 + $0x88] ss:$16 sps:$4 sm:$0xff]  }
  0x4e   : > { %4782 = vmatprep.subr.bf16.mxu0 %v14801_v24  ;;  %5799 = vmatprep.subr.bf16.mxu1 %v14803_v25  ;;  %v14819_v36 = vld [vmem:[#allocation3 + $0xa4] ss:$16 sps:$4 sm:$0xff]   ;;  %v14821_v37 = vld [vmem:[#allocation3 + $0xac] ss:$16 sps:$4 sm:$0xff]   ;;  %v14823_v38 = vld [vmem:[#allocation3 + $0xa0] ss:$16 sps:$4 sm:$0xff]  }
  0x4f   : > { %v14824_v39 = vld [vmem:[#allocation3 + $0xa8] ss:$16 sps:$4 sm:$0xff]   ;;  %v14825_v40 = vld [vmem:[#allocation3 + $0xc4] ss:$16 sps:$4 sm:$0xff]   ;;  %v14827_v41 = vld [vmem:[#allocation3 + $0xcc] ss:$16 sps:$4 sm:$0xff]  }
  0x50   : > { %v14829_v42 = vld [vmem:[#allocation3 + $0xc0] ss:$16 sps:$4 sm:$0xff]   ;;  %v14830_v43 = vld [vmem:[#allocation3 + $0xc8] ss:$16 sps:$4 sm:$0xff]   ;;  %v14831_v44 = vld [vmem:[#allocation3 + $0xe4] ss:$16 sps:$4 sm:$0xff]  }
  0x51   : > { %4783 = vmatpush1.bf16.msra.mxu0 %v14805_v26  ;;  %5800 = vmatpush1.bf16.msra.mxu1 %v14806_v27  ;;  %v14833_v45 = vld [vmem:[#allocation3 + $0xec] ss:$16 sps:$4 sm:$0xff]   ;;  %v14835_v46 = vld [vmem:[#allocation3 + $0xe0] ss:$16 sps:$4 sm:$0xff]   ;;  %v14836_v47 = vld [vmem:[#allocation3 + $0xe8] ss:$16 sps:$4 sm:$0xff]  }
  0x52   : > { %4784 = vmatprep.subr.bf16.mxu0 %v14807_v28  ;;  %5801 = vmatprep.subr.bf16.mxu1 %v14809_v29  ;;  %v14837_v48 = vld [vmem:[#allocation3 + $0x104] ss:$16 sps:$4 sm:$0xff]   ;;  %v14839_v49 = vld [vmem:[#allocation3 + $0x10c] ss:$16 sps:$4 sm:$0xff]   ;;  %v14841_v50 = vld [vmem:[#allocation3 + $0x100] ss:$16 sps:$4 sm:$0xff]  }
  0x53   : > { %v14842_v51 = vld [vmem:[#allocation3 + $0x108] ss:$16 sps:$4 sm:$0xff]   ;;  %v14843_v52 = vld [vmem:[#allocation3 + $0x124] ss:$16 sps:$4 sm:$0xff]   ;;  %v14845_v53 = vld [vmem:[#allocation3 + $0x12c] ss:$16 sps:$4 sm:$0xff]  }
  0x54   : > { %v14847_v54 = vld [vmem:[#allocation3 + $0x120] ss:$16 sps:$4 sm:$0xff]   ;;  %v14848_v55 = vld [vmem:[#allocation3 + $0x128] ss:$16 sps:$4 sm:$0xff]   ;;  %v14849_v56 = vld [vmem:[#allocation3 + $0x144] ss:$16 sps:$4 sm:$0xff]  }
  0x55   : > { %4785 = vmatpush1.bf16.msra.mxu0 %v14811_v30  ;;  %5802 = vmatpush1.bf16.msra.mxu1 %v14812_v31  ;;  %v14851_v57 = vld [vmem:[#allocation3 + $0x14c] ss:$16 sps:$4 sm:$0xff]   ;;  %v14853_v58 = vld [vmem:[#allocation3 + $0x140] ss:$16 sps:$4 sm:$0xff]   ;;  %v14854_v59 = vld [vmem:[#allocation3 + $0x148] ss:$16 sps:$4 sm:$0xff]  }
  0x56   : > { %4786 = vmatprep.subr.bf16.mxu0 %v14813_v32  ;;  %5803 = vmatprep.subr.bf16.mxu1 %v14815_v33  ;;  %v14855_v60 = vld [vmem:[#allocation3 + $0x164] ss:$16 sps:$4 sm:$0xff]   ;;  %v14857_v61 = vld [vmem:[#allocation3 + $0x16c] ss:$16 sps:$4 sm:$0xff]   ;;  %v14859_v62 = vld [vmem:[#allocation3 + $0x160] ss:$16 sps:$4 sm:$0xff]  }
  0x57   : > { %v14860_v63 = vld [vmem:[#allocation3 + $0x168] ss:$16 sps:$4 sm:$0xff]   ;;  %v14887_v0 = vld [vmem:[%s18958_s0 + $0x4] ss:$72 sps:$4 sm:$0xff]   ;;  %v14865_v3 = vld [vmem:[#allocation3 + $0x180] ss:$16 sps:$4 sm:$0xff]  }
  0x58   : > { %v14861_v1 = vld [vmem:[#allocation3 + $0x184] ss:$16 sps:$4 sm:$0xff]   ;;  %v14863_v2 = vld [vmem:[#allocation3 + $0x18c] ss:$16 sps:$4 sm:$0xff]   ;;  %4810 = vmatprep.mubr.bf16.mxu0 %v14887_v0  ;;  %5827 = vmatprep.mubr.bf16.mxu1 %v14887_v0  ;;  %v14866_v4 = vld [vmem:[#allocation3 + $0x188] ss:$16 sps:$4 sm:$0xff]  }
  0x59   : > { %4787 = vmatpush1.bf16.msra.mxu0 %v14817_v34  ;;  %5804 = vmatpush1.bf16.msra.mxu1 %v14818_v35  ;;  %v14867_v5 = vld [vmem:[#allocation3 + $0x1a4] ss:$16 sps:$4 sm:$0xff]   ;;  %v14869_v6 = vld [vmem:[#allocation3 + $0x1ac] ss:$16 sps:$4 sm:$0xff]   ;;  %v14871_v7 = vld [vmem:[#allocation3 + $0x1a0] ss:$16 sps:$4 sm:$0xff]  }
  0x5a   : > { %4788 = vmatprep.subr.bf16.mxu0 %v14819_v36  ;;  %5805 = vmatprep.subr.bf16.mxu1 %v14821_v37  ;;  %v14872_v8 = vld [vmem:[#allocation3 + $0x1a8] ss:$16 sps:$4 sm:$0xff]   ;;  %v14873_v9 = vld [vmem:[#allocation3 + $0x1c4] ss:$16 sps:$4 sm:$0xff]   ;;  %v14875_v10 = vld [vmem:[#allocation3 + $0x1cc] ss:$16 sps:$4 sm:$0xff]  }
  0x5b   : > { %v14877_v11 = vld [vmem:[#allocation3 + $0x1c0] ss:$16 sps:$4 sm:$0xff]   ;;  %v14878_v12 = vld [vmem:[#allocation3 + $0x1c8] ss:$16 sps:$4 sm:$0xff]   ;;  %v14879_v13 = vld [vmem:[#allocation3 + $0x1e4] ss:$16 sps:$4 sm:$0xff]  }
  0x5c   : > { %v14881_v14 = vld [vmem:[#allocation3 + $0x1ec] ss:$16 sps:$4 sm:$0xff]   ;;  %v14883_v15 = vld [vmem:[#allocation3 + $0x1e0] ss:$16 sps:$4 sm:$0xff]   ;;  %v14884_v16 = vld [vmem:[#allocation3 + $0x1e8] ss:$16 sps:$4 sm:$0xff]  }
  0x5d   : > { %4789 = vmatpush1.bf16.msra.mxu0 %v14823_v38  ;;  %5806 = vmatpush1.bf16.msra.mxu1 %v14824_v39  ;;  %v14890_v17 = vld [vmem:[#allocation3 + $0x204] ss:$16 sps:$4 sm:$0xff]   ;;  %v14893_v18 = vld [vmem:[#allocation3 + $0x20c] ss:$16 sps:$4 sm:$0xff]   ;;  %v14885_v19 = vld [vmem:[%s18958_s0] ss:$72 sps:$4 sm:$0xff]  }
  0x5e   : > { %4790 = vmatprep.subr.bf16.mxu0 %v14825_v40  ;;  %5807 = vmatprep.subr.bf16.mxu1 %v14827_v41  ;;  %v14888_v20 = vld [vmem:[#allocation3 + $0x200] ss:$16 sps:$4 sm:$0xff]   ;;  %v14891_v21 = vld [vmem:[#allocation3 + $0x208] ss:$16 sps:$4 sm:$0xff]   ;;  %v14896_v22 = vld [vmem:[#allocation3 + $0x224] ss:$16 sps:$4 sm:$0xff]  }
  0x5f   : > { %v14899_v23 = vld [vmem:[#allocation3 + $0x22c] ss:$16 sps:$4 sm:$0xff]   ;;  %v14894_v25 = vld [vmem:[#allocation3 + $0x220] ss:$16 sps:$4 sm:$0xff]   ;;  %v14897_v26 = vld [vmem:[#allocation3 + $0x228] ss:$16 sps:$4 sm:$0xff]  }
  0x60   : > { %v14900_v24 = vld [vmem:[%s18958_s0 + $0x94] ss:$72 sps:$4 sm:$0xff]   ;;  %v14902_v29 = vld [vmem:[%s18958_s0 + $0x90] ss:$72 sps:$4 sm:$0xff]   ;;  %v14915_v34 = vld [vmem:[%s18958_s0 + $0x124] ss:$72 sps:$4 sm:$0xff]  }
  0x61   : > { %4791 = vmatpush1.bf16.msra.mxu0 %v14829_v42  ;;  %5808 = vmatpush1.bf16.msra.mxu1 %v14830_v43  ;;  %v14905_v27 = vld [vmem:[#allocation3 + $0x244] ss:$16 sps:$4 sm:$0xff]   ;;  %v14908_v28 = vld [vmem:[#allocation3 + $0x24c] ss:$16 sps:$4 sm:$0xff]   ;;  %v14903_v30 = vld [vmem:[#allocation3 + $0x240] ss:$16 sps:$4 sm:$0xff]  }
  0x62   : > { %4792 = vmatprep.subr.bf16.mxu0 %v14831_v44  ;;  %5809 = vmatprep.subr.bf16.mxu1 %v14833_v45  ;;  %v14906_v31 = vld [vmem:[#allocation3 + $0x248] ss:$16 sps:$4 sm:$0xff]   ;;  %v14911_v32 = vld [vmem:[#allocation3 + $0x264] ss:$16 sps:$4 sm:$0xff]   ;;  %v14914_v33 = vld [vmem:[#allocation3 + $0x26c] ss:$16 sps:$4 sm:$0xff]  }
  0x63   : > { %v14909_v35 = vld [vmem:[#allocation3 + $0x260] ss:$16 sps:$4 sm:$0xff]   ;;  %v14912_v36 = vld [vmem:[#allocation3 + $0x268] ss:$16 sps:$4 sm:$0xff]   ;;  %v14920_v37 = vld [vmem:[#allocation3 + $0x284] ss:$16 sps:$4 sm:$0xff]  }
  0x64   : > { %v14923_v38 = vld [vmem:[#allocation3 + $0x28c] ss:$16 sps:$4 sm:$0xff]   ;;  %v14917_v39 = vld [vmem:[%s18958_s0 + $0x120] ss:$72 sps:$4 sm:$0xff]   ;;  %v14926_v42 = vld [vmem:[#allocation3 + $0x2a4] ss:$16 sps:$4 sm:$0xff]  }
  0x65   : > { %4793 = vmatpush1.bf16.msra.mxu0 %v14835_v46  ;;  %5810 = vmatpush1.bf16.msra.mxu1 %v14836_v47  ;;  %v14918_v40 = vld [vmem:[#allocation3 + $0x280] ss:$16 sps:$4 sm:$0xff]   ;;  %v14921_v41 = vld [vmem:[#allocation3 + $0x288] ss:$16 sps:$4 sm:$0xff]   ;;  %v14929_v43 = vld [vmem:[#allocation3 + $0x2ac] ss:$16 sps:$4 sm:$0xff]  }
  0x66   : > { %4794 = vmatprep.subr.bf16.mxu0 %v14837_v48  ;;  %5811 = vmatprep.subr.bf16.mxu1 %v14839_v49  ;;  %v14930_v44 = vld [vmem:[%s18958_s0 + $0x1b4] ss:$72 sps:$4 sm:$0xff]   ;;  %v14924_v45 = vld [vmem:[#allocation3 + $0x2a0] ss:$16 sps:$4 sm:$0xff]   ;;  %v14927_v46 = vld [vmem:[#allocation3 + $0x2a8] ss:$16 sps:$4 sm:$0xff]  }
  0x67   : > { %v14935_v47 = vld [vmem:[#allocation3 + $0x2c4] ss:$16 sps:$4 sm:$0xff]   ;;  %v14938_v48 = vld [vmem:[#allocation3 + $0x2cc] ss:$16 sps:$4 sm:$0xff]   ;;  %v14932_v49 = vld [vmem:[%s18958_s0 + $0x1b0] ss:$72 sps:$4 sm:$0xff]  }
  0x68   : > { %v14960_v0 = vld [vmem:[%s18958_s0 + $0x2d4] ss:$72 sps:$4 sm:$0xff]   ;;  %p436_p9 = scmp.lt.s32.totalorder %s16029_s12, 1  ;;  %s13156_s27 = sshll.u32 %s16029_s12, 2  ;;  %vm13036_vm0 = vcmask 7168  }
  0x69   : > { %4795 = vmatpush1.bf16.msra.mxu0 %v14841_v50  ;;  %5812 = vmatpush1.bf16.msra.mxu1 %v14842_v51  ;;  %v14933_v50 = vld [vmem:[#allocation3 + $0x2c0] ss:$16 sps:$4 sm:$0xff]   ;;  %v14936_v51 = vld [vmem:[#allocation3 + $0x2c8] ss:$16 sps:$4 sm:$0xff]   ;;  %p18785_p11 = scmp.lt.s32.totalorder %s13156_s27, 7 }
  0x6a   : > { %4796 = vmatprep.subr.bf16.mxu0 %v14843_v52  ;;  %5813 = vmatprep.subr.bf16.mxu1 %v14845_v53  ;;  %v14941_v52 = vld [vmem:[#allocation3 + $0x2e4] ss:$16 sps:$4 sm:$0xff]   ;;  %v14944_v53 = vld [vmem:[#allocation3 + $0x2ec] ss:$16 sps:$4 sm:$0xff]   ;;  %s17797_s29 = scalar_select %p436_p9, %s16029_s12, 1 }
  0x6b   : > { %s19227_s27 = smov (!%p18785_p11, %s13156_s27), 7 }
  0x6c   : > { %s14750_s14 = smul.u32 4608, %s17797_s29  ;;  %s444_s11 = scalar_lea.vmem %s18964_s6, %s19227_s27 }
  0x6d   : > { %4797 = vmatpush1.bf16.msra.mxu0 %v14847_v54  ;;  %5814 = vmatpush1.bf16.msra.mxu1 %v14848_v55  ;;  %v14945_v54 = vld [vmem:[%s18958_s0 + $0x244] ss:$72 sps:$4 sm:$0xff]   ;;  %v14939_v55 = vld [vmem:[#allocation3 + $0x2e0] ss:$16 sps:$4 sm:$0xff]   ;;  %s449_s21 = scalar_lea.vmem %s18965_s7, %s19227_s27  ;;  %s13933_s19 = sshll.u32 %s17797_s29, 5 }
  0x6e   : > { %4798 = vmatprep.subr.bf16.mxu0 %v14849_v56  ;;  %5815 = vmatprep.subr.bf16.mxu1 %v14851_v57  ;;  %v14942_v56 = vld [vmem:[#allocation3 + $0x2e8] ss:$16 sps:$4 sm:$0xff]   ;;  %v14950_v57 = vld [vmem:[#allocation3 + $0x304] ss:$16 sps:$4 sm:$0xff]   ;;  %s17811_s22 = scalar_lea.vmem %s18963_s5, %s14750_s14  ;;  %s388_s14 = sand.u32 1, %s15949_s30  }
  0x6f   : > { %s13154_s30 = sshll.u32 %s388_s14, 7  ;;  %s456_s24 = scalar_lea.vmem %s18967_s9, %s13933_s19 }
  0x70   : > { %s18895_s15 = scalar_lea.vmem [#allocation5], %s13154_s30 }
  0x71   : > { %4799 = vmatpush1.bf16.msra.mxu0 %v14853_v58  ;;  %5816 = vmatpush1.bf16.msra.mxu1 %v14854_v59  ;;  %v14953_v58 = vld [vmem:[#allocation3 + $0x30c] ss:$16 sps:$4 sm:$0xff]   ;;  %v14947_v59 = vld [vmem:[%s18958_s0 + $0x240] ss:$72 sps:$4 sm:$0xff]  }
  0x72   : > { %4800 = vmatprep.subr.bf16.mxu0 %v14855_v60  ;;  %5817 = vmatprep.subr.bf16.mxu1 %v14857_v61  ;;  %v14948_v60 = vld [vmem:[#allocation3 + $0x300] ss:$16 sps:$4 sm:$0xff]   ;;  %v14951_v61 = vld [vmem:[#allocation3 + $0x308] ss:$16 sps:$4 sm:$0xff]  }
  0x75   : > { %4801 = vmatpush1.bf16.msra.mxu0 %v14859_v62  ;;  %5818 = vmatpush1.bf16.msra.mxu1 %v14860_v63  ;;  %v14956_v62 = vld [vmem:[#allocation3 + $0x324] ss:$16 sps:$4 sm:$0xff]   ;;  %v14959_v63 = vld [vmem:[#allocation3 + $0x32c] ss:$16 sps:$4 sm:$0xff]  }
  0x76   : > { %4802 = vmatprep.subr.bf16.mxu0 %v14861_v1  ;;  %5819 = vmatprep.subr.bf16.mxu1 %v14863_v2  ;;  %v14954_v1 = vld [vmem:[#allocation3 + $0x320] ss:$16 sps:$4 sm:$0xff]   ;;  %v14957_v2 = vld [vmem:[#allocation3 + $0x328] ss:$16 sps:$4 sm:$0xff]  }
  0x79   : > { %4803 = vmatpush1.bf16.msra.mxu0 %v14865_v3  ;;  %5820 = vmatpush1.bf16.msra.mxu1 %v14866_v4  ;;  %v14965_v3 = vld [vmem:[#allocation3 + $0x344] ss:$16 sps:$4 sm:$0xff]   ;;  %v14968_v4 = vld [vmem:[#allocation3 + $0x34c] ss:$16 sps:$4 sm:$0xff]  }
  0x7a   : > { %4804 = vmatprep.subr.bf16.mxu0 %v14867_v5  ;;  %5821 = vmatprep.subr.bf16.mxu1 %v14869_v6  ;;  %v14962_v5 = vld [vmem:[%s18958_s0 + $0x2d0] ss:$72 sps:$4 sm:$0xff]  }
  0x7b   : > { %v14963_v6 = vld [vmem:[#allocation3 + $0x340] ss:$16 sps:$4 sm:$0xff]  }
  0x7d   : > { %4805 = vmatpush1.bf16.msra.mxu0 %v14871_v7  ;;  %5822 = vmatpush1.bf16.msra.mxu1 %v14872_v8  ;;  %v14966_v7 = vld [vmem:[#allocation3 + $0x348] ss:$16 sps:$4 sm:$0xff]   ;;  %v14971_v8 = vld [vmem:[#allocation3 + $0x364] ss:$16 sps:$4 sm:$0xff]  }
  0x7e   : > { %4806 = vmatprep.subr.bf16.mxu0 %v14873_v9  ;;  %5823 = vmatprep.subr.bf16.mxu1 %v14875_v10  ;;  %v14974_v9 = vld [vmem:[#allocation3 + $0x36c] ss:$16 sps:$4 sm:$0xff]  }
  0x7f   : > { %v14975_v10 = vld [vmem:[%s18958_s0 + $0x364] ss:$72 sps:$4 sm:$0xff]  }
  0x81   : > { %4807 = vmatpush1.bf16.msra.mxu0 %v14877_v11  ;;  %5824 = vmatpush1.bf16.msra.mxu1 %v14878_v12  ;;  %v14969_v11 = vld [vmem:[#allocation3 + $0x360] ss:$16 sps:$4 sm:$0xff]   ;;  %v14972_v12 = vld [vmem:[#allocation3 + $0x368] ss:$16 sps:$4 sm:$0xff]  }
  0x82   : > { %4808 = vmatprep.subr.bf16.mxu0 %v14879_v13  ;;  %5825 = vmatprep.subr.bf16.mxu1 %v14881_v14  ;;  %v14980_v13 = vld [vmem:[#allocation3 + $0x384] ss:$16 sps:$4 sm:$0xff]   ;;  %v14983_v14 = vld [vmem:[#allocation3 + $0x38c] ss:$16 sps:$4 sm:$0xff]  }
  0x85   : > { %4809 = vmatpush1.bf16.msra.mxu0 %v14883_v15  ;;  %5826 = vmatpush1.bf16.msra.mxu1 %v14884_v16  ;;  %v14977_v15 = vld [vmem:[%s18958_s0 + $0x360] ss:$72 sps:$4 sm:$0xff]  }
  0x86   : > { %4891 = vmatprep.subr.bf16.mxu0 %v14890_v17  ;;  %5908 = vmatprep.subr.bf16.mxu1 %v14893_v18  ;;  %v14978_v16 = vld [vmem:[#allocation3 + $0x380] ss:$16 sps:$4 sm:$0xff]   ;;  %v14981_v17 = vld [vmem:[#allocation3 + $0x388] ss:$16 sps:$4 sm:$0xff]   ;;  %v14986_v18 = vld [vmem:[#allocation3 + $0x3a4] ss:$16 sps:$4 sm:$0xff]  }
  0x88   : > { %4811 = vmatmul.mubr.bf16.vlgmr.msra.gmra.mrb[0].mxu0 %v14885_v19  ;;  %5828 = vmatmul.mubr.bf16.vlgmr.msra.gmra.mrb[0].mxu1 %v14885_v19  ;;  %v14989_v19 = vld [vmem:[#allocation3 + $0x3ac] ss:$16 sps:$4 sm:$0xff]  }
  0x89   : > { %4892 = vmatpush1.bf16.msra.mxu0 %v14888_v20  ;;  %5909 = vmatpush1.bf16.msra.mxu1 %v14891_v21  ;;  %v14990_v20 = vld [vmem:[%s18958_s0 + $0x3f4] ss:$72 sps:$4 sm:$0xff]   ;;  %v14984_v21 = vld [vmem:[#allocation3 + $0x3a0] ss:$16 sps:$4 sm:$0xff]  }
  0x8a   : > { %4893 = vmatprep.subr.bf16.mxu0 %v14896_v22  ;;  %5910 = vmatprep.subr.bf16.mxu1 %v14899_v23  ;;  %v14987_v22 = vld [vmem:[#allocation3 + $0x3a8] ss:$16 sps:$4 sm:$0xff]   ;;  %v14995_v23 = vld [vmem:[#allocation3 + $0x3c4] ss:$16 sps:$4 sm:$0xff]  }
  0x8b   : > { %4820 = vmatprep.mubr.bf16.mxu0 %v14900_v24  ;;  %5837 = vmatprep.mubr.bf16.mxu1 %v14900_v24  ;;  %v14998_v24 = vld [vmem:[#allocation3 + $0x3cc] ss:$16 sps:$4 sm:$0xff]  }
  0x8d   : > { %4894 = vmatpush1.bf16.msra.mxu0 %v14894_v25  ;;  %5911 = vmatpush1.bf16.msra.mxu1 %v14897_v26  ;;  %v14992_v25 = vld [vmem:[%s18958_s0 + $0x3f0] ss:$72 sps:$4 sm:$0xff]  }
  0x8e   : > { %4895 = vmatprep.subr.bf16.mxu0 %v14905_v27  ;;  %5912 = vmatprep.subr.bf16.mxu1 %v14908_v28  ;;  %v14993_v26 = vld [vmem:[#allocation3 + $0x3c0] ss:$16 sps:$4 sm:$0xff]   ;;  %v14996_v27 = vld [vmem:[#allocation3 + $0x3c8] ss:$16 sps:$4 sm:$0xff]   ;;  %v15001_v28 = vld [vmem:[#allocation3 + $0x3e4] ss:$16 sps:$4 sm:$0xff]  }
  0x90   : > { %4821 = vmatmul.mubr.bf16.gmra.mrb[4].mxu0 %v14902_v29  ;;  %5838 = vmatmul.mubr.bf16.gmra.mrb[4].mxu1 %v14902_v29  ;;  %v15004_v29 = vld [vmem:[#allocation3 + $0x3ec] ss:$16 sps:$4 sm:$0xff]  }
  0x91   : > { %4896 = vmatpush1.bf16.msra.mxu0 %v14903_v30  ;;  %5913 = vmatpush1.bf16.msra.mxu1 %v14906_v31  ;;  %v15007_v30 = vld [vmem:[%s18958_s0 + $0xc] ss:$72 sps:$4 sm:$0xff]   ;;  %v14999_v31 = vld [vmem:[#allocation3 + $0x3e0] ss:$16 sps:$4 sm:$0xff]  }
  0x92   : > { %4897 = vmatprep.subr.bf16.mxu0 %v14911_v32  ;;  %5914 = vmatprep.subr.bf16.mxu1 %v14914_v33  ;;  %v15002_v32 = vld [vmem:[#allocation3 + $0x3e8] ss:$16 sps:$4 sm:$0xff]   ;;  %v15010_v33 = vld [vmem:[#allocation3 + $0x404] ss:$16 sps:$4 sm:$0xff]  }
  0x93   : > { %4830 = vmatprep.mubr.bf16.mxu0 %v14915_v34  ;;  %5847 = vmatprep.mubr.bf16.mxu1 %v14915_v34  ;;  %v15013_v34 = vld [vmem:[#allocation3 + $0x40c] ss:$16 sps:$4 sm:$0xff]  }
  0x95   : > { %4898 = vmatpush1.bf16.msra.mxu0 %v14909_v35  ;;  %5915 = vmatpush1.bf16.msra.mxu1 %v14912_v36  ;;  %v15005_v35 = vld [vmem:[%s18958_s0 + $0x8] ss:$72 sps:$4 sm:$0xff]  }
  0x96   : > { %4899 = vmatprep.subr.bf16.mxu0 %v14920_v37  ;;  %5916 = vmatprep.subr.bf16.mxu1 %v14923_v38  ;;  %v15008_v36 = vld [vmem:[#allocation3 + $0x400] ss:$16 sps:$4 sm:$0xff]   ;;  %v15011_v37 = vld [vmem:[#allocation3 + $0x408] ss:$16 sps:$4 sm:$0xff]   ;;  %v15016_v38 = vld [vmem:[#allocation3 + $0x424] ss:$16 sps:$4 sm:$0xff]  }
  0x98   : > { %4831 = vmatmul.mubr.bf16.gmra.mrb[8].mxu0 %v14917_v39  ;;  %5848 = vmatmul.mubr.bf16.gmra.mrb[8].mxu1 %v14917_v39  ;;  %v15019_v39 = vld [vmem:[#allocation3 + $0x42c] ss:$16 sps:$4 sm:$0xff]  }
  0x99   : > { %4900 = vmatpush1.bf16.msra.mxu0 %v14918_v40  ;;  %5917 = vmatpush1.bf16.msra.mxu1 %v14921_v41  ;;  %v15020_v40 = vld [vmem:[%s18958_s0 + $0x9c] ss:$72 sps:$4 sm:$0xff]   ;;  %v15014_v41 = vld [vmem:[#allocation3 + $0x420] ss:$16 sps:$4 sm:$0xff]  }
  0x9a   : > { %4901 = vmatprep.subr.bf16.mxu0 %v14926_v42  ;;  %5918 = vmatprep.subr.bf16.mxu1 %v14929_v43  ;;  %v15017_v42 = vld [vmem:[#allocation3 + $0x428] ss:$16 sps:$4 sm:$0xff]   ;;  %v15025_v43 = vld [vmem:[#allocation3 + $0x444] ss:$16 sps:$4 sm:$0xff]  }
  0x9b   : > { %4840 = vmatprep.mubr.bf16.mxu0 %v14930_v44  ;;  %5857 = vmatprep.mubr.bf16.mxu1 %v14930_v44  ;;  %v15028_v44 = vld [vmem:[#allocation3 + $0x44c] ss:$16 sps:$4 sm:$0xff]  }
  0x9d   : > { %4902 = vmatpush1.bf16.msra.mxu0 %v14924_v45  ;;  %5919 = vmatpush1.bf16.msra.mxu1 %v14927_v46  ;;  %v15022_v45 = vld [vmem:[%s18958_s0 + $0x98] ss:$72 sps:$4 sm:$0xff]  }
  0x9e   : > { %4903 = vmatprep.subr.bf16.mxu0 %v14935_v47  ;;  %5920 = vmatprep.subr.bf16.mxu1 %v14938_v48  ;;  %v15023_v46 = vld [vmem:[#allocation3 + $0x440] ss:$16 sps:$4 sm:$0xff]   ;;  %v15026_v47 = vld [vmem:[#allocation3 + $0x448] ss:$16 sps:$4 sm:$0xff]   ;;  %v15031_v48 = vld [vmem:[#allocation3 + $0x464] ss:$16 sps:$4 sm:$0xff]  }
  0xa0   : > { %4841 = vmatmul.mubr.bf16.gmra.mrb[12].mxu0 %v14932_v49  ;;  %5858 = vmatmul.mubr.bf16.gmra.mrb[12].mxu1 %v14932_v49  ;;  %v15034_v49 = vld [vmem:[#allocation3 + $0x46c] ss:$16 sps:$4 sm:$0xff]  }
  0xa1   : > { %4904 = vmatpush1.bf16.msra.mxu0 %v14933_v50  ;;  %5921 = vmatpush1.bf16.msra.mxu1 %v14936_v51  ;;  %v15035_v50 = vld [vmem:[%s18958_s0 + $0x12c] ss:$72 sps:$4 sm:$0xff]   ;;  %v15029_v51 = vld [vmem:[#allocation3 + $0x460] ss:$16 sps:$4 sm:$0xff]  }
  0xa2   : > { %4905 = vmatprep.subr.bf16.mxu0 %v14941_v52  ;;  %5922 = vmatprep.subr.bf16.mxu1 %v14944_v53  ;;  %v15032_v52 = vld [vmem:[#allocation3 + $0x468] ss:$16 sps:$4 sm:$0xff]   ;;  %v15040_v53 = vld [vmem:[#allocation3 + $0x484] ss:$16 sps:$4 sm:$0xff]  }
  0xa3   : > { %4850 = vmatprep.mubr.bf16.mxu0 %v14945_v54  ;;  %5867 = vmatprep.mubr.bf16.mxu1 %v14945_v54  ;;  %v15043_v54 = vld [vmem:[#allocation3 + $0x48c] ss:$16 sps:$4 sm:$0xff]  }
  0xa5   : > { %4906 = vmatpush1.bf16.msra.mxu0 %v14939_v55  ;;  %5923 = vmatpush1.bf16.msra.mxu1 %v14942_v56  ;;  %v15037_v55 = vld [vmem:[%s18958_s0 + $0x128] ss:$72 sps:$4 sm:$0xff]  }
  0xa6   : > { %4907 = vmatprep.subr.bf16.mxu0 %v14950_v57  ;;  %5924 = vmatprep.subr.bf16.mxu1 %v14953_v58  ;;  %v15038_v56 = vld [vmem:[#allocation3 + $0x480] ss:$16 sps:$4 sm:$0xff]   ;;  %v15041_v57 = vld [vmem:[#allocation3 + $0x488] ss:$16 sps:$4 sm:$0xff]   ;;  %v15046_v58 = vld [vmem:[#allocation3 + $0x4a4] ss:$16 sps:$4 sm:$0xff]  }
  0xa8   : > { %4851 = vmatmul.mubr.bf16.gmra.mrb[16].mxu0 %v14947_v59  ;;  %5868 = vmatmul.mubr.bf16.gmra.mrb[16].mxu1 %v14947_v59  ;;  %v15049_v59 = vld [vmem:[#allocation3 + $0x4ac] ss:$16 sps:$4 sm:$0xff]  }
  0xa9   : > { %4908 = vmatpush1.bf16.msra.mxu0 %v14948_v60  ;;  %5925 = vmatpush1.bf16.msra.mxu1 %v14951_v61  ;;  %v15050_v60 = vld [vmem:[%s18958_s0 + $0x1bc] ss:$72 sps:$4 sm:$0xff]   ;;  %v15044_v61 = vld [vmem:[#allocation3 + $0x4a0] ss:$16 sps:$4 sm:$0xff]  }
  0xaa   : > { %4909 = vmatprep.subr.bf16.mxu0 %v14956_v62  ;;  %5926 = vmatprep.subr.bf16.mxu1 %v14959_v63  ;;  %v15047_v62 = vld [vmem:[#allocation3 + $0x4a8] ss:$16 sps:$4 sm:$0xff]   ;;  %v15055_v63 = vld [vmem:[#allocation3 + $0x4c4] ss:$16 sps:$4 sm:$0xff]  }
  0xab   : > { %4860 = vmatprep.mubr.bf16.mxu0 %v14960_v0  ;;  %5877 = vmatprep.mubr.bf16.mxu1 %v14960_v0  ;;  %v15058_v0 = vld [vmem:[#allocation3 + $0x4cc] ss:$16 sps:$4 sm:$0xff]  }
  0xad   : > { %4910 = vmatpush1.bf16.msra.mxu0 %v14954_v1  ;;  %5927 = vmatpush1.bf16.msra.mxu1 %v14957_v2  ;;  %v15052_v1 = vld [vmem:[%s18958_s0 + $0x1b8] ss:$72 sps:$4 sm:$0xff]  }
  0xae   : > { %4911 = vmatprep.subr.bf16.mxu0 %v14965_v3  ;;  %5928 = vmatprep.subr.bf16.mxu1 %v14968_v4  ;;  %v15053_v2 = vld [vmem:[#allocation3 + $0x4c0] ss:$16 sps:$4 sm:$0xff]   ;;  %v15056_v3 = vld [vmem:[#allocation3 + $0x4c8] ss:$16 sps:$4 sm:$0xff]   ;;  %v15061_v4 = vld [vmem:[#allocation3 + $0x4e4] ss:$16 sps:$4 sm:$0xff]  }
  0xb0   : > { %4861 = vmatmul.mubr.bf16.gmra.mrb[20].mxu0 %v14962_v5  ;;  %5878 = vmatmul.mubr.bf16.gmra.mrb[20].mxu1 %v14962_v5  ;;  %v15064_v5 = vld [vmem:[#allocation3 + $0x4ec] ss:$16 sps:$4 sm:$0xff]  }
  0xb1   : > { %4912 = vmatpush1.bf16.msra.mxu0 %v14963_v6  ;;  %5929 = vmatpush1.bf16.msra.mxu1 %v14966_v7  ;;  %v15065_v6 = vld [vmem:[%s18958_s0 + $0x24c] ss:$72 sps:$4 sm:$0xff]   ;;  %v15059_v7 = vld [vmem:[#allocation3 + $0x4e0] ss:$16 sps:$4 sm:$0xff]  }
  0xb2   : > { %4913 = vmatprep.subr.bf16.mxu0 %v14971_v8  ;;  %5930 = vmatprep.subr.bf16.mxu1 %v14974_v9  ;;  %v15062_v8 = vld [vmem:[#allocation3 + $0x4e8] ss:$16 sps:$4 sm:$0xff]   ;;  %v15070_v9 = vld [vmem:[#allocation3 + $0x504] ss:$16 sps:$4 sm:$0xff]  }
  0xb3   : > { %4870 = vmatprep.mubr.bf16.mxu0 %v14975_v10  ;;  %5887 = vmatprep.mubr.bf16.mxu1 %v14975_v10  ;;  %v15073_v10 = vld [vmem:[#allocation3 + $0x50c] ss:$16 sps:$4 sm:$0xff]  }
  0xb5   : > { %4914 = vmatpush1.bf16.msra.mxu0 %v14969_v11  ;;  %5931 = vmatpush1.bf16.msra.mxu1 %v14972_v12  ;;  %v15067_v11 = vld [vmem:[%s18958_s0 + $0x248] ss:$72 sps:$4 sm:$0xff]  }
  0xb6   : > { %4915 = vmatprep.subr.bf16.mxu0 %v14980_v13  ;;  %5932 = vmatprep.subr.bf16.mxu1 %v14983_v14  ;;  %v15068_v12 = vld [vmem:[#allocation3 + $0x500] ss:$16 sps:$4 sm:$0xff]   ;;  %v15071_v13 = vld [vmem:[#allocation3 + $0x508] ss:$16 sps:$4 sm:$0xff]   ;;  %v15076_v14 = vld [vmem:[#allocation3 + $0x524] ss:$16 sps:$4 sm:$0xff]  }
  0xb8   : > { %4871 = vmatmul.mubr.bf16.gmra.mrb[24].mxu0 %v14977_v15  ;;  %5888 = vmatmul.mubr.bf16.gmra.mrb[24].mxu1 %v14977_v15  ;;  %v15079_v15 = vld [vmem:[#allocation3 + $0x52c] ss:$16 sps:$4 sm:$0xff]  }
  0xb9   : > { %4916 = vmatpush1.bf16.msra.mxu0 %v14978_v16  ;;  %5933 = vmatpush1.bf16.msra.mxu1 %v14981_v17  ;;  %v15080_v16 = vld [vmem:[%s18958_s0 + $0x2dc] ss:$72 sps:$4 sm:$0xff]   ;;  %v15074_v17 = vld [vmem:[#allocation3 + $0x520] ss:$16 sps:$4 sm:$0xff]  }
  0xba   : > { %4917 = vmatprep.subr.bf16.mxu0 %v14986_v18  ;;  %5934 = vmatprep.subr.bf16.mxu1 %v14989_v19  ;;  %v15077_v18 = vld [vmem:[#allocation3 + $0x528] ss:$16 sps:$4 sm:$0xff]   ;;  %v15085_v19 = vld [vmem:[#allocation3 + $0x544] ss:$16 sps:$4 sm:$0xff]  }
  0xbb   : > { %4880 = vmatprep.mubr.bf16.mxu0 %v14990_v20  ;;  %5897 = vmatprep.mubr.bf16.mxu1 %v14990_v20  ;;  %v15088_v20 = vld [vmem:[#allocation3 + $0x54c] ss:$16 sps:$4 sm:$0xff]  }
  0xbd   : > { %4918 = vmatpush1.bf16.msra.mxu0 %v14984_v21  ;;  %5935 = vmatpush1.bf16.msra.mxu1 %v14987_v22  ;;  %v15082_v21 = vld [vmem:[%s18958_s0 + $0x2d8] ss:$72 sps:$4 sm:$0xff]  }
  0xbe   : > { %4919 = vmatprep.subr.bf16.mxu0 %v14995_v23  ;;  %5936 = vmatprep.subr.bf16.mxu1 %v14998_v24  ;;  %v15083_v22 = vld [vmem:[#allocation3 + $0x540] ss:$16 sps:$4 sm:$0xff]   ;;  %v15086_v23 = vld [vmem:[#allocation3 + $0x548] ss:$16 sps:$4 sm:$0xff]   ;;  %v15091_v24 = vld [vmem:[#allocation3 + $0x564] ss:$16 sps:$4 sm:$0xff]  }
  0xc0   : > { %4881 = vmatmul.mubr.bf16.gmra.mrb[28].mxu0 %v14992_v25  ;;  %5898 = vmatmul.mubr.bf16.gmra.mrb[28].mxu1 %v14992_v25  ;;  %v15094_v25 = vld [vmem:[#allocation3 + $0x56c] ss:$16 sps:$4 sm:$0xff]  }
  0xc1   : > { %4920 = vmatpush1.bf16.msra.mxu0 %v14993_v26  ;;  %5937 = vmatpush1.bf16.msra.mxu1 %v14996_v27  ;;  %v15095_v26 = vld [vmem:[%s18958_s0 + $0x36c] ss:$72 sps:$4 sm:$0xff]   ;;  %v15089_v27 = vld [vmem:[#allocation3 + $0x560] ss:$16 sps:$4 sm:$0xff]  }
  0xc2   : > { %4921 = vmatprep.subr.bf16.mxu0 %v15001_v28  ;;  %5938 = vmatprep.subr.bf16.mxu1 %v15004_v29  ;;  %v15092_v28 = vld [vmem:[#allocation3 + $0x568] ss:$16 sps:$4 sm:$0xff]   ;;  %v15100_v29 = vld [vmem:[#allocation3 + $0x584] ss:$16 sps:$4 sm:$0xff]  }
  0xc3   : > { %4923 = vmatprep.mubr.bf16.mxu0 %v15007_v30  ;;  %5940 = vmatprep.mubr.bf16.mxu1 %v15007_v30  ;;  %v15103_v30 = vld [vmem:[#allocation3 + $0x58c] ss:$16 sps:$4 sm:$0xff]  }
  0xc5   : > { %4922 = vmatpush1.bf16.msra.mxu0 %v14999_v31  ;;  %5939 = vmatpush1.bf16.msra.mxu1 %v15002_v32  ;;  %v15097_v31 = vld [vmem:[%s18958_s0 + $0x368] ss:$72 sps:$4 sm:$0xff]  }
  0xc6   : > { %5004 = vmatprep.subr.bf16.mxu0 %v15010_v33  ;;  %6021 = vmatprep.subr.bf16.mxu1 %v15013_v34  ;;  %v15098_v32 = vld [vmem:[#allocation3 + $0x580] ss:$16 sps:$4 sm:$0xff]   ;;  %v15101_v33 = vld [vmem:[#allocation3 + $0x588] ss:$16 sps:$4 sm:$0xff]   ;;  %v15106_v34 = vld [vmem:[#allocation3 + $0x5a4] ss:$16 sps:$4 sm:$0xff]  }
  0xc8   : > { %4924 = vmatmul.mubr.bf16.vlgmr.msra.gmra.mrb[0].mxu0 %v15005_v35  ;;  %5941 = vmatmul.mubr.bf16.vlgmr.msra.gmra.mrb[0].mxu1 %v15005_v35  ;;  %v15109_v35 = vld [vmem:[#allocation3 + $0x5ac] ss:$16 sps:$4 sm:$0xff]  }
  0xc9   : > { %5005 = vmatpush1.bf16.msra.mxu0 %v15008_v36  ;;  %6022 = vmatpush1.bf16.msra.mxu1 %v15011_v37  ;;  %v15110_v36 = vld [vmem:[%s18958_s0 + $0x3fc] ss:$72 sps:$4 sm:$0xff]   ;;  %v15104_v37 = vld [vmem:[#allocation3 + $0x5a0] ss:$16 sps:$4 sm:$0xff]  }
  0xca   : > { %5006 = vmatprep.subr.bf16.mxu0 %v15016_v38  ;;  %6023 = vmatprep.subr.bf16.mxu1 %v15019_v39  ;;  %v15107_v38 = vld [vmem:[#allocation3 + $0x5a8] ss:$16 sps:$4 sm:$0xff]   ;;  %v15115_v39 = vld [vmem:[#allocation3 + $0x5c4] ss:$16 sps:$4 sm:$0xff]  }
  0xcb   : > { %4933 = vmatprep.mubr.bf16.mxu0 %v15020_v40  ;;  %5950 = vmatprep.mubr.bf16.mxu1 %v15020_v40  ;;  %v15118_v40 = vld [vmem:[#allocation3 + $0x5cc] ss:$16 sps:$4 sm:$0xff]  }
  0xcd   : > { %5007 = vmatpush1.bf16.msra.mxu0 %v15014_v41  ;;  %6024 = vmatpush1.bf16.msra.mxu1 %v15017_v42  ;;  %v15112_v41 = vld [vmem:[%s18958_s0 + $0x3f8] ss:$72 sps:$4 sm:$0xff]  }
  0xce   : > { %5008 = vmatprep.subr.bf16.mxu0 %v15025_v43  ;;  %6025 = vmatprep.subr.bf16.mxu1 %v15028_v44  ;;  %v15113_v42 = vld [vmem:[#allocation3 + $0x5c0] ss:$16 sps:$4 sm:$0xff]   ;;  %v15116_v43 = vld [vmem:[#allocation3 + $0x5c8] ss:$16 sps:$4 sm:$0xff]   ;;  %v15121_v44 = vld [vmem:[#allocation3 + $0x5e4] ss:$16 sps:$4 sm:$0xff]  }
  0xd0   : > { %4934 = vmatmul.mubr.bf16.gmra.mrb[4].mxu0 %v15022_v45  ;;  %5951 = vmatmul.mubr.bf16.gmra.mrb[4].mxu1 %v15022_v45  ;;  %v15124_v45 = vld [vmem:[#allocation3 + $0x5ec] ss:$16 sps:$4 sm:$0xff]  }
  0xd1   : > { %5009 = vmatpush1.bf16.msra.mxu0 %v15023_v46  ;;  %6026 = vmatpush1.bf16.msra.mxu1 %v15026_v47  ;;  %v15127_v46 = vld [vmem:[%s18958_s0 + $0x14] ss:$72 sps:$4 sm:$0xff]   ;;  %v15119_v47 = vld [vmem:[#allocation3 + $0x5e0] ss:$16 sps:$4 sm:$0xff]  }
  0xd2   : > { %5010 = vmatprep.subr.bf16.mxu0 %v15031_v48  ;;  %6027 = vmatprep.subr.bf16.mxu1 %v15034_v49  ;;  %v15122_v48 = vld [vmem:[#allocation3 + $0x5e8] ss:$16 sps:$4 sm:$0xff]   ;;  %v15130_v49 = vld [vmem:[#allocation3 + $0x604] ss:$16 sps:$4 sm:$0xff]  }
  0xd3   : > { %4943 = vmatprep.mubr.bf16.mxu0 %v15035_v50  ;;  %5960 = vmatprep.mubr.bf16.mxu1 %v15035_v50  ;;  %v15133_v50 = vld [vmem:[#allocation3 + $0x60c] ss:$16 sps:$4 sm:$0xff]  }
  0xd5   : > { %5011 = vmatpush1.bf16.msra.mxu0 %v15029_v51  ;;  %6028 = vmatpush1.bf16.msra.mxu1 %v15032_v52  ;;  %v15125_v51 = vld [vmem:[%s18958_s0 + $0x10] ss:$72 sps:$4 sm:$0xff]  }
  0xd6   : > { %5012 = vmatprep.subr.bf16.mxu0 %v15040_v53  ;;  %6029 = vmatprep.subr.bf16.mxu1 %v15043_v54  ;;  %v15128_v52 = vld [vmem:[#allocation3 + $0x600] ss:$16 sps:$4 sm:$0xff]   ;;  %v15131_v53 = vld [vmem:[#allocation3 + $0x608] ss:$16 sps:$4 sm:$0xff]   ;;  %v15136_v54 = vld [vmem:[#allocation3 + $0x624] ss:$16 sps:$4 sm:$0xff]  }
  0xd8   : > { %4944 = vmatmul.mubr.bf16.gmra.mrb[8].mxu0 %v15037_v55  ;;  %5961 = vmatmul.mubr.bf16.gmra.mrb[8].mxu1 %v15037_v55  ;;  %v15139_v55 = vld [vmem:[#allocation3 + $0x62c] ss:$16 sps:$4 sm:$0xff]  }
  0xd9   : > { %5013 = vmatpush1.bf16.msra.mxu0 %v15038_v56  ;;  %6030 = vmatpush1.bf16.msra.mxu1 %v15041_v57  ;;  %v15140_v56 = vld [vmem:[%s18958_s0 + $0xa4] ss:$72 sps:$4 sm:$0xff]   ;;  %v15134_v57 = vld [vmem:[#allocation3 + $0x620] ss:$16 sps:$4 sm:$0xff]  }
  0xda   : > { %5014 = vmatprep.subr.bf16.mxu0 %v15046_v58  ;;  %6031 = vmatprep.subr.bf16.mxu1 %v15049_v59  ;;  %v15137_v58 = vld [vmem:[#allocation3 + $0x628] ss:$16 sps:$4 sm:$0xff]   ;;  %v15145_v59 = vld [vmem:[#allocation3 + $0x644] ss:$16 sps:$4 sm:$0xff]  }
  0xdb   : > { %4953 = vmatprep.mubr.bf16.mxu0 %v15050_v60  ;;  %5970 = vmatprep.mubr.bf16.mxu1 %v15050_v60  ;;  %v15148_v60 = vld [vmem:[#allocation3 + $0x64c] ss:$16 sps:$4 sm:$0xff]  }
  0xdd   : > { %5015 = vmatpush1.bf16.msra.mxu0 %v15044_v61  ;;  %6032 = vmatpush1.bf16.msra.mxu1 %v15047_v62  ;;  %v15142_v61 = vld [vmem:[%s18958_s0 + $0xa0] ss:$72 sps:$4 sm:$0xff]  }
  0xde   : > { %5016 = vmatprep.subr.bf16.mxu0 %v15055_v63  ;;  %6033 = vmatprep.subr.bf16.mxu1 %v15058_v0  ;;  %v15143_v62 = vld [vmem:[#allocation3 + $0x640] ss:$16 sps:$4 sm:$0xff]   ;;  %v15146_v63 = vld [vmem:[#allocation3 + $0x648] ss:$16 sps:$4 sm:$0xff]   ;;  %v15151_v0 = vld [vmem:[#allocation3 + $0x664] ss:$16 sps:$4 sm:$0xff]  }
  0xe0   : > { %4954 = vmatmul.mubr.bf16.gmra.mrb[12].mxu0 %v15052_v1  ;;  %5971 = vmatmul.mubr.bf16.gmra.mrb[12].mxu1 %v15052_v1  ;;  %v15154_v1 = vld [vmem:[#allocation3 + $0x66c] ss:$16 sps:$4 sm:$0xff]  }
  0xe1   : > { %5017 = vmatpush1.bf16.msra.mxu0 %v15053_v2  ;;  %6034 = vmatpush1.bf16.msra.mxu1 %v15056_v3  ;;  %v15155_v2 = vld [vmem:[%s18958_s0 + $0x134] ss:$72 sps:$4 sm:$0xff]   ;;  %v15149_v3 = vld [vmem:[#allocation3 + $0x660] ss:$16 sps:$4 sm:$0xff]  }
  0xe2   : > { %5018 = vmatprep.subr.bf16.mxu0 %v15061_v4  ;;  %6035 = vmatprep.subr.bf16.mxu1 %v15064_v5  ;;  %v15152_v4 = vld [vmem:[#allocation3 + $0x668] ss:$16 sps:$4 sm:$0xff]   ;;  %v15160_v5 = vld [vmem:[#allocation3 + $0x684] ss:$16 sps:$4 sm:$0xff]  }
  0xe3   : > { %4963 = vmatprep.mubr.bf16.mxu0 %v15065_v6  ;;  %5980 = vmatprep.mubr.bf16.mxu1 %v15065_v6  ;;  %v15163_v6 = vld [vmem:[#allocation3 + $0x68c] ss:$16 sps:$4 sm:$0xff]  }
  0xe5   : > { %5019 = vmatpush1.bf16.msra.mxu0 %v15059_v7  ;;  %6036 = vmatpush1.bf16.msra.mxu1 %v15062_v8  ;;  %v15157_v7 = vld [vmem:[%s18958_s0 + $0x130] ss:$72 sps:$4 sm:$0xff]  }
  0xe6   : > { %5020 = vmatprep.subr.bf16.mxu0 %v15070_v9  ;;  %6037 = vmatprep.subr.bf16.mxu1 %v15073_v10  ;;  %v15158_v8 = vld [vmem:[#allocation3 + $0x680] ss:$16 sps:$4 sm:$0xff]   ;;  %v15161_v9 = vld [vmem:[#allocation3 + $0x688] ss:$16 sps:$4 sm:$0xff]   ;;  %v15166_v10 = vld [vmem:[#allocation3 + $0x6a4] ss:$16 sps:$4 sm:$0xff]  }
  0xe8   : > { %4964 = vmatmul.mubr.bf16.gmra.mrb[16].mxu0 %v15067_v11  ;;  %5981 = vmatmul.mubr.bf16.gmra.mrb[16].mxu1 %v15067_v11  ;;  %v15169_v11 = vld [vmem:[#allocation3 + $0x6ac] ss:$16 sps:$4 sm:$0xff]  }
  0xe9   : > { %5021 = vmatpush1.bf16.msra.mxu0 %v15068_v12  ;;  %6038 = vmatpush1.bf16.msra.mxu1 %v15071_v13  ;;  %v15170_v12 = vld [vmem:[%s18958_s0 + $0x1c4] ss:$72 sps:$4 sm:$0xff]   ;;  %v15164_v13 = vld [vmem:[#allocation3 + $0x6a0] ss:$16 sps:$4 sm:$0xff]  }
  0xea   : > { %5022 = vmatprep.subr.bf16.mxu0 %v15076_v14  ;;  %6039 = vmatprep.subr.bf16.mxu1 %v15079_v15  ;;  %v15167_v14 = vld [vmem:[#allocation3 + $0x6a8] ss:$16 sps:$4 sm:$0xff]   ;;  %v15175_v15 = vld [vmem:[#allocation3 + $0x6c4] ss:$16 sps:$4 sm:$0xff]  }
  0xeb   : > { %4973 = vmatprep.mubr.bf16.mxu0 %v15080_v16  ;;  %5990 = vmatprep.mubr.bf16.mxu1 %v15080_v16  ;;  %v15178_v16 = vld [vmem:[#allocation3 + $0x6cc] ss:$16 sps:$4 sm:$0xff]  }
  0xed   : > { %5023 = vmatpush1.bf16.msra.mxu0 %v15074_v17  ;;  %6040 = vmatpush1.bf16.msra.mxu1 %v15077_v18  ;;  %v15172_v17 = vld [vmem:[%s18958_s0 + $0x1c0] ss:$72 sps:$4 sm:$0xff]  }
  0xee   : > { %5024 = vmatprep.subr.bf16.mxu0 %v15085_v19  ;;  %6041 = vmatprep.subr.bf16.mxu1 %v15088_v20  ;;  %v15173_v18 = vld [vmem:[#allocation3 + $0x6c0] ss:$16 sps:$4 sm:$0xff]   ;;  %v15176_v19 = vld [vmem:[#allocation3 + $0x6c8] ss:$16 sps:$4 sm:$0xff]   ;;  %v15181_v20 = vld [vmem:[#allocation3 + $0x6e4] ss:$16 sps:$4 sm:$0xff]  }
  0xf0   : > { %4974 = vmatmul.mubr.bf16.gmra.mrb[20].mxu0 %v15082_v21  ;;  %5991 = vmatmul.mubr.bf16.gmra.mrb[20].mxu1 %v15082_v21  ;;  %v15184_v21 = vld [vmem:[#allocation3 + $0x6ec] ss:$16 sps:$4 sm:$0xff]  }
  0xf1   : > { %5025 = vmatpush1.bf16.msra.mxu0 %v15083_v22  ;;  %6042 = vmatpush1.bf16.msra.mxu1 %v15086_v23  ;;  %v15185_v22 = vld [vmem:[%s18958_s0 + $0x254] ss:$72 sps:$4 sm:$0xff]   ;;  %v15179_v23 = vld [vmem:[#allocation3 + $0x6e0] ss:$16 sps:$4 sm:$0xff]  }
  0xf2   : > { %5026 = vmatprep.subr.bf16.mxu0 %v15091_v24  ;;  %6043 = vmatprep.subr.bf16.mxu1 %v15094_v25  ;;  %v15182_v24 = vld [vmem:[#allocation3 + $0x6e8] ss:$16 sps:$4 sm:$0xff]   ;;  %v15190_v25 = vld [vmem:[#allocation3 + $0x704] ss:$16 sps:$4 sm:$0xff]  }
  0xf3   : > { %4983 = vmatprep.mubr.bf16.mxu0 %v15095_v26  ;;  %6000 = vmatprep.mubr.bf16.mxu1 %v15095_v26  ;;  %v15193_v26 = vld [vmem:[#allocation3 + $0x70c] ss:$16 sps:$4 sm:$0xff]  }
  0xf5   : > { %5027 = vmatpush1.bf16.msra.mxu0 %v15089_v27  ;;  %6044 = vmatpush1.bf16.msra.mxu1 %v15092_v28  ;;  %v15187_v27 = vld [vmem:[%s18958_s0 + $0x250] ss:$72 sps:$4 sm:$0xff]  }
  0xf6   : > { %5028 = vmatprep.subr.bf16.mxu0 %v15100_v29  ;;  %6045 = vmatprep.subr.bf16.mxu1 %v15103_v30  ;;  %v15188_v28 = vld [vmem:[#allocation3 + $0x700] ss:$16 sps:$4 sm:$0xff]   ;;  %v15191_v29 = vld [vmem:[#allocation3 + $0x708] ss:$16 sps:$4 sm:$0xff]   ;;  %v15196_v30 = vld [vmem:[#allocation3 + $0x724] ss:$16 sps:$4 sm:$0xff]  }
  0xf8   : > { %4984 = vmatmul.mubr.bf16.gmra.mrb[24].mxu0 %v15097_v31  ;;  %6001 = vmatmul.mubr.bf16.gmra.mrb[24].mxu1 %v15097_v31  ;;  %v15199_v31 = vld [vmem:[#allocation3 + $0x72c] ss:$16 sps:$4 sm:$0xff]  }
  0xf9   : > { %5029 = vmatpush1.bf16.msra.mxu0 %v15098_v32  ;;  %6046 = vmatpush1.bf16.msra.mxu1 %v15101_v33  ;;  %v15200_v32 = vld [vmem:[%s18958_s0 + $0x2e4] ss:$72 sps:$4 sm:$0xff]   ;;  %v15194_v33 = vld [vmem:[#allocation3 + $0x720] ss:$16 sps:$4 sm:$0xff]  }
  0xfa   : > { %5030 = vmatprep.subr.bf16.mxu0 %v15106_v34  ;;  %6047 = vmatprep.subr.bf16.mxu1 %v15109_v35  ;;  %v15197_v34 = vld [vmem:[#allocation3 + $0x728] ss:$16 sps:$4 sm:$0xff]   ;;  %v15205_v35 = vld [vmem:[#allocation3 + $0x744] ss:$16 sps:$4 sm:$0xff]  }
  0xfb   : > { %4993 = vmatprep.mubr.bf16.mxu0 %v15110_v36  ;;  %6010 = vmatprep.mubr.bf16.mxu1 %v15110_v36  ;;  %v15208_v36 = vld [vmem:[#allocation3 + $0x74c] ss:$16 sps:$4 sm:$0xff]  }
  0xfd   : > { %5031 = vmatpush1.bf16.msra.mxu0 %v15104_v37  ;;  %6048 = vmatpush1.bf16.msra.mxu1 %v15107_v38  ;;  %v15202_v37 = vld [vmem:[%s18958_s0 + $0x2e0] ss:$72 sps:$4 sm:$0xff]  }
  0xfe   : > { %5032 = vmatprep.subr.bf16.mxu0 %v15115_v39  ;;  %6049 = vmatprep.subr.bf16.mxu1 %v15118_v40  ;;  %v15203_v38 = vld [vmem:[#allocation3 + $0x740] ss:$16 sps:$4 sm:$0xff]   ;;  %v15206_v39 = vld [vmem:[#allocation3 + $0x748] ss:$16 sps:$4 sm:$0xff]   ;;  %v15211_v40 = vld [vmem:[#allocation3 + $0x764] ss:$16 sps:$4 sm:$0xff]  }
 0x100   : > { %4994 = vmatmul.mubr.bf16.gmra.mrb[28].mxu0 %v15112_v41  ;;  %6011 = vmatmul.mubr.bf16.gmra.mrb[28].mxu1 %v15112_v41  ;;  %v15214_v41 = vld [vmem:[#allocation3 + $0x76c] ss:$16 sps:$4 sm:$0xff]  }
 0x101   : > { %5033 = vmatpush1.bf16.msra.mxu0 %v15113_v42  ;;  %6050 = vmatpush1.bf16.msra.mxu1 %v15116_v43  ;;  %v15215_v42 = vld [vmem:[%s18958_s0 + $0x374] ss:$72 sps:$4 sm:$0xff]   ;;  %v15209_v43 = vld [vmem:[#allocation3 + $0x760] ss:$16 sps:$4 sm:$0xff]  }
 0x102   : > { %5034 = vmatprep.subr.bf16.mxu0 %v15121_v44  ;;  %6051 = vmatprep.subr.bf16.mxu1 %v15124_v45  ;;  %v15212_v44 = vld [vmem:[#allocation3 + $0x768] ss:$16 sps:$4 sm:$0xff]   ;;  %v15220_v45 = vld [vmem:[#allocation3 + $0x784] ss:$16 sps:$4 sm:$0xff]  }
 0x103   : > { %5036 = vmatprep.mubr.bf16.mxu0 %v15127_v46  ;;  %6053 = vmatprep.mubr.bf16.mxu1 %v15127_v46  ;;  %v15223_v46 = vld [vmem:[#allocation3 + $0x78c] ss:$16 sps:$4 sm:$0xff]  }
 0x105   : > { %5035 = vmatpush1.bf16.msra.mxu0 %v15119_v47  ;;  %6052 = vmatpush1.bf16.msra.mxu1 %v15122_v48  ;;  %v15217_v47 = vld [vmem:[%s18958_s0 + $0x370] ss:$72 sps:$4 sm:$0xff]  }
 0x106   : > { %5117 = vmatprep.subr.bf16.mxu0 %v15130_v49  ;;  %6134 = vmatprep.subr.bf16.mxu1 %v15133_v50  ;;  %v15218_v48 = vld [vmem:[#allocation3 + $0x780] ss:$16 sps:$4 sm:$0xff]   ;;  %v15221_v49 = vld [vmem:[#allocation3 + $0x788] ss:$16 sps:$4 sm:$0xff]   ;;  %v15226_v50 = vld [vmem:[#allocation3 + $0x7a4] ss:$16 sps:$4 sm:$0xff]  }
 0x108   : > { %5037 = vmatmul.mubr.bf16.vlgmr.msra.gmra.mrb[0].mxu0 %v15125_v51  ;;  %6054 = vmatmul.mubr.bf16.vlgmr.msra.gmra.mrb[0].mxu1 %v15125_v51  ;;  %v15229_v51 = vld [vmem:[#allocation3 + $0x7ac] ss:$16 sps:$4 sm:$0xff]  }
 0x109   : > { %5118 = vmatpush1.bf16.msra.mxu0 %v15128_v52  ;;  %6135 = vmatpush1.bf16.msra.mxu1 %v15131_v53  ;;  %v15230_v52 = vld [vmem:[%s18958_s0 + $0x404] ss:$72 sps:$4 sm:$0xff]   ;;  %v15224_v53 = vld [vmem:[#allocation3 + $0x7a0] ss:$16 sps:$4 sm:$0xff]  }
 0x10a   : > { %5119 = vmatprep.subr.bf16.mxu0 %v15136_v54  ;;  %6136 = vmatprep.subr.bf16.mxu1 %v15139_v55  ;;  %v15227_v54 = vld [vmem:[#allocation3 + $0x7a8] ss:$16 sps:$4 sm:$0xff]   ;;  %v15235_v55 = vld [vmem:[#allocation3 + $0x7c4] ss:$16 sps:$4 sm:$0xff]  }
 0x10b   : > { %5046 = vmatprep.mubr.bf16.mxu0 %v15140_v56  ;;  %6063 = vmatprep.mubr.bf16.mxu1 %v15140_v56  ;;  %v15238_v56 = vld [vmem:[#allocation3 + $0x7cc] ss:$16 sps:$4 sm:$0xff]  }
 0x10d   : > { %5120 = vmatpush1.bf16.msra.mxu0 %v15134_v57  ;;  %6137 = vmatpush1.bf16.msra.mxu1 %v15137_v58  ;;  %v15232_v57 = vld [vmem:[%s18958_s0 + $0x400] ss:$72 sps:$4 sm:$0xff]  }
 0x10e   : > { %5121 = vmatprep.subr.bf16.mxu0 %v15145_v59  ;;  %6138 = vmatprep.subr.bf16.mxu1 %v15148_v60  ;;  %v15233_v58 = vld [vmem:[#allocation3 + $0x7c0] ss:$16 sps:$4 sm:$0xff]   ;;  %v15236_v59 = vld [vmem:[#allocation3 + $0x7c8] ss:$16 sps:$4 sm:$0xff]   ;;  %v15241_v60 = vld [vmem:[#allocation3 + $0x7e4] ss:$16 sps:$4 sm:$0xff]  }
 0x110   : > { %5047 = vmatmul.mubr.bf16.gmra.mrb[4].mxu0 %v15142_v61  ;;  %6064 = vmatmul.mubr.bf16.gmra.mrb[4].mxu1 %v15142_v61  ;;  %v15244_v61 = vld [vmem:[#allocation3 + $0x7ec] ss:$16 sps:$4 sm:$0xff]  }
 0x111   : > { %5122 = vmatpush1.bf16.msra.mxu0 %v15143_v62  ;;  %6139 = vmatpush1.bf16.msra.mxu1 %v15146_v63  ;;  %v15247_v62 = vld [vmem:[%s18958_s0 + $0x1c] ss:$72 sps:$4 sm:$0xff]   ;;  %v15239_v63 = vld [vmem:[#allocation3 + $0x7e0] ss:$16 sps:$4 sm:$0xff]  }
 0x112   : > { %5123 = vmatprep.subr.bf16.mxu0 %v15151_v0  ;;  %6140 = vmatprep.subr.bf16.mxu1 %v15154_v1  ;;  %v15242_v0 = vld [vmem:[#allocation3 + $0x7e8] ss:$16 sps:$4 sm:$0xff]   ;;  %v15250_v1 = vld [vmem:[#allocation3 + $0x804] ss:$16 sps:$4 sm:$0xff]  }
 0x113   : > { %5056 = vmatprep.mubr.bf16.mxu0 %v15155_v2  ;;  %6073 = vmatprep.mubr.bf16.mxu1 %v15155_v2  ;;  %v15253_v2 = vld [vmem:[#allocation3 + $0x80c] ss:$16 sps:$4 sm:$0xff]  }
 0x115   : > { %5124 = vmatpush1.bf16.msra.mxu0 %v15149_v3  ;;  %6141 = vmatpush1.bf16.msra.mxu1 %v15152_v4  ;;  %v15245_v3 = vld [vmem:[%s18958_s0 + $0x18] ss:$72 sps:$4 sm:$0xff]  }
 0x116   : > { %5125 = vmatprep.subr.bf16.mxu0 %v15160_v5  ;;  %6142 = vmatprep.subr.bf16.mxu1 %v15163_v6  ;;  %v15248_v4 = vld [vmem:[#allocation3 + $0x800] ss:$16 sps:$4 sm:$0xff]   ;;  %v15251_v5 = vld [vmem:[#allocation3 + $0x808] ss:$16 sps:$4 sm:$0xff]   ;;  %v15256_v6 = vld [vmem:[#allocation3 + $0x824] ss:$16 sps:$4 sm:$0xff]  }
 0x118   : > { %5057 = vmatmul.mubr.bf16.gmra.mrb[8].mxu0 %v15157_v7  ;;  %6074 = vmatmul.mubr.bf16.gmra.mrb[8].mxu1 %v15157_v7  ;;  %v15259_v7 = vld [vmem:[#allocation3 + $0x82c] ss:$16 sps:$4 sm:$0xff]  }
 0x119   : > { %5126 = vmatpush1.bf16.msra.mxu0 %v15158_v8  ;;  %6143 = vmatpush1.bf16.msra.mxu1 %v15161_v9  ;;  %v15260_v8 = vld [vmem:[%s18958_s0 + $0xac] ss:$72 sps:$4 sm:$0xff]   ;;  %v15254_v9 = vld [vmem:[#allocation3 + $0x820] ss:$16 sps:$4 sm:$0xff]  }
 0x11a   : > { %5127 = vmatprep.subr.bf16.mxu0 %v15166_v10  ;;  %6144 = vmatprep.subr.bf16.mxu1 %v15169_v11  ;;  %v15257_v10 = vld [vmem:[#allocation3 + $0x828] ss:$16 sps:$4 sm:$0xff]   ;;  %v15265_v11 = vld [vmem:[#allocation3 + $0x844] ss:$16 sps:$4 sm:$0xff]  }
 0x11b   : > { %5066 = vmatprep.mubr.bf16.mxu0 %v15170_v12  ;;  %6083 = vmatprep.mubr.bf16.mxu1 %v15170_v12  ;;  %v15268_v12 = vld [vmem:[#allocation3 + $0x84c] ss:$16 sps:$4 sm:$0xff]  }
 0x11d   : > { %5128 = vmatpush1.bf16.msra.mxu0 %v15164_v13  ;;  %6145 = vmatpush1.bf16.msra.mxu1 %v15167_v14  ;;  %v15262_v13 = vld [vmem:[%s18958_s0 + $0xa8] ss:$72 sps:$4 sm:$0xff]  }
 0x11e   : > { %5129 = vmatprep.subr.bf16.mxu0 %v15175_v15  ;;  %6146 = vmatprep.subr.bf16.mxu1 %v15178_v16  ;;  %v15263_v14 = vld [vmem:[#allocation3 + $0x840] ss:$16 sps:$4 sm:$0xff]   ;;  %v15266_v15 = vld [vmem:[#allocation3 + $0x848] ss:$16 sps:$4 sm:$0xff]   ;;  %v15271_v16 = vld [vmem:[#allocation3 + $0x864] ss:$16 sps:$4 sm:$0xff]  }
 0x120   : > { %5067 = vmatmul.mubr.bf16.gmra.mrb[12].mxu0 %v15172_v17  ;;  %6084 = vmatmul.mubr.bf16.gmra.mrb[12].mxu1 %v15172_v17  ;;  %v15274_v17 = vld [vmem:[#allocation3 + $0x86c] ss:$16 sps:$4 sm:$0xff]  }
 0x121   : > { %5130 = vmatpush1.bf16.msra.mxu0 %v15173_v18  ;;  %6147 = vmatpush1.bf16.msra.mxu1 %v15176_v19  ;;  %v15275_v18 = vld [vmem:[%s18958_s0 + $0x13c] ss:$72 sps:$4 sm:$0xff]   ;;  %v15269_v19 = vld [vmem:[#allocation3 + $0x860] ss:$16 sps:$4 sm:$0xff]  }
 0x122   : > { %5131 = vmatprep.subr.bf16.mxu0 %v15181_v20  ;;  %6148 = vmatprep.subr.bf16.mxu1 %v15184_v21  ;;  %v15272_v20 = vld [vmem:[#allocation3 + $0x868] ss:$16 sps:$4 sm:$0xff]   ;;  %v15280_v21 = vld [vmem:[#allocation3 + $0x884] ss:$16 sps:$4 sm:$0xff]  }
 0x123   : > { %5076 = vmatprep.mubr.bf16.mxu0 %v15185_v22  ;;  %6093 = vmatprep.mubr.bf16.mxu1 %v15185_v22  ;;  %v15283_v22 = vld [vmem:[#allocation3 + $0x88c] ss:$16 sps:$4 sm:$0xff]  }
 0x125   : > { %5132 = vmatpush1.bf16.msra.mxu0 %v15179_v23  ;;  %6149 = vmatpush1.bf16.msra.mxu1 %v15182_v24  ;;  %v15277_v23 = vld [vmem:[%s18958_s0 + $0x138] ss:$72 sps:$4 sm:$0xff]  }
 0x126   : > { %5133 = vmatprep.subr.bf16.mxu0 %v15190_v25  ;;  %6150 = vmatprep.subr.bf16.mxu1 %v15193_v26  ;;  %v15278_v24 = vld [vmem:[#allocation3 + $0x880] ss:$16 sps:$4 sm:$0xff]   ;;  %v15281_v25 = vld [vmem:[#allocation3 + $0x888] ss:$16 sps:$4 sm:$0xff]   ;;  %v15286_v26 = vld [vmem:[#allocation3 + $0x8a4] ss:$16 sps:$4 sm:$0xff]  }
 0x128   : > { %5077 = vmatmul.mubr.bf16.gmra.mrb[16].mxu0 %v15187_v27  ;;  %6094 = vmatmul.mubr.bf16.gmra.mrb[16].mxu1 %v15187_v27  ;;  %v15289_v27 = vld [vmem:[#allocation3 + $0x8ac] ss:$16 sps:$4 sm:$0xff]  }
 0x129   : > { %5134 = vmatpush1.bf16.msra.mxu0 %v15188_v28  ;;  %6151 = vmatpush1.bf16.msra.mxu1 %v15191_v29  ;;  %v15290_v28 = vld [vmem:[%s18958_s0 + $0x1cc] ss:$72 sps:$4 sm:$0xff]   ;;  %v15284_v29 = vld [vmem:[#allocation3 + $0x8a0] ss:$16 sps:$4 sm:$0xff]  }
 0x12a   : > { %5135 = vmatprep.subr.bf16.mxu0 %v15196_v30  ;;  %6152 = vmatprep.subr.bf16.mxu1 %v15199_v31  ;;  %v15287_v30 = vld [vmem:[#allocation3 + $0x8a8] ss:$16 sps:$4 sm:$0xff]   ;;  %v15295_v31 = vld [vmem:[#allocation3 + $0x8c4] ss:$16 sps:$4 sm:$0xff]  }
 0x12b   : > { %5086 = vmatprep.mubr.bf16.mxu0 %v15200_v32  ;;  %6103 = vmatprep.mubr.bf16.mxu1 %v15200_v32  ;;  %v15298_v32 = vld [vmem:[#allocation3 + $0x8cc] ss:$16 sps:$4 sm:$0xff]  }
 0x12d   : > { %5136 = vmatpush1.bf16.msra.mxu0 %v15194_v33  ;;  %6153 = vmatpush1.bf16.msra.mxu1 %v15197_v34  ;;  %v15292_v33 = vld [vmem:[%s18958_s0 + $0x1c8] ss:$72 sps:$4 sm:$0xff]  }
 0x12e   : > { %5137 = vmatprep.subr.bf16.mxu0 %v15205_v35  ;;  %6154 = vmatprep.subr.bf16.mxu1 %v15208_v36  ;;  %v15293_v34 = vld [vmem:[#allocation3 + $0x8c0] ss:$16 sps:$4 sm:$0xff]   ;;  %v15296_v35 = vld [vmem:[#allocation3 + $0x8c8] ss:$16 sps:$4 sm:$0xff]   ;;  %v15301_v36 = vld [vmem:[#allocation3 + $0x8e4] ss:$16 sps:$4 sm:$0xff]  }
 0x130   : > { %5087 = vmatmul.mubr.bf16.gmra.mrb[20].mxu0 %v15202_v37  ;;  %6104 = vmatmul.mubr.bf16.gmra.mrb[20].mxu1 %v15202_v37  ;;  %v15304_v37 = vld [vmem:[#allocation3 + $0x8ec] ss:$16 sps:$4 sm:$0xff]  }
 0x131   : > { %5138 = vmatpush1.bf16.msra.mxu0 %v15203_v38  ;;  %6155 = vmatpush1.bf16.msra.mxu1 %v15206_v39  ;;  %v15305_v38 = vld [vmem:[%s18958_s0 + $0x25c] ss:$72 sps:$4 sm:$0xff]   ;;  %v15299_v39 = vld [vmem:[#allocation3 + $0x8e0] ss:$16 sps:$4 sm:$0xff]  }
 0x132   : > { %5139 = vmatprep.subr.bf16.mxu0 %v15211_v40  ;;  %6156 = vmatprep.subr.bf16.mxu1 %v15214_v41  ;;  %v15302_v40 = vld [vmem:[#allocation3 + $0x8e8] ss:$16 sps:$4 sm:$0xff]   ;;  %v15310_v41 = vld [vmem:[#allocation3 + $0x904] ss:$16 sps:$4 sm:$0xff]  }
 0x133   : > { %5096 = vmatprep.mubr.bf16.mxu0 %v15215_v42  ;;  %6113 = vmatprep.mubr.bf16.mxu1 %v15215_v42  ;;  %v15313_v42 = vld [vmem:[#allocation3 + $0x90c] ss:$16 sps:$4 sm:$0xff]  }
 0x135   : > { %5140 = vmatpush1.bf16.msra.mxu0 %v15209_v43  ;;  %6157 = vmatpush1.bf16.msra.mxu1 %v15212_v44  ;;  %v15307_v43 = vld [vmem:[%s18958_s0 + $0x258] ss:$72 sps:$4 sm:$0xff]  }
 0x136   : > { %5141 = vmatprep.subr.bf16.mxu0 %v15220_v45  ;;  %6158 = vmatprep.subr.bf16.mxu1 %v15223_v46  ;;  %v15308_v44 = vld [vmem:[#allocation3 + $0x900] ss:$16 sps:$4 sm:$0xff]   ;;  %v15311_v45 = vld [vmem:[#allocation3 + $0x908] ss:$16 sps:$4 sm:$0xff]   ;;  %v15316_v46 = vld [vmem:[#allocation3 + $0x924] ss:$16 sps:$4 sm:$0xff]  }
 0x138   : > { %5097 = vmatmul.mubr.bf16.gmra.mrb[24].mxu0 %v15217_v47  ;;  %6114 = vmatmul.mubr.bf16.gmra.mrb[24].mxu1 %v15217_v47  ;;  %v15319_v47 = vld [vmem:[#allocation3 + $0x92c] ss:$16 sps:$4 sm:$0xff]  }
 0x139   : > { %5142 = vmatpush1.bf16.msra.mxu0 %v15218_v48  ;;  %6159 = vmatpush1.bf16.msra.mxu1 %v15221_v49  ;;  %v15320_v48 = vld [vmem:[%s18958_s0 + $0x2ec] ss:$72 sps:$4 sm:$0xff]   ;;  %v15314_v49 = vld [vmem:[#allocation3 + $0x920] ss:$16 sps:$4 sm:$0xff]  }
 0x13a   : > { %5143 = vmatprep.subr.bf16.mxu0 %v15226_v50  ;;  %6160 = vmatprep.subr.bf16.mxu1 %v15229_v51  ;;  %v15317_v50 = vld [vmem:[#allocation3 + $0x928] ss:$16 sps:$4 sm:$0xff]   ;;  %v15325_v51 = vld [vmem:[#allocation3 + $0x944] ss:$16 sps:$4 sm:$0xff]  }
 0x13b   : > { %5106 = vmatprep.mubr.bf16.mxu0 %v15230_v52  ;;  %6123 = vmatprep.mubr.bf16.mxu1 %v15230_v52  ;;  %v15328_v52 = vld [vmem:[#allocation3 + $0x94c] ss:$16 sps:$4 sm:$0xff]  }
 0x13d   : > { %5144 = vmatpush1.bf16.msra.mxu0 %v15224_v53  ;;  %6161 = vmatpush1.bf16.msra.mxu1 %v15227_v54  ;;  %v15322_v53 = vld [vmem:[%s18958_s0 + $0x2e8] ss:$72 sps:$4 sm:$0xff]  }
 0x13e   : > { %5145 = vmatprep.subr.bf16.mxu0 %v15235_v55  ;;  %6162 = vmatprep.subr.bf16.mxu1 %v15238_v56  ;;  %v15323_v54 = vld [vmem:[#allocation3 + $0x940] ss:$16 sps:$4 sm:$0xff]   ;;  %v15326_v55 = vld [vmem:[#allocation3 + $0x948] ss:$16 sps:$4 sm:$0xff]   ;;  %v15331_v56 = vld [vmem:[#allocation3 + $0x964] ss:$16 sps:$4 sm:$0xff]  }
 0x140   : > { %5107 = vmatmul.mubr.bf16.gmra.mrb[28].mxu0 %v15232_v57  ;;  %6124 = vmatmul.mubr.bf16.gmra.mrb[28].mxu1 %v15232_v57  ;;  %v15334_v57 = vld [vmem:[#allocation3 + $0x96c] ss:$16 sps:$4 sm:$0xff]  }
 0x141   : > { %5146 = vmatpush1.bf16.msra.mxu0 %v15233_v58  ;;  %6163 = vmatpush1.bf16.msra.mxu1 %v15236_v59  ;;  %v15335_v58 = vld [vmem:[%s18958_s0 + $0x37c] ss:$72 sps:$4 sm:$0xff]   ;;  %v15329_v59 = vld [vmem:[#allocation3 + $0x960] ss:$16 sps:$4 sm:$0xff]  }
 0x142   : > { %5147 = vmatprep.subr.bf16.mxu0 %v15241_v60  ;;  %6164 = vmatprep.subr.bf16.mxu1 %v15244_v61  ;;  %v15332_v60 = vld [vmem:[#allocation3 + $0x968] ss:$16 sps:$4 sm:$0xff]   ;;  %v15340_v61 = vld [vmem:[#allocation3 + $0x984] ss:$16 sps:$4 sm:$0xff]  }
 0x143   : > { %5149 = vmatprep.mubr.bf16.mxu0 %v15247_v62  ;;  %6166 = vmatprep.mubr.bf16.mxu1 %v15247_v62  ;;  %v15343_v62 = vld [vmem:[#allocation3 + $0x98c] ss:$16 sps:$4 sm:$0xff]  }
 0x145   : > { %5148 = vmatpush1.bf16.msra.mxu0 %v15239_v63  ;;  %6165 = vmatpush1.bf16.msra.mxu1 %v15242_v0  ;;  %v15337_v63 = vld [vmem:[%s18958_s0 + $0x378] ss:$72 sps:$4 sm:$0xff]  }
 0x146   : > { %5230 = vmatprep.subr.bf16.mxu0 %v15250_v1  ;;  %6247 = vmatprep.subr.bf16.mxu1 %v15253_v2  ;;  %v15338_v0 = vld [vmem:[#allocation3 + $0x980] ss:$16 sps:$4 sm:$0xff]   ;;  %v15341_v1 = vld [vmem:[#allocation3 + $0x988] ss:$16 sps:$4 sm:$0xff]   ;;  %v15346_v2 = vld [vmem:[#allocation3 + $0x9a4] ss:$16 sps:$4 sm:$0xff]  }
 0x148   : > { %5150 = vmatmul.mubr.bf16.vlgmr.msra.gmra.mrb[0].mxu0 %v15245_v3  ;;  %6167 = vmatmul.mubr.bf16.vlgmr.msra.gmra.mrb[0].mxu1 %v15245_v3  ;;  %v15349_v3 = vld [vmem:[#allocation3 + $0x9ac] ss:$16 sps:$4 sm:$0xff]  }
 0x149   : > { %5231 = vmatpush1.bf16.msra.mxu0 %v15248_v4  ;;  %6248 = vmatpush1.bf16.msra.mxu1 %v15251_v5  ;;  %v15350_v4 = vld [vmem:[%s18958_s0 + $0x40c] ss:$72 sps:$4 sm:$0xff]   ;;  %v15344_v5 = vld [vmem:[#allocation3 + $0x9a0] ss:$16 sps:$4 sm:$0xff]  }
 0x14a   : > { %5232 = vmatprep.subr.bf16.mxu0 %v15256_v6  ;;  %6249 = vmatprep.subr.bf16.mxu1 %v15259_v7  ;;  %v15347_v6 = vld [vmem:[#allocation3 + $0x9a8] ss:$16 sps:$4 sm:$0xff]   ;;  %v15355_v7 = vld [vmem:[#allocation3 + $0x9c4] ss:$16 sps:$4 sm:$0xff]  }
 0x14b   : > { %5159 = vmatprep.mubr.bf16.mxu0 %v15260_v8  ;;  %6176 = vmatprep.mubr.bf16.mxu1 %v15260_v8  ;;  %v15358_v8 = vld [vmem:[#allocation3 + $0x9cc] ss:$16 sps:$4 sm:$0xff]  }
 0x14d   : > { %5233 = vmatpush1.bf16.msra.mxu0 %v15254_v9  ;;  %6250 = vmatpush1.bf16.msra.mxu1 %v15257_v10  ;;  %v15352_v9 = vld [vmem:[%s18958_s0 + $0x408] ss:$72 sps:$4 sm:$0xff]  }
 0x14e   : > { %5234 = vmatprep.subr.bf16.mxu0 %v15265_v11  ;;  %6251 = vmatprep.subr.bf16.mxu1 %v15268_v12  ;;  %v15353_v10 = vld [vmem:[#allocation3 + $0x9c0] ss:$16 sps:$4 sm:$0xff]   ;;  %v15356_v11 = vld [vmem:[#allocation3 + $0x9c8] ss:$16 sps:$4 sm:$0xff]   ;;  %v15361_v12 = vld [vmem:[#allocation3 + $0x9e4] ss:$16 sps:$4 sm:$0xff]  }
 0x150   : > { %5160 = vmatmul.mubr.bf16.gmra.mrb[4].mxu0 %v15262_v13  ;;  %6177 = vmatmul.mubr.bf16.gmra.mrb[4].mxu1 %v15262_v13  ;;  %v15364_v13 = vld [vmem:[#allocation3 + $0x9ec] ss:$16 sps:$4 sm:$0xff]  }
 0x151   : > { %5235 = vmatpush1.bf16.msra.mxu0 %v15263_v14  ;;  %6252 = vmatpush1.bf16.msra.mxu1 %v15266_v15  ;;  %v15367_v14 = vld [vmem:[%s18958_s0 + $0x24] ss:$72 sps:$4 sm:$0xff]   ;;  %v15359_v15 = vld [vmem:[#allocation3 + $0x9e0] ss:$16 sps:$4 sm:$0xff]  }
 0x152   : > { %5236 = vmatprep.subr.bf16.mxu0 %v15271_v16  ;;  %6253 = vmatprep.subr.bf16.mxu1 %v15274_v17  ;;  %v15362_v16 = vld [vmem:[#allocation3 + $0x9e8] ss:$16 sps:$4 sm:$0xff]   ;;  %v15370_v17 = vld [vmem:[#allocation3 + $0xa04] ss:$16 sps:$4 sm:$0xff]  }
 0x153   : > { %5169 = vmatprep.mubr.bf16.mxu0 %v15275_v18  ;;  %6186 = vmatprep.mubr.bf16.mxu1 %v15275_v18  ;;  %v15373_v18 = vld [vmem:[#allocation3 + $0xa0c] ss:$16 sps:$4 sm:$0xff]  }
 0x155   : > { %5237 = vmatpush1.bf16.msra.mxu0 %v15269_v19  ;;  %6254 = vmatpush1.bf16.msra.mxu1 %v15272_v20  ;;  %v15365_v19 = vld [vmem:[%s18958_s0 + $0x20] ss:$72 sps:$4 sm:$0xff]  }
 0x156   : > { %5238 = vmatprep.subr.bf16.mxu0 %v15280_v21  ;;  %6255 = vmatprep.subr.bf16.mxu1 %v15283_v22  ;;  %v15368_v20 = vld [vmem:[#allocation3 + $0xa00] ss:$16 sps:$4 sm:$0xff]   ;;  %v15371_v21 = vld [vmem:[#allocation3 + $0xa08] ss:$16 sps:$4 sm:$0xff]   ;;  %v15376_v22 = vld [vmem:[#allocation3 + $0xa24] ss:$16 sps:$4 sm:$0xff]  }
 0x158   : > { %5170 = vmatmul.mubr.bf16.gmra.mrb[8].mxu0 %v15277_v23  ;;  %6187 = vmatmul.mubr.bf16.gmra.mrb[8].mxu1 %v15277_v23  ;;  %v15379_v23 = vld [vmem:[#allocation3 + $0xa2c] ss:$16 sps:$4 sm:$0xff]  }
 0x159   : > { %5239 = vmatpush1.bf16.msra.mxu0 %v15278_v24  ;;  %6256 = vmatpush1.bf16.msra.mxu1 %v15281_v25  ;;  %v15380_v24 = vld [vmem:[%s18958_s0 + $0xb4] ss:$72 sps:$4 sm:$0xff]   ;;  %v15374_v25 = vld [vmem:[#allocation3 + $0xa20] ss:$16 sps:$4 sm:$0xff]  }
 0x15a   : > { %5240 = vmatprep.subr.bf16.mxu0 %v15286_v26  ;;  %6257 = vmatprep.subr.bf16.mxu1 %v15289_v27  ;;  %v15377_v26 = vld [vmem:[#allocation3 + $0xa28] ss:$16 sps:$4 sm:$0xff]   ;;  %v15385_v27 = vld [vmem:[#allocation3 + $0xa44] ss:$16 sps:$4 sm:$0xff]  }
 0x15b   : > { %5179 = vmatprep.mubr.bf16.mxu0 %v15290_v28  ;;  %6196 = vmatprep.mubr.bf16.mxu1 %v15290_v28  ;;  %v15388_v28 = vld [vmem:[#allocation3 + $0xa4c] ss:$16 sps:$4 sm:$0xff]  }
 0x15d   : > { %5241 = vmatpush1.bf16.msra.mxu0 %v15284_v29  ;;  %6258 = vmatpush1.bf16.msra.mxu1 %v15287_v30  ;;  %v15382_v29 = vld [vmem:[%s18958_s0 + $0xb0] ss:$72 sps:$4 sm:$0xff]  }
 0x15e   : > { %5242 = vmatprep.subr.bf16.mxu0 %v15295_v31  ;;  %6259 = vmatprep.subr.bf16.mxu1 %v15298_v32  ;;  %v15383_v30 = vld [vmem:[#allocation3 + $0xa40] ss:$16 sps:$4 sm:$0xff]   ;;  %v15386_v31 = vld [vmem:[#allocation3 + $0xa48] ss:$16 sps:$4 sm:$0xff]   ;;  %v15391_v32 = vld [vmem:[#allocation3 + $0xa64] ss:$16 sps:$4 sm:$0xff]  }
 0x160   : > { %5180 = vmatmul.mubr.bf16.gmra.mrb[12].mxu0 %v15292_v33  ;;  %6197 = vmatmul.mubr.bf16.gmra.mrb[12].mxu1 %v15292_v33  ;;  %v15394_v33 = vld [vmem:[#allocation3 + $0xa6c] ss:$16 sps:$4 sm:$0xff]  }
 0x161   : > { %5243 = vmatpush1.bf16.msra.mxu0 %v15293_v34  ;;  %6260 = vmatpush1.bf16.msra.mxu1 %v15296_v35  ;;  %v15395_v34 = vld [vmem:[%s18958_s0 + $0x144] ss:$72 sps:$4 sm:$0xff]   ;;  %v15389_v35 = vld [vmem:[#allocation3 + $0xa60] ss:$16 sps:$4 sm:$0xff]  }
 0x162   : > { %5244 = vmatprep.subr.bf16.mxu0 %v15301_v36  ;;  %6261 = vmatprep.subr.bf16.mxu1 %v15304_v37  ;;  %v15392_v36 = vld [vmem:[#allocation3 + $0xa68] ss:$16 sps:$4 sm:$0xff]   ;;  %v15400_v37 = vld [vmem:[#allocation3 + $0xa84] ss:$16 sps:$4 sm:$0xff]  }
 0x163   : > { %5189 = vmatprep.mubr.bf16.mxu0 %v15305_v38  ;;  %6206 = vmatprep.mubr.bf16.mxu1 %v15305_v38  ;;  %v15403_v38 = vld [vmem:[#allocation3 + $0xa8c] ss:$16 sps:$4 sm:$0xff]  }
 0x165   : > { %5245 = vmatpush1.bf16.msra.mxu0 %v15299_v39  ;;  %6262 = vmatpush1.bf16.msra.mxu1 %v15302_v40  ;;  %v15397_v39 = vld [vmem:[%s18958_s0 + $0x140] ss:$72 sps:$4 sm:$0xff]  }
 0x166   : > { %5246 = vmatprep.subr.bf16.mxu0 %v15310_v41  ;;  %6263 = vmatprep.subr.bf16.mxu1 %v15313_v42  ;;  %v15398_v40 = vld [vmem:[#allocation3 + $0xa80] ss:$16 sps:$4 sm:$0xff]   ;;  %v15401_v41 = vld [vmem:[#allocation3 + $0xa88] ss:$16 sps:$4 sm:$0xff]   ;;  %v15406_v42 = vld [vmem:[#allocation3 + $0xaa4] ss:$16 sps:$4 sm:$0xff]  }
 0x168   : > { %5190 = vmatmul.mubr.bf16.gmra.mrb[16].mxu0 %v15307_v43  ;;  %6207 = vmatmul.mubr.bf16.gmra.mrb[16].mxu1 %v15307_v43  ;;  %v15409_v43 = vld [vmem:[#allocation3 + $0xaac] ss:$16 sps:$4 sm:$0xff]  }
 0x169   : > { %5247 = vmatpush1.bf16.msra.mxu0 %v15308_v44  ;;  %6264 = vmatpush1.bf16.msra.mxu1 %v15311_v45  ;;  %v15410_v44 = vld [vmem:[%s18958_s0 + $0x1d4] ss:$72 sps:$4 sm:$0xff]   ;;  %v15404_v45 = vld [vmem:[#allocation3 + $0xaa0] ss:$16 sps:$4 sm:$0xff]  }
 0x16a   : > { %5248 = vmatprep.subr.bf16.mxu0 %v15316_v46  ;;  %6265 = vmatprep.subr.bf16.mxu1 %v15319_v47  ;;  %v15407_v46 = vld [vmem:[#allocation3 + $0xaa8] ss:$16 sps:$4 sm:$0xff]   ;;  %v15415_v47 = vld [vmem:[#allocation3 + $0xac4] ss:$16 sps:$4 sm:$0xff]  }
 0x16b   : > { %5199 = vmatprep.mubr.bf16.mxu0 %v15320_v48  ;;  %6216 = vmatprep.mubr.bf16.mxu1 %v15320_v48  ;;  %v15418_v48 = vld [vmem:[#allocation3 + $0xacc] ss:$16 sps:$4 sm:$0xff]  }
 0x16d   : > { %5249 = vmatpush1.bf16.msra.mxu0 %v15314_v49  ;;  %6266 = vmatpush1.bf16.msra.mxu1 %v15317_v50  ;;  %v15412_v49 = vld [vmem:[%s18958_s0 + $0x1d0] ss:$72 sps:$4 sm:$0xff]  }
 0x16e   : > { %5250 = vmatprep.subr.bf16.mxu0 %v15325_v51  ;;  %6267 = vmatprep.subr.bf16.mxu1 %v15328_v52  ;;  %v15413_v50 = vld [vmem:[#allocation3 + $0xac0] ss:$16 sps:$4 sm:$0xff]   ;;  %v15416_v51 = vld [vmem:[#allocation3 + $0xac8] ss:$16 sps:$4 sm:$0xff]   ;;  %v15421_v52 = vld [vmem:[#allocation3 + $0xae4] ss:$16 sps:$4 sm:$0xff]  }
 0x170   : > { %5200 = vmatmul.mubr.bf16.gmra.mrb[20].mxu0 %v15322_v53  ;;  %6217 = vmatmul.mubr.bf16.gmra.mrb[20].mxu1 %v15322_v53  ;;  %v15424_v53 = vld [vmem:[#allocation3 + $0xaec] ss:$16 sps:$4 sm:$0xff]  }
 0x171   : > { %5251 = vmatpush1.bf16.msra.mxu0 %v15323_v54  ;;  %6268 = vmatpush1.bf16.msra.mxu1 %v15326_v55  ;;  %v15425_v54 = vld [vmem:[%s18958_s0 + $0x264] ss:$72 sps:$4 sm:$0xff]   ;;  %v15419_v55 = vld [vmem:[#allocation3 + $0xae0] ss:$16 sps:$4 sm:$0xff]  }
 0x172   : > { %5252 = vmatprep.subr.bf16.mxu0 %v15331_v56  ;;  %6269 = vmatprep.subr.bf16.mxu1 %v15334_v57  ;;  %v15422_v56 = vld [vmem:[#allocation3 + $0xae8] ss:$16 sps:$4 sm:$0xff]   ;;  %v15430_v57 = vld [vmem:[#allocation3 + $0xb04] ss:$16 sps:$4 sm:$0xff]  }
 0x173   : > { %5209 = vmatprep.mubr.bf16.mxu0 %v15335_v58  ;;  %6226 = vmatprep.mubr.bf16.mxu1 %v15335_v58  ;;  %v15433_v58 = vld [vmem:[#allocation3 + $0xb0c] ss:$16 sps:$4 sm:$0xff]  }
 0x175   : > { %5253 = vmatpush1.bf16.msra.mxu0 %v15329_v59  ;;  %6270 = vmatpush1.bf16.msra.mxu1 %v15332_v60  ;;  %v15427_v59 = vld [vmem:[%s18958_s0 + $0x260] ss:$72 sps:$4 sm:$0xff]  }
 0x176   : > { %5254 = vmatprep.subr.bf16.mxu0 %v15340_v61  ;;  %6271 = vmatprep.subr.bf16.mxu1 %v15343_v62  ;;  %v15428_v60 = vld [vmem:[#allocation3 + $0xb00] ss:$16 sps:$4 sm:$0xff]   ;;  %v15431_v61 = vld [vmem:[#allocation3 + $0xb08] ss:$16 sps:$4 sm:$0xff]   ;;  %v15436_v62 = vld [vmem:[#allocation3 + $0xb24] ss:$16 sps:$4 sm:$0xff]  }
 0x178   : > { %5210 = vmatmul.mubr.bf16.gmra.mrb[24].mxu0 %v15337_v63  ;;  %6227 = vmatmul.mubr.bf16.gmra.mrb[24].mxu1 %v15337_v63  ;;  %v15439_v63 = vld [vmem:[#allocation3 + $0xb2c] ss:$16 sps:$4 sm:$0xff]  }
 0x179   : > { %5255 = vmatpush1.bf16.msra.mxu0 %v15338_v0  ;;  %6272 = vmatpush1.bf16.msra.mxu1 %v15341_v1  ;;  %v15440_v0 = vld [vmem:[%s18958_s0 + $0x2f4] ss:$72 sps:$4 sm:$0xff]   ;;  %v15434_v1 = vld [vmem:[#allocation3 + $0xb20] ss:$16 sps:$4 sm:$0xff]  }
 0x17a   : > { %5256 = vmatprep.subr.bf16.mxu0 %v15346_v2  ;;  %6273 = vmatprep.subr.bf16.mxu1 %v15349_v3  ;;  %v15437_v2 = vld [vmem:[#allocation3 + $0xb28] ss:$16 sps:$4 sm:$0xff]   ;;  %v15445_v3 = vld [vmem:[#allocation3 + $0xb44] ss:$16 sps:$4 sm:$0xff]  }
 0x17b   : > { %5219 = vmatprep.mubr.bf16.mxu0 %v15350_v4  ;;  %6236 = vmatprep.mubr.bf16.mxu1 %v15350_v4  ;;  %v15448_v4 = vld [vmem:[#allocation3 + $0xb4c] ss:$16 sps:$4 sm:$0xff]  }
 0x17d   : > { %5257 = vmatpush1.bf16.msra.mxu0 %v15344_v5  ;;  %6274 = vmatpush1.bf16.msra.mxu1 %v15347_v6  ;;  %v15442_v5 = vld [vmem:[%s18958_s0 + $0x2f0] ss:$72 sps:$4 sm:$0xff]  }
 0x17e   : > { %5258 = vmatprep.subr.bf16.mxu0 %v15355_v7  ;;  %6275 = vmatprep.subr.bf16.mxu1 %v15358_v8  ;;  %v15443_v6 = vld [vmem:[#allocation3 + $0xb40] ss:$16 sps:$4 sm:$0xff]   ;;  %v15446_v7 = vld [vmem:[#allocation3 + $0xb48] ss:$16 sps:$4 sm:$0xff]   ;;  %v15451_v8 = vld [vmem:[#allocation3 + $0xb64] ss:$16 sps:$4 sm:$0xff]  }
 0x180   : > { %5220 = vmatmul.mubr.bf16.gmra.mrb[28].mxu0 %v15352_v9  ;;  %6237 = vmatmul.mubr.bf16.gmra.mrb[28].mxu1 %v15352_v9  ;;  %v15454_v9 = vld [vmem:[#allocation3 + $0xb6c] ss:$16 sps:$4 sm:$0xff]  }
 0x181   : > { %5259 = vmatpush1.bf16.msra.mxu0 %v15353_v10  ;;  %6276 = vmatpush1.bf16.msra.mxu1 %v15356_v11  ;;  %v15455_v10 = vld [vmem:[%s18958_s0 + $0x384] ss:$72 sps:$4 sm:$0xff]   ;;  %v15449_v11 = vld [vmem:[#allocation3 + $0xb60] ss:$16 sps:$4 sm:$0xff]  }
 0x182   : > { %5260 = vmatprep.subr.bf16.mxu0 %v15361_v12  ;;  %6277 = vmatprep.subr.bf16.mxu1 %v15364_v13  ;;  %v15452_v12 = vld [vmem:[#allocation3 + $0xb68] ss:$16 sps:$4 sm:$0xff]   ;;  %v15460_v13 = vld [vmem:[#allocation3 + $0xb84] ss:$16 sps:$4 sm:$0xff]  }
 0x183   : > { %5262 = vmatprep.mubr.bf16.mxu0 %v15367_v14  ;;  %6279 = vmatprep.mubr.bf16.mxu1 %v15367_v14  ;;  %v15463_v14 = vld [vmem:[#allocation3 + $0xb8c] ss:$16 sps:$4 sm:$0xff]  }
 0x185   : > { %5261 = vmatpush1.bf16.msra.mxu0 %v15359_v15  ;;  %6278 = vmatpush1.bf16.msra.mxu1 %v15362_v16  ;;  %v15457_v15 = vld [vmem:[%s18958_s0 + $0x380] ss:$72 sps:$4 sm:$0xff]  }
 0x186   : > { %5343 = vmatprep.subr.bf16.mxu0 %v15370_v17  ;;  %6360 = vmatprep.subr.bf16.mxu1 %v15373_v18  ;;  %v15458_v16 = vld [vmem:[#allocation3 + $0xb80] ss:$16 sps:$4 sm:$0xff]   ;;  %v15461_v17 = vld [vmem:[#allocation3 + $0xb88] ss:$16 sps:$4 sm:$0xff]   ;;  %v15466_v18 = vld [vmem:[#allocation3 + $0xba4] ss:$16 sps:$4 sm:$0xff]  }
 0x188   : > { %5263 = vmatmul.mubr.bf16.vlgmr.msra.gmra.mrb[0].mxu0 %v15365_v19  ;;  %6280 = vmatmul.mubr.bf16.vlgmr.msra.gmra.mrb[0].mxu1 %v15365_v19  ;;  %v15469_v19 = vld [vmem:[#allocation3 + $0xbac] ss:$16 sps:$4 sm:$0xff]  }
 0x189   : > { %5344 = vmatpush1.bf16.msra.mxu0 %v15368_v20  ;;  %6361 = vmatpush1.bf16.msra.mxu1 %v15371_v21  ;;  %v15470_v20 = vld [vmem:[%s18958_s0 + $0x414] ss:$72 sps:$4 sm:$0xff]   ;;  %v15464_v21 = vld [vmem:[#allocation3 + $0xba0] ss:$16 sps:$4 sm:$0xff]  }
 0x18a   : > { %5345 = vmatprep.subr.bf16.mxu0 %v15376_v22  ;;  %6362 = vmatprep.subr.bf16.mxu1 %v15379_v23  ;;  %v15467_v22 = vld [vmem:[#allocation3 + $0xba8] ss:$16 sps:$4 sm:$0xff]   ;;  %v15475_v23 = vld [vmem:[#allocation3 + $0xbc4] ss:$16 sps:$4 sm:$0xff]  }
 0x18b   : > { %5272 = vmatprep.mubr.bf16.mxu0 %v15380_v24  ;;  %6289 = vmatprep.mubr.bf16.mxu1 %v15380_v24  ;;  %v15478_v24 = vld [vmem:[#allocation3 + $0xbcc] ss:$16 sps:$4 sm:$0xff]  }
 0x18d   : > { %5346 = vmatpush1.bf16.msra.mxu0 %v15374_v25  ;;  %6363 = vmatpush1.bf16.msra.mxu1 %v15377_v26  ;;  %v15472_v25 = vld [vmem:[%s18958_s0 + $0x410] ss:$72 sps:$4 sm:$0xff]  }
 0x18e   : > { %5347 = vmatprep.subr.bf16.mxu0 %v15385_v27  ;;  %6364 = vmatprep.subr.bf16.mxu1 %v15388_v28  ;;  %v15473_v26 = vld [vmem:[#allocation3 + $0xbc0] ss:$16 sps:$4 sm:$0xff]   ;;  %v15476_v27 = vld [vmem:[#allocation3 + $0xbc8] ss:$16 sps:$4 sm:$0xff]   ;;  %v15481_v28 = vld [vmem:[#allocation3 + $0xbe4] ss:$16 sps:$4 sm:$0xff]  }
 0x190   : > { %5273 = vmatmul.mubr.bf16.gmra.mrb[4].mxu0 %v15382_v29  ;;  %6290 = vmatmul.mubr.bf16.gmra.mrb[4].mxu1 %v15382_v29  ;;  %v15484_v29 = vld [vmem:[#allocation3 + $0xbec] ss:$16 sps:$4 sm:$0xff]  }
 0x191   : > { %5348 = vmatpush1.bf16.msra.mxu0 %v15383_v30  ;;  %6365 = vmatpush1.bf16.msra.mxu1 %v15386_v31  ;;  %v15487_v30 = vld [vmem:[%s18958_s0 + $0x2c] ss:$72 sps:$4 sm:$0xff]   ;;  %v15479_v31 = vld [vmem:[#allocation3 + $0xbe0] ss:$16 sps:$4 sm:$0xff]  }
 0x192   : > { %5349 = vmatprep.subr.bf16.mxu0 %v15391_v32  ;;  %6366 = vmatprep.subr.bf16.mxu1 %v15394_v33  ;;  %v15482_v32 = vld [vmem:[#allocation3 + $0xbe8] ss:$16 sps:$4 sm:$0xff]   ;;  %v15490_v33 = vld [vmem:[#allocation3 + $0xc04] ss:$16 sps:$4 sm:$0xff]  }
 0x193   : > { %5282 = vmatprep.mubr.bf16.mxu0 %v15395_v34  ;;  %6299 = vmatprep.mubr.bf16.mxu1 %v15395_v34  ;;  %v15493_v34 = vld [vmem:[#allocation3 + $0xc0c] ss:$16 sps:$4 sm:$0xff]  }
 0x195   : > { %5350 = vmatpush1.bf16.msra.mxu0 %v15389_v35  ;;  %6367 = vmatpush1.bf16.msra.mxu1 %v15392_v36  ;;  %v15485_v35 = vld [vmem:[%s18958_s0 + $0x28] ss:$72 sps:$4 sm:$0xff]  }
 0x196   : > { %5351 = vmatprep.subr.bf16.mxu0 %v15400_v37  ;;  %6368 = vmatprep.subr.bf16.mxu1 %v15403_v38  ;;  %v15488_v36 = vld [vmem:[#allocation3 + $0xc00] ss:$16 sps:$4 sm:$0xff]   ;;  %v15491_v37 = vld [vmem:[#allocation3 + $0xc08] ss:$16 sps:$4 sm:$0xff]   ;;  %v15496_v38 = vld [vmem:[#allocation3 + $0xc24] ss:$16 sps:$4 sm:$0xff]  }
 0x198   : > { %5283 = vmatmul.mubr.bf16.gmra.mrb[8].mxu0 %v15397_v39  ;;  %6300 = vmatmul.mubr.bf16.gmra.mrb[8].mxu1 %v15397_v39  ;;  %v15499_v39 = vld [vmem:[#allocation3 + $0xc2c] ss:$16 sps:$4 sm:$0xff]  }
 0x199   : > { %5352 = vmatpush1.bf16.msra.mxu0 %v15398_v40  ;;  %6369 = vmatpush1.bf16.msra.mxu1 %v15401_v41  ;;  %v15500_v40 = vld [vmem:[%s18958_s0 + $0xbc] ss:$72 sps:$4 sm:$0xff]   ;;  %v15494_v41 = vld [vmem:[#allocation3 + $0xc20] ss:$16 sps:$4 sm:$0xff]  }
 0x19a   : > { %5353 = vmatprep.subr.bf16.mxu0 %v15406_v42  ;;  %6370 = vmatprep.subr.bf16.mxu1 %v15409_v43  ;;  %v15497_v42 = vld [vmem:[#allocation3 + $0xc28] ss:$16 sps:$4 sm:$0xff]   ;;  %v15505_v43 = vld [vmem:[#allocation3 + $0xc44] ss:$16 sps:$4 sm:$0xff]  }
 0x19b   : > { %5292 = vmatprep.mubr.bf16.mxu0 %v15410_v44  ;;  %6309 = vmatprep.mubr.bf16.mxu1 %v15410_v44  ;;  %v15508_v44 = vld [vmem:[#allocation3 + $0xc4c] ss:$16 sps:$4 sm:$0xff]  }
 0x19d   : > { %5354 = vmatpush1.bf16.msra.mxu0 %v15404_v45  ;;  %6371 = vmatpush1.bf16.msra.mxu1 %v15407_v46  ;;  %v15502_v45 = vld [vmem:[%s18958_s0 + $0xb8] ss:$72 sps:$4 sm:$0xff]  }
 0x19e   : > { %5355 = vmatprep.subr.bf16.mxu0 %v15415_v47  ;;  %6372 = vmatprep.subr.bf16.mxu1 %v15418_v48  ;;  %v15503_v46 = vld [vmem:[#allocation3 + $0xc40] ss:$16 sps:$4 sm:$0xff]   ;;  %v15506_v47 = vld [vmem:[#allocation3 + $0xc48] ss:$16 sps:$4 sm:$0xff]   ;;  %v15511_v48 = vld [vmem:[#allocation3 + $0xc64] ss:$16 sps:$4 sm:$0xff]  }
 0x1a0   : > { %5293 = vmatmul.mubr.bf16.gmra.mrb[12].mxu0 %v15412_v49  ;;  %6310 = vmatmul.mubr.bf16.gmra.mrb[12].mxu1 %v15412_v49  ;;  %v15514_v49 = vld [vmem:[#allocation3 + $0xc6c] ss:$16 sps:$4 sm:$0xff]  }
 0x1a1   : > { %5356 = vmatpush1.bf16.msra.mxu0 %v15413_v50  ;;  %6373 = vmatpush1.bf16.msra.mxu1 %v15416_v51  ;;  %v15515_v50 = vld [vmem:[%s18958_s0 + $0x14c] ss:$72 sps:$4 sm:$0xff]   ;;  %v15509_v51 = vld [vmem:[#allocation3 + $0xc60] ss:$16 sps:$4 sm:$0xff]  }
 0x1a2   : > { %5357 = vmatprep.subr.bf16.mxu0 %v15421_v52  ;;  %6374 = vmatprep.subr.bf16.mxu1 %v15424_v53  ;;  %v15512_v52 = vld [vmem:[#allocation3 + $0xc68] ss:$16 sps:$4 sm:$0xff]   ;;  %v15520_v53 = vld [vmem:[#allocation3 + $0xc84] ss:$16 sps:$4 sm:$0xff]  }
 0x1a3   : > { %5302 = vmatprep.mubr.bf16.mxu0 %v15425_v54  ;;  %6319 = vmatprep.mubr.bf16.mxu1 %v15425_v54  ;;  %v15523_v54 = vld [vmem:[#allocation3 + $0xc8c] ss:$16 sps:$4 sm:$0xff]  }
 0x1a5   : > { %5358 = vmatpush1.bf16.msra.mxu0 %v15419_v55  ;;  %6375 = vmatpush1.bf16.msra.mxu1 %v15422_v56  ;;  %v15517_v55 = vld [vmem:[%s18958_s0 + $0x148] ss:$72 sps:$4 sm:$0xff]  }
 0x1a6   : > { %5359 = vmatprep.subr.bf16.mxu0 %v15430_v57  ;;  %6376 = vmatprep.subr.bf16.mxu1 %v15433_v58  ;;  %v15518_v56 = vld [vmem:[#allocation3 + $0xc80] ss:$16 sps:$4 sm:$0xff]   ;;  %v15521_v57 = vld [vmem:[#allocation3 + $0xc88] ss:$16 sps:$4 sm:$0xff]   ;;  %v15526_v58 = vld [vmem:[#allocation3 + $0xca4] ss:$16 sps:$4 sm:$0xff]  }
 0x1a8   : > { %5303 = vmatmul.mubr.bf16.gmra.mrb[16].mxu0 %v15427_v59  ;;  %6320 = vmatmul.mubr.bf16.gmra.mrb[16].mxu1 %v15427_v59  ;;  %v15529_v59 = vld [vmem:[#allocation3 + $0xcac] ss:$16 sps:$4 sm:$0xff]  }
 0x1a9   : > { %5360 = vmatpush1.bf16.msra.mxu0 %v15428_v60  ;;  %6377 = vmatpush1.bf16.msra.mxu1 %v15431_v61  ;;  %v15530_v60 = vld [vmem:[%s18958_s0 + $0x1dc] ss:$72 sps:$4 sm:$0xff]   ;;  %v15524_v61 = vld [vmem:[#allocation3 + $0xca0] ss:$16 sps:$4 sm:$0xff]  }
 0x1aa   : > { %5361 = vmatprep.subr.bf16.mxu0 %v15436_v62  ;;  %6378 = vmatprep.subr.bf16.mxu1 %v15439_v63  ;;  %v15527_v62 = vld [vmem:[#allocation3 + $0xca8] ss:$16 sps:$4 sm:$0xff]   ;;  %v15535_v63 = vld [vmem:[#allocation3 + $0xcc4] ss:$16 sps:$4 sm:$0xff]  }
 0x1ab   : > { %5312 = vmatprep.mubr.bf16.mxu0 %v15440_v0  ;;  %6329 = vmatprep.mubr.bf16.mxu1 %v15440_v0  ;;  %v15538_v0 = vld [vmem:[#allocation3 + $0xccc] ss:$16 sps:$4 sm:$0xff]  }
 0x1ad   : > { %5362 = vmatpush1.bf16.msra.mxu0 %v15434_v1  ;;  %6379 = vmatpush1.bf16.msra.mxu1 %v15437_v2  ;;  %v15532_v1 = vld [vmem:[%s18958_s0 + $0x1d8] ss:$72 sps:$4 sm:$0xff]  }
 0x1ae   : > { %5363 = vmatprep.subr.bf16.mxu0 %v15445_v3  ;;  %6380 = vmatprep.subr.bf16.mxu1 %v15448_v4  ;;  %v15533_v2 = vld [vmem:[#allocation3 + $0xcc0] ss:$16 sps:$4 sm:$0xff]   ;;  %v15536_v3 = vld [vmem:[#allocation3 + $0xcc8] ss:$16 sps:$4 sm:$0xff]   ;;  %v15541_v4 = vld [vmem:[#allocation3 + $0xce4] ss:$16 sps:$4 sm:$0xff]  }
 0x1b0   : > { %5313 = vmatmul.mubr.bf16.gmra.mrb[20].mxu0 %v15442_v5  ;;  %6330 = vmatmul.mubr.bf16.gmra.mrb[20].mxu1 %v15442_v5  ;;  %v15544_v5 = vld [vmem:[#allocation3 + $0xcec] ss:$16 sps:$4 sm:$0xff]  }
 0x1b1   : > { %5364 = vmatpush1.bf16.msra.mxu0 %v15443_v6  ;;  %6381 = vmatpush1.bf16.msra.mxu1 %v15446_v7  ;;  %v15545_v6 = vld [vmem:[%s18958_s0 + $0x26c] ss:$72 sps:$4 sm:$0xff]   ;;  %v15539_v7 = vld [vmem:[#allocation3 + $0xce0] ss:$16 sps:$4 sm:$0xff]  }
 0x1b2   : > { %5365 = vmatprep.subr.bf16.mxu0 %v15451_v8  ;;  %6382 = vmatprep.subr.bf16.mxu1 %v15454_v9  ;;  %v15542_v8 = vld [vmem:[#allocation3 + $0xce8] ss:$16 sps:$4 sm:$0xff]   ;;  %v15550_v9 = vld [vmem:[#allocation3 + $0xd04] ss:$16 sps:$4 sm:$0xff]  }
 0x1b3   : > { %5322 = vmatprep.mubr.bf16.mxu0 %v15455_v10  ;;  %6339 = vmatprep.mubr.bf16.mxu1 %v15455_v10  ;;  %v15553_v10 = vld [vmem:[#allocation3 + $0xd0c] ss:$16 sps:$4 sm:$0xff]  }
 0x1b5   : > { %5366 = vmatpush1.bf16.msra.mxu0 %v15449_v11  ;;  %6383 = vmatpush1.bf16.msra.mxu1 %v15452_v12  ;;  %v15547_v11 = vld [vmem:[%s18958_s0 + $0x268] ss:$72 sps:$4 sm:$0xff]  }
 0x1b6   : > { %5367 = vmatprep.subr.bf16.mxu0 %v15460_v13  ;;  %6384 = vmatprep.subr.bf16.mxu1 %v15463_v14  ;;  %v15548_v12 = vld [vmem:[#allocation3 + $0xd00] ss:$16 sps:$4 sm:$0xff]   ;;  %v15551_v13 = vld [vmem:[#allocation3 + $0xd08] ss:$16 sps:$4 sm:$0xff]   ;;  %v15556_v14 = vld [vmem:[#allocation3 + $0xd24] ss:$16 sps:$4 sm:$0xff]  }
 0x1b8   : > { %5323 = vmatmul.mubr.bf16.gmra.mrb[24].mxu0 %v15457_v15  ;;  %6340 = vmatmul.mubr.bf16.gmra.mrb[24].mxu1 %v15457_v15  ;;  %v15559_v15 = vld [vmem:[#allocation3 + $0xd2c] ss:$16 sps:$4 sm:$0xff]  }
 0x1b9   : > { %5368 = vmatpush1.bf16.msra.mxu0 %v15458_v16  ;;  %6385 = vmatpush1.bf16.msra.mxu1 %v15461_v17  ;;  %v15560_v16 = vld [vmem:[%s18958_s0 + $0x2fc] ss:$72 sps:$4 sm:$0xff]   ;;  %v15554_v17 = vld [vmem:[#allocation3 + $0xd20] ss:$16 sps:$4 sm:$0xff]  }
 0x1ba   : > { %5369 = vmatprep.subr.bf16.mxu0 %v15466_v18  ;;  %6386 = vmatprep.subr.bf16.mxu1 %v15469_v19  ;;  %v15557_v18 = vld [vmem:[#allocation3 + $0xd28] ss:$16 sps:$4 sm:$0xff]   ;;  %v15565_v19 = vld [vmem:[#allocation3 + $0xd44] ss:$16 sps:$4 sm:$0xff]  }
 0x1bb   : > { %5332 = vmatprep.mubr.bf16.mxu0 %v15470_v20  ;;  %6349 = vmatprep.mubr.bf16.mxu1 %v15470_v20  ;;  %v15568_v20 = vld [vmem:[#allocation3 + $0xd4c] ss:$16 sps:$4 sm:$0xff]  }
 0x1bd   : > { %5370 = vmatpush1.bf16.msra.mxu0 %v15464_v21  ;;  %6387 = vmatpush1.bf16.msra.mxu1 %v15467_v22  ;;  %v15562_v21 = vld [vmem:[%s18958_s0 + $0x2f8] ss:$72 sps:$4 sm:$0xff]  }
 0x1be   : > { %5371 = vmatprep.subr.bf16.mxu0 %v15475_v23  ;;  %6388 = vmatprep.subr.bf16.mxu1 %v15478_v24  ;;  %v15563_v22 = vld [vmem:[#allocation3 + $0xd40] ss:$16 sps:$4 sm:$0xff]   ;;  %v15566_v23 = vld [vmem:[#allocation3 + $0xd48] ss:$16 sps:$4 sm:$0xff]   ;;  %v15571_v24 = vld [vmem:[#allocation3 + $0xd64] ss:$16 sps:$4 sm:$0xff]  }
 0x1c0   : > { %5333 = vmatmul.mubr.bf16.gmra.mrb[28].mxu0 %v15472_v25  ;;  %6350 = vmatmul.mubr.bf16.gmra.mrb[28].mxu1 %v15472_v25  ;;  %v15574_v25 = vld [vmem:[#allocation3 + $0xd6c] ss:$16 sps:$4 sm:$0xff]  }
 0x1c1   : > { %5372 = vmatpush1.bf16.msra.mxu0 %v15473_v26  ;;  %6389 = vmatpush1.bf16.msra.mxu1 %v15476_v27  ;;  %v15575_v26 = vld [vmem:[%s18958_s0 + $0x38c] ss:$72 sps:$4 sm:$0xff]   ;;  %v15569_v27 = vld [vmem:[#allocation3 + $0xd60] ss:$16 sps:$4 sm:$0xff]  }
 0x1c2   : > { %5373 = vmatprep.subr.bf16.mxu0 %v15481_v28  ;;  %6390 = vmatprep.subr.bf16.mxu1 %v15484_v29  ;;  %v15572_v28 = vld [vmem:[#allocation3 + $0xd68] ss:$16 sps:$4 sm:$0xff]   ;;  %v15580_v29 = vld [vmem:[#allocation3 + $0xd84] ss:$16 sps:$4 sm:$0xff]  }
 0x1c3   : > { %5375 = vmatprep.mubr.bf16.mxu0 %v15487_v30  ;;  %6392 = vmatprep.mubr.bf16.mxu1 %v15487_v30  ;;  %v15583_v30 = vld [vmem:[#allocation3 + $0xd8c] ss:$16 sps:$4 sm:$0xff]  }
 0x1c5   : > { %5374 = vmatpush1.bf16.msra.mxu0 %v15479_v31  ;;  %6391 = vmatpush1.bf16.msra.mxu1 %v15482_v32  ;;  %v15577_v31 = vld [vmem:[%s18958_s0 + $0x388] ss:$72 sps:$4 sm:$0xff]  }
 0x1c6   : > { %5456 = vmatprep.subr.bf16.mxu0 %v15490_v33  ;;  %6473 = vmatprep.subr.bf16.mxu1 %v15493_v34  ;;  %v15578_v32 = vld [vmem:[#allocation3 + $0xd80] ss:$16 sps:$4 sm:$0xff]   ;;  %v15581_v33 = vld [vmem:[#allocation3 + $0xd88] ss:$16 sps:$4 sm:$0xff]   ;;  %v15586_v34 = vld [vmem:[#allocation3 + $0xda4] ss:$16 sps:$4 sm:$0xff]  }
 0x1c8   : > { %5376 = vmatmul.mubr.bf16.vlgmr.msra.gmra.mrb[0].mxu0 %v15485_v35  ;;  %6393 = vmatmul.mubr.bf16.vlgmr.msra.gmra.mrb[0].mxu1 %v15485_v35  ;;  %v15589_v35 = vld [vmem:[#allocation3 + $0xdac] ss:$16 sps:$4 sm:$0xff]  }
 0x1c9   : > { %5457 = vmatpush1.bf16.msra.mxu0 %v15488_v36  ;;  %6474 = vmatpush1.bf16.msra.mxu1 %v15491_v37  ;;  %v15590_v36 = vld [vmem:[%s18958_s0 + $0x41c] ss:$72 sps:$4 sm:$0xff]   ;;  %v15584_v37 = vld [vmem:[#allocation3 + $0xda0] ss:$16 sps:$4 sm:$0xff]  }
 0x1ca   : > { %5458 = vmatprep.subr.bf16.mxu0 %v15496_v38  ;;  %6475 = vmatprep.subr.bf16.mxu1 %v15499_v39  ;;  %v15587_v38 = vld [vmem:[#allocation3 + $0xda8] ss:$16 sps:$4 sm:$0xff]   ;;  %v15595_v39 = vld [vmem:[#allocation3 + $0xdc4] ss:$16 sps:$4 sm:$0xff]  }
 0x1cb   : > { %5385 = vmatprep.mubr.bf16.mxu0 %v15500_v40  ;;  %6402 = vmatprep.mubr.bf16.mxu1 %v15500_v40  ;;  %v15598_v40 = vld [vmem:[#allocation3 + $0xdcc] ss:$16 sps:$4 sm:$0xff]  }
 0x1cd   : > { %5459 = vmatpush1.bf16.msra.mxu0 %v15494_v41  ;;  %6476 = vmatpush1.bf16.msra.mxu1 %v15497_v42  ;;  %v15592_v41 = vld [vmem:[%s18958_s0 + $0x418] ss:$72 sps:$4 sm:$0xff]  }
 0x1ce   : > { %5460 = vmatprep.subr.bf16.mxu0 %v15505_v43  ;;  %6477 = vmatprep.subr.bf16.mxu1 %v15508_v44  ;;  %v15593_v42 = vld [vmem:[#allocation3 + $0xdc0] ss:$16 sps:$4 sm:$0xff]   ;;  %v15596_v43 = vld [vmem:[#allocation3 + $0xdc8] ss:$16 sps:$4 sm:$0xff]   ;;  %v15601_v44 = vld [vmem:[#allocation3 + $0xde4] ss:$16 sps:$4 sm:$0xff]  }
 0x1d0   : > { %5386 = vmatmul.mubr.bf16.gmra.mrb[4].mxu0 %v15502_v45  ;;  %6403 = vmatmul.mubr.bf16.gmra.mrb[4].mxu1 %v15502_v45  ;;  %v15604_v45 = vld [vmem:[#allocation3 + $0xdec] ss:$16 sps:$4 sm:$0xff]  }
 0x1d1   : > { %5461 = vmatpush1.bf16.msra.mxu0 %v15503_v46  ;;  %6478 = vmatpush1.bf16.msra.mxu1 %v15506_v47  ;;  %v15607_v46 = vld [vmem:[%s18958_s0 + $0x34] ss:$72 sps:$4 sm:$0xff]   ;;  %v15599_v47 = vld [vmem:[#allocation3 + $0xde0] ss:$16 sps:$4 sm:$0xff]  }
 0x1d2   : > { %5462 = vmatprep.subr.bf16.mxu0 %v15511_v48  ;;  %6479 = vmatprep.subr.bf16.mxu1 %v15514_v49  ;;  %v15602_v48 = vld [vmem:[#allocation3 + $0xde8] ss:$16 sps:$4 sm:$0xff]   ;;  %v15610_v49 = vld [vmem:[#allocation3 + $0xe04] ss:$16 sps:$4 sm:$0xff]  }
 0x1d3   : > { %5395 = vmatprep.mubr.bf16.mxu0 %v15515_v50  ;;  %6412 = vmatprep.mubr.bf16.mxu1 %v15515_v50  ;;  %v15613_v50 = vld [vmem:[#allocation3 + $0xe0c] ss:$16 sps:$4 sm:$0xff]  }
 0x1d5   : > { %5463 = vmatpush1.bf16.msra.mxu0 %v15509_v51  ;;  %6480 = vmatpush1.bf16.msra.mxu1 %v15512_v52  ;;  %v15605_v51 = vld [vmem:[%s18958_s0 + $0x30] ss:$72 sps:$4 sm:$0xff]  }
 0x1d6   : > { %5464 = vmatprep.subr.bf16.mxu0 %v15520_v53  ;;  %6481 = vmatprep.subr.bf16.mxu1 %v15523_v54  ;;  %v15608_v52 = vld [vmem:[#allocation3 + $0xe00] ss:$16 sps:$4 sm:$0xff]   ;;  %v15611_v53 = vld [vmem:[#allocation3 + $0xe08] ss:$16 sps:$4 sm:$0xff]   ;;  %v15616_v54 = vld [vmem:[#allocation3 + $0xe24] ss:$16 sps:$4 sm:$0xff]  }
 0x1d8   : > { %5396 = vmatmul.mubr.bf16.gmra.mrb[8].mxu0 %v15517_v55  ;;  %6413 = vmatmul.mubr.bf16.gmra.mrb[8].mxu1 %v15517_v55  ;;  %v15619_v55 = vld [vmem:[#allocation3 + $0xe2c] ss:$16 sps:$4 sm:$0xff]  }
 0x1d9   : > { %5465 = vmatpush1.bf16.msra.mxu0 %v15518_v56  ;;  %6482 = vmatpush1.bf16.msra.mxu1 %v15521_v57  ;;  %v15620_v56 = vld [vmem:[%s18958_s0 + $0xc4] ss:$72 sps:$4 sm:$0xff]   ;;  %v15614_v57 = vld [vmem:[#allocation3 + $0xe20] ss:$16 sps:$4 sm:$0xff]  }
 0x1da   : > { %5466 = vmatprep.subr.bf16.mxu0 %v15526_v58  ;;  %6483 = vmatprep.subr.bf16.mxu1 %v15529_v59  ;;  %v15617_v58 = vld [vmem:[#allocation3 + $0xe28] ss:$16 sps:$4 sm:$0xff]   ;;  %v15625_v59 = vld [vmem:[#allocation3 + $0xe44] ss:$16 sps:$4 sm:$0xff]  }
 0x1db   : > { %5405 = vmatprep.mubr.bf16.mxu0 %v15530_v60  ;;  %6422 = vmatprep.mubr.bf16.mxu1 %v15530_v60  ;;  %v15628_v60 = vld [vmem:[#allocation3 + $0xe4c] ss:$16 sps:$4 sm:$0xff]  }
 0x1dd   : > { %5467 = vmatpush1.bf16.msra.mxu0 %v15524_v61  ;;  %6484 = vmatpush1.bf16.msra.mxu1 %v15527_v62  ;;  %v15622_v61 = vld [vmem:[%s18958_s0 + $0xc0] ss:$72 sps:$4 sm:$0xff]  }
 0x1de   : > { %5468 = vmatprep.subr.bf16.mxu0 %v15535_v63  ;;  %6485 = vmatprep.subr.bf16.mxu1 %v15538_v0  ;;  %v15623_v62 = vld [vmem:[#allocation3 + $0xe40] ss:$16 sps:$4 sm:$0xff]   ;;  %v15626_v63 = vld [vmem:[#allocation3 + $0xe48] ss:$16 sps:$4 sm:$0xff]   ;;  %v15631_v0 = vld [vmem:[#allocation3 + $0xe64] ss:$16 sps:$4 sm:$0xff]  }
 0x1e0   : > { %5406 = vmatmul.mubr.bf16.gmra.mrb[12].mxu0 %v15532_v1  ;;  %6423 = vmatmul.mubr.bf16.gmra.mrb[12].mxu1 %v15532_v1  ;;  %v15634_v1 = vld [vmem:[#allocation3 + $0xe6c] ss:$16 sps:$4 sm:$0xff]  }
 0x1e1   : > { %5469 = vmatpush1.bf16.msra.mxu0 %v15533_v2  ;;  %6486 = vmatpush1.bf16.msra.mxu1 %v15536_v3  ;;  %v15635_v2 = vld [vmem:[%s18958_s0 + $0x154] ss:$72 sps:$4 sm:$0xff]   ;;  %v15629_v3 = vld [vmem:[#allocation3 + $0xe60] ss:$16 sps:$4 sm:$0xff]  }
 0x1e2   : > { %5470 = vmatprep.subr.bf16.mxu0 %v15541_v4  ;;  %6487 = vmatprep.subr.bf16.mxu1 %v15544_v5  ;;  %v15632_v4 = vld [vmem:[#allocation3 + $0xe68] ss:$16 sps:$4 sm:$0xff]   ;;  %v15640_v5 = vld [vmem:[#allocation3 + $0xe84] ss:$16 sps:$4 sm:$0xff]  }
 0x1e3   : > { %5415 = vmatprep.mubr.bf16.mxu0 %v15545_v6  ;;  %6432 = vmatprep.mubr.bf16.mxu1 %v15545_v6  ;;  %v15643_v6 = vld [vmem:[#allocation3 + $0xe8c] ss:$16 sps:$4 sm:$0xff]  }
 0x1e5   : > { %5471 = vmatpush1.bf16.msra.mxu0 %v15539_v7  ;;  %6488 = vmatpush1.bf16.msra.mxu1 %v15542_v8  ;;  %v15637_v7 = vld [vmem:[%s18958_s0 + $0x150] ss:$72 sps:$4 sm:$0xff]  }
 0x1e6   : > { %5472 = vmatprep.subr.bf16.mxu0 %v15550_v9  ;;  %6489 = vmatprep.subr.bf16.mxu1 %v15553_v10  ;;  %v15638_v8 = vld [vmem:[#allocation3 + $0xe80] ss:$16 sps:$4 sm:$0xff]   ;;  %v15641_v9 = vld [vmem:[#allocation3 + $0xe88] ss:$16 sps:$4 sm:$0xff]   ;;  %v15646_v10 = vld [vmem:[#allocation3 + $0xea4] ss:$16 sps:$4 sm:$0xff]  }
 0x1e8   : > { %5416 = vmatmul.mubr.bf16.gmra.mrb[16].mxu0 %v15547_v11  ;;  %6433 = vmatmul.mubr.bf16.gmra.mrb[16].mxu1 %v15547_v11  ;;  %v15649_v11 = vld [vmem:[#allocation3 + $0xeac] ss:$16 sps:$4 sm:$0xff]  }
 0x1e9   : > { %5473 = vmatpush1.bf16.msra.mxu0 %v15548_v12  ;;  %6490 = vmatpush1.bf16.msra.mxu1 %v15551_v13  ;;  %v15650_v12 = vld [vmem:[%s18958_s0 + $0x1e4] ss:$72 sps:$4 sm:$0xff]   ;;  %v15644_v13 = vld [vmem:[#allocation3 + $0xea0] ss:$16 sps:$4 sm:$0xff]  }
 0x1ea   : > { %5474 = vmatprep.subr.bf16.mxu0 %v15556_v14  ;;  %6491 = vmatprep.subr.bf16.mxu1 %v15559_v15  ;;  %v15647_v14 = vld [vmem:[#allocation3 + $0xea8] ss:$16 sps:$4 sm:$0xff]   ;;  %v15655_v15 = vld [vmem:[#allocation3 + $0xec4] ss:$16 sps:$4 sm:$0xff]  }
 0x1eb   : > { %5425 = vmatprep.mubr.bf16.mxu0 %v15560_v16  ;;  %6442 = vmatprep.mubr.bf16.mxu1 %v15560_v16  ;;  %v15658_v16 = vld [vmem:[#allocation3 + $0xecc] ss:$16 sps:$4 sm:$0xff]  }
 0x1ed   : > { %5475 = vmatpush1.bf16.msra.mxu0 %v15554_v17  ;;  %6492 = vmatpush1.bf16.msra.mxu1 %v15557_v18  ;;  %v15652_v17 = vld [vmem:[%s18958_s0 + $0x1e0] ss:$72 sps:$4 sm:$0xff]  }
 0x1ee   : > { %5476 = vmatprep.subr.bf16.mxu0 %v15565_v19  ;;  %6493 = vmatprep.subr.bf16.mxu1 %v15568_v20  ;;  %v15653_v18 = vld [vmem:[#allocation3 + $0xec0] ss:$16 sps:$4 sm:$0xff]   ;;  %v15656_v19 = vld [vmem:[#allocation3 + $0xec8] ss:$16 sps:$4 sm:$0xff]   ;;  %v15661_v20 = vld [vmem:[#allocation3 + $0xee4] ss:$16 sps:$4 sm:$0xff]  }
 0x1f0   : > { %5426 = vmatmul.mubr.bf16.gmra.mrb[20].mxu0 %v15562_v21  ;;  %6443 = vmatmul.mubr.bf16.gmra.mrb[20].mxu1 %v15562_v21  ;;  %v15664_v21 = vld [vmem:[#allocation3 + $0xeec] ss:$16 sps:$4 sm:$0xff]  }
 0x1f1   : > { %5477 = vmatpush1.bf16.msra.mxu0 %v15563_v22  ;;  %6494 = vmatpush1.bf16.msra.mxu1 %v15566_v23  ;;  %v15659_v22 = vld [vmem:[#allocation3 + $0xee0] ss:$16 sps:$4 sm:$0xff]   ;;  %v15662_v23 = vld [vmem:[#allocation3 + $0xee8] ss:$16 sps:$4 sm:$0xff]  }
 0x1f2   : > { %5478 = vmatprep.subr.bf16.mxu0 %v15571_v24  ;;  %6495 = vmatprep.subr.bf16.mxu1 %v15574_v25  ;;  %v15665_v24 = vld [vmem:[%s18958_s0 + $0x274] ss:$72 sps:$4 sm:$0xff]  }
 0x1f3   : > { %5435 = vmatprep.mubr.bf16.mxu0 %v15575_v26  ;;  %6452 = vmatprep.mubr.bf16.mxu1 %v15575_v26  ;;  %v15670_v25 = vld [vmem:[#allocation3 + $0xf04] ss:$16 sps:$4 sm:$0xff]   ;;  %v15673_v26 = vld [vmem:[#allocation3 + $0xf0c] ss:$16 sps:$4 sm:$0xff]  }
 0x1f5   : > { %5479 = vmatpush1.bf16.msra.mxu0 %v15569_v27  ;;  %6496 = vmatpush1.bf16.msra.mxu1 %v15572_v28  ;;  %v15667_v27 = vld [vmem:[%s18958_s0 + $0x270] ss:$72 sps:$4 sm:$0xff]  }
 0x1f6   : > { %5480 = vmatprep.subr.bf16.mxu0 %v15580_v29  ;;  %6497 = vmatprep.subr.bf16.mxu1 %v15583_v30  ;;  %v15668_v28 = vld [vmem:[#allocation3 + $0xf00] ss:$16 sps:$4 sm:$0xff]   ;;  %v15671_v29 = vld [vmem:[#allocation3 + $0xf08] ss:$16 sps:$4 sm:$0xff]   ;;  %v15676_v30 = vld [vmem:[#allocation3 + $0xf24] ss:$16 sps:$4 sm:$0xff]  }
 0x1f8   : > { %5436 = vmatmul.mubr.bf16.gmra.mrb[24].mxu0 %v15577_v31  ;;  %6453 = vmatmul.mubr.bf16.gmra.mrb[24].mxu1 %v15577_v31  ;;  %v15679_v31 = vld [vmem:[#allocation3 + $0xf2c] ss:$16 sps:$4 sm:$0xff]  }
 0x1f9   : > { %5481 = vmatpush1.bf16.msra.mxu0 %v15578_v32  ;;  %6498 = vmatpush1.bf16.msra.mxu1 %v15581_v33  ;;  %v15680_v32 = vld [vmem:[%s18958_s0 + $0x304] ss:$72 sps:$4 sm:$0xff]   ;;  %v15674_v33 = vld [vmem:[#allocation3 + $0xf20] ss:$16 sps:$4 sm:$0xff]  }
 0x1fa   : > { %5482 = vmatprep.subr.bf16.mxu0 %v15586_v34  ;;  %6499 = vmatprep.subr.bf16.mxu1 %v15589_v35  ;;  %v15677_v34 = vld [vmem:[#allocation3 + $0xf28] ss:$16 sps:$4 sm:$0xff]   ;;  %v15685_v35 = vld [vmem:[#allocation3 + $0xf44] ss:$16 sps:$4 sm:$0xff]  }
 0x1fb   : > { %5445 = vmatprep.mubr.bf16.mxu0 %v15590_v36  ;;  %6462 = vmatprep.mubr.bf16.mxu1 %v15590_v36  ;;  %v15688_v36 = vld [vmem:[#allocation3 + $0xf4c] ss:$16 sps:$4 sm:$0xff]  }
 0x1fd   : > { %5483 = vmatpush1.bf16.msra.mxu0 %v15584_v37  ;;  %6500 = vmatpush1.bf16.msra.mxu1 %v15587_v38  ;;  %v15682_v37 = vld [vmem:[%s18958_s0 + $0x300] ss:$72 sps:$4 sm:$0xff]  }
 0x1fe   : > { %5484 = vmatprep.subr.bf16.mxu0 %v15595_v39  ;;  %6501 = vmatprep.subr.bf16.mxu1 %v15598_v40  ;;  %v15683_v38 = vld [vmem:[#allocation3 + $0xf40] ss:$16 sps:$4 sm:$0xff]   ;;  %v15686_v39 = vld [vmem:[#allocation3 + $0xf48] ss:$16 sps:$4 sm:$0xff]   ;;  %v15691_v40 = vld [vmem:[#allocation3 + $0xf64] ss:$16 sps:$4 sm:$0xff]  }
 0x200   : > { %5446 = vmatmul.mubr.bf16.gmra.mrb[28].mxu0 %v15592_v41  ;;  %6463 = vmatmul.mubr.bf16.gmra.mrb[28].mxu1 %v15592_v41  ;;  %v15694_v41 = vld [vmem:[#allocation3 + $0xf6c] ss:$16 sps:$4 sm:$0xff]  }
 0x201   : > { %5485 = vmatpush1.bf16.msra.mxu0 %v15593_v42  ;;  %6502 = vmatpush1.bf16.msra.mxu1 %v15596_v43  ;;  %v15695_v42 = vld [vmem:[%s18958_s0 + $0x394] ss:$72 sps:$4 sm:$0xff]   ;;  %v15689_v43 = vld [vmem:[#allocation3 + $0xf60] ss:$16 sps:$4 sm:$0xff]  }
 0x202   : > { %5486 = vmatprep.subr.bf16.mxu0 %v15601_v44  ;;  %6503 = vmatprep.subr.bf16.mxu1 %v15604_v45  ;;  %v15692_v44 = vld [vmem:[#allocation3 + $0xf68] ss:$16 sps:$4 sm:$0xff]   ;;  %v15700_v45 = vld [vmem:[#allocation3 + $0xf84] ss:$16 sps:$4 sm:$0xff]  }
 0x203   : > { %5488 = vmatprep.mubr.bf16.mxu0 %v15607_v46  ;;  %6505 = vmatprep.mubr.bf16.mxu1 %v15607_v46  ;;  %v15703_v46 = vld [vmem:[#allocation3 + $0xf8c] ss:$16 sps:$4 sm:$0xff]  }
 0x205   : > { %5487 = vmatpush1.bf16.msra.mxu0 %v15599_v47  ;;  %6504 = vmatpush1.bf16.msra.mxu1 %v15602_v48  ;;  %v15697_v47 = vld [vmem:[%s18958_s0 + $0x390] ss:$72 sps:$4 sm:$0xff]  }
 0x206   : > { %5569 = vmatprep.subr.bf16.mxu0 %v15610_v49  ;;  %6586 = vmatprep.subr.bf16.mxu1 %v15613_v50  ;;  %v15698_v48 = vld [vmem:[#allocation3 + $0xf80] ss:$16 sps:$4 sm:$0xff]   ;;  %v15701_v49 = vld [vmem:[#allocation3 + $0xf88] ss:$16 sps:$4 sm:$0xff]   ;;  %v15706_v50 = vld [vmem:[#allocation3 + $0xfa4] ss:$16 sps:$4 sm:$0xff]  }
 0x208   : > { %5489 = vmatmul.mubr.bf16.vlgmr.msra.gmra.mrb[0].mxu0 %v15605_v51  ;;  %6506 = vmatmul.mubr.bf16.vlgmr.msra.gmra.mrb[0].mxu1 %v15605_v51  ;;  %v15709_v51 = vld [vmem:[#allocation3 + $0xfac] ss:$16 sps:$4 sm:$0xff]  }
 0x209   : > { %5570 = vmatpush1.bf16.msra.mxu0 %v15608_v52  ;;  %6587 = vmatpush1.bf16.msra.mxu1 %v15611_v53  ;;  %v15710_v52 = vld [vmem:[%s18958_s0 + $0x424] ss:$72 sps:$4 sm:$0xff]   ;;  %v15704_v53 = vld [vmem:[#allocation3 + $0xfa0] ss:$16 sps:$4 sm:$0xff]  }
 0x20a   : > { %5571 = vmatprep.subr.bf16.mxu0 %v15616_v54  ;;  %6588 = vmatprep.subr.bf16.mxu1 %v15619_v55  ;;  %v15707_v54 = vld [vmem:[#allocation3 + $0xfa8] ss:$16 sps:$4 sm:$0xff]   ;;  %v15715_v55 = vld [vmem:[#allocation3 + $0xfc4] ss:$16 sps:$4 sm:$0xff]  }
 0x20b   : > { %5498 = vmatprep.mubr.bf16.mxu0 %v15620_v56  ;;  %6515 = vmatprep.mubr.bf16.mxu1 %v15620_v56  ;;  %v15718_v56 = vld [vmem:[#allocation3 + $0xfcc] ss:$16 sps:$4 sm:$0xff]  }
 0x20d   : > { %5572 = vmatpush1.bf16.msra.mxu0 %v15614_v57  ;;  %6589 = vmatpush1.bf16.msra.mxu1 %v15617_v58  ;;  %v15712_v57 = vld [vmem:[%s18958_s0 + $0x420] ss:$72 sps:$4 sm:$0xff]  }
 0x20e   : > { %5573 = vmatprep.subr.bf16.mxu0 %v15625_v59  ;;  %6590 = vmatprep.subr.bf16.mxu1 %v15628_v60  ;;  %v15713_v58 = vld [vmem:[#allocation3 + $0xfc0] ss:$16 sps:$4 sm:$0xff]   ;;  %v15716_v59 = vld [vmem:[#allocation3 + $0xfc8] ss:$16 sps:$4 sm:$0xff]   ;;  %v15721_v60 = vld [vmem:[#allocation3 + $0xfe4] ss:$16 sps:$4 sm:$0xff]  }
 0x210   : > { %5499 = vmatmul.mubr.bf16.gmra.mrb[4].mxu0 %v15622_v61  ;;  %6516 = vmatmul.mubr.bf16.gmra.mrb[4].mxu1 %v15622_v61  ;;  %v15724_v61 = vld [vmem:[#allocation3 + $0xfec] ss:$16 sps:$4 sm:$0xff]  }
 0x211   : > { %5574 = vmatpush1.bf16.msra.mxu0 %v15623_v62  ;;  %6591 = vmatpush1.bf16.msra.mxu1 %v15626_v63  ;;  %v15727_v62 = vld [vmem:[%s18958_s0 + $0x3c] ss:$72 sps:$4 sm:$0xff]   ;;  %v15719_v63 = vld [vmem:[#allocation3 + $0xfe0] ss:$16 sps:$4 sm:$0xff]  }
 0x212   : > { %5575 = vmatprep.subr.bf16.mxu0 %v15631_v0  ;;  %6592 = vmatprep.subr.bf16.mxu1 %v15634_v1  ;;  %v15722_v0 = vld [vmem:[#allocation3 + $0xfe8] ss:$16 sps:$4 sm:$0xff]   ;;  %v15730_v1 = vld [vmem:[#allocation3 + $0x1004] ss:$16 sps:$4 sm:$0xff]  }
 0x213   : > { %5508 = vmatprep.mubr.bf16.mxu0 %v15635_v2  ;;  %6525 = vmatprep.mubr.bf16.mxu1 %v15635_v2  ;;  %v15733_v2 = vld [vmem:[#allocation3 + $0x100c] ss:$16 sps:$4 sm:$0xff]  }
 0x215   : > { %5576 = vmatpush1.bf16.msra.mxu0 %v15629_v3  ;;  %6593 = vmatpush1.bf16.msra.mxu1 %v15632_v4  ;;  %v15725_v3 = vld [vmem:[%s18958_s0 + $0x38] ss:$72 sps:$4 sm:$0xff]  }
 0x216   : > { %5577 = vmatprep.subr.bf16.mxu0 %v15640_v5  ;;  %6594 = vmatprep.subr.bf16.mxu1 %v15643_v6  ;;  %v15728_v4 = vld [vmem:[#allocation3 + $0x1000] ss:$16 sps:$4 sm:$0xff]   ;;  %v15731_v5 = vld [vmem:[#allocation3 + $0x1008] ss:$16 sps:$4 sm:$0xff]   ;;  %v15736_v6 = vld [vmem:[#allocation3 + $0x1024] ss:$16 sps:$4 sm:$0xff]  }
 0x218   : > { %5509 = vmatmul.mubr.bf16.gmra.mrb[8].mxu0 %v15637_v7  ;;  %6526 = vmatmul.mubr.bf16.gmra.mrb[8].mxu1 %v15637_v7  ;;  %v15739_v7 = vld [vmem:[#allocation3 + $0x102c] ss:$16 sps:$4 sm:$0xff]  }
 0x219   : > { %5578 = vmatpush1.bf16.msra.mxu0 %v15638_v8  ;;  %6595 = vmatpush1.bf16.msra.mxu1 %v15641_v9  ;;  %v15740_v8 = vld [vmem:[%s18958_s0 + $0xcc] ss:$72 sps:$4 sm:$0xff]   ;;  %v15734_v9 = vld [vmem:[#allocation3 + $0x1020] ss:$16 sps:$4 sm:$0xff]  }
 0x21a   : > { %5579 = vmatprep.subr.bf16.mxu0 %v15646_v10  ;;  %6596 = vmatprep.subr.bf16.mxu1 %v15649_v11  ;;  %v15737_v10 = vld [vmem:[#allocation3 + $0x1028] ss:$16 sps:$4 sm:$0xff]   ;;  %v15745_v11 = vld [vmem:[#allocation3 + $0x1044] ss:$16 sps:$4 sm:$0xff]  }
 0x21b   : > { %5518 = vmatprep.mubr.bf16.mxu0 %v15650_v12  ;;  %6535 = vmatprep.mubr.bf16.mxu1 %v15650_v12  ;;  %v15748_v12 = vld [vmem:[#allocation3 + $0x104c] ss:$16 sps:$4 sm:$0xff]  }
 0x21d   : > { %5580 = vmatpush1.bf16.msra.mxu0 %v15644_v13  ;;  %6597 = vmatpush1.bf16.msra.mxu1 %v15647_v14  ;;  %v15742_v13 = vld [vmem:[%s18958_s0 + $0xc8] ss:$72 sps:$4 sm:$0xff]  }
 0x21e   : > { %5581 = vmatprep.subr.bf16.mxu0 %v15655_v15  ;;  %6598 = vmatprep.subr.bf16.mxu1 %v15658_v16  ;;  %v15743_v14 = vld [vmem:[#allocation3 + $0x1040] ss:$16 sps:$4 sm:$0xff]   ;;  %v15746_v15 = vld [vmem:[#allocation3 + $0x1048] ss:$16 sps:$4 sm:$0xff]   ;;  %v15751_v16 = vld [vmem:[#allocation3 + $0x1064] ss:$16 sps:$4 sm:$0xff]  }
 0x220   : > { %5519 = vmatmul.mubr.bf16.gmra.mrb[12].mxu0 %v15652_v17  ;;  %6536 = vmatmul.mubr.bf16.gmra.mrb[12].mxu1 %v15652_v17  ;;  %v15754_v17 = vld [vmem:[#allocation3 + $0x106c] ss:$16 sps:$4 sm:$0xff]  }
 0x221   : > { %5582 = vmatpush1.bf16.msra.mxu0 %v15653_v18  ;;  %6599 = vmatpush1.bf16.msra.mxu1 %v15656_v19  ;;  %v15755_v18 = vld [vmem:[%s18958_s0 + $0x15c] ss:$72 sps:$4 sm:$0xff]   ;;  %v15749_v19 = vld [vmem:[#allocation3 + $0x1060] ss:$16 sps:$4 sm:$0xff]  }
 0x222   : > { %5583 = vmatprep.subr.bf16.mxu0 %v15661_v20  ;;  %6600 = vmatprep.subr.bf16.mxu1 %v15664_v21  ;;  %v15752_v20 = vld [vmem:[#allocation3 + $0x1068] ss:$16 sps:$4 sm:$0xff]   ;;  %v15760_v21 = vld [vmem:[#allocation3 + $0x1084] ss:$16 sps:$4 sm:$0xff]  }
 0x223   : > { %5528 = vmatprep.mubr.bf16.mxu0 %v15665_v24  ;;  %6545 = vmatprep.mubr.bf16.mxu1 %v15665_v24  ;;  %v15758_v24 = vld [vmem:[#allocation3 + $0x1080] ss:$16 sps:$4 sm:$0xff]  }
 0x225   : > { %5584 = vmatpush1.bf16.msra.mxu0 %v15659_v22  ;;  %6601 = vmatpush1.bf16.msra.mxu1 %v15662_v23  ;;  %v15763_v22 = vld [vmem:[#allocation3 + $0x108c] ss:$16 sps:$4 sm:$0xff]   ;;  %v15757_v23 = vld [vmem:[%s18958_s0 + $0x158] ss:$72 sps:$4 sm:$0xff]  }
 0x226   : > { %5585 = vmatprep.subr.bf16.mxu0 %v15670_v25  ;;  %6602 = vmatprep.subr.bf16.mxu1 %v15673_v26  ;;  %v15761_v25 = vld [vmem:[#allocation3 + $0x1088] ss:$16 sps:$4 sm:$0xff]   ;;  %v15766_v26 = vld [vmem:[#allocation3 + $0x10a4] ss:$16 sps:$4 sm:$0xff]  }
 0x228   : > { %5529 = vmatmul.mubr.bf16.gmra.mrb[16].mxu0 %v15667_v27  ;;  %6546 = vmatmul.mubr.bf16.gmra.mrb[16].mxu1 %v15667_v27  ;;  %v15769_v27 = vld [vmem:[#allocation3 + $0x10ac] ss:$16 sps:$4 sm:$0xff]  }
 0x229   : > { %5586 = vmatpush1.bf16.msra.mxu0 %v15668_v28  ;;  %6603 = vmatpush1.bf16.msra.mxu1 %v15671_v29  ;;  %v15770_v28 = vld [vmem:[%s18958_s0 + $0x1ec] ss:$72 sps:$4 sm:$0xff]   ;;  %v15764_v29 = vld [vmem:[#allocation3 + $0x10a0] ss:$16 sps:$4 sm:$0xff]  }
 0x22a   : > { %5587 = vmatprep.subr.bf16.mxu0 %v15676_v30  ;;  %6604 = vmatprep.subr.bf16.mxu1 %v15679_v31  ;;  %v15767_v30 = vld [vmem:[#allocation3 + $0x10a8] ss:$16 sps:$4 sm:$0xff]   ;;  %v15775_v31 = vld [vmem:[#allocation3 + $0x10c4] ss:$16 sps:$4 sm:$0xff]  }
 0x22b   : > { %5538 = vmatprep.mubr.bf16.mxu0 %v15680_v32  ;;  %6555 = vmatprep.mubr.bf16.mxu1 %v15680_v32  ;;  %v15778_v32 = vld [vmem:[#allocation3 + $0x10cc] ss:$16 sps:$4 sm:$0xff]  }
 0x22d   : > { %5588 = vmatpush1.bf16.msra.mxu0 %v15674_v33  ;;  %6605 = vmatpush1.bf16.msra.mxu1 %v15677_v34  ;;  %v15772_v33 = vld [vmem:[%s18958_s0 + $0x1e8] ss:$72 sps:$4 sm:$0xff]  }
 0x22e   : > { %5589 = vmatprep.subr.bf16.mxu0 %v15685_v35  ;;  %6606 = vmatprep.subr.bf16.mxu1 %v15688_v36  ;;  %v15773_v34 = vld [vmem:[#allocation3 + $0x10c0] ss:$16 sps:$4 sm:$0xff]   ;;  %v15776_v35 = vld [vmem:[#allocation3 + $0x10c8] ss:$16 sps:$4 sm:$0xff]   ;;  %v15781_v36 = vld [vmem:[#allocation3 + $0x10e4] ss:$16 sps:$4 sm:$0xff]  }
 0x230   : > { %5539 = vmatmul.mubr.bf16.gmra.mrb[20].mxu0 %v15682_v37  ;;  %6556 = vmatmul.mubr.bf16.gmra.mrb[20].mxu1 %v15682_v37  ;;  %v15784_v37 = vld [vmem:[#allocation3 + $0x10ec] ss:$16 sps:$4 sm:$0xff]  }
 0x231   : > { %5590 = vmatpush1.bf16.msra.mxu0 %v15683_v38  ;;  %6607 = vmatpush1.bf16.msra.mxu1 %v15686_v39  ;;  %v15785_v38 = vld [vmem:[%s18958_s0 + $0x27c] ss:$72 sps:$4 sm:$0xff]   ;;  %v15779_v39 = vld [vmem:[#allocation3 + $0x10e0] ss:$16 sps:$4 sm:$0xff]  }
 0x232   : > { %5591 = vmatprep.subr.bf16.mxu0 %v15691_v40  ;;  %6608 = vmatprep.subr.bf16.mxu1 %v15694_v41  ;;  %v15782_v40 = vld [vmem:[#allocation3 + $0x10e8] ss:$16 sps:$4 sm:$0xff]   ;;  %v15790_v41 = vld [vmem:[#allocation3 + $0x1104] ss:$16 sps:$4 sm:$0xff]  }
 0x233   : > { %5548 = vmatprep.mubr.bf16.mxu0 %v15695_v42  ;;  %6565 = vmatprep.mubr.bf16.mxu1 %v15695_v42  ;;  %v15793_v42 = vld [vmem:[#allocation3 + $0x110c] ss:$16 sps:$4 sm:$0xff]  }
 0x235   : > { %5592 = vmatpush1.bf16.msra.mxu0 %v15689_v43  ;;  %6609 = vmatpush1.bf16.msra.mxu1 %v15692_v44  ;;  %v15787_v43 = vld [vmem:[%s18958_s0 + $0x278] ss:$72 sps:$4 sm:$0xff]  }
 0x236   : > { %5593 = vmatprep.subr.bf16.mxu0 %v15700_v45  ;;  %6610 = vmatprep.subr.bf16.mxu1 %v15703_v46  ;;  %v15788_v44 = vld [vmem:[#allocation3 + $0x1100] ss:$16 sps:$4 sm:$0xff]   ;;  %v15791_v45 = vld [vmem:[#allocation3 + $0x1108] ss:$16 sps:$4 sm:$0xff]   ;;  %v15796_v46 = vld [vmem:[#allocation3 + $0x1124] ss:$16 sps:$4 sm:$0xff]  }
 0x238   : > { %5549 = vmatmul.mubr.bf16.gmra.mrb[24].mxu0 %v15697_v47  ;;  %6566 = vmatmul.mubr.bf16.gmra.mrb[24].mxu1 %v15697_v47  ;;  %v15799_v47 = vld [vmem:[#allocation3 + $0x112c] ss:$16 sps:$4 sm:$0xff]  }
 0x239   : > { %5594 = vmatpush1.bf16.msra.mxu0 %v15698_v48  ;;  %6611 = vmatpush1.bf16.msra.mxu1 %v15701_v49  ;;  %v15800_v48 = vld [vmem:[%s18958_s0 + $0x30c] ss:$72 sps:$4 sm:$0xff]   ;;  %v15794_v49 = vld [vmem:[#allocation3 + $0x1120] ss:$16 sps:$4 sm:$0xff]  }
 0x23a   : > { %5595 = vmatprep.subr.bf16.mxu0 %v15706_v50  ;;  %6612 = vmatprep.subr.bf16.mxu1 %v15709_v51  ;;  %v15797_v50 = vld [vmem:[#allocation3 + $0x1128] ss:$16 sps:$4 sm:$0xff]   ;;  %v15805_v51 = vld [vmem:[#allocation3 + $0x1144] ss:$16 sps:$4 sm:$0xff]  }
 0x23b   : > { %5558 = vmatprep.mubr.bf16.mxu0 %v15710_v52  ;;  %6575 = vmatprep.mubr.bf16.mxu1 %v15710_v52  ;;  %v15808_v52 = vld [vmem:[#allocation3 + $0x114c] ss:$16 sps:$4 sm:$0xff]  }
 0x23d   : > { %5596 = vmatpush1.bf16.msra.mxu0 %v15704_v53  ;;  %6613 = vmatpush1.bf16.msra.mxu1 %v15707_v54  ;;  %v15802_v53 = vld [vmem:[%s18958_s0 + $0x308] ss:$72 sps:$4 sm:$0xff]  }
 0x23e   : > { %5597 = vmatprep.subr.bf16.mxu0 %v15715_v55  ;;  %6614 = vmatprep.subr.bf16.mxu1 %v15718_v56  ;;  %v15803_v54 = vld [vmem:[#allocation3 + $0x1140] ss:$16 sps:$4 sm:$0xff]   ;;  %v15806_v55 = vld [vmem:[#allocation3 + $0x1148] ss:$16 sps:$4 sm:$0xff]   ;;  %v15811_v56 = vld [vmem:[#allocation3 + $0x1164] ss:$16 sps:$4 sm:$0xff]  }
 0x240   : > { %5559 = vmatmul.mubr.bf16.gmra.mrb[28].mxu0 %v15712_v57  ;;  %6576 = vmatmul.mubr.bf16.gmra.mrb[28].mxu1 %v15712_v57  ;;  %v15814_v57 = vld [vmem:[#allocation3 + $0x116c] ss:$16 sps:$4 sm:$0xff]  }
 0x241   : > { %5598 = vmatpush1.bf16.msra.mxu0 %v15713_v58  ;;  %6615 = vmatpush1.bf16.msra.mxu1 %v15716_v59  ;;  %v15815_v58 = vld [vmem:[%s18958_s0 + $0x39c] ss:$72 sps:$4 sm:$0xff]   ;;  %v15809_v59 = vld [vmem:[#allocation3 + $0x1160] ss:$16 sps:$4 sm:$0xff]  }
 0x242   : > { %5599 = vmatprep.subr.bf16.mxu0 %v15721_v60  ;;  %6616 = vmatprep.subr.bf16.mxu1 %v15724_v61  ;;  %v15812_v60 = vld [vmem:[#allocation3 + $0x1168] ss:$16 sps:$4 sm:$0xff]   ;;  %v15820_v61 = vld [vmem:[#allocation3 + $0x1184] ss:$16 sps:$4 sm:$0xff]  }
 0x243   : > { %5601 = vmatprep.mubr.bf16.mxu0 %v15727_v62  ;;  %6618 = vmatprep.mubr.bf16.mxu1 %v15727_v62  ;;  %v15823_v62 = vld [vmem:[#allocation3 + $0x118c] ss:$16 sps:$4 sm:$0xff]  }
 0x245   : > { %5600 = vmatpush1.bf16.msra.mxu0 %v15719_v63  ;;  %6617 = vmatpush1.bf16.msra.mxu1 %v15722_v0  ;;  %v15817_v63 = vld [vmem:[%s18958_s0 + $0x398] ss:$72 sps:$4 sm:$0xff]  }
 0x246   : > { %5682 = vmatprep.subr.bf16.mxu0 %v15730_v1  ;;  %6699 = vmatprep.subr.bf16.mxu1 %v15733_v2  ;;  %v15818_v0 = vld [vmem:[#allocation3 + $0x1180] ss:$16 sps:$4 sm:$0xff]   ;;  %v15821_v1 = vld [vmem:[#allocation3 + $0x1188] ss:$16 sps:$4 sm:$0xff]   ;;  %v15826_v2 = vld [vmem:[#allocation3 + $0x11a4] ss:$16 sps:$4 sm:$0xff]  }
 0x248   : > { %5602 = vmatmul.mubr.bf16.vlgmr.msra.gmra.mrb[0].mxu0 %v15725_v3  ;;  %6619 = vmatmul.mubr.bf16.vlgmr.msra.gmra.mrb[0].mxu1 %v15725_v3  ;;  %v15829_v3 = vld [vmem:[#allocation3 + $0x11ac] ss:$16 sps:$4 sm:$0xff]  }
 0x249   : > { %5683 = vmatpush1.bf16.msra.mxu0 %v15728_v4  ;;  %6700 = vmatpush1.bf16.msra.mxu1 %v15731_v5  ;;  %v15830_v4 = vld [vmem:[%s18958_s0 + $0x42c] ss:$72 sps:$4 sm:$0xff]   ;;  %v15824_v5 = vld [vmem:[#allocation3 + $0x11a0] ss:$16 sps:$4 sm:$0xff]  }
 0x24a   : > { %5684 = vmatprep.subr.bf16.mxu0 %v15736_v6  ;;  %6701 = vmatprep.subr.bf16.mxu1 %v15739_v7  ;;  %v15827_v6 = vld [vmem:[#allocation3 + $0x11a8] ss:$16 sps:$4 sm:$0xff]   ;;  %v15835_v7 = vld [vmem:[#allocation3 + $0x11c4] ss:$16 sps:$4 sm:$0xff]  }
 0x24b   : > { %5611 = vmatprep.mubr.bf16.mxu0 %v15740_v8  ;;  %6628 = vmatprep.mubr.bf16.mxu1 %v15740_v8  ;;  %v15838_v8 = vld [vmem:[#allocation3 + $0x11cc] ss:$16 sps:$4 sm:$0xff]  }
 0x24d   : > { %5685 = vmatpush1.bf16.msra.mxu0 %v15734_v9  ;;  %6702 = vmatpush1.bf16.msra.mxu1 %v15737_v10  ;;  %v15832_v9 = vld [vmem:[%s18958_s0 + $0x428] ss:$72 sps:$4 sm:$0xff]  }
 0x24e   : > { %5686 = vmatprep.subr.bf16.mxu0 %v15745_v11  ;;  %6703 = vmatprep.subr.bf16.mxu1 %v15748_v12  ;;  %v15833_v10 = vld [vmem:[#allocation3 + $0x11c0] ss:$16 sps:$4 sm:$0xff]   ;;  %v15836_v11 = vld [vmem:[#allocation3 + $0x11c8] ss:$16 sps:$4 sm:$0xff]   ;;  %v15841_v12 = vld [vmem:[#allocation3 + $0x11e4] ss:$16 sps:$4 sm:$0xff]  }
 0x250   : > { %5612 = vmatmul.mubr.bf16.gmra.mrb[4].mxu0 %v15742_v13  ;;  %6629 = vmatmul.mubr.bf16.gmra.mrb[4].mxu1 %v15742_v13  ;;  %v15844_v13 = vld [vmem:[#allocation3 + $0x11ec] ss:$16 sps:$4 sm:$0xff]  }
 0x251   : > { %5687 = vmatpush1.bf16.msra.mxu0 %v15743_v14  ;;  %6704 = vmatpush1.bf16.msra.mxu1 %v15746_v15  ;;  %v15847_v14 = vld [vmem:[%s18958_s0 + $0x44] ss:$72 sps:$4 sm:$0xff]   ;;  %v15839_v15 = vld [vmem:[#allocation3 + $0x11e0] ss:$16 sps:$4 sm:$0xff]  }
 0x252   : > { %5688 = vmatprep.subr.bf16.mxu0 %v15751_v16  ;;  %6705 = vmatprep.subr.bf16.mxu1 %v15754_v17  ;;  %v15842_v16 = vld [vmem:[#allocation3 + $0x11e8] ss:$16 sps:$4 sm:$0xff]  }
 0x253   : > { %5621 = vmatprep.mubr.bf16.mxu0 %v15755_v18  ;;  %6638 = vmatprep.mubr.bf16.mxu1 %v15755_v18  ;;  %v15845_v17 = vld [vmem:[%s18958_s0 + $0x40] ss:$72 sps:$4 sm:$0xff]   ;;  %v15848_v18 = vld [vmem:[%s18958_s0 + $0xd4] ss:$72 sps:$4 sm:$0xff]  }
 0x255   : > { %5689 = vmatpush1.bf16.msra.mxu0 %v15749_v19  ;;  %6706 = vmatpush1.bf16.msra.mxu1 %v15752_v20  ;;  %v15850_v19 = vld [vmem:[%s18958_s0 + $0xd0] ss:$72 sps:$4 sm:$0xff]   ;;  %v15851_v20 = vld [vmem:[%s18958_s0 + $0x164] ss:$72 sps:$4 sm:$0xff]  }
 0x256   : > { %5690 = vmatprep.subr.bf16.mxu0 %v15760_v21  ;;  %6707 = vmatprep.subr.bf16.mxu1 %v15763_v22  ;;  %v15853_v21 = vld [vmem:[%s18958_s0 + $0x160] ss:$72 sps:$4 sm:$0xff]   ;;  %v15854_v22 = vld [vmem:[%s18958_s0 + $0x1f4] ss:$72 sps:$4 sm:$0xff]  }
 0x258   : > { %5622 = vmatmul.mubr.bf16.gmra.mrb[8].mxu0 %v15757_v23  ;;  %6639 = vmatmul.mubr.bf16.gmra.mrb[8].mxu1 %v15757_v23  ;;  %v15856_v23 = vld [vmem:[%s18958_s0 + $0x1f0] ss:$72 sps:$4 sm:$0xff]  }
 0x259   : > { %5691 = vmatpush1.bf16.msra.mxu0 %v15758_v24  ;;  %6708 = vmatpush1.bf16.msra.mxu1 %v15761_v25  ;;  %v15857_v24 = vld [vmem:[%s18958_s0 + $0x284] ss:$72 sps:$4 sm:$0xff]   ;;  %v15859_v25 = vld [vmem:[%s18958_s0 + $0x280] ss:$72 sps:$4 sm:$0xff]  }
 0x25a   : > { %5692 = vmatprep.subr.bf16.mxu0 %v15766_v26  ;;  %6709 = vmatprep.subr.bf16.mxu1 %v15769_v27  ;;  %v15860_v26 = vld [vmem:[%s18958_s0 + $0x314] ss:$72 sps:$4 sm:$0xff]   ;;  %v15862_v27 = vld [vmem:[%s18958_s0 + $0x310] ss:$72 sps:$4 sm:$0xff]  }
 0x25b   : > { %5631 = vmatprep.mubr.bf16.mxu0 %v15770_v28  ;;  %6648 = vmatprep.mubr.bf16.mxu1 %v15770_v28  ;;  %v15863_v28 = vld [vmem:[%s18958_s0 + $0x3a4] ss:$72 sps:$4 sm:$0xff]  }
 0x25d   : > { %5693 = vmatpush1.bf16.msra.mxu0 %v15764_v29  ;;  %6710 = vmatpush1.bf16.msra.mxu1 %v15767_v30  ;;  %v15865_v29 = vld [vmem:[%s18958_s0 + $0x3a0] ss:$72 sps:$4 sm:$0xff]   ;;  %v15866_v30 = vld [vmem:[%s18958_s0 + $0x434] ss:$72 sps:$4 sm:$0xff]  }
 0x25e   : > { %5694 = vmatprep.subr.bf16.mxu0 %v15775_v31  ;;  %6711 = vmatprep.subr.bf16.mxu1 %v15778_v32  ;;  %v15868_v31 = vld [vmem:[%s18958_s0 + $0x430] ss:$72 sps:$4 sm:$0xff]  }
 0x260   : > { %5632 = vmatmul.mubr.bf16.gmra.mrb[12].mxu0 %v15772_v33  ;;  %6649 = vmatmul.mubr.bf16.gmra.mrb[12].mxu1 %v15772_v33 }
 0x261   : > { %5695 = vmatpush1.bf16.msra.mxu0 %v15773_v34  ;;  %6712 = vmatpush1.bf16.msra.mxu1 %v15776_v35 }
 0x262   : > { %5696 = vmatprep.subr.bf16.mxu0 %v15781_v36  ;;  %6713 = vmatprep.subr.bf16.mxu1 %v15784_v37 }
 0x263   : > { %5641 = vmatprep.mubr.bf16.mxu0 %v15785_v38  ;;  %6658 = vmatprep.mubr.bf16.mxu1 %v15785_v38 }
 0x265   : > { %5697 = vmatpush1.bf16.msra.mxu0 %v15779_v39  ;;  %6714 = vmatpush1.bf16.msra.mxu1 %v15782_v40 }
 0x266   : > { %5698 = vmatprep.subr.bf16.mxu0 %v15790_v41  ;;  %6715 = vmatprep.subr.bf16.mxu1 %v15793_v42 }
 0x268   : > { %5642 = vmatmul.mubr.bf16.gmra.mrb[16].mxu0 %v15787_v43  ;;  %6659 = vmatmul.mubr.bf16.gmra.mrb[16].mxu1 %v15787_v43 }
 0x269   : > { %5699 = vmatpush1.bf16.msra.mxu0 %v15788_v44  ;;  %6716 = vmatpush1.bf16.msra.mxu1 %v15791_v45 }
 0x26a   : > { %5700 = vmatprep.subr.bf16.mxu0 %v15796_v46  ;;  %6717 = vmatprep.subr.bf16.mxu1 %v15799_v47 }
 0x26b   : > { %5651 = vmatprep.mubr.bf16.mxu0 %v15800_v48  ;;  %6668 = vmatprep.mubr.bf16.mxu1 %v15800_v48 }
 0x26d   : > { %5701 = vmatpush1.bf16.msra.mxu0 %v15794_v49  ;;  %6718 = vmatpush1.bf16.msra.mxu1 %v15797_v50 }
 0x26e   : > { %5702 = vmatprep.subr.bf16.mxu0 %v15805_v51  ;;  %6719 = vmatprep.subr.bf16.mxu1 %v15808_v52 }
 0x270   : > { %5652 = vmatmul.mubr.bf16.gmra.mrb[20].mxu0 %v15802_v53  ;;  %6669 = vmatmul.mubr.bf16.gmra.mrb[20].mxu1 %v15802_v53 }
 0x271   : > { %5703 = vmatpush1.bf16.msra.mxu0 %v15803_v54  ;;  %6720 = vmatpush1.bf16.msra.mxu1 %v15806_v55 }
 0x272   : > { %5704 = vmatprep.subr.bf16.mxu0 %v15811_v56  ;;  %6721 = vmatprep.subr.bf16.mxu1 %v15814_v57 }
 0x273   : > { %5661 = vmatprep.mubr.bf16.mxu0 %v15815_v58  ;;  %6678 = vmatprep.mubr.bf16.mxu1 %v15815_v58 }
 0x275   : > { %5705 = vmatpush1.bf16.msra.mxu0 %v15809_v59  ;;  %6722 = vmatpush1.bf16.msra.mxu1 %v15812_v60 }
 0x276   : > { %5706 = vmatprep.subr.bf16.mxu0 %v15820_v61  ;;  %6723 = vmatprep.subr.bf16.mxu1 %v15823_v62 }
 0x278   : > { %5662 = vmatmul.mubr.bf16.gmra.mrb[24].mxu0 %v15817_v63  ;;  %6679 = vmatmul.mubr.bf16.gmra.mrb[24].mxu1 %v15817_v63 }
 0x279   : > { %5707 = vmatpush1.bf16.msra.mxu0 %v15818_v0  ;;  %6724 = vmatpush1.bf16.msra.mxu1 %v15821_v1 }
 0x27a   : > { %5708 = vmatprep.subr.bf16.mxu0 %v15826_v2  ;;  %6725 = vmatprep.subr.bf16.mxu1 %v15829_v3 }
 0x27b   : > { %5671 = vmatprep.mubr.bf16.mxu0 %v15830_v4  ;;  %6688 = vmatprep.mubr.bf16.mxu1 %v15830_v4 }
 0x27d   : > { %5709 = vmatpush1.bf16.msra.mxu0 %v15824_v5  ;;  %6726 = vmatpush1.bf16.msra.mxu1 %v15827_v6 }
 0x27e   : > { %5710 = vmatprep.subr.bf16.mxu0 %v15835_v7  ;;  %6727 = vmatprep.subr.bf16.mxu1 %v15838_v8 }
 0x280   : > { %5672 = vmatmul.mubr.bf16.gmra.mrb[28].mxu0 %v15832_v9  ;;  %6689 = vmatmul.mubr.bf16.gmra.mrb[28].mxu1 %v15832_v9 }
 0x281   : > { %5711 = vmatpush1.bf16.msra.mxu0 %v15833_v10  ;;  %6728 = vmatpush1.bf16.msra.mxu1 %v15836_v11 }
 0x282   : > { %5712 = vmatprep.subr.bf16.mxu0 %v15841_v12  ;;  %6729 = vmatprep.subr.bf16.mxu1 %v15844_v13 }
 0x283   : > { %5714 = vmatprep.mubr.bf16.mxu0 %v15847_v14  ;;  %6731 = vmatprep.mubr.bf16.mxu1 %v15847_v14 }
 0x285   : > { %5713 = vmatpush1.bf16.msra.mxu0 %v15839_v15  ;;  %6730 = vmatpush1.bf16.msra.mxu1 %v15842_v16 }
 0x288   : > { %5715 = vmatmul.mubr.bf16.vlgmr.msra.gmra.mrb[0].mxu0 %v15845_v17  ;;  %6732 = vmatmul.mubr.bf16.vlgmr.msra.gmra.mrb[0].mxu1 %v15845_v17 }
 0x289   : > { %5724 = vmatprep.mubr.bf16.mxu0 %v15848_v18  ;;  %6741 = vmatprep.mubr.bf16.mxu1 %v15848_v18 }
 0x290   : > { %5725 = vmatmul.mubr.bf16.gmra.mrb[4].mxu0 %v15850_v19  ;;  %6742 = vmatmul.mubr.bf16.gmra.mrb[4].mxu1 %v15850_v19 }
 0x291   : > { %5734 = vmatprep.mubr.bf16.mxu0 %v15851_v20  ;;  %6751 = vmatprep.mubr.bf16.mxu1 %v15851_v20 }
 0x298   : > { %5735 = vmatmul.mubr.bf16.gmra.mrb[8].mxu0 %v15853_v21  ;;  %6752 = vmatmul.mubr.bf16.gmra.mrb[8].mxu1 %v15853_v21 }
 0x299   : > { %5744 = vmatprep.mubr.bf16.mxu0 %v15854_v22  ;;  %6761 = vmatprep.mubr.bf16.mxu1 %v15854_v22 }
 0x2a0   : > { %5745 = vmatmul.mubr.bf16.gmra.mrb[12].mxu0 %v15856_v23  ;;  %6762 = vmatmul.mubr.bf16.gmra.mrb[12].mxu1 %v15856_v23 }
 0x2a1   : > { %5754 = vmatprep.mubr.bf16.mxu0 %v15857_v24  ;;  %6771 = vmatprep.mubr.bf16.mxu1 %v15857_v24 }
 0x2a8   : > { %5755 = vmatmul.mubr.bf16.gmra.mrb[16].mxu0 %v15859_v25  ;;  %6772 = vmatmul.mubr.bf16.gmra.mrb[16].mxu1 %v15859_v25 }
 0x2a9   : > { %5764 = vmatprep.mubr.bf16.mxu0 %v15860_v26  ;;  %6781 = vmatprep.mubr.bf16.mxu1 %v15860_v26 }
 0x2b0   : > { %5765 = vmatmul.mubr.bf16.gmra.mrb[20].mxu0 %v15862_v27  ;;  %6782 = vmatmul.mubr.bf16.gmra.mrb[20].mxu1 %v15862_v27 }
 0x2b1   : > { %5774 = vmatprep.mubr.bf16.mxu0 %v15863_v28  ;;  %6791 = vmatprep.mubr.bf16.mxu1 %v15863_v28 }
 0x2b8   : > { %5775 = vmatmul.mubr.bf16.gmra.mrb[24].mxu0 %v15865_v29  ;;  %6792 = vmatmul.mubr.bf16.gmra.mrb[24].mxu1 %v15865_v29 }
 0x2b9   : > { %5784 = vmatprep.mubr.bf16.mxu0 %v15866_v30  ;;  %6801 = vmatprep.mubr.bf16.mxu1 %v15866_v30 }
 0x2c0   : > { %5785 = vmatmul.mubr.bf16.gmra.mrb[28].mxu0 %v15868_v31  ;;  %6802 = vmatmul.mubr.bf16.gmra.mrb[28].mxu1 %v15868_v31 }
 0x35b   : > { %v16542_v32 = vpop.f32.mrb[0].mxu0  ;;  %v16544_v33 = vpop.f32.mrb[0].mxu1 }
 0x35c   : > { %v16546_v34 = vpop.f32.mrb[1].mxu0  ;;  %v16548_v35 = vpop.f32.mrb[1].mxu1  ;;  %v6901_v36 = vmul.f32 %v16542_v32, %v16542_v32  ;;  %v6903_v37 = vmul.f32 %v16544_v33, %v16544_v33 }
 0x35d   : > { %v6902_v38 = vmul.f32 %v16546_v34, %v16546_v34  ;;  %v6904_v39 = vmul.f32 %v16548_v35, %v16548_v35  ;;  %v16558_v40 = vpop.f32.mrb[2].mxu0  ;;  %v16560_v41 = vpop.f32.mrb[2].mxu1 }
 0x35e   : > { %v6812_v42 = vadd.f32 %v16558_v40, %v16542_v32  ;;  %v6905_v43 = vmul.f32 %v16558_v40, %v16558_v40  ;;  %v6854_v44 = vadd.f32 %v16560_v41, %v16544_v33  ;;  %v6907_v45 = vmul.f32 %v16560_v41, %v16560_v41  ;;  %v16570_v46 = vpop.f32.mrb[3].mxu0  ;;  %v16572_v47 = vpop.f32.mrb[3].mxu1 }
 0x35f   : > { %v6833_v48 = vadd.f32 %v16570_v46, %v16546_v34  ;;  %v6906_v49 = vmul.f32 %v16570_v46, %v16570_v46  ;;  %v6875_v50 = vadd.f32 %v16572_v47, %v16548_v35  ;;  %v6908_v51 = vmul.f32 %v16572_v47, %v16572_v47 }
 0x360   : > { %v6965_v52 = vadd.f32 %v6905_v43, %v6901_v36  ;;  %v7007_v53 = vadd.f32 %v6907_v45, %v6903_v37 }
 0x361   : > { %v6986_v54 = vadd.f32 %v6906_v49, %v6902_v38  ;;  %v7028_v55 = vadd.f32 %v6908_v51, %v6904_v39 }
 0x363   : > { %v16582_v56 = vpop.f32.mrb[4].mxu0  ;;  %v16584_v57 = vpop.f32.mrb[4].mxu1 }
 0x364   : > { %v6813_v58 = vadd.f32 %v6812_v42, %v16582_v56  ;;  %v6909_v59 = vmul.f32 %v16582_v56, %v16582_v56  ;;  %v6855_v60 = vadd.f32 %v6854_v44, %v16584_v57  ;;  %v6911_v61 = vmul.f32 %v16584_v57, %v16584_v57  ;;  %v16592_v62 = vpop.f32.mrb[5].mxu0  ;;  %v16594_v63 = vpop.f32.mrb[5].mxu1 }
 0x365   : > { %v6834_v0 = vadd.f32 %v6833_v48, %v16592_v62  ;;  %v6910_v1 = vmul.f32 %v16592_v62, %v16592_v62  ;;  %v6876_v2 = vadd.f32 %v6875_v50, %v16594_v63  ;;  %v6912_v3 = vmul.f32 %v16594_v63, %v16594_v63  ;;  %v16602_v4 = vpop.f32.mrb[6].mxu0  ;;  %v16604_v5 = vpop.f32.mrb[6].mxu1 }
 0x366   : > { %v6966_v6 = vadd.f32 %v6965_v52, %v6909_v59  ;;  %v7008_v7 = vadd.f32 %v7007_v53, %v6911_v61  ;;  %v6814_v8 = vadd.f32 %v6813_v58, %v16602_v4  ;;  %v6913_v9 = vmul.f32 %v16602_v4, %v16602_v4  ;;  %v16609_v10 = vpop.f32.mrb[7].mxu0  ;;  %v16611_v11 = vpop.f32.mrb[7].mxu1 }
 0x367   : > { %v6987_v12 = vadd.f32 %v6986_v54, %v6910_v1  ;;  %v7029_v13 = vadd.f32 %v7028_v55, %v6912_v3  ;;  %v6856_v14 = vadd.f32 %v6855_v60, %v16604_v5  ;;  %v6915_v15 = vmul.f32 %v16604_v5, %v16604_v5 }
 0x368   : > { %v6967_v16 = vadd.f32 %v6966_v6, %v6913_v9  ;;  %v6835_v17 = vadd.f32 %v6834_v0, %v16609_v10  ;;  %v6914_v18 = vmul.f32 %v16609_v10, %v16609_v10  ;;  %v6877_v19 = vadd.f32 %v6876_v2, %v16611_v11 }
 0x369   : > { %v7009_v20 = vadd.f32 %v7008_v7, %v6915_v15  ;;  %v6916_v21 = vmul.f32 %v16611_v11, %v16611_v11 }
 0x36a   : > { %v6988_v22 = vadd.f32 %v6987_v12, %v6914_v18 }
 0x36b   : > { %v7030_v23 = vadd.f32 %v7029_v13, %v6916_v21  ;;  %v16622_v24 = vpop.f32.mrb[8].mxu0  ;;  %v16624_v25 = vpop.f32.mrb[8].mxu1 }
 0x36c   : > { %v6815_v26 = vadd.f32 %v6814_v8, %v16622_v24  ;;  %v6917_v27 = vmul.f32 %v16622_v24, %v16622_v24  ;;  %v6857_v28 = vadd.f32 %v6856_v14, %v16624_v25  ;;  %v6919_v29 = vmul.f32 %v16624_v25, %v16624_v25  ;;  %v16632_v30 = vpop.f32.mrb[9].mxu0  ;;  %v16634_v31 = vpop.f32.mrb[9].mxu1 }
 0x36d   : > { %v6836_v36 = vadd.f32 %v6835_v17, %v16632_v30  ;;  %v6918_v37 = vmul.f32 %v16632_v30, %v16632_v30  ;;  %v6878_v38 = vadd.f32 %v6877_v19, %v16634_v31  ;;  %v6920_v39 = vmul.f32 %v16634_v31, %v16634_v31  ;;  %v16642_v42 = vpop.f32.mrb[10].mxu0  ;;  %v16644_v43 = vpop.f32.mrb[10].mxu1 }
 0x36e   : > { %19055 = vst [vmem:[#allocation7_spill] sm:$0xff] %v16644_v43  ;;  %v6968_v44 = vadd.f32 %v6967_v16, %v6917_v27  ;;  %v7010_v45 = vadd.f32 %v7009_v20, %v6919_v29  ;;  %v6816_v48 = vadd.f32 %v6815_v26, %v16642_v42  ;;  %v6921_v49 = vmul.f32 %v16642_v42, %v16642_v42  ;;  %v16649_v50 = vpop.f32.mrb[11].mxu0  ;;  %v16651_v51 = vpop.f32.mrb[11].mxu1 }
 0x36f   : > { %v6989_v52 = vadd.f32 %v6988_v22, %v6918_v37  ;;  %v7031_v53 = vadd.f32 %v7030_v23, %v6920_v39  ;;  %v6858_v54 = vadd.f32 %v6857_v28, %v16644_v43  ;;  %v6923_v55 = vmul.f32 %v16644_v43, %v16644_v43 }
 0x370   : > { %v6969_v58 = vadd.f32 %v6968_v44, %v6921_v49  ;;  %v6837_v59 = vadd.f32 %v6836_v36, %v16649_v50  ;;  %v6922_v60 = vmul.f32 %v16649_v50, %v16649_v50  ;;  %v6879_v61 = vadd.f32 %v6878_v38, %v16651_v51 }
 0x371   : > { %v7011_v0 = vadd.f32 %v7010_v45, %v6923_v55  ;;  %v6924_v1 = vmul.f32 %v16651_v51, %v16651_v51 }
 0x372   : > { %v6990_v2 = vadd.f32 %v6989_v52, %v6922_v60  ;;  %v7199_v60 = vlaneseq }
 0x373   : > { %v7032_v3 = vadd.f32 %v7031_v53, %v6924_v1  ;;  %v16662_v6 = vpop.f32.mrb[12].mxu0  ;;  %v16664_v7 = vpop.f32.mrb[12].mxu1 }
 0x374   : > { %19056 = vst [vmem:[#allocation8_spill] sm:$0xff] %v16662_v6  ;;  %19057 = vst [vmem:[#allocation9_spill] sm:$0xff] %v16664_v7  ;;  %v6817_v8 = vadd.f32 %v6816_v48, %v16662_v6  ;;  %v6925_v9 = vmul.f32 %v16662_v6, %v16662_v6  ;;  %v6859_v12 = vadd.f32 %v6858_v54, %v16664_v7  ;;  %v16672_v14 = vpop.f32.mrb[13].mxu0  ;;  %v16674_v15 = vpop.f32.mrb[13].mxu1 }
 0x375   : > { %v6927_v13 = vmul.f32 %v16664_v7, %v16664_v7  ;;  %19058 = vst [vmem:[#allocation10_spill] sm:$0xff] %v16672_v14  ;;  %19059 = vst [vmem:[#allocation11_spill] sm:$0xff] %v16674_v15  ;;  %v6838_v16 = vadd.f32 %v6837_v59, %v16672_v14  ;;  %v6926_v17 = vmul.f32 %v16672_v14, %v16672_v14  ;;  %v16682_v20 = vpop.f32.mrb[14].mxu0  ;;  %v16684_v21 = vpop.f32.mrb[14].mxu1 }
 0x376   : > { %v6880_v18 = vadd.f32 %v6879_v61, %v16674_v15  ;;  %v6928_v19 = vmul.f32 %v16674_v15, %v16674_v15  ;;  %19060 = vst [vmem:[#allocation12_spill] sm:$0xff] %v16682_v20  ;;  %19061 = vst [vmem:[#allocation13_spill] sm:$0xff] %v16684_v21  ;;  %v6970_v22 = vadd.f32 %v6969_v58, %v6925_v9  ;;  %v16689_v28 = vpop.f32.mrb[15].mxu0  ;;  %v16691_v29 = vpop.f32.mrb[15].mxu1 }
 0x377   : > { %v7012_v23 = vadd.f32 %v7011_v0, %v6927_v13  ;;  %v6818_v26 = vadd.f32 %v6817_v8, %v16682_v20  ;;  %v6929_v27 = vmul.f32 %v16682_v20, %v16682_v20  ;;  %19062 = vst [vmem:[#allocation14_spill] sm:$0xff] %v16689_v28  ;;  %19063 = vst [vmem:[#allocation15_spill] sm:$0xff] %v16691_v29 }
 0x378   : > { %v6991_v36 = vadd.f32 %v6990_v2, %v6926_v17  ;;  %v7033_v37 = vadd.f32 %v7032_v3, %v6928_v19  ;;  %v6860_v38 = vadd.f32 %v6859_v12, %v16684_v21  ;;  %v6931_v39 = vmul.f32 %v16684_v21, %v16684_v21 }
 0x379   : > { %v6971_v44 = vadd.f32 %v6970_v22, %v6929_v27  ;;  %v6839_v45 = vadd.f32 %v6838_v16, %v16689_v28  ;;  %v6930_v48 = vmul.f32 %v16689_v28, %v16689_v28  ;;  %v6881_v49 = vadd.f32 %v6880_v18, %v16691_v29 }
 0x37a   : > { %v7013_v52 = vadd.f32 %v7012_v23, %v6931_v39  ;;  %v6932_v53 = vmul.f32 %v16691_v29, %v16691_v29 }
 0x37b   : > { %v6992_v54 = vadd.f32 %v6991_v36, %v6930_v48  ;;  %v16702_v58 = vpop.f32.mrb[16].mxu0  ;;  %v16704_v59 = vpop.f32.mrb[16].mxu1 }
 0x37c   : > { %v7034_v55 = vadd.f32 %v7033_v37, %v6932_v53  ;;  %19064 = vst [vmem:[#allocation16_spill] sm:$0xff] %v16702_v58  ;;  %19065 = vst [vmem:[#allocation17_spill] sm:$0xff] %v16704_v59  ;;  %v6819_v61 = vadd.f32 %v6818_v26, %v16702_v58  ;;  %v6933_v0 = vmul.f32 %v16702_v58, %v16702_v58  ;;  %v16712_v3 = vpop.f32.mrb[17].mxu0  ;;  %v16714_v8 = vpop.f32.mrb[17].mxu1 }
 0x37d   : > { %v6861_v1 = vadd.f32 %v6860_v38, %v16704_v59  ;;  %v6935_v2 = vmul.f32 %v16704_v59, %v16704_v59  ;;  %19066 = vst [vmem:[#allocation18_spill] sm:$0xff] %v16712_v3  ;;  %19067 = vst [vmem:[#allocation19_spill] sm:$0xff] %v16714_v8  ;;  %v6840_v9 = vadd.f32 %v6839_v45, %v16712_v3  ;;  %v16722_v17 = vpop.f32.mrb[18].mxu0  ;;  %v16724_v18 = vpop.f32.mrb[18].mxu1 }
 0x37e   : > { %v6934_v12 = vmul.f32 %v16712_v3, %v16712_v3  ;;  %v6882_v13 = vadd.f32 %v6881_v49, %v16714_v8  ;;  %v6936_v16 = vmul.f32 %v16714_v8, %v16714_v8  ;;  %19068 = vst [vmem:[#allocation20_spill] sm:$0xff] %v16722_v17  ;;  %19069 = vst [vmem:[#allocation21_spill] sm:$0xff] %v16724_v18  ;;  %v16729_v27 = vpop.f32.mrb[19].mxu0  ;;  %v16731_v36 = vpop.f32.mrb[19].mxu1 }
 0x37f   : > { %v6972_v19 = vadd.f32 %v6971_v44, %v6933_v0  ;;  %v7014_v22 = vadd.f32 %v7013_v52, %v6935_v2  ;;  %v6820_v23 = vadd.f32 %v6819_v61, %v16722_v17  ;;  %v6937_v26 = vmul.f32 %v16722_v17, %v16722_v17  ;;  %19070 = vst [vmem:[#allocation22_spill] sm:$0xff] %v16729_v27 }
 0x380   : > { %19071 = vst [vmem:[#allocation23_spill] sm:$0xff] %v16731_v36  ;;  %v6993_v37 = vadd.f32 %v6992_v54, %v6934_v12  ;;  %v7035_v38 = vadd.f32 %v7034_v55, %v6936_v16  ;;  %v6862_v39 = vadd.f32 %v6861_v1, %v16724_v18  ;;  %v6939_v45 = vmul.f32 %v16724_v18, %v16724_v18 }
 0x381   : > { %v6973_v48 = vadd.f32 %v6972_v19, %v6937_v26  ;;  %v6841_v44 = vadd.f32 %v6840_v9, %v16729_v27  ;;  %v6938_v49 = vmul.f32 %v16729_v27, %v16729_v27  ;;  %v6883_v52 = vadd.f32 %v6882_v13, %v16731_v36 }
 0x382   : > { %v7015_v53 = vadd.f32 %v7014_v22, %v6939_v45  ;;  %v6940_v61 = vmul.f32 %v16731_v36, %v16731_v36  ;;  %v7200_v2 = vshrl.u32 %v7199_v60, 7 }
 0x383   : > { %v6994_v0 = vadd.f32 %v6993_v37, %v6938_v49  ;;  %v16742_v55 = vpop.f32.mrb[20].mxu0  ;;  %v16744_v1 = vpop.f32.mrb[20].mxu1 }
 0x384   : > { %v7036_v54 = vadd.f32 %v7035_v38, %v6940_v61  ;;  %19072 = vst [vmem:[#allocation24_spill] sm:$0xff] %v16742_v55  ;;  %19073 = vst [vmem:[#allocation25_spill] sm:$0xff] %v16744_v1  ;;  %v6821_v12 = vadd.f32 %v6820_v23, %v16742_v55  ;;  %v6941_v9 = vmul.f32 %v16742_v55, %v16742_v55  ;;  %v16752_v19 = vpop.f32.mrb[21].mxu0  ;;  %v16754_v22 = vpop.f32.mrb[21].mxu1 }
 0x385   : > { %v6863_v16 = vadd.f32 %v6862_v39, %v16744_v1  ;;  %v6943_v13 = vmul.f32 %v16744_v1, %v16744_v1  ;;  %19074 = vst [vmem:[#allocation26_spill] sm:$0xff] %v16752_v19  ;;  %19075 = vst [vmem:[#allocation27_spill] sm:$0xff] %v16754_v22  ;;  %v6842_v26 = vadd.f32 %v6841_v44, %v16752_v19  ;;  %v16762_v38 = vpop.f32.mrb[22].mxu0  ;;  %v16764_v39 = vpop.f32.mrb[22].mxu1 }
 0x386   : > { %v6942_v37 = vmul.f32 %v16752_v19, %v16752_v19  ;;  %v6884_v60 = vadd.f32 %v6883_v52, %v16754_v22  ;;  %v6944_v23 = vmul.f32 %v16754_v22, %v16754_v22  ;;  %19076 = vst [vmem:[#allocation28_spill] sm:$0xff] %v16762_v38  ;;  %19077 = vst [vmem:[#allocation29_spill] sm:$0xff] %v16764_v39  ;;  %v16769_v44 = vpop.f32.mrb[23].mxu0  ;;  %v16771_v55 = vpop.f32.mrb[23].mxu1 }
 0x387   : > { %v6974_v45 = vadd.f32 %v6973_v48, %v6941_v9  ;;  %v7016_v49 = vadd.f32 %v7015_v53, %v6943_v13  ;;  %v6822_v61 = vadd.f32 %v6821_v12, %v16762_v38  ;;  %v6945_v1 = vmul.f32 %v16762_v38, %v16762_v38  ;;  %19078 = vst [vmem:[#allocation30_spill] sm:$0xff] %v16769_v44 }
 0x388   : > { %19079 = vst [vmem:[#allocation31_spill] sm:$0xff] %v16771_v55  ;;  %v6995_v19 = vadd.f32 %v6994_v0, %v6942_v37  ;;  %v7037_v52 = vadd.f32 %v7036_v54, %v6944_v23  ;;  %v6864_v18 = vadd.f32 %v6863_v16, %v16764_v39  ;;  %v6947_v22 = vmul.f32 %v16764_v39, %v16764_v39 }
 0x389   : > { %v6975_v59 = vadd.f32 %v6974_v45, %v6945_v1  ;;  %v6843_v48 = vadd.f32 %v6842_v26, %v16769_v44  ;;  %v6946_v53 = vmul.f32 %v16769_v44, %v16769_v44  ;;  %v6885_v12 = vadd.f32 %v6884_v60, %v16771_v55 }
 0x38a   : > { %v7017_v9 = vadd.f32 %v7016_v49, %v6947_v22  ;;  %v6948_v13 = vmul.f32 %v16771_v55, %v16771_v55  ;;  %v16782_v0 = vsub.s32 0, %v7200_v2  ;;  %v16788_v1 = vsub.s32 2, %v7200_v2 }
 0x38b   : > { %v6996_v38 = vadd.f32 %v6995_v19, %v6946_v53  ;;  %v16784_v16 = vpop.f32.mrb[24].mxu0  ;;  %v16786_v37 = vpop.f32.mrb[24].mxu1  ;;  %v16790_v26 = vsub.s32 1, %v7200_v2  ;;  %v16792_v23 = vsub.s32 3, %v7200_v2 }
 0x38c   : > { %19080 = vst [vmem:[#allocation32_spill] sm:$0xff] %v16782_v0  ;;  %v7038_v54 = vadd.f32 %v7037_v52, %v6948_v13  ;;  %19081 = vst [vmem:[#allocation33_spill] sm:$0xff] %v16784_v16  ;;  %v6823_v60 = vadd.f32 %v6822_v61, %v16784_v16  ;;  %v6949_v22 = vmul.f32 %v16784_v16, %v16784_v16  ;;  %v16800_v49 = vpop.f32.mrb[25].mxu0  ;;  %v16802_v52 = vpop.f32.mrb[25].mxu1 }
 0x38d   : > { %19082 = vst [vmem:[#allocation34_spill] sm:$0xff] %v16786_v37  ;;  %19083 = vst [vmem:[#allocation35_spill] sm:$0xff] %v16788_v1  ;;  %v6865_v19 = vadd.f32 %v6864_v18, %v16786_v37  ;;  %v6951_v45 = vmul.f32 %v16786_v37, %v16786_v37  ;;  %v6844_v53 = vadd.f32 %v6843_v48, %v16800_v49  ;;  %v16810_v16 = vpop.f32.mrb[26].mxu0  ;;  %v16812_v18 = vpop.f32.mrb[26].mxu1 }
 0x38e   : > { %19084 = vst [vmem:[#allocation36_spill] sm:$0xff] %v16790_v26  ;;  %19085 = vst [vmem:[#allocation37_spill] sm:$0xff] %v16792_v23  ;;  %v6950_v2 = vmul.f32 %v16800_v49, %v16800_v49  ;;  %v6886_v13 = vadd.f32 %v6885_v12, %v16802_v52  ;;  %v6952_v61 = vmul.f32 %v16802_v52, %v16802_v52  ;;  %v16817_v48 = vpop.f32.mrb[27].mxu0  ;;  %v16819_v17 = vpop.f32.mrb[27].mxu1  ;;  %v7197_v12 = vld [vmem:[%s18960_s2] sm:$0xf] }
 0x38f   : > { %19086 = vst [vmem:[#allocation38_spill] sm:$0xff] %v16800_v49  ;;  %19087 = vst [vmem:[#allocation39_spill] sm:$0xff] %v16802_v52  ;;  %v6976_v39 = vadd.f32 %v6975_v59, %v6949_v22  ;;  %v7018_v37 = vadd.f32 %v7017_v9, %v6951_v45  ;;  %v6824_v55 = vadd.f32 %v6823_v60, %v16810_v16  ;;  %v7283_v9 = vld [vmem:[%s18961_s3] sm:$0xf] }
 0x390   : > { %19088 = vst [vmem:[#allocation40_spill] sm:$0xff] %v16810_v16  ;;  %19089 = vst [vmem:[#allocation41_spill] sm:$0xff] %v16812_v18  ;;  %v6953_v44 = vmul.f32 %v16810_v16, %v16810_v16  ;;  %v6997_v52 = vadd.f32 %v6996_v38, %v6950_v2  ;;  %v7039_v49 = vadd.f32 %v7038_v54, %v6952_v61 }
 0x391   : > { %19090 = vst [vmem:[#allocation42_spill] sm:$0xff] %v16817_v48  ;;  %19091 = vst [vmem:[#allocation43_spill] sm:$0xff] %v16819_v17  ;;  %v6866_v58 = vadd.f32 %v6865_v19, %v16812_v18  ;;  %v6955_v59 = vmul.f32 %v16812_v18, %v16812_v18  ;;  %v6845_v22 = vadd.f32 %v6844_v53, %v16817_v48 }
 0x392   : > { %v6977_v60 = vadd.f32 %v6976_v39, %v6953_v44  ;;  %v6954_v45 = vmul.f32 %v16817_v48, %v16817_v48  ;;  %v6887_v16 = vadd.f32 %v6886_v13, %v16819_v17  ;;  %v6956_v38 = vmul.f32 %v16819_v17, %v16819_v17 }
 0x393   : > { %v7019_v36 = vadd.f32 %v7018_v37, %v6955_v59  ;;  %v16837_v54 = vrot.slane %v7197_v12, %v16782_v0  ;;  %v16840_v19 = vrot.slane %v7197_v12, %v16788_v1  ;;  %v16843_v39 = vrot.slane %v7283_v9, %v16782_v0  ;;  %v16851_v13 = vpop.f32.mrb[28].mxu0  ;;  %v16853_v61 = vpop.f32.mrb[28].mxu1 }
 0x394   : > { %v6998_v2 = vadd.f32 %v6997_v52, %v6954_v45  ;;  %v16846_v44 = vrot.slane %v7283_v9, %v16788_v1  ;;  %v16849_v53 = vrot.slane %v7197_v12, %v16790_v26  ;;  %v7040_v37 = vadd.f32 %v7039_v49, %v6956_v38  ;;  %v16870_v0 = vpop.f32.mrb[29].mxu0 }
 0x395   : > { %19092 = vst [vmem:[#allocation44_spill] sm:$0xff] %v16837_v54  ;;  %19093 = vst [vmem:[#allocation45_spill] sm:$0xff] %v16840_v19  ;;  %v16856_v59 = vrot.slane %v7283_v9, %v16790_v26  ;;  %v16859_v18 = vrot.slane %v7197_v12, %v16792_v23  ;;  %v16862_v52 = vrot.slane %v7283_v9, %v16792_v23  ;;  %v16872_v26 = vpop.f32.mrb[29].mxu1  ;;  %v16880_v17 = vpop.f32.mrb[30].mxu0 }
 0x396   : > { %19094 = vst [vmem:[#allocation46_spill] sm:$0xff] %v16843_v39  ;;  %19095 = vst [vmem:[#allocation47_spill] sm:$0xff] %v16846_v44  ;;  %v6825_v45 = vadd.f32 %v6824_v55, %v16851_v13  ;;  %v6957_v1 = vmul.f32 %v16851_v13, %v16851_v13  ;;  %v6867_v49 = vadd.f32 %v6866_v58, %v16853_v61  ;;  %v16882_v58 = vpop.f32.mrb[30].mxu1 }
 0x397   : > { %19096 = vst [vmem:[#allocation48_spill] sm:$0xff] %v16849_v53  ;;  %19097 = vst [vmem:[#allocation49_spill] sm:$0xff] %v16856_v59  ;;  %v6959_v38 = vmul.f32 %v16853_v61, %v16853_v61  ;;  %v6846_v12 = vadd.f32 %v6845_v22, %v16870_v0  ;;  %v6958_v9 = vmul.f32 %v16870_v0, %v16870_v0  ;;  %v16887_v22 = vpop.f32.mrb[31].mxu0  ;;  %v16889_v53 = vpop.f32.mrb[31].mxu1 }
 0x398   : > { %19098 = vst [vmem:[#allocation50_spill] sm:$0xff] %v16859_v18  ;;  %19099 = vst [vmem:[#allocation51_spill] sm:$0xff] %v16862_v52  ;;  %v6888_v23 = vadd.f32 %v6887_v16, %v16872_v26  ;;  %v6960_v55 = vmul.f32 %v16872_v26, %v16872_v26  ;;  %v6978_v48 = vadd.f32 %v6977_v60, %v6957_v1 }
 0x399   : > { %v7020_v52 = vadd.f32 %v7019_v36, %v6959_v38  ;;  %v6826_v59 = vadd.f32 %v6825_v45, %v16880_v17  ;;  %v6961_v18 = vmul.f32 %v16880_v17, %v16880_v17  ;;  %v6999_v44 = vadd.f32 %v6998_v2, %v6958_v9 }
 0x39a   : > { %v7041_v16 = vadd.f32 %v7040_v37, %v6960_v55  ;;  %v6868_v39 = vadd.f32 %v6867_v49, %v16882_v58  ;;  %v6963_v19 = vmul.f32 %v16882_v58, %v16882_v58  ;;  %v6847_v36 = vadd.f32 %v6846_v12, %v16887_v22 }
 0x39b   : > { %v6827_v54 = vrot.slane %v6826_v59, 4  ;;  %v6979_v8 = vadd.f32 %v6978_v48, %v6961_v18  ;;  %v6962_v1 = vmul.f32 %v16887_v22, %v16887_v22  ;;  %v6889_v38 = vadd.f32 %v6888_v23, %v16889_v53 }
 0x39c   : > { %v6869_v60 = vrot.slane %v6868_v39, 4  ;;  %v7021_v45 = vadd.f32 %v7020_v52, %v6963_v19  ;;  %v6964_v2 = vmul.f32 %v16889_v53, %v16889_v53  ;;  %v6848_v49 = vrot.slane %v6847_v36, 4 }
 0x39d   : > { %v6828_v37 = vadd.f32 %v6827_v54, %v6826_v59  ;;  %v6980_v9 = vrot.slane %v6979_v8, 4  ;;  %v7000_v55 = vadd.f32 %v6999_v44, %v6962_v1  ;;  %v6890_v21 = vrot.slane %v6889_v38, 4 }
 0x39e   : > { %v6870_v27 = vadd.f32 %v6869_v60, %v6868_v39  ;;  %v7022_v3 = vrot.slane %v7021_v45, 4  ;;  %v7042_v18 = vadd.f32 %v7041_v16, %v6964_v2  ;;  %v6849_v7 = vadd.f32 %v6848_v49, %v6847_v36 }
 0x39f   : > { %v6829_v48 = vrot.slane %v6828_v37, 2  ;;  %v6981_v12 = vadd.f32 %v6980_v9, %v6979_v8  ;;  %v7001_v20 = vrot.slane %v7000_v55, 4  ;;  %v6891_v19 = vadd.f32 %v6890_v21, %v6889_v38 }
 0x3a0   : > { %v6871_v6 = vrot.slane %v6870_v27, 2  ;;  %v7023_v29 = vadd.f32 %v7022_v3, %v7021_v45  ;;  %v7043_v52 = vrot.slane %v7042_v18, 4  ;;  %v6850_v28 = vrot.slane %v6849_v7, 2 }
 0x3a1   : > { %v6830_v23 = vadd.f32 %v6829_v48, %v6828_v37  ;;  %v6982_v15 = vrot.slane %v6981_v12, 2  ;;  %v7002_v14 = vadd.f32 %v7001_v20, %v7000_v55  ;;  %v6892_v43 = vrot.slane %v6891_v19, 2 }
 0x3a2   : > { %v6872_v54 = vadd.f32 %v6871_v6, %v6870_v27  ;;  %v7024_v59 = vrot.slane %v7023_v29, 2  ;;  %v7044_v44 = vadd.f32 %v7043_v52, %v7042_v18  ;;  %v6851_v60 = vadd.f32 %v6850_v28, %v6849_v7 }
 0x3a3   : > { %v6831_v39 = vrot.slane %v6830_v23, 1  ;;  %v6983_v1 = vadd.f32 %v6982_v15, %v6981_v12  ;;  %v7003_v16 = vrot.slane %v7002_v14, 2  ;;  %v6893_v36 = vadd.f32 %v6892_v43, %v6891_v19 }
 0x3a4   : > { %v6873_v2 = vrot.slane %v6872_v54, 1  ;;  %v7025_v8 = vadd.f32 %v7024_v59, %v7023_v29  ;;  %v7045_v9 = vrot.slane %v7044_v44, 2  ;;  %v6852_v21 = vrot.slane %v6851_v60, 1 }
 0x3a5   : > { %v6832_v49 = vadd.f32 %v6831_v39, %v6830_v23  ;;  %v6984_v3 = vrot.slane %v6983_v1, 1  ;;  %v7004_v45 = vadd.f32 %v7003_v16, %v7002_v14  ;;  %v6894_v48 = vrot.slane %v6893_v36, 1 }
 0x3a6   : > { %v6874_v38 = vadd.f32 %v6873_v2, %v6872_v54  ;;  %v7026_v37 = vrot.slane %v7025_v8, 1  ;;  %v7046_v20 = vadd.f32 %v7045_v9, %v7044_v44  ;;  %v6853_v55 = vadd.f32 %v6852_v21, %v6851_v60 }
 0x3a7   : > { %v16900_v6 = vmul.f32 0.0078125, %v6832_v49  ;;  %v6985_v27 = vadd.f32 %v6984_v3, %v6983_v1  ;;  %v7005_v18 = vrot.slane %v7004_v45, 1  ;;  %v6895_v28 = vadd.f32 %v6894_v48, %v6893_v36 }
 0x3a8   : > { %v16902_v15 = vmul.f32 0.0078125, %v6874_v38  ;;  %v7027_v7 = vadd.f32 %v7026_v37, %v7025_v8  ;;  %v7047_v29 = vrot.slane %v7046_v20, 1  ;;  %v16916_v39 = vmul.f32 0.0078125, %v6853_v55 }
 0x3a9   : > { %v7049_v43 = vmul.f32 0.0078125, %v6985_v27  ;;  %v7053_v12 = vmul.f32 %v16900_v6, %v16900_v6  ;;  %v7117_v14 = vsub.f32 %v16851_v13, %v16900_v6  ;;  %v7121_v19 = vsub.f32 %v16880_v17, %v16900_v6 }
 0x3aa   : > { %v7051_v52 = vmul.f32 0.0078125, %v7027_v7  ;;  %v7055_v23 = vmul.f32 %v16902_v15, %v16902_v15  ;;  %v7119_v54 = vsub.f32 %v16853_v61, %v16902_v15  ;;  %v7123_v59 = vsub.f32 %v16882_v58, %v16902_v15 }
 0x3ab   : > { %v7057_v44 = vsub.f32 %v7049_v43, %v7053_v12  ;;  %v7006_v1 = vadd.f32 %v7005_v18, %v7004_v45  ;;  %v16918_v60 = vmul.f32 0.0078125, %v6895_v28  ;;  %v7048_v2 = vadd.f32 %v7047_v29, %v7046_v20  ;;  %v19120_v29 = vld [vmem:[#allocation48_spill] sm:$0xff] }
 0x3ac   : > { %v7059_v16 = vsub.f32 %v7051_v52, %v7055_v23  ;;  %v7061_v8 = vsub.f32 %v16542_v32, %v16900_v6  ;;  %v7065_v36 = vsub.f32 %v16558_v40, %v16900_v6  ;;  %v7054_v3 = vmul.f32 %v16916_v39, %v16916_v39 }
 0x3ad   : > { %v7125_v9 = vadd.f32 1e-05, %v7057_v44  ;;  %v7050_v49 = vmul.f32 0.0078125, %v7006_v1  ;;  %v7118_v21 = vsub.f32 %v16870_v0, %v16916_v39  ;;  %v7052_v37 = vmul.f32 0.0078125, %v7048_v2 }
 0x3ae   : > { %v7127_v38 = vadd.f32 1e-05, %v7059_v16  ;;  %v7056_v48 = vmul.f32 %v16918_v60, %v16918_v60  ;;  %v7063_v43 = vsub.f32 %v16544_v33, %v16902_v15  ;;  %v7067_v52 = vsub.f32 %v16560_v41, %v16902_v15  ;;  %v19113_v33 = vld [vmem:[#allocation44_spill] sm:$0xff] }
 0x3af   : > { %15887 = vrsqrt.f32 %v7125_v9  ;;  %v7058_v32 = vsub.f32 %v7050_v49, %v7054_v3  ;;  %v19118_v18 = vsub.f32 %v16872_v26, %v16918_v60  ;;  %v19121_v49 = vld [vmem:[#allocation50_spill] sm:$0xff] }
 0x3b0   : > { %15889 = vrsqrt.f32 %v7127_v38  ;;  %v7060_v27 = vsub.f32 %v7052_v37, %v7056_v48  ;;  %v19123_v37 = vld [vmem:[#allocation51_spill] sm:$0xff] }
 0x3b1   : > { %v7126_v7 = vadd.f32 1e-05, %v7058_v32 }
 0x3b2   : > { %v7128_v12 = vadd.f32 1e-05, %v7060_v27 }
 0x3b3   : > { %15891 = vrsqrt.f32 %v7126_v7 }
 0x3b4   : > { %15893 = vrsqrt.f32 %v7128_v12 }
 0x3b9   : > { %v16996_v23 = vpop.eup %15887 }
 0x3ba   : > { %v17006_v55 = vpop.eup %15889  ;;  %v7189_v44 = vmul.f32 %v16996_v23, %v7117_v14  ;;  %v7193_v2 = vmul.f32 %v16996_v23, %v7121_v19  ;;  %v7133_v41 = vmul.f32 %v16996_v23, %v7061_v8  ;;  %v7137_v1 = vmul.f32 %v16996_v23, %v7065_v36 }
 0x3bb   : > { %v7191_v16 = vmul.f32 %v17006_v55, %v7119_v54  ;;  %v7195_v13 = vmul.f32 %v17006_v55, %v7123_v59  ;;  %v7135_v14 = vmul.f32 %v17006_v55, %v7063_v43  ;;  %v7139_v17 = vmul.f32 %v17006_v55, %v7067_v52  ;;  %v19114_v54 = vld [vmem:[#allocation45_spill] sm:$0xff]  ;;  %v19115_v52 = vld [vmem:[#allocation46_spill] sm:$0xff] }
 0x3bc   : > { %v7275_v19 = vmul.f32 %v19113_v33, %v7189_v44  ;;  %v7279_v8 = vmul.f32 %v19113_v33, %v7193_v2  ;;  %v7219_v36 = vmul.f32 %v19113_v33, %v7133_v41  ;;  %v7223_v20 = vmul.f32 %v19113_v33, %v7137_v1 }
 0x3bd   : > { %v17032_v61 = vpop.eup %15891  ;;  %v7277_v40 = vmul.f32 %v19114_v54, %v7191_v16  ;;  %v7281_v58 = vmul.f32 %v19114_v54, %v7195_v13  ;;  %v7221_v59 = vmul.f32 %v19114_v54, %v7135_v14  ;;  %v7225_v43 = vmul.f32 %v19114_v54, %v7139_v17  ;;  %v19117_v13 = vld [vmem:[#allocation47_spill] sm:$0xff] }
 0x3be   : > { %v17038_v45 = vpop.eup %15893  ;;  %v7361_v44 = vadd.f32 %v19115_v52, %v7275_v19  ;;  %v7365_v2 = vadd.f32 %v19115_v52, %v7279_v8  ;;  %v7190_v1 = vmul.f32 %v17032_v61, %v7118_v21  ;;  %v19116_v16 = vsub.f32 %v16887_v22, %v16916_v39 }
 0x3bf   : > { %v7363_v14 = vadd.f32 %v19117_v13, %v7277_v40  ;;  %v7367_v17 = vadd.f32 %v19117_v13, %v7281_v58  ;;  %v7192_v19 = vmul.f32 %v17038_v45, %v19118_v18  ;;  %v19119_v8 = vsub.f32 %v16889_v53, %v16918_v60  ;;  %v19122_v18 = vld [vmem:[#allocation49_spill] sm:$0xff] }
 0x3c0   : > { %v7194_v41 = vmul.f32 %v17032_v61, %v19116_v16  ;;  %v7425_v21 = vmul.f32 0.2, %v7361_v44  ;;  %v7429_v28 = vmul.f32 0.2, %v7365_v2  ;;  %v7276_v22 = vmul.f32 %v19120_v29, %v7190_v1 }
 0x3c1   : > { %v7196_v0 = vmul.f32 %v17038_v45, %v19119_v8  ;;  %v7427_v9 = vmul.f32 0.2, %v7363_v14  ;;  %v7431_v40 = vmul.f32 0.2, %v7367_v17  ;;  %v7278_v58 = vmul.f32 %v19121_v49, %v7192_v19 }
 0x3c2   : > { %v7280_v16 = vmul.f32 %v19120_v29, %v7194_v41  ;;  %v7489_v26 = vmax.f32 %v7361_v44, %v7425_v21  ;;  %v7493_v27 = vmax.f32 %v7365_v2, %v7429_v28  ;;  %v7362_v32 = vadd.f32 %v19122_v18, %v7276_v22 }
 0x3c3   : > { %v7282_v12 = vmul.f32 %v19121_v49, %v7196_v0  ;;  %v7491_v48 = vmax.f32 %v7363_v14, %v7427_v9  ;;  %v7495_v8 = vmax.f32 %v7367_v17, %v7431_v40  ;;  %v7364_v38 = vadd.f32 %v19123_v37, %v7278_v58 }
 0x3c4   : > { %v7366_v53 = vadd.f32 %v19122_v18, %v7280_v16  ;;  %v17068_v3 = vpack.c.bf16 %v7493_v27, %v7489_v26  ;;  %v7426_v41 = vmul.f32 0.2, %v7362_v32  ;;  %v19124_v19 = vsub.f32 %v16546_v34, %v16916_v39 }
 0x3c5   : > { %v7368_v1 = vadd.f32 %v19123_v37, %v7282_v12  ;;  %v17074_v28 = vpack.c.bf16 %v7495_v8, %v7491_v48  ;;  %v7428_v2 = vmul.f32 0.2, %v7364_v38  ;;  %v19125_v9 = vsub.f32 %v16570_v46, %v16916_v39 }
 0x3c6   : > { %v7430_v7 = vmul.f32 0.2, %v7366_v53  ;;  %v7134_v44 = vmul.f32 %v17032_v61, %v19124_v19  ;;  %v7490_v17 = vmax.f32 %v7362_v32, %v7426_v41  ;;  %v19126_v21 = vsub.f32 %v16548_v35, %v16918_v60 }
 0x3c7   : > { %v7432_v0 = vmul.f32 0.2, %v7368_v1  ;;  %v7138_v14 = vmul.f32 %v17032_v61, %v19125_v9  ;;  %v7492_v22 = vmax.f32 %v7364_v38, %v7428_v2  ;;  %v19127_v40 = vsub.f32 %v16572_v47, %v16918_v60 }
 0x3c8   : > { %v7494_v12 = vmax.f32 %v7366_v53, %v7430_v7  ;;  %v7220_v27 = vmul.f32 %v19120_v29, %v7134_v44  ;;  %v7136_v34 = vmul.f32 %v17038_v45, %v19126_v21  ;;  %v7305_v26 = vadd.f32 %v19115_v52, %v7219_v36 }
 0x3c9   : > { %v7496_v16 = vmax.f32 %v7368_v1, %v7432_v0  ;;  %v7224_v48 = vmul.f32 %v19120_v29, %v7138_v14  ;;  %v7140_v46 = vmul.f32 %v17038_v45, %v19127_v40  ;;  %v7309_v8 = vadd.f32 %v19115_v52, %v7223_v20 }
 0x3ca   : > { %v17090_v58 = vpack.c.bf16 %v7494_v12, %v7490_v17  ;;  %v7306_v32 = vadd.f32 %v19122_v18, %v7220_v27  ;;  %v7222_v7 = vmul.f32 %v19121_v49, %v7136_v34  ;;  %v7369_v41 = vmul.f32 0.2, %v7305_v26 }
 0x3cb   : > { %v17095_v35 = vpack.c.bf16 %v7496_v16, %v7492_v22  ;;  %v7310_v38 = vadd.f32 %v19122_v18, %v7224_v48  ;;  %v7226_v53 = vmul.f32 %v19121_v49, %v7140_v46  ;;  %v7307_v19 = vadd.f32 %v19117_v13, %v7221_v59 }
 0x3cc   : > { %v7370_v1 = vmul.f32 0.2, %v7306_v32  ;;  %v7308_v47 = vadd.f32 %v19123_v37, %v7222_v7  ;;  %v7373_v0 = vmul.f32 0.2, %v7309_v8  ;;  %v7311_v36 = vadd.f32 %v19117_v13, %v7225_v43 }
 0x3cd   : > { %v7374_v44 = vmul.f32 0.2, %v7310_v38  ;;  %v7312_v2 = vadd.f32 %v19123_v37, %v7226_v53  ;;  %v7433_v17 = vmax.f32 %v7305_v26, %v7369_v41  ;;  %v7371_v12 = vmul.f32 0.2, %v7307_v19 }
 0x3ce   : > { %v7434_v9 = vmax.f32 %v7306_v32, %v7370_v1  ;;  %v7372_v14 = vmul.f32 0.2, %v7308_v47  ;;  %v7437_v34 = vmax.f32 %v7309_v8, %v7373_v0  ;;  %v7375_v20 = vmul.f32 0.2, %v7311_v36 }
 0x3cf   : > { %v7438_v27 = vmax.f32 %v7310_v38, %v7374_v44  ;;  %v7376_v21 = vmul.f32 0.2, %v7312_v2  ;;  %v7435_v16 = vmax.f32 %v7307_v19, %v7371_v12  ;;  %v19128_v48 = vsub.f32 %v16592_v62, %v16916_v39 }
 0x3d0   : > { %v7436_v22 = vmax.f32 %v7308_v47, %v7372_v14  ;;  %v19129_v40 = vsub.f32 %v16609_v10, %v16916_v39  ;;  %v17114_v7 = vpack.c.bf16 %v7437_v34, %v7433_v17  ;;  %v7439_v26 = vmax.f32 %v7311_v36, %v7375_v20 }
 0x3d1   : > { %v7142_v59 = vmul.f32 %v17032_v61, %v19128_v48  ;;  %v17112_v46 = vpack.c.bf16 %v7438_v27, %v7434_v9  ;;  %v7440_v32 = vmax.f32 %v7312_v2, %v7376_v21  ;;  %v19130_v62 = vsub.f32 %v16594_v63, %v16918_v60 }
 0x3d2   : > { %v7146_v43 = vmul.f32 %v17032_v61, %v19129_v40  ;;  %v19131_v10 = vsub.f32 %v16611_v11, %v16918_v60  ;;  %v17129_v41 = vpack.c.bf16 %v7439_v26, %v7435_v16  ;;  %v19132_v19 = vsub.f32 %v16582_v56, %v16900_v6 }
 0x3d3   : > { %v7228_v38 = vmul.f32 %v19120_v29, %v7142_v59  ;;  %v7144_v8 = vmul.f32 %v17038_v45, %v19130_v62  ;;  %7545 = vmatprep.subr.bf16.mxu0 %v17112_v46  ;;  %v17127_v47 = vpack.c.bf16 %v7440_v32, %v7436_v22  ;;  %v19133_v63 = vsub.f32 %v16602_v4, %v16900_v6 }
 0x3d4   : > { %v7232_v53 = vmul.f32 %v19120_v29, %v7146_v43  ;;  %v7148_v1 = vmul.f32 %v17038_v45, %v19131_v10  ;;  %v7141_v44 = vmul.f32 %v16996_v23, %v19132_v19  ;;  %7546 = vmatpush1.bf16.msra.mxu0 %v17114_v7  ;;  %v19134_v4 = vsub.f32 %v16584_v57, %v16902_v15 }
 0x3d5   : > { %v7145_v2 = vmul.f32 %v16996_v23, %v19133_v63  ;;  %v7314_v11 = vadd.f32 %v19122_v18, %v7228_v38  ;;  %v7230_v36 = vmul.f32 %v19121_v49, %v7144_v8  ;;  %7598 = vmatprep.subr.bf16.mxu1 %v17127_v47  ;;  %v19135_v12 = vsub.f32 %v16604_v5, %v16902_v15 }
 0x3d6   : > { %v7318_v0 = vadd.f32 %v19122_v18, %v7232_v53  ;;  %v7234_v9 = vmul.f32 %v19121_v49, %v7148_v1  ;;  %v7227_v56 = vmul.f32 %v19113_v33, %v7141_v44  ;;  %v7143_v17 = vmul.f32 %v17006_v55, %v19134_v4  ;;  %7599 = vmatpush1.bf16.msra.mxu1 %v17129_v41 }
 0x3d7   : > { %v7231_v14 = vmul.f32 %v19113_v33, %v7145_v2  ;;  %v7147_v27 = vmul.f32 %v17006_v55, %v19135_v12  ;;  %v7378_v21 = vmul.f32 0.2, %v7314_v11  ;;  %v7316_v20 = vadd.f32 %v19123_v37, %v7230_v36 }
 0x3d8   : > { %v7382_v34 = vmul.f32 0.2, %v7318_v0  ;;  %v7320_v22 = vadd.f32 %v19123_v37, %v7234_v9  ;;  %v7313_v16 = vadd.f32 %v19115_v52, %v7227_v56  ;;  %v7229_v57 = vmul.f32 %v19114_v54, %v7143_v17 }
 0x3d9   : > { %v7317_v48 = vadd.f32 %v19115_v52, %v7231_v14  ;;  %v7233_v59 = vmul.f32 %v19114_v54, %v7147_v27  ;;  %v7442_v40 = vmax.f32 %v7314_v11, %v7378_v21  ;;  %v7380_v43 = vmul.f32 0.2, %v7316_v20 }
 0x3da   : > { %v7446_v5 = vmax.f32 %v7318_v0, %v7382_v34  ;;  %v7384_v32 = vmul.f32 0.2, %v7320_v22  ;;  %v7377_v26 = vmul.f32 0.2, %v7313_v16  ;;  %v7315_v53 = vadd.f32 %v19117_v13, %v7229_v57 }
 0x3db   : > { %v7381_v38 = vmul.f32 0.2, %v7317_v48  ;;  %v7319_v62 = vadd.f32 %v19117_v13, %v7233_v59  ;;  %v7444_v10 = vmax.f32 %v7316_v20, %v7380_v43  ;;  %v19136_v19 = vsub.f32 %v16632_v30, %v16916_v39 }
 0x3dc   : > { %v17164_v8 = vpack.c.bf16 %v7446_v5, %v7442_v40  ;;  %v7448_v1 = vmax.f32 %v7320_v22, %v7384_v32  ;;  %v7441_v63 = vmax.f32 %v7313_v16, %v7377_v26  ;;  %v7379_v11 = vmul.f32 0.2, %v7315_v53 }
 0x3dd   : > { %v7150_v44 = vmul.f32 %v17032_v61, %v19136_v19  ;;  %v7445_v2 = vmax.f32 %v7317_v48, %v7381_v38  ;;  %v7383_v0 = vmul.f32 0.2, %v7319_v62  ;;  %v19137_v9 = vsub.f32 %v16649_v50, %v16916_v39 }
 0x3de   : > { %7547 = vmatprep.subr.bf16.mxu0 %v17164_v8  ;;  %v17171_v36 = vpack.c.bf16 %v7448_v1, %v7444_v10  ;;  %v19138_v30 = vsub.f32 %v16634_v31, %v16918_v60  ;;  %v7443_v12 = vmax.f32 %v7315_v53, %v7379_v11  ;;  %v19139_v21 = vsub.f32 %v16651_v51, %v16918_v60  ;;  %v19143_v53 = vld [vmem:[#allocation7_spill] sm:$0xff] }
 0x3df   : > { %v7154_v56 = vmul.f32 %v17032_v61, %v19137_v9  ;;  %v7236_v14 = vmul.f32 %v19120_v29, %v7150_v44  ;;  %v17182_v17 = vpack.c.bf16 %v7445_v2, %v7441_v63  ;;  %v7447_v27 = vmax.f32 %v7319_v62, %v7383_v0 }
 0x3e0   : > { %v7152_v4 = vmul.f32 %v17038_v45, %v19138_v30  ;;  %v7156_v34 = vmul.f32 %v17038_v45, %v19139_v21  ;;  %7600 = vmatprep.subr.bf16.mxu1 %v17171_v36  ;;  %v19140_v31 = vsub.f32 %v16622_v24, %v16900_v6  ;;  %v19141_v57 = vsub.f32 %v16642_v42, %v16900_v6 }
 0x3e1   : > { %v7240_v50 = vmul.f32 %v19120_v29, %v7154_v56  ;;  %v7322_v20 = vadd.f32 %v19122_v18, %v7236_v14  ;;  %7548 = vmatpush1.bf16.msra.mxu0 %v17182_v17  ;;  %v17197_v48 = vpack.c.bf16 %v7447_v27, %v7443_v12  ;;  %v19142_v40 = vsub.f32 %v16624_v25, %v16902_v15 }
 0x3e2   : > { %v7238_v22 = vmul.f32 %v19121_v49, %v7152_v4  ;;  %v7149_v16 = vmul.f32 %v16996_v23, %v19140_v31  ;;  %v7242_v51 = vmul.f32 %v19121_v49, %v7156_v34  ;;  %v7153_v59 = vmul.f32 %v16996_v23, %v19141_v57  ;;  %v19145_v4 = vld [vmem:[#allocation10_spill] sm:$0xff] }
 0x3e3   : > { %v7151_v5 = vmul.f32 %v17006_v55, %v19142_v40  ;;  %v7326_v24 = vadd.f32 %v19122_v18, %v7240_v50  ;;  %v7386_v43 = vmul.f32 0.2, %v7322_v20  ;;  %7601 = vmatpush1.bf16.msra.mxu1 %v17197_v48  ;;  %v19144_v62 = vsub.f32 %v19143_v53, %v16902_v15 }
 0x3e4   : > { %v7324_v32 = vadd.f32 %v19123_v37, %v7238_v22  ;;  %v7235_v26 = vmul.f32 %v19113_v33, %v7149_v16  ;;  %v7328_v38 = vadd.f32 %v19123_v37, %v7242_v51  ;;  %v7239_v42 = vmul.f32 %v19113_v33, %v7153_v59  ;;  %v19147_v16 = vld [vmem:[#allocation14_spill] sm:$0xff] }
 0x3e5   : > { %v7155_v25 = vmul.f32 %v17006_v55, %v19144_v62  ;;  %v7237_v10 = vmul.f32 %v19114_v54, %v7151_v5  ;;  %v7390_v1 = vmul.f32 0.2, %v7326_v24  ;;  %v7450_v19 = vmax.f32 %v7322_v20, %v7386_v43  ;;  %v19151_v62 = vld [vmem:[#allocation15_spill] sm:$0xff] }
 0x3e6   : > { %v7388_v44 = vmul.f32 0.2, %v7324_v32  ;;  %v7321_v63 = vadd.f32 %v19115_v52, %v7235_v26  ;;  %v7392_v2 = vmul.f32 0.2, %v7328_v38  ;;  %v7325_v11 = vadd.f32 %v19115_v52, %v7239_v42 }
 0x3e7   : > { %v7241_v0 = vmul.f32 %v19114_v54, %v7155_v25  ;;  %v7323_v9 = vadd.f32 %v19117_v13, %v7237_v10  ;;  %v7454_v56 = vmax.f32 %v7326_v24, %v7390_v1  ;;  %v19146_v12 = vsub.f32 %v19145_v4, %v16916_v39 }
 0x3e8   : > { %v7452_v14 = vmax.f32 %v7324_v32, %v7388_v44  ;;  %v7385_v30 = vmul.f32 0.2, %v7321_v63  ;;  %v7456_v21 = vmax.f32 %v7328_v38, %v7392_v2  ;;  %v7389_v34 = vmul.f32 0.2, %v7325_v11  ;;  %v19149_v38 = vld [vmem:[#allocation11_spill] sm:$0xff]  ;;  %v19153_v44 = vld [vmem:[#allocation8_spill] sm:$0xff] }
 0x3e9   : > { %v7158_v27 = vmul.f32 %v17032_v61, %v19146_v12  ;;  %v7327_v50 = vadd.f32 %v19117_v13, %v7241_v0  ;;  %v7387_v20 = vmul.f32 0.2, %v7323_v9  ;;  %v17228_v22 = vpack.c.bf16 %v7454_v56, %v7450_v19 }
 0x3ea   : > { %v7449_v31 = vmax.f32 %v7321_v63, %v7385_v30  ;;  %v19148_v51 = vsub.f32 %v19147_v16, %v16916_v39  ;;  %v17235_v40 = vpack.c.bf16 %v7456_v21, %v7452_v14  ;;  %v7453_v5 = vmax.f32 %v7325_v11, %v7389_v34  ;;  %v19155_v11 = vld [vmem:[#allocation12_spill] sm:$0xff]  ;;  %v19157_v34 = vld [vmem:[#allocation9_spill] sm:$0xff] }
 0x3eb   : > { %v7244_v59 = vmul.f32 %v19120_v29, %v7158_v27  ;;  %v7391_v24 = vmul.f32 0.2, %v7327_v50  ;;  %v7451_v43 = vmax.f32 %v7323_v9, %v7387_v20  ;;  %7549 = vmatprep.subr.bf16.mxu0 %v17228_v22  ;;  %v19150_v42 = vsub.f32 %v19149_v38, %v16918_v60 }
 0x3ec   : > { %v7162_v57 = vmul.f32 %v17032_v61, %v19148_v51  ;;  %v19152_v25 = vsub.f32 %v19151_v62, %v16918_v60  ;;  %7602 = vmatprep.subr.bf16.mxu1 %v17235_v40  ;;  %v17249_v1 = vpack.c.bf16 %v7453_v5, %v7449_v31  ;;  %v19154_v63 = vsub.f32 %v19153_v44, %v16900_v6  ;;  %v19161_v62 = vld [vmem:[#allocation18_spill] sm:$0xff] }
 0x3ed   : > { %v7330_v26 = vadd.f32 %v19122_v18, %v7244_v59  ;;  %v7160_v53 = vmul.f32 %v17038_v45, %v19150_v42  ;;  %v7455_v19 = vmax.f32 %v7327_v50, %v7391_v24  ;;  %v19156_v0 = vsub.f32 %v19155_v11, %v16900_v6  ;;  %v19159_v24 = vld [vmem:[#allocation13_spill] sm:$0xff] }
 0x3ee   : > { %v7248_v32 = vmul.f32 %v19120_v29, %v7162_v57  ;;  %v7164_v10 = vmul.f32 %v17038_v45, %v19152_v25  ;;  %v7157_v2 = vmul.f32 %v16996_v23, %v19154_v63  ;;  %7550 = vmatpush1.bf16.msra.mxu0 %v17249_v1  ;;  %v19158_v50 = vsub.f32 %v19157_v34, %v16902_v15 }
 0x3ef   : > { %v7161_v9 = vmul.f32 %v16996_v23, %v19156_v0  ;;  %v7394_v14 = vmul.f32 0.2, %v7330_v26  ;;  %v7246_v30 = vmul.f32 %v19121_v49, %v7160_v53  ;;  %v17263_v12 = vpack.c.bf16 %v7455_v19, %v7451_v43 }
 0x3f0   : > { %v7334_v56 = vadd.f32 %v19122_v18, %v7248_v32  ;;  %v7250_v4 = vmul.f32 %v19121_v49, %v7164_v10  ;;  %v7243_v27 = vmul.f32 %v19113_v33, %v7157_v2  ;;  %v7159_v20 = vmul.f32 %v17006_v55, %v19158_v50 }
 0x3f1   : > { %v7247_v21 = vmul.f32 %v19113_v33, %v7161_v9  ;;  %v7458_v16 = vmax.f32 %v7330_v26, %v7394_v14  ;;  %v7332_v51 = vadd.f32 %v19123_v37, %v7246_v30  ;;  %7603 = vmatpush1.bf16.msra.mxu1 %v17263_v12  ;;  %v19160_v43 = vsub.f32 %v19159_v24, %v16902_v15  ;;  %v19163_v14 = vld [vmem:[#allocation22_spill] sm:$0xff] }
 0x3f2   : > { %v7398_v31 = vmul.f32 0.2, %v7334_v56  ;;  %v7336_v57 = vadd.f32 %v19123_v37, %v7250_v4  ;;  %v7329_v59 = vadd.f32 %v19115_v52, %v7243_v27  ;;  %v7245_v38 = vmul.f32 %v19114_v54, %v7159_v20 }
 0x3f3   : > { %v7333_v5 = vadd.f32 %v19115_v52, %v7247_v21  ;;  %v7163_v32 = vmul.f32 %v17006_v55, %v19160_v43  ;;  %v7396_v53 = vmul.f32 0.2, %v7332_v51  ;;  %v19162_v25 = vsub.f32 %v19161_v62, %v16916_v39  ;;  %v19167_v43 = vld [vmem:[#allocation23_spill] sm:$0xff]  ;;  %v19169_v62 = vld [vmem:[#allocation16_spill] sm:$0xff] }
 0x3f4   : > { %v7462_v42 = vmax.f32 %v7334_v56, %v7398_v31  ;;  %v7400_v26 = vmul.f32 0.2, %v7336_v57  ;;  %v7393_v19 = vmul.f32 0.2, %v7329_v59  ;;  %v7331_v2 = vadd.f32 %v19117_v13, %v7245_v38 }
 0x3f5   : > { %v7166_v10 = vmul.f32 %v17032_v61, %v19162_v25  ;;  %v7397_v44 = vmul.f32 0.2, %v7333_v5  ;;  %v7249_v63 = vmul.f32 %v19114_v54, %v7163_v32  ;;  %v7460_v0 = vmax.f32 %v7332_v51, %v7396_v53 }
 0x3f6   : > { %v17287_v11 = vpack.c.bf16 %v7462_v42, %v7458_v16  ;;  %v7464_v9 = vmax.f32 %v7336_v57, %v7400_v26  ;;  %v19164_v56 = vsub.f32 %v19163_v14, %v16916_v39  ;;  %v7457_v4 = vmax.f32 %v7329_v59, %v7393_v19  ;;  %v19165_v16 = vld [vmem:[#allocation19_spill] sm:$0xff] }
 0x3f7   : > { %v7461_v27 = vmax.f32 %v7333_v5, %v7397_v44  ;;  %v7335_v21 = vadd.f32 %v19117_v13, %v7249_v63  ;;  %v7395_v34 = vmul.f32 0.2, %v7331_v2  ;;  %v7252_v20 = vmul.f32 %v19120_v29, %v7166_v10  ;;  %v19170_v44 = vld [vmem:[#allocation20_spill] sm:$0xff] }
 0x3f8   : > { %v7170_v30 = vmul.f32 %v17032_v61, %v19164_v56  ;;  %7551 = vmatprep.subr.bf16.mxu0 %v17287_v11  ;;  %v17295_v50 = vpack.c.bf16 %v7464_v9, %v7460_v0  ;;  %v19166_v51 = vsub.f32 %v19165_v16, %v16918_v60  ;;  %v19168_v32 = vsub.f32 %v19167_v43, %v16918_v60 }
 0x3f9   : > { %v17303_v24 = vpack.c.bf16 %v7461_v27, %v7457_v4  ;;  %v7399_v59 = vmul.f32 0.2, %v7335_v21  ;;  %v7459_v5 = vmax.f32 %v7331_v2, %v7395_v34  ;;  %v7338_v42 = vadd.f32 %v19122_v18, %v7252_v20  ;;  %v19171_v2 = vld [vmem:[#allocation17_spill] sm:$0xff] }
 0x3fa   : > { %v7256_v31 = vmul.f32 %v19120_v29, %v7170_v30  ;;  %v7168_v57 = vmul.f32 %v17038_v45, %v19166_v51  ;;  %v7172_v38 = vmul.f32 %v17038_v45, %v19168_v32  ;;  %7604 = vmatprep.subr.bf16.mxu1 %v17295_v50  ;;  %v7093_v25 = vsub.f32 %v19169_v62, %v16900_v6  ;;  %v19172_v34 = vld [vmem:[#allocation21_spill] sm:$0xff] }
 0x3fb   : > { %7552 = vmatpush1.bf16.msra.mxu0 %v17303_v24  ;;  %v7463_v10 = vmax.f32 %v7335_v21, %v7399_v59  ;;  %v7097_v63 = vsub.f32 %v19170_v44, %v16900_v6  ;;  %v7095_v0 = vsub.f32 %v19171_v2, %v16902_v15  ;;  %v7402_v9 = vmul.f32 0.2, %v7338_v42  ;;  %v19174_v2 = vld [vmem:[#allocation30_spill] sm:$0xff] }
 0x3fc   : > { %v7342_v53 = vadd.f32 %v19122_v18, %v7256_v31  ;;  %v7254_v26 = vmul.f32 %v19121_v49, %v7168_v57  ;;  %v7258_v19 = vmul.f32 %v19121_v49, %v7172_v38  ;;  %v7165_v30 = vmul.f32 %v16996_v23, %v7093_v25 }
 0x3fd   : > { %v17323_v4 = vpack.c.bf16 %v7463_v10, %v7459_v5  ;;  %v7169_v21 = vmul.f32 %v16996_v23, %v7097_v63  ;;  %v7099_v20 = vsub.f32 %v19172_v34, %v16902_v15  ;;  %v7466_v31 = vmax.f32 %v7338_v42, %v7402_v9  ;;  %v19173_v42 = vld [vmem:[#allocation26_spill] sm:$0xff] }
 0x3fe   : > { %v7406_v14 = vmul.f32 0.2, %v7342_v53  ;;  %v7340_v56 = vadd.f32 %v19123_v37, %v7254_v26  ;;  %v7344_v27 = vadd.f32 %v19123_v37, %v7258_v19  ;;  %v7251_v57 = vmul.f32 %v19113_v33, %v7165_v30 }
 0x3ff   : > { %7605 = vmatpush1.bf16.msra.mxu1 %v17323_v4  ;;  %v7255_v43 = vmul.f32 %v19113_v33, %v7169_v21  ;;  %v7167_v5 = vmul.f32 %v17006_v55, %v7095_v0  ;;  %v7171_v32 = vmul.f32 %v17006_v55, %v7099_v20  ;;  %v7106_v0 = vsub.f32 %v19174_v2, %v16916_v39 }
 0x400   : > { %v7470_v16 = vmax.f32 %v7342_v53, %v7406_v14  ;;  %v7404_v51 = vmul.f32 0.2, %v7340_v56  ;;  %v7408_v59 = vmul.f32 0.2, %v7344_v27  ;;  %v7337_v62 = vadd.f32 %v19115_v52, %v7251_v57  ;;  %v19175_v14 = vld [vmem:[#allocation27_spill] sm:$0xff] }
 0x401   : > { %v7102_v53 = vsub.f32 %v19173_v42, %v16916_v39  ;;  %v7341_v10 = vadd.f32 %v19115_v52, %v7255_v43  ;;  %v7253_v19 = vmul.f32 %v19114_v54, %v7167_v5  ;;  %v7257_v44 = vmul.f32 %v19114_v54, %v7171_v32 }
 0x402   : > { %v17334_v38 = vpack.c.bf16 %v7470_v16, %v7466_v31  ;;  %v7468_v26 = vmax.f32 %v7340_v56, %v7404_v51  ;;  %v7472_v25 = vmax.f32 %v7344_v27, %v7408_v59  ;;  %v7401_v63 = vmul.f32 0.2, %v7337_v62  ;;  %v19176_v51 = vld [vmem:[#allocation31_spill] sm:$0xff] }
 0x403   : > { %v7174_v9 = vmul.f32 %v17032_v61, %v7102_v53  ;;  %v7104_v56 = vsub.f32 %v19175_v14, %v16918_v60  ;;  %v7405_v27 = vmul.f32 0.2, %v7341_v10  ;;  %v7339_v21 = vadd.f32 %v19117_v13, %v7253_v19  ;;  %v19177_v53 = vld [vmem:[#allocation24_spill] sm:$0xff] }
 0x404   : > { %7553 = vmatprep.subr.bf16.mxu0 %v17334_v38  ;;  %v17348_v30 = vpack.c.bf16 %v7472_v25, %v7468_v26  ;;  %v7343_v34 = vadd.f32 %v19117_v13, %v7257_v44  ;;  %v7465_v20 = vmax.f32 %v7337_v62, %v7401_v63  ;;  %v7178_v31 = vmul.f32 %v17032_v61, %v7106_v0  ;;  %v19178_v14 = vld [vmem:[#allocation28_spill] sm:$0xff] }
 0x405   : > { %v7260_v16 = vmul.f32 %v19120_v29, %v7174_v9  ;;  %v7108_v57 = vsub.f32 %v19176_v51, %v16918_v60  ;;  %v7469_v59 = vmax.f32 %v7341_v10, %v7405_v27  ;;  %v7403_v43 = vmul.f32 0.2, %v7339_v21 }
 0x406   : > { %7606 = vmatprep.subr.bf16.mxu1 %v17348_v30  ;;  %v7407_v5 = vmul.f32 0.2, %v7343_v34  ;;  %v7176_v32 = vmul.f32 %v17038_v45, %v7104_v56  ;;  %v7264_v26 = vmul.f32 %v19120_v29, %v7178_v31  ;;  %v7101_v25 = vsub.f32 %v19177_v53, %v16900_v6 }
 0x407   : > { %v7346_v42 = vadd.f32 %v19122_v18, %v7260_v16  ;;  %v7180_v62 = vmul.f32 %v17038_v45, %v7108_v57  ;;  %v17363_v19 = vpack.c.bf16 %v7469_v59, %v7465_v20  ;;  %v7467_v44 = vmax.f32 %v7339_v21, %v7403_v43  ;;  %v19179_v21 = vld [vmem:[#allocation25_spill] sm:$0xff] }
 0x408   : > { %v7471_v63 = vmax.f32 %v7343_v34, %v7407_v5  ;;  %v7262_v2 = vmul.f32 %v19121_v49, %v7176_v32  ;;  %v7350_v10 = vadd.f32 %v19122_v18, %v7264_v26  ;;  %v7105_v56 = vsub.f32 %v19178_v14, %v16900_v6  ;;  %v19180_v32 = vld [vmem:[#allocation29_spill] sm:$0xff] }
 0x409   : > { %v7410_v0 = vmul.f32 0.2, %v7346_v42  ;;  %v7266_v9 = vmul.f32 %v19121_v49, %v7180_v62  ;;  %7554 = vmatpush1.bf16.msra.mxu0 %v17363_v19  ;;  %v7173_v20 = vmul.f32 %v16996_v23, %v7101_v25  ;;  %v7103_v34 = vsub.f32 %v19179_v21, %v16902_v15 }
 0x40a   : > { %v17371_v27 = vpack.c.bf16 %v7471_v63, %v7467_v44  ;;  %v7348_v31 = vadd.f32 %v19123_v37, %v7262_v2  ;;  %v7414_v16 = vmul.f32 0.2, %v7350_v10  ;;  %v7177_v59 = vmul.f32 %v16996_v23, %v7105_v56 }
 0x40b   : > { %v7474_v51 = vmax.f32 %v7346_v42, %v7410_v0  ;;  %v7352_v57 = vadd.f32 %v19123_v37, %v7266_v9  ;;  %v7259_v5 = vmul.f32 %v19113_v33, %v7173_v20  ;;  %v7107_v26 = vsub.f32 %v19180_v32, %v16902_v15  ;;  %v19181_v42 = vld [vmem:[#allocation38_spill] sm:$0xff] }
 0x40c   : > { %7607 = vmatpush1.bf16.msra.mxu1 %v17371_v27  ;;  %v7412_v43 = vmul.f32 0.2, %v7348_v31  ;;  %v7175_v62 = vmul.f32 %v17006_v55, %v7103_v34  ;;  %v7478_v53 = vmax.f32 %v7350_v10, %v7414_v16  ;;  %v7263_v44 = vmul.f32 %v19113_v33, %v7177_v59  ;;  %v19182_v10 = vld [vmem:[#allocation42_spill] sm:$0xff] }
 0x40d   : > { %v7416_v25 = vmul.f32 0.2, %v7352_v57  ;;  %v7110_v63 = vsub.f32 %v19181_v42, %v16916_v39  ;;  %v7345_v0 = vadd.f32 %v19115_v52, %v7259_v5  ;;  %v7179_v9 = vmul.f32 %v17006_v55, %v7107_v26 }
 0x40e   : > { %v7476_v2 = vmax.f32 %v7348_v31, %v7412_v43  ;;  %v7261_v14 = vmul.f32 %v19114_v54, %v7175_v62  ;;  %v17390_v56 = vpack.c.bf16 %v7478_v53, %v7474_v51  ;;  %v7349_v21 = vadd.f32 %v19115_v52, %v7263_v44 }
 0x40f   : > { %v7480_v20 = vmax.f32 %v7352_v57, %v7416_v25  ;;  %v7114_v34 = vsub.f32 %v19182_v10, %v16916_v39  ;;  %v7409_v16 = vmul.f32 0.2, %v7345_v0  ;;  %v7265_v59 = vmul.f32 %v19114_v54, %v7179_v9  ;;  %v19183_v57 = vld [vmem:[#allocation39_spill] sm:$0xff] }
 0x410   : > { %v7347_v32 = vadd.f32 %v19117_v13, %v7261_v14  ;;  %v7182_v31 = vmul.f32 %v17032_v61, %v7110_v63  ;;  %7555 = vmatprep.subr.bf16.mxu0 %v17390_v56  ;;  %v7413_v5 = vmul.f32 0.2, %v7349_v21  ;;  %v7112_v26 = vsub.f32 %v19183_v57, %v16918_v60  ;;  %v19184_v63 = vld [vmem:[#allocation43_spill] sm:$0xff] }
 0x411   : > { %v17399_v43 = vpack.c.bf16 %v7480_v20, %v7476_v2  ;;  %v7186_v51 = vmul.f32 %v17032_v61, %v7114_v34  ;;  %v7473_v62 = vmax.f32 %v7345_v0, %v7409_v16  ;;  %v7351_v39 = vadd.f32 %v19117_v13, %v7265_v59  ;;  %v19185_v0 = vld [vmem:[#allocation33_spill] sm:$0xff] }
 0x412   : > { %v7411_v53 = vmul.f32 0.2, %v7347_v32  ;;  %v7268_v25 = vmul.f32 %v19120_v29, %v7182_v31  ;;  %v7477_v44 = vmax.f32 %v7349_v21, %v7413_v5  ;;  %v7116_v2 = vsub.f32 %v19184_v63, %v16918_v60  ;;  %v19186_v60 = vld [vmem:[#allocation40_spill] sm:$0xff]  ;;  %v19188_v63 = vld [vmem:[#allocation41_spill] sm:$0xff] }
 0x413   : > { %7608 = vmatprep.subr.bf16.mxu1 %v17399_v43  ;;  %v7272_v42 = vmul.f32 %v19120_v29, %v7186_v51  ;;  %v7184_v9 = vmul.f32 %v17038_v45, %v7112_v26  ;;  %v7415_v61 = vmul.f32 0.2, %v7351_v39  ;;  %v7109_v10 = vsub.f32 %v19185_v0, %v16900_v6 }
 0x414   : > { %v7475_v14 = vmax.f32 %v7347_v32, %v7411_v53  ;;  %v7354_v20 = vadd.f32 %v19122_v18, %v7268_v25  ;;  %v17414_v34 = vpack.c.bf16 %v7477_v44, %v7473_v62  ;;  %v7188_v21 = vmul.f32 %v17038_v45, %v7116_v2 }
 0x415   : > { %v7358_v16 = vadd.f32 %v19122_v18, %v7272_v42  ;;  %v7270_v29 = vmul.f32 %v19121_v49, %v7184_v9  ;;  %v7479_v59 = vmax.f32 %v7351_v39, %v7415_v61  ;;  %v7113_v5 = vsub.f32 %v19186_v60, %v16900_v6  ;;  %v19187_v18 = vld [vmem:[#allocation34_spill] sm:$0xff] }
 0x416   : > { %v7418_v31 = vmul.f32 0.2, %v7354_v20  ;;  %v7181_v32 = vmul.f32 %v16996_v23, %v7109_v10  ;;  %7556 = vmatpush1.bf16.msra.mxu0 %v17414_v34  ;;  %v7274_v57 = vmul.f32 %v19121_v49, %v7188_v21  ;;  %v7111_v62 = vsub.f32 %v19187_v18, %v16902_v15  ;;  %v15870_v18 = vld [vmem:[%s18962_s4 + $0x8] sm:$0xff]  }
 0x417   : > { %v7422_v51 = vmul.f32 0.2, %v7358_v16  ;;  %v7356_v26 = vadd.f32 %v19123_v37, %v7270_v29  ;;  %v17427_v45 = vpack.c.bf16 %v7479_v59, %v7475_v14  ;;  %v7185_v39 = vmul.f32 %v16996_v23, %v7113_v5 }
 0x418   : > { %v7482_v53 = vmax.f32 %v7354_v20, %v7418_v31  ;;  %v7267_v25 = vmul.f32 %v19113_v33, %v7181_v32  ;;  %v7360_v44 = vadd.f32 %v19123_v37, %v7274_v57  ;;  %v7115_v2 = vsub.f32 %v19188_v63, %v16902_v15  ;;  %v15878_v63 = vld [vmem:[%s18962_s4 + $0x48] sm:$0xff]  }
 0x419   : > { %v7486_v6 = vmax.f32 %v7358_v16, %v7422_v51  ;;  %v7420_v42 = vmul.f32 0.2, %v7356_v26  ;;  %7609 = vmatpush1.bf16.msra.mxu1 %v17427_v45  ;;  %v7271_v49 = vmul.f32 %v19113_v33, %v7185_v39  ;;  %v7183_v61 = vmul.f32 %v17006_v55, %v7111_v62  ;;  %v15871_v62 = vld [vmem:[%s18962_s4 + $0x10] sm:$0xff]   ;;  %v15873_v39 = vld [vmem:[%s18962_s4 + $0x20] sm:$0xff]  }
 0x41a   : > { %v7353_v9 = vadd.f32 %v19115_v52, %v7267_v25  ;;  %v7424_v23 = vmul.f32 0.2, %v7360_v44  ;;  %v7187_v0 = vmul.f32 %v17006_v55, %v7115_v2  ;;  %v19032_v10 = vmov 0   ;;  %v15874_v25 = vld [vmem:[%s18962_s4 + $0x28] sm:$0xff]   ;;  %v15879_v2 = vld [vmem:[%s18962_s4 + $0x50] sm:$0xff]  }
 0x41b   : > { %v17438_v14 = vpack.c.bf16 %v7486_v6, %v7482_v53  ;;  %v7484_v20 = vmax.f32 %v7356_v26, %v7420_v42  ;;  %7577 = vmatprep.mubr.bf16.mxu0 %v19032_v10  ;;  %7630 = vmatprep.mubr.bf16.mxu1 %v19032_v10  ;;  %v7357_v15 = vadd.f32 %v19115_v52, %v7271_v49  ;;  %v15872_v53 = vld [vmem:[%s18962_s4 + $0x18] sm:$0xff]   ;;  %v15875_v6 = vld [vmem:[%s18962_s4 + $0x30] sm:$0xff]   ;;  %v15877_v42 = vld [vmem:[%s18962_s4 + $0x40] sm:$0xff]  }
 0x41c   : > { %v7417_v37 = vmul.f32 0.2, %v7353_v9  ;;  %v7269_v33 = vmul.f32 %v19114_v54, %v7183_v61  ;;  %v7488_v16 = vmax.f32 %v7360_v44, %v7424_v23  ;;  %v7273_v21 = vmul.f32 %v19114_v54, %v7187_v0  ;;  %v15876_v44 = vld [vmem:[%s18962_s4 + $0x38] sm:$0xff]   ;;  %v15882_v61 = vld [vmem:[%s18962_s4 + $0x68] sm:$0xff]  }
 0x41d   : > { %7557 = vmatprep.subr.bf16.mxu0 %v17438_v14  ;;  %v7421_v29 = vmul.f32 0.2, %v7357_v15  ;;  %v15880_v49 = vld [vmem:[%s18962_s4 + $0x58] sm:$0xff]  }
 0x41e   : > { %v7481_v59 = vmax.f32 %v7353_v9, %v7417_v37  ;;  %v7355_v31 = vadd.f32 %v19117_v13, %v7269_v33  ;;  %v17448_v55 = vpack.c.bf16 %v7488_v16, %v7484_v20  ;;  %v7359_v60 = vadd.f32 %v19117_v13, %v7273_v21  ;;  %v15869_v13 = vld [vmem:[%s18962_s4] sm:$0xff]  }
 0x41f   : > { %v7485_v5 = vmax.f32 %v7357_v15, %v7421_v29  ;;  %v15881_v9 = vld [vmem:[%s18962_s4 + $0x60] sm:$0xff]  }
 0x420   : > { %v7419_v32 = vmul.f32 0.2, %v7355_v31  ;;  %7610 = vmatprep.subr.bf16.mxu1 %v17448_v55  ;;  %v7423_v52 = vmul.f32 0.2, %v7359_v60 }
 0x421   : > { %v17452_v51 = vpack.c.bf16 %v7485_v5, %v7481_v59 }
 0x422   : > { %v7483_v57 = vmax.f32 %v7355_v31, %v7419_v32  ;;  %v7487_v26 = vmax.f32 %v7359_v60, %v7423_v52  ;;  %v15883_v32 = vld [vmem:[%s18962_s4 + $0x70] sm:$0xff]  }
 0x423   : > { %7558 = vmatpush1.bf16.msra.mxu0 %v17452_v51 }
 0x424   : > { %v17455_v54 = vpack.c.bf16 %v7487_v26, %v7483_v57  ;;  %7559 = vmatprep.subr.bf16.mxu0 %v17090_v58 }
 0x426   : > { %7611 = vmatpush1.bf16.msra.mxu1 %v17455_v54 }
 0x427   : > { %7612 = vmatprep.subr.bf16.mxu1 %v17095_v35  ;;  %7560 = vmatpush1.bf16.msra.mxu0 %v17068_v3 }
 0x428   : > { %7684 = vmatprep.subr.bf16.mxu0 %v17112_v46 }
 0x42a   : > { %7613 = vmatpush1.bf16.msra.mxu1 %v17074_v28  ;;  %7578 = vmatmul.mubr.bf16.vlgmr.msra.gmra.mrb[32].mxu0 %v15869_v13 }
 0x42b   : > { %7737 = vmatprep.subr.bf16.mxu1 %v17127_v47  ;;  %7685 = vmatpush1.bf16.msra.mxu0 %v17114_v7 }
 0x42c   : > { %7686 = vmatprep.subr.bf16.mxu0 %v17164_v8  ;;  %7587 = vmatprep.mubr.bf16.mxu0 %v19032_v10 }
 0x42d   : > { %7631 = vmatmul.mubr.bf16.vlgmr.msra.gmra.mrb[32].mxu1 %v15869_v13 }
 0x42e   : > { %7738 = vmatpush1.bf16.msra.mxu1 %v17129_v41  ;;  %7640 = vmatprep.mubr.bf16.mxu1 %v19032_v10 }
 0x42f   : > { %7739 = vmatprep.subr.bf16.mxu1 %v17171_v36  ;;  %7687 = vmatpush1.bf16.msra.mxu0 %v17182_v17 }
 0x430   : > { %7688 = vmatprep.subr.bf16.mxu0 %v17228_v22 }
 0x432   : > { %7740 = vmatpush1.bf16.msra.mxu1 %v17197_v48  ;;  %7588 = vmatmul.mubr.bf16.gmra.mrb[36].mxu0 %v15870_v18 }
 0x433   : > { %7741 = vmatprep.subr.bf16.mxu1 %v17235_v40  ;;  %7689 = vmatpush1.bf16.msra.mxu0 %v17249_v1 }
 0x434   : > { %7690 = vmatprep.subr.bf16.mxu0 %v17287_v11  ;;  %7716 = vmatprep.mubr.bf16.mxu0 %v19032_v10 }
 0x435   : > { %7641 = vmatmul.mubr.bf16.gmra.mrb[36].mxu1 %v15870_v18 }
 0x436   : > { %7742 = vmatpush1.bf16.msra.mxu1 %v17263_v12  ;;  %7769 = vmatprep.mubr.bf16.mxu1 %v19032_v10 }
 0x437   : > { %7743 = vmatprep.subr.bf16.mxu1 %v17295_v50  ;;  %7691 = vmatpush1.bf16.msra.mxu0 %v17303_v24 }
 0x438   : > { %7692 = vmatprep.subr.bf16.mxu0 %v17334_v38 }
 0x43a   : > { %7744 = vmatpush1.bf16.msra.mxu1 %v17323_v4 }
 0x43b   : > { %7745 = vmatprep.subr.bf16.mxu1 %v17348_v30  ;;  %7693 = vmatpush1.bf16.msra.mxu0 %v17363_v19 }
 0x43c   : > { %7694 = vmatprep.subr.bf16.mxu0 %v17390_v56 }
 0x43e   : > { %7746 = vmatpush1.bf16.msra.mxu1 %v17371_v27 }
 0x43f   : > { %7747 = vmatprep.subr.bf16.mxu1 %v17399_v43  ;;  %7695 = vmatpush1.bf16.msra.mxu0 %v17414_v34 }
 0x440   : > { %7696 = vmatprep.subr.bf16.mxu0 %v17438_v14 }
 0x442   : > { %7748 = vmatpush1.bf16.msra.mxu1 %v17427_v45 }
 0x443   : > { %7749 = vmatprep.subr.bf16.mxu1 %v17448_v55  ;;  %7697 = vmatpush1.bf16.msra.mxu0 %v17452_v51 }
 0x444   : > { %7698 = vmatprep.subr.bf16.mxu0 %v17090_v58 }
 0x446   : > { %7750 = vmatpush1.bf16.msra.mxu1 %v17455_v54 }
 0x447   : > { %7751 = vmatprep.subr.bf16.mxu1 %v17095_v35  ;;  %7699 = vmatpush1.bf16.msra.mxu0 %v17068_v3 }
 0x448   : > { %7823 = vmatprep.subr.bf16.mxu0 %v17112_v46 }
 0x44a   : > { %7752 = vmatpush1.bf16.msra.mxu1 %v17074_v28  ;;  %7717 = vmatmul.mubr.bf16.vlgmr.msra.gmra.mrb[40].mxu0 %v15871_v62 }
 0x44b   : > { %7876 = vmatprep.subr.bf16.mxu1 %v17127_v47  ;;  %7824 = vmatpush1.bf16.msra.mxu0 %v17114_v7 }
 0x44c   : > { %7825 = vmatprep.subr.bf16.mxu0 %v17164_v8  ;;  %7726 = vmatprep.mubr.bf16.mxu0 %v19032_v10 }
 0x44d   : > { %7770 = vmatmul.mubr.bf16.vlgmr.msra.gmra.mrb[40].mxu1 %v15871_v62 }
 0x44e   : > { %7877 = vmatpush1.bf16.msra.mxu1 %v17129_v41  ;;  %7779 = vmatprep.mubr.bf16.mxu1 %v19032_v10 }
 0x44f   : > { %7878 = vmatprep.subr.bf16.mxu1 %v17171_v36  ;;  %7826 = vmatpush1.bf16.msra.mxu0 %v17182_v17 }
 0x450   : > { %7827 = vmatprep.subr.bf16.mxu0 %v17228_v22 }
 0x452   : > { %7879 = vmatpush1.bf16.msra.mxu1 %v17197_v48  ;;  %7727 = vmatmul.mubr.bf16.gmra.mrb[44].mxu0 %v15872_v53 }
 0x453   : > { %7880 = vmatprep.subr.bf16.mxu1 %v17235_v40  ;;  %7828 = vmatpush1.bf16.msra.mxu0 %v17249_v1 }
 0x454   : > { %7829 = vmatprep.subr.bf16.mxu0 %v17287_v11  ;;  %7855 = vmatprep.mubr.bf16.mxu0 %v19032_v10 }
 0x455   : > { %7780 = vmatmul.mubr.bf16.gmra.mrb[44].mxu1 %v15872_v53 }
 0x456   : > { %7881 = vmatpush1.bf16.msra.mxu1 %v17263_v12  ;;  %7908 = vmatprep.mubr.bf16.mxu1 %v19032_v10 }
 0x457   : > { %7882 = vmatprep.subr.bf16.mxu1 %v17295_v50  ;;  %7830 = vmatpush1.bf16.msra.mxu0 %v17303_v24 }
 0x458   : > { %7831 = vmatprep.subr.bf16.mxu0 %v17334_v38 }
 0x45a   : > { %7883 = vmatpush1.bf16.msra.mxu1 %v17323_v4 }
 0x45b   : > { %7884 = vmatprep.subr.bf16.mxu1 %v17348_v30  ;;  %7832 = vmatpush1.bf16.msra.mxu0 %v17363_v19 }
 0x45c   : > { %7833 = vmatprep.subr.bf16.mxu0 %v17390_v56 }
 0x45e   : > { %7885 = vmatpush1.bf16.msra.mxu1 %v17371_v27 }
 0x45f   : > { %7886 = vmatprep.subr.bf16.mxu1 %v17399_v43  ;;  %7834 = vmatpush1.bf16.msra.mxu0 %v17414_v34 }
 0x460   : > { %7835 = vmatprep.subr.bf16.mxu0 %v17438_v14 }
 0x462   : > { %7887 = vmatpush1.bf16.msra.mxu1 %v17427_v45 }
 0x463   : > { %7888 = vmatprep.subr.bf16.mxu1 %v17448_v55  ;;  %7836 = vmatpush1.bf16.msra.mxu0 %v17452_v51 }
 0x464   : > { %7837 = vmatprep.subr.bf16.mxu0 %v17090_v58 }
 0x466   : > { %7889 = vmatpush1.bf16.msra.mxu1 %v17455_v54 }
 0x467   : > { %7890 = vmatprep.subr.bf16.mxu1 %v17095_v35  ;;  %7838 = vmatpush1.bf16.msra.mxu0 %v17068_v3 }
 0x468   : > { %7962 = vmatprep.subr.bf16.mxu0 %v17112_v46 }
 0x46a   : > { %7891 = vmatpush1.bf16.msra.mxu1 %v17074_v28  ;;  %7856 = vmatmul.mubr.bf16.vlgmr.msra.gmra.mrb[48].mxu0 %v15873_v39 }
 0x46b   : > { %8015 = vmatprep.subr.bf16.mxu1 %v17127_v47  ;;  %7963 = vmatpush1.bf16.msra.mxu0 %v17114_v7 }
 0x46c   : > { %7964 = vmatprep.subr.bf16.mxu0 %v17164_v8  ;;  %7865 = vmatprep.mubr.bf16.mxu0 %v19032_v10 }
 0x46d   : > { %7909 = vmatmul.mubr.bf16.vlgmr.msra.gmra.mrb[48].mxu1 %v15873_v39 }
 0x46e   : > { %8016 = vmatpush1.bf16.msra.mxu1 %v17129_v41  ;;  %7918 = vmatprep.mubr.bf16.mxu1 %v19032_v10 }
 0x46f   : > { %8017 = vmatprep.subr.bf16.mxu1 %v17171_v36  ;;  %7965 = vmatpush1.bf16.msra.mxu0 %v17182_v17 }
 0x470   : > { %7966 = vmatprep.subr.bf16.mxu0 %v17228_v22 }
 0x472   : > { %8018 = vmatpush1.bf16.msra.mxu1 %v17197_v48  ;;  %7866 = vmatmul.mubr.bf16.gmra.mrb[52].mxu0 %v15874_v25 }
 0x473   : > { %8019 = vmatprep.subr.bf16.mxu1 %v17235_v40  ;;  %7967 = vmatpush1.bf16.msra.mxu0 %v17249_v1 }
 0x474   : > { %7968 = vmatprep.subr.bf16.mxu0 %v17287_v11  ;;  %7994 = vmatprep.mubr.bf16.mxu0 %v19032_v10 }
 0x475   : > { %7919 = vmatmul.mubr.bf16.gmra.mrb[52].mxu1 %v15874_v25 }
 0x476   : > { %8020 = vmatpush1.bf16.msra.mxu1 %v17263_v12  ;;  %8047 = vmatprep.mubr.bf16.mxu1 %v19032_v10 }
 0x477   : > { %8021 = vmatprep.subr.bf16.mxu1 %v17295_v50  ;;  %7969 = vmatpush1.bf16.msra.mxu0 %v17303_v24 }
 0x478   : > { %7970 = vmatprep.subr.bf16.mxu0 %v17334_v38 }
 0x47a   : > { %8022 = vmatpush1.bf16.msra.mxu1 %v17323_v4 }
 0x47b   : > { %8023 = vmatprep.subr.bf16.mxu1 %v17348_v30  ;;  %7971 = vmatpush1.bf16.msra.mxu0 %v17363_v19 }
 0x47c   : > { %7972 = vmatprep.subr.bf16.mxu0 %v17390_v56 }
 0x47e   : > { %8024 = vmatpush1.bf16.msra.mxu1 %v17371_v27 }
 0x47f   : > { %8025 = vmatprep.subr.bf16.mxu1 %v17399_v43  ;;  %7973 = vmatpush1.bf16.msra.mxu0 %v17414_v34 }
 0x480   : > { %7974 = vmatprep.subr.bf16.mxu0 %v17438_v14 }
 0x482   : > { %8026 = vmatpush1.bf16.msra.mxu1 %v17427_v45 }
 0x483   : > { %8027 = vmatprep.subr.bf16.mxu1 %v17448_v55  ;;  %7975 = vmatpush1.bf16.msra.mxu0 %v17452_v51 }
 0x484   : > { %7976 = vmatprep.subr.bf16.mxu0 %v17090_v58 }
 0x486   : > { %8028 = vmatpush1.bf16.msra.mxu1 %v17455_v54 }
 0x487   : > { %8029 = vmatprep.subr.bf16.mxu1 %v17095_v35  ;;  %7977 = vmatpush1.bf16.msra.mxu0 %v17068_v3 }
 0x488   : > { %8101 = vmatprep.subr.bf16.mxu0 %v17112_v46 }
 0x48a   : > { %8030 = vmatpush1.bf16.msra.mxu1 %v17074_v28  ;;  %7995 = vmatmul.mubr.bf16.vlgmr.msra.gmra.mrb[56].mxu0 %v15875_v6 }
 0x48b   : > { %8154 = vmatprep.subr.bf16.mxu1 %v17127_v47  ;;  %8102 = vmatpush1.bf16.msra.mxu0 %v17114_v7 }
 0x48c   : > { %8103 = vmatprep.subr.bf16.mxu0 %v17164_v8  ;;  %8004 = vmatprep.mubr.bf16.mxu0 %v19032_v10 }
 0x48d   : > { %8048 = vmatmul.mubr.bf16.vlgmr.msra.gmra.mrb[56].mxu1 %v15875_v6 }
 0x48e   : > { %8155 = vmatpush1.bf16.msra.mxu1 %v17129_v41  ;;  %8057 = vmatprep.mubr.bf16.mxu1 %v19032_v10 }
 0x48f   : > { %8156 = vmatprep.subr.bf16.mxu1 %v17171_v36  ;;  %8104 = vmatpush1.bf16.msra.mxu0 %v17182_v17 }
 0x490   : > { %8105 = vmatprep.subr.bf16.mxu0 %v17228_v22 }
 0x492   : > { %8157 = vmatpush1.bf16.msra.mxu1 %v17197_v48  ;;  %8005 = vmatmul.mubr.bf16.gmra.mrb[60].mxu0 %v15876_v44 }
 0x493   : > { %8158 = vmatprep.subr.bf16.mxu1 %v17235_v40  ;;  %8106 = vmatpush1.bf16.msra.mxu0 %v17249_v1 }
 0x494   : > { %8107 = vmatprep.subr.bf16.mxu0 %v17287_v11  ;;  %8133 = vmatprep.mubr.bf16.mxu0 %v19032_v10 }
 0x495   : > { %8058 = vmatmul.mubr.bf16.gmra.mrb[60].mxu1 %v15876_v44 }
 0x496   : > { %8159 = vmatpush1.bf16.msra.mxu1 %v17263_v12  ;;  %8186 = vmatprep.mubr.bf16.mxu1 %v19032_v10 }
 0x497   : > { %8160 = vmatprep.subr.bf16.mxu1 %v17295_v50  ;;  %8108 = vmatpush1.bf16.msra.mxu0 %v17303_v24 }
 0x498   : > { %8109 = vmatprep.subr.bf16.mxu0 %v17334_v38 }
 0x49a   : > { %8161 = vmatpush1.bf16.msra.mxu1 %v17323_v4 }
 0x49b   : > { %8162 = vmatprep.subr.bf16.mxu1 %v17348_v30  ;;  %8110 = vmatpush1.bf16.msra.mxu0 %v17363_v19 }
 0x49c   : > { %8111 = vmatprep.subr.bf16.mxu0 %v17390_v56 }
 0x49e   : > { %8163 = vmatpush1.bf16.msra.mxu1 %v17371_v27 }
 0x49f   : > { %8164 = vmatprep.subr.bf16.mxu1 %v17399_v43  ;;  %8112 = vmatpush1.bf16.msra.mxu0 %v17414_v34 }
 0x4a0   : > { %8113 = vmatprep.subr.bf16.mxu0 %v17438_v14 }
 0x4a2   : > { %8165 = vmatpush1.bf16.msra.mxu1 %v17427_v45 }
 0x4a3   : > { %8166 = vmatprep.subr.bf16.mxu1 %v17448_v55  ;;  %8114 = vmatpush1.bf16.msra.mxu0 %v17452_v51 }
 0x4a4   : > { %8115 = vmatprep.subr.bf16.mxu0 %v17090_v58 }
 0x4a6   : > { %8167 = vmatpush1.bf16.msra.mxu1 %v17455_v54 }
 0x4a7   : > { %8168 = vmatprep.subr.bf16.mxu1 %v17095_v35  ;;  %8116 = vmatpush1.bf16.msra.mxu0 %v17068_v3 }
 0x4a8   : > { %8240 = vmatprep.subr.bf16.mxu0 %v17112_v46 }
 0x4aa   : > { %8169 = vmatpush1.bf16.msra.mxu1 %v17074_v28  ;;  %8134 = vmatmul.mubr.bf16.vlgmr.msra.gmra.mrb[64].mxu0 %v15877_v42 }
 0x4ab   : > { %8293 = vmatprep.subr.bf16.mxu1 %v17127_v47  ;;  %8241 = vmatpush1.bf16.msra.mxu0 %v17114_v7 }
 0x4ac   : > { %8242 = vmatprep.subr.bf16.mxu0 %v17164_v8  ;;  %8143 = vmatprep.mubr.bf16.mxu0 %v19032_v10 }
 0x4ad   : > { %8187 = vmatmul.mubr.bf16.vlgmr.msra.gmra.mrb[64].mxu1 %v15877_v42 }
 0x4ae   : > { %8294 = vmatpush1.bf16.msra.mxu1 %v17129_v41  ;;  %8196 = vmatprep.mubr.bf16.mxu1 %v19032_v10 }
 0x4af   : > { %8295 = vmatprep.subr.bf16.mxu1 %v17171_v36  ;;  %8243 = vmatpush1.bf16.msra.mxu0 %v17182_v17 }
 0x4b0   : > { %8244 = vmatprep.subr.bf16.mxu0 %v17228_v22 }
 0x4b2   : > { %8296 = vmatpush1.bf16.msra.mxu1 %v17197_v48  ;;  %8144 = vmatmul.mubr.bf16.gmra.mrb[68].mxu0 %v15878_v63 }
 0x4b3   : > { %8297 = vmatprep.subr.bf16.mxu1 %v17235_v40  ;;  %8245 = vmatpush1.bf16.msra.mxu0 %v17249_v1 }
 0x4b4   : > { %8246 = vmatprep.subr.bf16.mxu0 %v17287_v11  ;;  %8272 = vmatprep.mubr.bf16.mxu0 %v19032_v10 }
 0x4b5   : > { %8197 = vmatmul.mubr.bf16.gmra.mrb[68].mxu1 %v15878_v63 }
 0x4b6   : > { %8298 = vmatpush1.bf16.msra.mxu1 %v17263_v12  ;;  %8325 = vmatprep.mubr.bf16.mxu1 %v19032_v10 }
 0x4b7   : > { %8299 = vmatprep.subr.bf16.mxu1 %v17295_v50  ;;  %8247 = vmatpush1.bf16.msra.mxu0 %v17303_v24 }
 0x4b8   : > { %8248 = vmatprep.subr.bf16.mxu0 %v17334_v38 }
 0x4ba   : > { %8300 = vmatpush1.bf16.msra.mxu1 %v17323_v4 }
 0x4bb   : > { %8301 = vmatprep.subr.bf16.mxu1 %v17348_v30  ;;  %8249 = vmatpush1.bf16.msra.mxu0 %v17363_v19 }
 0x4bc   : > { %8250 = vmatprep.subr.bf16.mxu0 %v17390_v56 }
 0x4be   : > { %8302 = vmatpush1.bf16.msra.mxu1 %v17371_v27 }
 0x4bf   : > { %8303 = vmatprep.subr.bf16.mxu1 %v17399_v43  ;;  %8251 = vmatpush1.bf16.msra.mxu0 %v17414_v34 }
 0x4c0   : > { %8252 = vmatprep.subr.bf16.mxu0 %v17438_v14 }
 0x4c2   : > { %8304 = vmatpush1.bf16.msra.mxu1 %v17427_v45 }
 0x4c3   : > { %8305 = vmatprep.subr.bf16.mxu1 %v17448_v55  ;;  %8253 = vmatpush1.bf16.msra.mxu0 %v17452_v51 }
 0x4c4   : > { %8254 = vmatprep.subr.bf16.mxu0 %v17090_v58 }
 0x4c6   : > { %8306 = vmatpush1.bf16.msra.mxu1 %v17455_v54 }
 0x4c7   : > { %8307 = vmatprep.subr.bf16.mxu1 %v17095_v35  ;;  %8255 = vmatpush1.bf16.msra.mxu0 %v17068_v3 }
 0x4c8   : > { %8379 = vmatprep.subr.bf16.mxu0 %v17112_v46 }
 0x4ca   : > { %8308 = vmatpush1.bf16.msra.mxu1 %v17074_v28  ;;  %8273 = vmatmul.mubr.bf16.vlgmr.msra.gmra.mrb[72].mxu0 %v15879_v2 }
 0x4cb   : > { %8432 = vmatprep.subr.bf16.mxu1 %v17127_v47  ;;  %8380 = vmatpush1.bf16.msra.mxu0 %v17114_v7 }
 0x4cc   : > { %8381 = vmatprep.subr.bf16.mxu0 %v17164_v8  ;;  %8282 = vmatprep.mubr.bf16.mxu0 %v19032_v10 }
 0x4cd   : > { %8326 = vmatmul.mubr.bf16.vlgmr.msra.gmra.mrb[72].mxu1 %v15879_v2 }
 0x4ce   : > { %8433 = vmatpush1.bf16.msra.mxu1 %v17129_v41  ;;  %8335 = vmatprep.mubr.bf16.mxu1 %v19032_v10 }
 0x4cf   : > { %8434 = vmatprep.subr.bf16.mxu1 %v17171_v36  ;;  %8382 = vmatpush1.bf16.msra.mxu0 %v17182_v17 }
 0x4d0   : > { %8383 = vmatprep.subr.bf16.mxu0 %v17228_v22 }
 0x4d2   : > { %8435 = vmatpush1.bf16.msra.mxu1 %v17197_v48  ;;  %8283 = vmatmul.mubr.bf16.gmra.mrb[76].mxu0 %v15880_v49 }
 0x4d3   : > { %8436 = vmatprep.subr.bf16.mxu1 %v17235_v40  ;;  %8384 = vmatpush1.bf16.msra.mxu0 %v17249_v1 }
 0x4d4   : > { %8385 = vmatprep.subr.bf16.mxu0 %v17287_v11  ;;  %8411 = vmatprep.mubr.bf16.mxu0 %v19032_v10 }
 0x4d5   : > { %8336 = vmatmul.mubr.bf16.gmra.mrb[76].mxu1 %v15880_v49 }
 0x4d6   : > { %8437 = vmatpush1.bf16.msra.mxu1 %v17263_v12  ;;  %8464 = vmatprep.mubr.bf16.mxu1 %v19032_v10 }
 0x4d7   : > { %8438 = vmatprep.subr.bf16.mxu1 %v17295_v50  ;;  %8386 = vmatpush1.bf16.msra.mxu0 %v17303_v24 }
 0x4d8   : > { %8387 = vmatprep.subr.bf16.mxu0 %v17334_v38 }
 0x4da   : > { %8439 = vmatpush1.bf16.msra.mxu1 %v17323_v4 }
 0x4db   : > { %8440 = vmatprep.subr.bf16.mxu1 %v17348_v30  ;;  %8388 = vmatpush1.bf16.msra.mxu0 %v17363_v19 }
 0x4dc   : > { %8389 = vmatprep.subr.bf16.mxu0 %v17390_v56 }
 0x4de   : > { %8441 = vmatpush1.bf16.msra.mxu1 %v17371_v27 }
 0x4df   : > { %8442 = vmatprep.subr.bf16.mxu1 %v17399_v43  ;;  %8390 = vmatpush1.bf16.msra.mxu0 %v17414_v34 }
 0x4e0   : > { %8391 = vmatprep.subr.bf16.mxu0 %v17438_v14 }
 0x4e2   : > { %8443 = vmatpush1.bf16.msra.mxu1 %v17427_v45 }
 0x4e3   : > { %8444 = vmatprep.subr.bf16.mxu1 %v17448_v55  ;;  %8392 = vmatpush1.bf16.msra.mxu0 %v17452_v51 }
 0x4e4   : > { %8393 = vmatprep.subr.bf16.mxu0 %v17090_v58 }
 0x4e6   : > { %8445 = vmatpush1.bf16.msra.mxu1 %v17455_v54 }
 0x4e7   : > { %8446 = vmatprep.subr.bf16.mxu1 %v17095_v35  ;;  %8394 = vmatpush1.bf16.msra.mxu0 %v17068_v3 }
 0x4e8   : > { %8518 = vmatprep.subr.bf16.mxu0 %v17112_v46 }
 0x4ea   : > { %8447 = vmatpush1.bf16.msra.mxu1 %v17074_v28  ;;  %8412 = vmatmul.mubr.bf16.vlgmr.msra.gmra.mrb[80].mxu0 %v15881_v9 }
 0x4eb   : > { %8571 = vmatprep.subr.bf16.mxu1 %v17127_v47  ;;  %8519 = vmatpush1.bf16.msra.mxu0 %v17114_v7 }
 0x4ec   : > { %8520 = vmatprep.subr.bf16.mxu0 %v17164_v8  ;;  %8421 = vmatprep.mubr.bf16.mxu0 %v19032_v10 }
 0x4ed   : > { %8465 = vmatmul.mubr.bf16.vlgmr.msra.gmra.mrb[80].mxu1 %v15881_v9 }
 0x4ee   : > { %8572 = vmatpush1.bf16.msra.mxu1 %v17129_v41  ;;  %8474 = vmatprep.mubr.bf16.mxu1 %v19032_v10 }
 0x4ef   : > { %8573 = vmatprep.subr.bf16.mxu1 %v17171_v36  ;;  %8521 = vmatpush1.bf16.msra.mxu0 %v17182_v17 }
 0x4f0   : > { %8522 = vmatprep.subr.bf16.mxu0 %v17228_v22 }
 0x4f2   : > { %8574 = vmatpush1.bf16.msra.mxu1 %v17197_v48  ;;  %8422 = vmatmul.mubr.bf16.gmra.mrb[84].mxu0 %v15882_v61 }
 0x4f3   : > { %8575 = vmatprep.subr.bf16.mxu1 %v17235_v40  ;;  %8523 = vmatpush1.bf16.msra.mxu0 %v17249_v1 }
 0x4f4   : > { %8524 = vmatprep.subr.bf16.mxu0 %v17287_v11  ;;  %8550 = vmatprep.mubr.bf16.mxu0 %v19032_v10 }
 0x4f5   : > { %8475 = vmatmul.mubr.bf16.gmra.mrb[84].mxu1 %v15882_v61 }
 0x4f6   : > { %8576 = vmatpush1.bf16.msra.mxu1 %v17263_v12  ;;  %8603 = vmatprep.mubr.bf16.mxu1 %v19032_v10 }
 0x4f7   : > { %8577 = vmatprep.subr.bf16.mxu1 %v17295_v50  ;;  %8525 = vmatpush1.bf16.msra.mxu0 %v17303_v24 }
 0x4f8   : > { %8526 = vmatprep.subr.bf16.mxu0 %v17334_v38 }
 0x4fa   : > { %8578 = vmatpush1.bf16.msra.mxu1 %v17323_v4 }
 0x4fb   : > { %8579 = vmatprep.subr.bf16.mxu1 %v17348_v30  ;;  %8527 = vmatpush1.bf16.msra.mxu0 %v17363_v19 }
 0x4fc   : > { %8528 = vmatprep.subr.bf16.mxu0 %v17390_v56 }
 0x4fd   : > { %v7579_v23 = vpop.f32.mrb[32].mxu0 }
 0x4fe   : > { %8580 = vmatpush1.bf16.msra.mxu1 %v17371_v27  ;;  %v7581_v20 = vpop.f32.mrb[33].mxu0 }
 0x4ff   : > { %8581 = vmatprep.subr.bf16.mxu1 %v17399_v43  ;;  %8529 = vmatpush1.bf16.msra.mxu0 %v17414_v34  ;;  %v7583_v0 = vpop.f32.mrb[34].mxu0 }
 0x500   : > { %8530 = vmatprep.subr.bf16.mxu0 %v17438_v14  ;;  %v17748_v15 = vpack.c.bf16 %v7583_v0, %v7579_v23  ;;  %v7585_v37 = vpop.f32.mrb[35].mxu0  ;;  %v7632_v33 = vpop.f32.mrb[32].mxu1  ;;  %v9251_v0 = vld [vmem:[%s17811_s22 + $0x4a0] sm:$0xff] }
 0x501   : > { %v17750_v16 = vpack.c.bf16 %v7585_v37, %v7581_v20  ;;  %v7634_v21 = vpop.f32.mrb[33].mxu1  ;;  %v9254_v20 = vld [vmem:[%s17811_s22 + $0x4b8] sm:$0xff] }
 0x502   : > { %8582 = vmatpush1.bf16.msra.mxu1 %v17427_v45  ;;  %v7636_v29 = vpop.f32.mrb[34].mxu1 }
 0x503   : > { %8583 = vmatprep.subr.bf16.mxu1 %v17448_v55  ;;  %8531 = vmatpush1.bf16.msra.mxu0 %v17452_v51  ;;  %v17755_v59 = vpack.c.bf16 %v7636_v29, %v7632_v33  ;;  %v7638_v31 = vpop.f32.mrb[35].mxu1  ;;  %v15886_v33 = vld [vmem:[%s18962_s4 + $0x88] sm:$0xff]   ;;  %v9399_v29 = vunpack.c.l.s8.bf16 %v9251_v0 }
 0x504   : > { %8532 = vmatprep.subr.bf16.mxu0 %v17090_v58  ;;  %v17758_v60 = vpack.c.bf16 %v7638_v31, %v7634_v21  ;;  %v9402_v21 = vunpack.c.l.s8.bf16 %v9254_v20  ;;  %v9253_v31 = vld [vmem:[%s17811_s22 + $0x4b0] sm:$0xff] }
 0x505   : > { %v7589_v5 = vpop.f32.mrb[36].mxu0 }
 0x506   : > { %8584 = vmatpush1.bf16.msra.mxu1 %v17455_v54  ;;  %v7591_v52 = vpop.f32.mrb[37].mxu0 }
 0x507   : > { %8585 = vmatprep.subr.bf16.mxu1 %v17095_v35  ;;  %8533 = vmatpush1.bf16.msra.mxu0 %v17068_v3  ;;  %v7593_v57 = vpop.f32.mrb[38].mxu0 }
 0x508   : > { %8657 = vmatprep.subr.bf16.mxu0 %v17112_v46  ;;  %v17767_v26 = vpack.c.bf16 %v7593_v57, %v7589_v5  ;;  %v7595_v13 = vpop.f32.mrb[39].mxu0  ;;  %v7642_v18 = vpop.f32.mrb[36].mxu1  ;;  %v9406_v57 = vunpack.c.h.s8.bf16 %v9254_v20 }
 0x509   : > { %v17769_v62 = vpack.c.bf16 %v7595_v13, %v7591_v52  ;;  %v7644_v53 = vpop.f32.mrb[37].mxu1  ;;  %v9401_v52 = vunpack.c.l.s8.bf16 %v9253_v31  ;;  %v9403_v13 = vunpack.c.h.s8.bf16 %v9251_v0  ;;  %v9266_v0 = vld [vmem:[%s17811_s22 + $0x518] sm:$0xff] }
 0x50a   : > { %8586 = vmatpush1.bf16.msra.mxu1 %v17074_v28  ;;  %8551 = vmatmul.mubr.bf16.vlgmr.msra.gmra.mrb[88].mxu0 %v15883_v32  ;;  %v7646_v39 = vpop.f32.mrb[38].mxu1 }
 0x50b   : > { %8710 = vmatprep.subr.bf16.mxu1 %v17127_v47  ;;  %8658 = vmatpush1.bf16.msra.mxu0 %v17114_v7  ;;  %v17774_v25 = vpack.c.bf16 %v7646_v39, %v7642_v18  ;;  %v7648_v6 = vpop.f32.mrb[39].mxu1  ;;  %v15884_v47 = vld [vmem:[%s18962_s4 + $0x78] sm:$0xff]   ;;  %v9255_v39 = vld [vmem:[%s17811_s22 + $0x4c0] sm:$0xff] }
 0x50c   : > { %8659 = vmatprep.subr.bf16.mxu0 %v17164_v8  ;;  %8560 = vmatprep.mubr.bf16.mxu0 %v19032_v10  ;;  %v17778_v46 = vpack.c.bf16 %v7648_v6, %v7644_v53  ;;  %v9258_v53 = vld [vmem:[%s17811_s22 + $0x4d8] sm:$0xff]  ;;  %v9405_v6 = vunpack.c.h.s8.bf16 %v9253_v31 }
 0x50d   : > { %8604 = vmatmul.mubr.bf16.vlgmr.msra.gmra.mrb[88].mxu1 %v15883_v32  ;;  %v9256_v32 = vld [vmem:[%s17811_s22 + $0x4c8] sm:$0xff] }
 0x50e   : > { %8711 = vmatpush1.bf16.msra.mxu1 %v17129_v41  ;;  %8613 = vmatprep.mubr.bf16.mxu1 %v19032_v10  ;;  %v9408_v18 = vunpack.c.l.s8.bf16 %v9256_v32 }
 0x50f   : > { %8712 = vmatprep.subr.bf16.mxu1 %v17171_v36  ;;  %8660 = vmatpush1.bf16.msra.mxu0 %v17182_v17 }
 0x510   : > { %8661 = vmatprep.subr.bf16.mxu0 %v17228_v22  ;;  %v9248_v22 = vld [vmem:[%s17811_s22 + $0x488] sm:$0xff] }
 0x512   : > { %8713 = vmatpush1.bf16.msra.mxu1 %v17197_v48  ;;  %8561 = vmatmul.mubr.bf16.gmra.mrb[92].mxu0 %v15884_v47 }
 0x513   : > { %8714 = vmatprep.subr.bf16.mxu1 %v17235_v40  ;;  %8662 = vmatpush1.bf16.msra.mxu0 %v17249_v1 }
 0x514   : > { %8663 = vmatprep.subr.bf16.mxu0 %v17287_v11  ;;  %8689 = vmatprep.mubr.bf16.mxu0 %v19032_v10 }
 0x515   : > { %8614 = vmatmul.mubr.bf16.gmra.mrb[92].mxu1 %v15884_v47  ;;  %v9410_v47 = vunpack.c.l.s8.bf16 %v9258_v53 }
 0x516   : > { %8715 = vmatpush1.bf16.msra.mxu1 %v17263_v12  ;;  %8742 = vmatprep.mubr.bf16.mxu1 %v19032_v10 }
 0x517   : > { %8716 = vmatprep.subr.bf16.mxu1 %v17295_v50  ;;  %8664 = vmatpush1.bf16.msra.mxu0 %v17303_v24  ;;  %v9392_v24 = vunpack.c.l.s8.bf16 %v9248_v22 }
 0x518   : > { %8665 = vmatprep.subr.bf16.mxu0 %v17334_v38  ;;  %v9247_v38 = vld [vmem:[%s17811_s22 + $0x480] sm:$0xff] }
 0x519   : > { %v9395_v49 = vunpack.c.h.s8.bf16 %v9247_v38 }
 0x51a   : > { %8717 = vmatpush1.bf16.msra.mxu1 %v17323_v4  ;;  %v9250_v4 = vld [vmem:[%s17811_s22 + $0x498] sm:$0xff] }
 0x51b   : > { %8718 = vmatprep.subr.bf16.mxu1 %v17348_v30  ;;  %8666 = vmatpush1.bf16.msra.mxu0 %v17363_v19  ;;  %v9398_v2 = vunpack.c.h.s8.bf16 %v9250_v4 }
 0x51c   : > { %8667 = vmatprep.subr.bf16.mxu0 %v17390_v56 }
 0x51d   : > { %v7718_v7 = vpop.f32.mrb[40].mxu0 }
 0x51e   : > { %8719 = vmatpush1.bf16.msra.mxu1 %v17371_v27  ;;  %v7720_v41 = vpop.f32.mrb[41].mxu0  ;;  %v15885_v27 = vld [vmem:[%s18962_s4 + $0x80] sm:$0xff]  }
 0x51f   : > { %8720 = vmatprep.subr.bf16.mxu1 %v17399_v43  ;;  %8668 = vmatpush1.bf16.msra.mxu0 %v17414_v34  ;;  %v7722_v8 = vpop.f32.mrb[42].mxu0  ;;  %v9394_v43 = vunpack.c.l.s8.bf16 %v9250_v4  ;;  %v9249_v34 = vld [vmem:[%s17811_s22 + $0x490] sm:$0xff] }
 0x520   : > { %8669 = vmatprep.subr.bf16.mxu0 %v17438_v14  ;;  %v17816_v36 = vpack.c.bf16 %v7722_v8, %v7718_v7  ;;  %v7724_v17 = vpop.f32.mrb[43].mxu0  ;;  %v7771_v48 = vpop.f32.mrb[40].mxu1  ;;  %v9396_v14 = vunpack.c.h.s8.bf16 %v9248_v22  ;;  %v9407_v7 = vunpack.c.l.s8.bf16 %v9255_v39  ;;  %v9412_v8 = vunpack.c.h.s8.bf16 %v9256_v32 }
 0x521   : > { %v17819_v40 = vpack.c.bf16 %v7724_v17, %v7720_v41  ;;  %v7773_v1 = vpop.f32.mrb[41].mxu1  ;;  %v9257_v41 = vld [vmem:[%s17811_s22 + $0x4d0] sm:$0xff]  ;;  %v9260_v17 = vld [vmem:[%s17811_s22 + $0x4e8] sm:$0xff]  ;;  %v9414_v22 = vunpack.c.h.s8.bf16 %v9258_v53 }
 0x522   : > { %8721 = vmatpush1.bf16.msra.mxu1 %v17427_v45  ;;  %v7775_v12 = vpop.f32.mrb[42].mxu1 }
 0x523   : > { %8722 = vmatprep.subr.bf16.mxu1 %v17448_v55  ;;  %8670 = vmatpush1.bf16.msra.mxu0 %v17452_v51  ;;  %v17824_v11 = vpack.c.bf16 %v7775_v12, %v7771_v48  ;;  %v7777_v50 = vpop.f32.mrb[43].mxu1  ;;  %v9409_v48 = vunpack.c.l.s8.bf16 %v9257_v41  ;;  %v9416_v12 = vunpack.c.l.s8.bf16 %v9260_v17 }
 0x524   : > { %8671 = vmatprep.subr.bf16.mxu0 %v17090_v58  ;;  %v17829_v30 = vpack.c.bf16 %v7777_v50, %v7773_v1  ;;  %v9391_v58 = vunpack.c.l.s8.bf16 %v9247_v38  ;;  %v9411_v1 = vunpack.c.h.s8.bf16 %v9255_v39  ;;  %v9262_v50 = vld [vmem:[%s17811_s22 + $0x4f8] sm:$0xff]  ;;  %v9413_v38 = vunpack.c.h.s8.bf16 %v9257_v41 }
 0x525   : > { %v7728_v19 = vpop.f32.mrb[44].mxu0 }
 0x526   : > { %8723 = vmatpush1.bf16.msra.mxu1 %v17455_v54  ;;  %v7730_v56 = vpop.f32.mrb[45].mxu0  ;;  %v9252_v54 = vld [vmem:[%s17811_s22 + $0x4a8] sm:$0xff] }
 0x527   : > { %8724 = vmatprep.subr.bf16.mxu1 %v17095_v35  ;;  %8672 = vmatpush1.bf16.msra.mxu0 %v17068_v3  ;;  %v7732_v45 = vpop.f32.mrb[46].mxu0  ;;  %v9393_v3 = vunpack.c.l.s8.bf16 %v9249_v34  ;;  %v9400_v23 = vunpack.c.l.s8.bf16 %v9252_v54  ;;  %v9404_v5 = vunpack.c.h.s8.bf16 %v9252_v54 }
 0x528   : > { %9679 = vmatprep.subr.bf16.mxu0 %v9392_v24  ;;  %v17838_v55 = vpack.c.bf16 %v7732_v45, %v7728_v19  ;;  %v7734_v51 = vpop.f32.mrb[47].mxu0  ;;  %v7781_v44 = vpop.f32.mrb[44].mxu1  ;;  %v9259_v24 = vld [vmem:[%s17811_s22 + $0x4e0] sm:$0xff] }
 0x529   : > { %v17841_v42 = vpack.c.bf16 %v7734_v51, %v7730_v56  ;;  %v7783_v63 = vpop.f32.mrb[45].mxu1  ;;  %v9415_v56 = vunpack.c.l.s8.bf16 %v9259_v24 }
 0x52a   : > { %8725 = vmatpush1.bf16.msra.mxu1 %v17074_v28  ;;  %8690 = vmatmul.mubr.bf16.vlgmr.msra.gmra.mrb[96].mxu0 %v15885_v27  ;;  %v7785_v35 = vpop.f32.mrb[46].mxu1  ;;  %v9397_v28 = vunpack.c.h.s8.bf16 %v9249_v34  ;;  %v9420_v34 = vunpack.c.h.s8.bf16 %v9260_v17  ;;  %v9430_v17 = vunpack.c.h.s8.bf16 %v9266_v0 }
 0x52b   : > { %9944 = vmatprep.subr.bf16.mxu1 %v9394_v43  ;;  %9680 = vmatpush1.bf16.msra.mxu0 %v9391_v58  ;;  %v17844_v9 = vpack.c.bf16 %v7785_v35, %v7781_v44  ;;  %v7787_v61 = vpop.f32.mrb[47].mxu1  ;;  %v9261_v43 = vld [vmem:[%s17811_s22 + $0x4f0] sm:$0xff]  ;;  %v9264_v44 = vld [vmem:[%s17811_s22 + $0x508] sm:$0xff] }
 0x52c   : > { %9681 = vmatprep.subr.bf16.mxu0 %v9396_v14  ;;  %v17848_v37 = vpack.c.bf16 %v7787_v61, %v7783_v63  ;;  %8699 = vmatprep.mubr.bf16.mxu0 %v19032_v10  ;;  %v9424_v20 = vunpack.c.l.s8.bf16 %v9264_v44 }
 0x52d   : > { %8743 = vmatmul.mubr.bf16.vlgmr.msra.gmra.mrb[96].mxu1 %v15885_v27  ;;  %v9418_v27 = vunpack.c.l.s8.bf16 %v9262_v50 }
 0x52e   : > { %9945 = vmatpush1.bf16.msra.mxu1 %v9393_v3  ;;  %8752 = vmatprep.mubr.bf16.mxu1 %v19032_v10  ;;  %v9417_v3 = vunpack.c.l.s8.bf16 %v9261_v43 }
 0x52f   : > { %9946 = vmatprep.subr.bf16.mxu1 %v9398_v2  ;;  %9682 = vmatpush1.bf16.msra.mxu0 %v9395_v49  ;;  %v9422_v2 = vunpack.c.h.s8.bf16 %v9262_v50  ;;  %v9419_v49 = vunpack.c.h.s8.bf16 %v9259_v24  ;;  %v9270_v50 = vld [vmem:[%s17811_s22 + $0x538] sm:$0xff]  ;;  %v9267_v24 = vld [vmem:[%s17811_s22 + $0x520] sm:$0xff] }
 0x530   : > { %9683 = vmatprep.subr.bf16.mxu0 %v9400_v23 }
 0x532   : > { %9947 = vmatpush1.bf16.msra.mxu1 %v9397_v28  ;;  %8700 = vmatmul.mubr.bf16.gmra.mrb[100].mxu0 %v15886_v33  ;;  %v9263_v28 = vld [vmem:[%s17811_s22 + $0x500] sm:$0xff] }
 0x533   : > { %9948 = vmatprep.subr.bf16.mxu1 %v9402_v21  ;;  %9684 = vmatpush1.bf16.msra.mxu0 %v9399_v29  ;;  %v9421_v29 = vunpack.c.h.s8.bf16 %v9261_v43  ;;  %v9423_v32 = vunpack.c.l.s8.bf16 %v9263_v28 }
 0x534   : > { %9685 = vmatprep.subr.bf16.mxu0 %v9404_v5  ;;  %v9426_v5 = vunpack.c.l.s8.bf16 %v9266_v0 }
 0x535   : > { %8753 = vmatmul.mubr.bf16.gmra.mrb[100].mxu1 %v15886_v33 }
 0x536   : > { %9949 = vmatpush1.bf16.msra.mxu1 %v9401_v52  ;;  %v9265_v52 = vld [vmem:[%s17811_s22 + $0x510] sm:$0xff] }
 0x537   : > { %9950 = vmatprep.subr.bf16.mxu1 %v9406_v57  ;;  %9686 = vmatpush1.bf16.msra.mxu0 %v9403_v13  ;;  %v9428_v13 = vunpack.c.h.s8.bf16 %v9264_v44  ;;  %v9425_v41 = vunpack.c.l.s8.bf16 %v9265_v52 }
 0x538   : > { %9687 = vmatprep.subr.bf16.mxu0 %v9408_v18 }
 0x53a   : > { %9951 = vmatpush1.bf16.msra.mxu1 %v9405_v6  ;;  %v9268_v6 = vld [vmem:[%s17811_s22 + $0x528] sm:$0xff] }
 0x53b   : > { %9952 = vmatprep.subr.bf16.mxu1 %v9410_v47  ;;  %9688 = vmatpush1.bf16.msra.mxu0 %v9407_v7  ;;  %v9436_v43 = vunpack.c.h.s8.bf16 %v9268_v6 }
 0x53c   : > { %9689 = vmatprep.subr.bf16.mxu0 %v9412_v8 }
 0x53d   : > { %v7857_v4 = vpop.f32.mrb[48].mxu0 }
 0x53e   : > { %9953 = vmatpush1.bf16.msra.mxu1 %v9409_v48  ;;  %v7859_v19 = vpop.f32.mrb[49].mxu0  ;;  %v9427_v48 = vunpack.c.h.s8.bf16 %v9263_v28 }
 0x53f   : > { %9954 = vmatprep.subr.bf16.mxu1 %v9414_v22  ;;  %9690 = vmatpush1.bf16.msra.mxu0 %v9411_v1  ;;  %v7861_v58 = vpop.f32.mrb[50].mxu0 }
 0x540   : > { %9691 = vmatprep.subr.bf16.mxu0 %v9416_v12  ;;  %v17864_v45 = vpack.c.bf16 %v7861_v58, %v7857_v4  ;;  %v7863_v14 = vpop.f32.mrb[51].mxu0  ;;  %v7910_v51 = vpop.f32.mrb[48].mxu1  ;;  %v9432_v12 = vunpack.c.l.s8.bf16 %v9268_v6  ;;  %v9272_v58 = vld [vmem:[%s17811_s22 + $0x548] sm:$0xff] }
 0x541   : > { %v17867_v54 = vpack.c.bf16 %v7863_v14, %v7859_v19  ;;  %v7912_v63 = vpop.f32.mrb[49].mxu1  ;;  %v9434_v19 = vunpack.c.l.s8.bf16 %v9270_v50  ;;  %v9438_v14 = vunpack.c.h.s8.bf16 %v9270_v50  ;;  %v9440_v44 = vunpack.c.l.s8.bf16 %v9272_v58 }
 0x542   : > { %9955 = vmatpush1.bf16.msra.mxu1 %v9413_v38  ;;  %v7914_v35 = vpop.f32.mrb[50].mxu1  ;;  %v9429_v38 = vunpack.c.h.s8.bf16 %v9265_v52 }
 0x543   : > { %9956 = vmatprep.subr.bf16.mxu1 %v9418_v27  ;;  %9692 = vmatpush1.bf16.msra.mxu0 %v9415_v56  ;;  %v7931_v61 = vpack.c.bf16 %v7914_v35, %v7910_v51  ;;  %v7916_v23 = vpop.f32.mrb[51].mxu1  ;;  %v9431_v27 = vunpack.c.l.s8.bf16 %v9267_v24  ;;  %v9269_v56 = vld [vmem:[%s17811_s22 + $0x530] sm:$0xff]  ;;  %v9435_v51 = vunpack.c.h.s8.bf16 %v9267_v24 }
 0x544   : > { %9693 = vmatprep.subr.bf16.mxu0 %v9420_v34  ;;  %v17871_v33 = vpack.c.bf16 %v7916_v23, %v7912_v63  ;;  %v9433_v34 = vunpack.c.l.s8.bf16 %v9269_v56  ;;  %v9274_v63 = vld [vmem:[%s17811_s22 + $0x558] sm:$0xff]  ;;  %v9437_v35 = vunpack.c.h.s8.bf16 %v9269_v56  ;;  %v9444_v23 = vunpack.c.h.s8.bf16 %v9272_v58 }
 0x545   : > { %9711 = vmatprep.mubr.bf16.mxu0 %v7931_v61  ;;  %9976 = vmatprep.mubr.bf16.mxu1 %v7931_v61  ;;  %v7867_v21 = vpop.f32.mrb[52].mxu0  ;;  %v9273_v61 = vld [vmem:[%s17811_s22 + $0x550] sm:$0xff]  ;;  %v9446_v28 = vunpack.c.h.s8.bf16 %v9274_v63  ;;  %v9282_v58 = vld [vmem:[%s17811_s22 + $0x598] sm:$0xff] }
 0x546   : > { %9957 = vmatpush1.bf16.msra.mxu1 %v9417_v3  ;;  %v7869_v31 = vpop.f32.mrb[53].mxu0  ;;  %v9271_v3 = vld [vmem:[%s17811_s22 + $0x540] sm:$0xff]  ;;  %v9441_v0 = vunpack.c.l.s8.bf16 %v9273_v61  ;;  %v9445_v52 = vunpack.c.h.s8.bf16 %v9273_v61 }
 0x547   : > { %9958 = vmatprep.subr.bf16.mxu1 %v9422_v2  ;;  %9694 = vmatpush1.bf16.msra.mxu0 %v9419_v49  ;;  %v7871_v57 = vpop.f32.mrb[54].mxu0  ;;  %v9442_v2 = vunpack.c.l.s8.bf16 %v9274_v63  ;;  %v9439_v49 = vunpack.c.l.s8.bf16 %v9271_v3 }
 0x548   : > { %9695 = vmatprep.subr.bf16.mxu0 %v9424_v20  ;;  %v7920_v18 = vpop.f32.mrb[52].mxu1  ;;  %v17874_v53 = vpack.c.bf16 %v7871_v57, %v7867_v21  ;;  %v7873_v39 = vpop.f32.mrb[55].mxu0  ;;  %v9276_v20 = vld [vmem:[%s17811_s22 + $0x568] sm:$0xff]  ;;  %v9443_v21 = vunpack.c.h.s8.bf16 %v9271_v3  ;;  %v9458_v3 = vunpack.c.l.s8.bf16 %v9282_v58 }
 0x549   : > { %v7922_v47 = vpop.f32.mrb[53].mxu1  ;;  %v17877_v7 = vpack.c.bf16 %v7873_v39, %v7869_v31  ;;  %v9278_v31 = vld [vmem:[%s17811_s22 + $0x578] sm:$0xff]  ;;  %v9277_v39 = vld [vmem:[%s17811_s22 + $0x570] sm:$0xff] }
 0x54a   : > { %9959 = vmatpush1.bf16.msra.mxu1 %v9421_v29  ;;  %v7924_v8 = vpop.f32.mrb[54].mxu1  ;;  %v9448_v29 = vunpack.c.l.s8.bf16 %v9276_v20  ;;  %v9449_v50 = vunpack.c.l.s8.bf16 %v9277_v39 }
 0x54b   : > { %9960 = vmatprep.subr.bf16.mxu1 %v9426_v5  ;;  %9696 = vmatpush1.bf16.msra.mxu0 %v9423_v32  ;;  %v17879_v22 = vpack.c.bf16 %v7924_v8, %v7920_v18  ;;  %v7926_v1 = vpop.f32.mrb[55].mxu1  ;;  %v9275_v5 = vld [vmem:[%s17811_s22 + $0x560] sm:$0xff] }
 0x54c   : > { %9697 = vmatprep.subr.bf16.mxu0 %v9428_v13  ;;  %v17883_v4 = vpack.c.bf16 %v7926_v1, %v7922_v47  ;;  %v9450_v13 = vunpack.c.l.s8.bf16 %v9278_v31  ;;  %v9447_v18 = vunpack.c.l.s8.bf16 %v9275_v5  ;;  %v9452_v47 = vunpack.c.h.s8.bf16 %v9276_v20 }
 0x54e   : > { %9961 = vmatpush1.bf16.msra.mxu1 %v9425_v41 }
 0x54f   : > { %9962 = vmatprep.subr.bf16.mxu1 %v9430_v17  ;;  %9698 = vmatpush1.bf16.msra.mxu0 %v9427_v48  ;;  %v9280_v48 = vld [vmem:[%s17811_s22 + $0x588] sm:$0xff] }
 0x550   : > { %9699 = vmatprep.subr.bf16.mxu0 %v9432_v12  ;;  %v9460_v61 = vunpack.c.h.s8.bf16 %v9280_v48 }
 0x552   : > { %9963 = vmatpush1.bf16.msra.mxu1 %v9429_v38  ;;  %v9454_v38 = vunpack.c.h.s8.bf16 %v9278_v31 }
 0x553   : > { %9964 = vmatprep.subr.bf16.mxu1 %v9434_v19  ;;  %9700 = vmatpush1.bf16.msra.mxu0 %v9431_v27  ;;  %v9451_v19 = vunpack.c.h.s8.bf16 %v9275_v5 }
 0x554   : > { %9701 = vmatprep.subr.bf16.mxu0 %v9436_v43  ;;  %v9456_v43 = vunpack.c.l.s8.bf16 %v9280_v48 }
 0x556   : > { %9965 = vmatpush1.bf16.msra.mxu1 %v9433_v34  ;;  %v9279_v34 = vld [vmem:[%s17811_s22 + $0x580] sm:$0xff] }
 0x557   : > { %9966 = vmatprep.subr.bf16.mxu1 %v9438_v14  ;;  %9702 = vmatpush1.bf16.msra.mxu0 %v9435_v51 }
 0x558   : > { %9703 = vmatprep.subr.bf16.mxu0 %v9440_v44  ;;  %v9453_v44 = vunpack.c.h.s8.bf16 %v9277_v39  ;;  %v9286_v39 = vld [vmem:[%s17811_s22 + $0x5b8] sm:$0xff] }
 0x55a   : > { %9967 = vmatpush1.bf16.msra.mxu1 %v9437_v35  ;;  %v9455_v35 = vunpack.c.l.s8.bf16 %v9279_v34 }
 0x55b   : > { %9968 = vmatprep.subr.bf16.mxu1 %v9442_v2  ;;  %9704 = vmatpush1.bf16.msra.mxu0 %v9439_v49  ;;  %v9281_v2 = vld [vmem:[%s17811_s22 + $0x590] sm:$0xff] }
 0x55c   : > { %9705 = vmatprep.subr.bf16.mxu0 %v9444_v23  ;;  %v9457_v31 = vunpack.c.l.s8.bf16 %v9281_v2 }
 0x55d   : > { %v7996_v32 = vpop.f32.mrb[56].mxu0 }
 0x55e   : > { %9969 = vmatpush1.bf16.msra.mxu1 %v9441_v0  ;;  %v7998_v57 = vpop.f32.mrb[57].mxu0 }
 0x55f   : > { %9970 = vmatprep.subr.bf16.mxu1 %v9446_v28  ;;  %9706 = vmatpush1.bf16.msra.mxu0 %v9443_v21  ;;  %v8000_v6 = vpop.f32.mrb[58].mxu0  ;;  %v9284_v28 = vld [vmem:[%s17811_s22 + $0x5a8] sm:$0xff] }
 0x560   : > { %9707 = vmatprep.subr.bf16.mxu0 %v9448_v29  ;;  %v17894_v41 = vpack.c.bf16 %v8000_v6, %v7996_v32  ;;  %v8002_v8 = vpop.f32.mrb[59].mxu0  ;;  %v8049_v17 = vpop.f32.mrb[56].mxu1  ;;  %v9462_v32 = vunpack.c.h.s8.bf16 %v9282_v58  ;;  %v9283_v6 = vld [vmem:[%s17811_s22 + $0x5a0] sm:$0xff] }
 0x561   : > { %v17897_v1 = vpack.c.bf16 %v8002_v8, %v7998_v57  ;;  %v8051_v12 = vpop.f32.mrb[57].mxu1  ;;  %v9461_v8 = vunpack.c.h.s8.bf16 %v9281_v2  ;;  %v9463_v48 = vunpack.c.l.s8.bf16 %v9283_v6 }
 0x562   : > { %9971 = vmatpush1.bf16.msra.mxu1 %v9445_v52  ;;  %v8053_v24 = vpop.f32.mrb[58].mxu1  ;;  %v9459_v52 = vunpack.c.h.s8.bf16 %v9279_v34 }
 0x563   : > { %9972 = vmatprep.subr.bf16.mxu1 %v9450_v13  ;;  %9708 = vmatpush1.bf16.msra.mxu0 %v9447_v18  ;;  %v17899_v27 = vpack.c.bf16 %v8053_v24, %v8049_v17  ;;  %v8055_v56 = vpop.f32.mrb[59].mxu1  ;;  %v9464_v18 = vunpack.c.l.s8.bf16 %v9284_v28  ;;  %v9466_v17 = vunpack.c.l.s8.bf16 %v9286_v39  ;;  %v9288_v24 = vld [vmem:[%s17811_s22 + $0x5c8] sm:$0xff] }
 0x564   : > { %9709 = vmatprep.subr.bf16.mxu0 %v9452_v47  ;;  %v17903_v14 = vpack.c.bf16 %v8055_v56, %v8051_v12  ;;  %v9285_v12 = vld [vmem:[%s17811_s22 + $0x5b0] sm:$0xff]  ;;  %v9290_v56 = vld [vmem:[%s17811_s22 + $0x5d8] sm:$0xff] }
 0x565   : > { %v8006_v51 = vpop.f32.mrb[60].mxu0  ;;  %v9469_v58 = vunpack.c.h.s8.bf16 %v9285_v12  ;;  %v9474_v34 = vunpack.c.l.s8.bf16 %v9290_v56 }
 0x566   : > { %9973 = vmatpush1.bf16.msra.mxu1 %v9449_v50  ;;  %v8008_v63 = vpop.f32.mrb[61].mxu0  ;;  %v9468_v50 = vunpack.c.h.s8.bf16 %v9284_v28 }
 0x567   : > { %9974 = vmatprep.subr.bf16.mxu1 %v9454_v38  ;;  %9710 = vmatpush1.bf16.msra.mxu0 %v9451_v19  ;;  %v8010_v49 = vpop.f32.mrb[62].mxu0  ;;  %v9465_v38 = vunpack.c.l.s8.bf16 %v9285_v12  ;;  %v9467_v19 = vunpack.c.h.s8.bf16 %v9283_v6  ;;  %v9296_v6 = vld [vmem:[%s17811_s22 + $0x608] sm:$0xff] }
 0x568   : > { %9732 = vmatprep.subr.bf16.mxu0 %v9456_v43  ;;  %v17906_v23 = vpack.c.bf16 %v8010_v49, %v8006_v51  ;;  %v8012_v20 = vpop.f32.mrb[63].mxu0  ;;  %v8059_v0 = vpop.f32.mrb[60].mxu1  ;;  %v9287_v43 = vld [vmem:[%s17811_s22 + $0x5c0] sm:$0xff] }
 0x569   : > { %v17909_v21 = vpack.c.bf16 %v8012_v20, %v8008_v63  ;;  %v8061_v29 = vpop.f32.mrb[61].mxu1  ;;  %v9471_v51 = vunpack.c.l.s8.bf16 %v9287_v43  ;;  %v9476_v63 = vunpack.c.h.s8.bf16 %v9288_v24  ;;  %v9475_v2 = vunpack.c.h.s8.bf16 %v9287_v43 }
 0x56a   : > { %9975 = vmatpush1.bf16.msra.mxu1 %v9453_v44  ;;  %9712 = vmatmul.mubr.bf16.vlgmr.msra.gmra.mrb[104].mxu0 %v17867_v54  ;;  %v8063_v5 = vpop.f32.mrb[62].mxu1  ;;  %v9289_v44 = vld [vmem:[%s17811_s22 + $0x5d0] sm:$0xff] }
 0x56b   : > { %9997 = vmatprep.subr.bf16.mxu1 %v9458_v3  ;;  %9733 = vmatpush1.bf16.msra.mxu0 %v9455_v35  ;;  %v17912_v57 = vpack.c.bf16 %v8063_v5, %v8059_v0  ;;  %v8065_v13 = vpop.f32.mrb[63].mxu1  ;;  %v9292_v3 = vld [vmem:[%s17811_s22 + $0x5e8] sm:$0xff]  ;;  %v9473_v35 = vunpack.c.l.s8.bf16 %v9289_v44  ;;  %v9477_v0 = vunpack.c.h.s8.bf16 %v9289_v44  ;;  %v9293_v5 = vld [vmem:[%s17811_s22 + $0x5f0] sm:$0xff] }
 0x56c   : > { %9734 = vmatprep.subr.bf16.mxu0 %v9460_v61  ;;  %9721 = vmatprep.mubr.bf16.mxu0 %v17879_v22  ;;  %v17917_v47 = vpack.c.bf16 %v8065_v13, %v8061_v29  ;;  %v9480_v49 = vunpack.c.l.s8.bf16 %v9292_v3  ;;  %v9291_v61 = vld [vmem:[%s17811_s22 + $0x5e0] sm:$0xff] }
 0x56d   : > { %9977 = vmatmul.mubr.bf16.vlgmr.msra.gmra.mrb[104].mxu1 %v17867_v54  ;;  %v9470_v54 = vunpack.c.h.s8.bf16 %v9286_v39 }
 0x56e   : > { %9998 = vmatpush1.bf16.msra.mxu1 %v9457_v31  ;;  %9986 = vmatprep.mubr.bf16.mxu1 %v17879_v22  ;;  %v9472_v22 = vunpack.c.l.s8.bf16 %v9288_v24  ;;  %v9479_v31 = vunpack.c.l.s8.bf16 %v9291_v61  ;;  %v9483_v24 = vunpack.c.h.s8.bf16 %v9291_v61  ;;  %v9300_v61 = vld [vmem:[%s17811_s22 + $0x628] sm:$0xff] }
 0x56f   : > { %9999 = vmatprep.subr.bf16.mxu1 %v9462_v32  ;;  %9735 = vmatpush1.bf16.msra.mxu0 %v9459_v52  ;;  %v9484_v52 = vunpack.c.h.s8.bf16 %v9292_v3  ;;  %v9297_v3 = vld [vmem:[%s17811_s22 + $0x610] sm:$0xff] }
 0x570   : > { %9736 = vmatprep.subr.bf16.mxu0 %v9464_v18 }
 0x572   : > { %10000 = vmatpush1.bf16.msra.mxu1 %v9461_v8  ;;  %9722 = vmatmul.mubr.bf16.gmra.mrb[108].mxu0 %v17877_v7 }
 0x573   : > { %10001 = vmatprep.subr.bf16.mxu1 %v9466_v17  ;;  %9737 = vmatpush1.bf16.msra.mxu0 %v9463_v48  ;;  %v9481_v48 = vunpack.c.l.s8.bf16 %v9293_v5 }
 0x574   : > { %9738 = vmatprep.subr.bf16.mxu0 %v9468_v50  ;;  %9764 = vmatprep.mubr.bf16.mxu0 %v17894_v41 }
 0x575   : > { %9987 = vmatmul.mubr.bf16.gmra.mrb[108].mxu1 %v17877_v7  ;;  %v9478_v7 = vunpack.c.h.s8.bf16 %v9290_v56  ;;  %v9295_v56 = vld [vmem:[%s17811_s22 + $0x600] sm:$0xff] }
 0x576   : > { %10002 = vmatpush1.bf16.msra.mxu1 %v9465_v38  ;;  %10029 = vmatprep.mubr.bf16.mxu1 %v17894_v41  ;;  %v9294_v41 = vld [vmem:[%s17811_s22 + $0x5f8] sm:$0xff] }
 0x577   : > { %10003 = vmatprep.subr.bf16.mxu1 %v9470_v54  ;;  %9739 = vmatpush1.bf16.msra.mxu0 %v9467_v19  ;;  %v9482_v29 = vunpack.c.l.s8.bf16 %v9294_v41  ;;  %v9486_v50 = vunpack.c.h.s8.bf16 %v9294_v41  ;;  %v9488_v19 = vunpack.c.l.s8.bf16 %v9296_v6 }
 0x578   : > { %9740 = vmatprep.subr.bf16.mxu0 %v9472_v22  ;;  %v9298_v22 = vld [vmem:[%s17811_s22 + $0x618] sm:$0xff] }
 0x579   : > { %v9490_v44 = vunpack.c.l.s8.bf16 %v9298_v22 }
 0x57a   : > { %10004 = vmatpush1.bf16.msra.mxu1 %v9469_v58 }
 0x57b   : > { %10005 = vmatprep.subr.bf16.mxu1 %v9474_v34  ;;  %9741 = vmatpush1.bf16.msra.mxu0 %v9471_v51  ;;  %v9485_v34 = vunpack.c.h.s8.bf16 %v9293_v5  ;;  %v9491_v5 = vunpack.c.h.s8.bf16 %v9295_v56 }
 0x57c   : > { %9742 = vmatprep.subr.bf16.mxu0 %v9476_v63  ;;  %v9487_v63 = vunpack.c.l.s8.bf16 %v9295_v56 }
 0x57d   : > { %v8135_v20 = vpop.f32.mrb[64].mxu0 }
 0x57e   : > { %10006 = vmatpush1.bf16.msra.mxu1 %v9473_v35  ;;  %v8137_v28 = vpop.f32.mrb[65].mxu0 }
 0x57f   : > { %10007 = vmatprep.subr.bf16.mxu1 %v9478_v7  ;;  %9743 = vmatpush1.bf16.msra.mxu0 %v9475_v2  ;;  %v8139_v32 = vpop.f32.mrb[66].mxu0  ;;  %v9492_v7 = vunpack.c.h.s8.bf16 %v9296_v6  ;;  %v9299_v6 = vld [vmem:[%s17811_s22 + $0x620] sm:$0xff] }
 0x580   : > { %9744 = vmatprep.subr.bf16.mxu0 %v9480_v49  ;;  %v17934_v13 = vpack.c.bf16 %v8139_v32, %v8135_v20  ;;  %v8141_v18 = vpop.f32.mrb[67].mxu0  ;;  %v8188_v39 = vpop.f32.mrb[64].mxu1 }
 0x581   : > { %v17937_v8 = vpack.c.bf16 %v8141_v18, %v8137_v28  ;;  %v8190_v17 = vpop.f32.mrb[65].mxu1  ;;  %v9489_v28 = vunpack.c.l.s8.bf16 %v9297_v3  ;;  %v9496_v18 = vunpack.c.l.s8.bf16 %v9300_v61 }
 0x582   : > { %10008 = vmatpush1.bf16.msra.mxu1 %v9477_v0  ;;  %v8192_v12 = vpop.f32.mrb[66].mxu1 }
 0x583   : > { %10009 = vmatprep.subr.bf16.mxu1 %v9482_v29  ;;  %9745 = vmatpush1.bf16.msra.mxu0 %v9479_v31  ;;  %v17939_v38 = vpack.c.bf16 %v8192_v12, %v8188_v39  ;;  %v8194_v54 = vpop.f32.mrb[67].mxu1  ;;  %v9494_v31 = vunpack.c.h.s8.bf16 %v9298_v22  ;;  %v9302_v39 = vld [vmem:[%s17811_s22 + $0x638] sm:$0xff] }
 0x584   : > { %9746 = vmatprep.subr.bf16.mxu0 %v9484_v52  ;;  %v17943_v43 = vpack.c.bf16 %v8194_v54, %v8190_v17  ;;  %v9498_v12 = vunpack.c.l.s8.bf16 %v9302_v39  ;;  %v9500_v54 = vunpack.c.h.s8.bf16 %v9300_v61  ;;  %v9502_v56 = vunpack.c.h.s8.bf16 %v9302_v39 }
 0x585   : > { %v8145_v58 = vpop.f32.mrb[68].mxu0 }
 0x586   : > { %10010 = vmatpush1.bf16.msra.mxu1 %v9481_v48  ;;  %v8147_v51 = vpop.f32.mrb[69].mxu0  ;;  %v9493_v48 = vunpack.c.h.s8.bf16 %v9297_v3 }
 0x587   : > { %10011 = vmatprep.subr.bf16.mxu1 %v9486_v50  ;;  %9747 = vmatpush1.bf16.msra.mxu0 %v9483_v24  ;;  %v8149_v35 = vpop.f32.mrb[70].mxu0  ;;  %v9495_v50 = vunpack.c.l.s8.bf16 %v9299_v6  ;;  %v9301_v24 = vld [vmem:[%s17811_s22 + $0x630] sm:$0xff] }
 0x588   : > { %9748 = vmatprep.subr.bf16.mxu0 %v9488_v19  ;;  %v17946_v2 = vpack.c.bf16 %v8149_v35, %v8145_v58  ;;  %v8151_v49 = vpop.f32.mrb[71].mxu0  ;;  %v8198_v41 = vpop.f32.mrb[68].mxu1  ;;  %v9304_v19 = vld [vmem:[%s17811_s22 + $0x648] sm:$0xff]  ;;  %v9497_v22 = vunpack.c.l.s8.bf16 %v9301_v24  ;;  %v9499_v58 = vunpack.c.h.s8.bf16 %v9299_v6 }
 0x589   : > { %v17949_v20 = vpack.c.bf16 %v8151_v49, %v8147_v51  ;;  %v8200_v0 = vpop.f32.mrb[69].mxu1  ;;  %v9306_v51 = vld [vmem:[%s17811_s22 + $0x658] sm:$0xff]  ;;  %v9508_v49 = vunpack.c.h.s8.bf16 %v9304_v19 }
 0x58a   : > { %10012 = vmatpush1.bf16.msra.mxu1 %v9485_v34  ;;  %v8202_v29 = vpop.f32.mrb[70].mxu1  ;;  %v9504_v34 = vunpack.c.l.s8.bf16 %v9304_v19  ;;  %v9506_v3 = vunpack.c.l.s8.bf16 %v9306_v51 }
 0x58b   : > { %10013 = vmatprep.subr.bf16.mxu1 %v9490_v44  ;;  %9749 = vmatpush1.bf16.msra.mxu0 %v9487_v63  ;;  %v17951_v32 = vpack.c.bf16 %v8202_v29, %v8198_v41  ;;  %v8204_v52 = vpop.f32.mrb[71].mxu1  ;;  %v9303_v44 = vld [vmem:[%s17811_s22 + $0x640] sm:$0xff]  ;;  %v9501_v63 = vunpack.c.h.s8.bf16 %v9301_v24  ;;  %v9308_v41 = vld [vmem:[%s17811_s22 + $0x668] sm:$0xff] }
 0x58c   : > { %9750 = vmatprep.subr.bf16.mxu0 %v9492_v7  ;;  %v17955_v17 = vpack.c.bf16 %v8204_v52, %v8200_v0  ;;  %v9503_v35 = vunpack.c.l.s8.bf16 %v9303_v44  ;;  %v9305_v7 = vld [vmem:[%s17811_s22 + $0x650] sm:$0xff]  ;;  %v9510_v0 = vunpack.c.h.s8.bf16 %v9306_v51  ;;  %v9512_v29 = vunpack.c.l.s8.bf16 %v9308_v41 }
 0x58d   : > { %v9505_v61 = vunpack.c.l.s8.bf16 %v9305_v7  ;;  %v9516_v24 = vunpack.c.h.s8.bf16 %v9308_v41  ;;  %v9314_v41 = vld [vmem:[%s17811_s22 + $0x698] sm:$0xff] }
 0x58e   : > { %10014 = vmatpush1.bf16.msra.mxu1 %v9489_v28  ;;  %v9507_v28 = vunpack.c.h.s8.bf16 %v9303_v44 }
 0x58f   : > { %10015 = vmatprep.subr.bf16.mxu1 %v9494_v31  ;;  %9751 = vmatpush1.bf16.msra.mxu0 %v9491_v5  ;;  %v9310_v31 = vld [vmem:[%s17811_s22 + $0x678] sm:$0xff]  ;;  %v9307_v5 = vld [vmem:[%s17811_s22 + $0x660] sm:$0xff] }
 0x590   : > { %9752 = vmatprep.subr.bf16.mxu0 %v9496_v18  ;;  %v9509_v18 = vunpack.c.h.s8.bf16 %v9305_v7  ;;  %v9514_v6 = vunpack.c.l.s8.bf16 %v9310_v31 }
 0x592   : > { %10016 = vmatpush1.bf16.msra.mxu1 %v9493_v48  ;;  %v9511_v48 = vunpack.c.l.s8.bf16 %v9307_v5 }
 0x593   : > { %10017 = vmatprep.subr.bf16.mxu1 %v9498_v12  ;;  %9753 = vmatpush1.bf16.msra.mxu0 %v9495_v50  ;;  %v9309_v12 = vld [vmem:[%s17811_s22 + $0x670] sm:$0xff] }
 0x594   : > { %9754 = vmatprep.subr.bf16.mxu0 %v9500_v54  ;;  %v9513_v51 = vunpack.c.l.s8.bf16 %v9309_v12 }
 0x596   : > { %10018 = vmatpush1.bf16.msra.mxu1 %v9497_v22 }
 0x597   : > { %10019 = vmatprep.subr.bf16.mxu1 %v9502_v56  ;;  %9755 = vmatpush1.bf16.msra.mxu0 %v9499_v58  ;;  %v9312_v56 = vld [vmem:[%s17811_s22 + $0x688] sm:$0xff] }
 0x598   : > { %9756 = vmatprep.subr.bf16.mxu0 %v9504_v34 }
 0x59a   : > { %10020 = vmatpush1.bf16.msra.mxu1 %v9501_v63  ;;  %v9518_v63 = vunpack.c.h.s8.bf16 %v9310_v31  ;;  %v9313_v31 = vld [vmem:[%s17811_s22 + $0x690] sm:$0xff] }
 0x59b   : > { %10021 = vmatprep.subr.bf16.mxu1 %v9506_v3  ;;  %9757 = vmatpush1.bf16.msra.mxu0 %v9503_v35  ;;  %v9515_v3 = vunpack.c.h.s8.bf16 %v9307_v5 }
 0x59c   : > { %9758 = vmatprep.subr.bf16.mxu0 %v9508_v49  ;;  %v9520_v49 = vunpack.c.l.s8.bf16 %v9312_v56 }
 0x59d   : > { %v8274_v52 = vpop.f32.mrb[72].mxu0 }
 0x59e   : > { %10022 = vmatpush1.bf16.msra.mxu1 %v9505_v61  ;;  %v8276_v39 = vpop.f32.mrb[73].mxu0 }
 0x59f   : > { %10023 = vmatprep.subr.bf16.mxu1 %v9510_v0  ;;  %9759 = vmatpush1.bf16.msra.mxu0 %v9507_v28  ;;  %v8278_v50 = vpop.f32.mrb[74].mxu0  ;;  %v9311_v0 = vld [vmem:[%s17811_s22 + $0x680] sm:$0xff] }
 0x5a0   : > { %9760 = vmatprep.subr.bf16.mxu0 %v9512_v29  ;;  %v17966_v54 = vpack.c.bf16 %v8278_v50, %v8274_v52  ;;  %v8280_v19 = vpop.f32.mrb[75].mxu0  ;;  %v8327_v22 = vpop.f32.mrb[72].mxu1  ;;  %v9517_v29 = vunpack.c.h.s8.bf16 %v9309_v12  ;;  %v9519_v5 = vunpack.c.l.s8.bf16 %v9311_v0  ;;  %v9521_v12 = vunpack.c.l.s8.bf16 %v9313_v31 }
 0x5a1   : > { %v17969_v58 = vpack.c.bf16 %v8280_v19, %v8276_v39  ;;  %v8329_v34 = vpop.f32.mrb[73].mxu1 }
 0x5a2   : > { %10024 = vmatpush1.bf16.msra.mxu1 %v9509_v18  ;;  %v8331_v44 = vpop.f32.mrb[74].mxu1  ;;  %v9522_v18 = vunpack.c.l.s8.bf16 %v9314_v41 }
 0x5a3   : > { %10025 = vmatprep.subr.bf16.mxu1 %v9514_v6  ;;  %9761 = vmatpush1.bf16.msra.mxu0 %v9511_v48  ;;  %v17971_v35 = vpack.c.bf16 %v8331_v44, %v8327_v22  ;;  %v8333_v7 = vpop.f32.mrb[75].mxu1  ;;  %v9526_v44 = vunpack.c.h.s8.bf16 %v9314_v41 }
 0x5a4   : > { %9762 = vmatprep.subr.bf16.mxu0 %v9516_v24  ;;  %v17974_v61 = vpack.c.bf16 %v8333_v7, %v8329_v34  ;;  %v9524_v24 = vunpack.c.h.s8.bf16 %v9312_v56  ;;  %v9316_v34 = vld [vmem:[%s17811_s22 + $0x6a8] sm:$0xff]  ;;  %v9523_v56 = vunpack.c.h.s8.bf16 %v9311_v0  ;;  %v9318_v7 = vld [vmem:[%s17811_s22 + $0x6b8] sm:$0xff] }
 0x5a5   : > { %v8284_v28 = vpop.f32.mrb[76].mxu0  ;;  %v9530_v41 = vunpack.c.l.s8.bf16 %v9318_v7  ;;  %v9532_v0 = vunpack.c.h.s8.bf16 %v9316_v34 }
 0x5a6   : > { %10026 = vmatpush1.bf16.msra.mxu1 %v9513_v51  ;;  %v8286_v52 = vpop.f32.mrb[77].mxu0 }
 0x5a7   : > { %10027 = vmatprep.subr.bf16.mxu1 %v9518_v63  ;;  %9763 = vmatpush1.bf16.msra.mxu0 %v9515_v3  ;;  %v8288_v39 = vpop.f32.mrb[78].mxu0 }
 0x5a8   : > { %9785 = vmatprep.subr.bf16.mxu0 %v9520_v49  ;;  %v17978_v6 = vpack.c.bf16 %v8288_v39, %v8284_v28  ;;  %v8290_v48 = vpop.f32.mrb[79].mxu0  ;;  %v8337_v50 = vpop.f32.mrb[76].mxu1  ;;  %v9528_v28 = vunpack.c.l.s8.bf16 %v9316_v34  ;;  %v9321_v34 = vld [vmem:[%s17811_s22 + $0x6d0] sm:$0xff] }
 0x5a9   : > { %v17980_v19 = vpack.c.bf16 %v8290_v48, %v8286_v52  ;;  %v8339_v22 = vpop.f32.mrb[77].mxu1  ;;  %v9525_v52 = vunpack.c.h.s8.bf16 %v9313_v31  ;;  %v9322_v48 = vld [vmem:[%s17811_s22 + $0x6d8] sm:$0xff] }
 0x5aa   : > { %10028 = vmatpush1.bf16.msra.mxu1 %v9517_v29  ;;  %9765 = vmatmul.mubr.bf16.vlgmr.msra.gmra.mrb[104].mxu0 %v17871_v33  ;;  %v8341_v51 = vpop.f32.mrb[78].mxu1  ;;  %v9315_v29 = vld [vmem:[%s17811_s22 + $0x6a0] sm:$0xff] }
 0x5ab   : > { %10050 = vmatprep.subr.bf16.mxu1 %v9522_v18  ;;  %9774 = vmatprep.mubr.bf16.mxu0 %v17906_v23  ;;  %v17985_v63 = vpack.c.bf16 %v8341_v51, %v8337_v50  ;;  %v8343_v3 = vpop.f32.mrb[79].mxu1  ;;  %v9317_v18 = vld [vmem:[%s17811_s22 + $0x6b0] sm:$0xff]  ;;  %v9527_v39 = vunpack.c.l.s8.bf16 %v9315_v29  ;;  %v9531_v31 = vunpack.c.h.s8.bf16 %v9315_v29  ;;  %v9323_v29 = vld [vmem:[%s17811_s22 + $0x6e0] sm:$0xff] }
 0x5ac   : > { %9786 = vmatpush1.bf16.msra.mxu0 %v9519_v5  ;;  %v17988_v49 = vpack.c.bf16 %v8343_v3, %v8339_v22  ;;  %v9320_v5 = vld [vmem:[%s17811_s22 + $0x6c8] sm:$0xff]  ;;  %v9533_v22 = vunpack.c.h.s8.bf16 %v9317_v18  ;;  %v9537_v3 = vunpack.c.l.s8.bf16 %v9321_v34 }
 0x5ad   : > { %10030 = vmatmul.mubr.bf16.vlgmr.msra.gmra.mrb[104].mxu1 %v17871_v33  ;;  %9787 = vmatprep.subr.bf16.mxu0 %v9524_v24  ;;  %v9529_v33 = vunpack.c.l.s8.bf16 %v9317_v18  ;;  %v9536_v50 = vunpack.c.l.s8.bf16 %v9320_v5  ;;  %v9319_v24 = vld [vmem:[%s17811_s22 + $0x6c0] sm:$0xff] }
 0x5ae   : > { %10039 = vmatprep.mubr.bf16.mxu1 %v17906_v23  ;;  %10051 = vmatpush1.bf16.msra.mxu1 %v9521_v12  ;;  %v9534_v23 = vunpack.c.h.s8.bf16 %v9318_v7  ;;  %v9538_v12 = vunpack.c.l.s8.bf16 %v9322_v48  ;;  %v9535_v51 = vunpack.c.l.s8.bf16 %v9319_v24  ;;  %v9539_v7 = vunpack.c.h.s8.bf16 %v9319_v24 }
 0x5af   : > { %10052 = vmatprep.subr.bf16.mxu1 %v9526_v44  ;;  %v9540_v44 = vunpack.c.h.s8.bf16 %v9320_v5  ;;  %v9543_v5 = vunpack.c.l.s8.bf16 %v9323_v29 }
 0x5b0   : > { %9788 = vmatpush1.bf16.msra.mxu0 %v9523_v56  ;;  %v9542_v56 = vunpack.c.h.s8.bf16 %v9322_v48 }
 0x5b1   : > { %9789 = vmatprep.subr.bf16.mxu0 %v9528_v28  ;;  %v9326_v28 = vld [vmem:[%s17811_s22 + $0x6f8] sm:$0xff] }
 0x5b2   : > { %10053 = vmatpush1.bf16.msra.mxu1 %v9525_v52  ;;  %9775 = vmatmul.mubr.bf16.gmra.mrb[108].mxu0 %v17883_v4 }
 0x5b3   : > { %10054 = vmatprep.subr.bf16.mxu1 %v9530_v41  ;;  %9817 = vmatprep.mubr.bf16.mxu0 %v17899_v27  ;;  %v9541_v41 = vunpack.c.h.s8.bf16 %v9321_v34  ;;  %v9328_v34 = vld [vmem:[%s17811_s22 + $0x708] sm:$0xff] }
 0x5b4   : > { %9790 = vmatpush1.bf16.msra.mxu0 %v9527_v39  ;;  %v9546_v39 = vunpack.c.l.s8.bf16 %v9326_v28 }
 0x5b5   : > { %10040 = vmatmul.mubr.bf16.gmra.mrb[108].mxu1 %v17883_v4  ;;  %9791 = vmatprep.subr.bf16.mxu0 %v9532_v0  ;;  %v9324_v4 = vld [vmem:[%s17811_s22 + $0x6e8] sm:$0xff]  ;;  %v9325_v0 = vld [vmem:[%s17811_s22 + $0x6f0] sm:$0xff] }
 0x5b6   : > { %10055 = vmatpush1.bf16.msra.mxu1 %v9529_v33  ;;  %10082 = vmatprep.mubr.bf16.mxu1 %v17899_v27  ;;  %v9544_v27 = vunpack.c.l.s8.bf16 %v9324_v4 }
 0x5b7   : > { %10056 = vmatprep.subr.bf16.mxu1 %v9534_v23 }
 0x5b8   : > { %9792 = vmatpush1.bf16.msra.mxu0 %v9531_v31 }
 0x5b9   : > { %9793 = vmatprep.subr.bf16.mxu0 %v9536_v50  ;;  %v9548_v50 = vunpack.c.h.s8.bf16 %v9324_v4  ;;  %v9552_v4 = vunpack.c.l.s8.bf16 %v9328_v34 }
 0x5ba   : > { %10057 = vmatpush1.bf16.msra.mxu1 %v9533_v22 }
 0x5bb   : > { %10058 = vmatprep.subr.bf16.mxu1 %v9538_v12  ;;  %v9545_v12 = vunpack.c.l.s8.bf16 %v9325_v0 }
 0x5bc   : > { %9794 = vmatpush1.bf16.msra.mxu0 %v9535_v51 }
 0x5bd   : > { %9795 = vmatprep.subr.bf16.mxu0 %v9540_v44  ;;  %v8413_v52 = vpop.f32.mrb[80].mxu0  ;;  %v9550_v44 = vunpack.c.h.s8.bf16 %v9326_v28  ;;  %v9329_v28 = vld [vmem:[%s17811_s22 + $0x710] sm:$0xff] }
 0x5be   : > { %10059 = vmatpush1.bf16.msra.mxu1 %v9537_v3  ;;  %v8415_v18 = vpop.f32.mrb[81].mxu0 }
 0x5bf   : > { %10060 = vmatprep.subr.bf16.mxu1 %v9542_v56  ;;  %v8417_v33 = vpop.f32.mrb[82].mxu0 }
 0x5c0   : > { %9796 = vmatpush1.bf16.msra.mxu0 %v9539_v7  ;;  %v18006_v23 = vpack.c.bf16 %v8417_v33, %v8413_v52  ;;  %v8419_v31 = vpop.f32.mrb[83].mxu0  ;;  %v8466_v48 = vpop.f32.mrb[80].mxu1  ;;  %v9547_v7 = vunpack.c.h.s8.bf16 %v9323_v29  ;;  %v9330_v52 = vld [vmem:[%s17811_s22 + $0x718] sm:$0xff] }
 0x5c1   : > { %9797 = vmatprep.subr.bf16.mxu0 %v9544_v27  ;;  %v18008_v24 = vpack.c.bf16 %v8419_v31, %v8415_v18  ;;  %v8468_v22 = vpop.f32.mrb[81].mxu1  ;;  %v9327_v27 = vld [vmem:[%s17811_s22 + $0x700] sm:$0xff] }
 0x5c2   : > { %10061 = vmatpush1.bf16.msra.mxu1 %v9541_v41  ;;  %v8470_v51 = vpop.f32.mrb[82].mxu1  ;;  %v9549_v41 = vunpack.c.h.s8.bf16 %v9325_v0  ;;  %v9553_v0 = vunpack.c.l.s8.bf16 %v9329_v28 }
 0x5c3   : > { %10062 = vmatprep.subr.bf16.mxu1 %v9546_v39  ;;  %v18011_v3 = vpack.c.bf16 %v8470_v51, %v8466_v48  ;;  %v8472_v56 = vpop.f32.mrb[83].mxu1  ;;  %v9554_v39 = vunpack.c.l.s8.bf16 %v9330_v52  ;;  %v9551_v48 = vunpack.c.l.s8.bf16 %v9327_v27 }
 0x5c4   : > { %9798 = vmatpush1.bf16.msra.mxu0 %v9543_v5  ;;  %v18014_v33 = vpack.c.bf16 %v8472_v56, %v8468_v22  ;;  %v9332_v56 = vld [vmem:[%s17811_s22 + $0x728] sm:$0xff] }
 0x5c5   : > { %19189 = vst [vmem:[#allocation44_spill] sm:$0xff] %v18011_v3  ;;  %9799 = vmatprep.subr.bf16.mxu0 %v9548_v50  ;;  %v8423_v18 = vpop.f32.mrb[84].mxu0  ;;  %v9556_v50 = vunpack.c.h.s8.bf16 %v9328_v34  ;;  %v9334_v3 = vld [vmem:[%s17811_s22 + $0x738] sm:$0xff]  ;;  %v9560_v34 = vunpack.c.l.s8.bf16 %v9332_v56 }
 0x5c6   : > { %19190 = vst [vmem:[#allocation45_spill] sm:$0xff] %v18014_v33  ;;  %10063 = vmatpush1.bf16.msra.mxu1 %v9545_v12  ;;  %v8425_v31 = vpop.f32.mrb[85].mxu0  ;;  %v9558_v33 = vunpack.c.h.s8.bf16 %v9330_v52 }
 0x5c7   : > { %10064 = vmatprep.subr.bf16.mxu1 %v9550_v44  ;;  %v8427_v10 = vpop.f32.mrb[86].mxu0 }
 0x5c8   : > { %9800 = vmatpush1.bf16.msra.mxu0 %v9547_v7  ;;  %v18018_v51 = vpack.c.bf16 %v8427_v10, %v8423_v18  ;;  %v8429_v29 = vpop.f32.mrb[87].mxu0  ;;  %v8476_v5 = vpop.f32.mrb[84].mxu1  ;;  %v9555_v18 = vunpack.c.h.s8.bf16 %v9327_v27 }
 0x5c9   : > { %9801 = vmatprep.subr.bf16.mxu0 %v9552_v4  ;;  %v18020_v22 = vpack.c.bf16 %v8429_v29, %v8425_v31  ;;  %v8478_v12 = vpop.f32.mrb[85].mxu1  ;;  %v9331_v31 = vld [vmem:[%s17811_s22 + $0x720] sm:$0xff]  ;;  %v9562_v29 = vunpack.c.l.s8.bf16 %v9334_v3 }
 0x5ca   : > { %19191 = vst [vmem:[#allocation46_spill] sm:$0xff] %v18018_v51  ;;  %10065 = vmatpush1.bf16.msra.mxu1 %v9549_v41  ;;  %v8480_v44 = vpop.f32.mrb[86].mxu1  ;;  %v9557_v41 = vunpack.c.h.s8.bf16 %v9329_v28  ;;  %v9559_v52 = vunpack.c.l.s8.bf16 %v9331_v31 }
 0x5cb   : > { %19192 = vst [vmem:[#allocation47_spill] sm:$0xff] %v18020_v22  ;;  %10066 = vmatprep.subr.bf16.mxu1 %v9554_v39  ;;  %v18023_v7 = vpack.c.bf16 %v8480_v44, %v8476_v5  ;;  %v8482_v10 = vpop.f32.mrb[87].mxu1  ;;  %v9333_v39 = vld [vmem:[%s17811_s22 + $0x730] sm:$0xff]  ;;  %v9564_v5 = vunpack.c.h.s8.bf16 %v9332_v56 }
 0x5cc   : > { %9802 = vmatpush1.bf16.msra.mxu0 %v9551_v48  ;;  %v18026_v4 = vpack.c.bf16 %v8482_v10, %v8478_v12  ;;  %v9561_v27 = vunpack.c.l.s8.bf16 %v9333_v39  ;;  %v9336_v48 = vld [vmem:[%s17811_s22 + $0x748] sm:$0xff]  ;;  %v9566_v12 = vunpack.c.h.s8.bf16 %v9334_v3  ;;  %v9565_v44 = vunpack.c.h.s8.bf16 %v9333_v39  ;;  %v9337_v56 = vld [vmem:[%s17811_s22 + $0x750] sm:$0xff]  ;;  %v9339_v39 = vld [vmem:[%s17811_s22 + $0x760] sm:$0xff] }
 0x5cd   : > { %19193 = vst [vmem:[#allocation48_spill] sm:$0xff] %v18023_v7  ;;  %9803 = vmatprep.subr.bf16.mxu0 %v9556_v50  ;;  %v9563_v50 = vunpack.c.h.s8.bf16 %v9331_v31  ;;  %v9568_v28 = vunpack.c.l.s8.bf16 %v9336_v48  ;;  %v9569_v3 = vunpack.c.l.s8.bf16 %v9337_v56  ;;  %v9340_v31 = vld [vmem:[%s17811_s22 + $0x768] sm:$0xff] }
 0x5ce   : > { %19194 = vst [vmem:[#allocation50_spill] sm:$0xff] %v18026_v4  ;;  %10067 = vmatpush1.bf16.msra.mxu1 %v9553_v0  ;;  %v9338_v0 = vld [vmem:[%s17811_s22 + $0x758] sm:$0xff] }
 0x5cf   : > { %10068 = vmatprep.subr.bf16.mxu1 %v9558_v33  ;;  %v9335_v33 = vld [vmem:[%s17811_s22 + $0x740] sm:$0xff]  ;;  %v9570_v10 = vunpack.c.l.s8.bf16 %v9338_v0 }
 0x5d0   : > { %9804 = vmatpush1.bf16.msra.mxu0 %v9555_v18  ;;  %v9567_v18 = vunpack.c.l.s8.bf16 %v9335_v33 }
 0x5d1   : > { %9805 = vmatprep.subr.bf16.mxu0 %v9560_v34  ;;  %v9572_v34 = vunpack.c.h.s8.bf16 %v9336_v48  ;;  %v9341_v48 = vld [vmem:[%s17811_s22 + $0x770] sm:$0xff] }
 0x5d2   : > { %10069 = vmatpush1.bf16.msra.mxu1 %v9557_v41  ;;  %v9574_v41 = vunpack.c.h.s8.bf16 %v9338_v0 }
 0x5d3   : > { %10070 = vmatprep.subr.bf16.mxu1 %v9562_v29  ;;  %v9571_v29 = vunpack.c.h.s8.bf16 %v9335_v33 }
 0x5d4   : > { %9806 = vmatpush1.bf16.msra.mxu0 %v9559_v52  ;;  %v9342_v52 = vld [vmem:[%s17811_s22 + $0x778] sm:$0xff] }
 0x5d5   : > { %9807 = vmatprep.subr.bf16.mxu0 %v9564_v5  ;;  %v9576_v5 = vunpack.c.l.s8.bf16 %v9340_v31  ;;  %v9582_v51 = vunpack.c.h.s8.bf16 %v9342_v52 }
 0x5d6   : > { %10071 = vmatpush1.bf16.msra.mxu1 %v9561_v27 }
 0x5d7   : > { %10072 = vmatprep.subr.bf16.mxu1 %v9566_v12  ;;  %v9573_v12 = vunpack.c.h.s8.bf16 %v9337_v56  ;;  %v9577_v56 = vunpack.c.l.s8.bf16 %v9341_v48 }
 0x5d8   : > { %9808 = vmatpush1.bf16.msra.mxu0 %v9563_v50  ;;  %v9578_v50 = vunpack.c.l.s8.bf16 %v9342_v52  ;;  %v9345_v52 = vld [vmem:[%s17811_s22 + $0x790] sm:$0xff] }
 0x5d9   : > { %9809 = vmatprep.subr.bf16.mxu0 %v9568_v28 }
 0x5da   : > { %10073 = vmatpush1.bf16.msra.mxu1 %v9565_v44  ;;  %v9575_v44 = vunpack.c.l.s8.bf16 %v9339_v39 }
 0x5db   : > { %10074 = vmatprep.subr.bf16.mxu1 %v9570_v10  ;;  %v9580_v10 = vunpack.c.h.s8.bf16 %v9340_v31  ;;  %v9343_v31 = vld [vmem:[%s17811_s22 + $0x780] sm:$0xff] }
 0x5dc   : > { %9810 = vmatpush1.bf16.msra.mxu0 %v9567_v18 }
 0x5dd   : > { %9811 = vmatprep.subr.bf16.mxu0 %v9572_v34  ;;  %v8552_v27 = vpop.f32.mrb[88].mxu0 }
 0x5de   : > { %10075 = vmatpush1.bf16.msra.mxu1 %v9569_v3  ;;  %v8554_v4 = vpop.f32.mrb[89].mxu0  ;;  %v9344_v3 = vld [vmem:[%s17811_s22 + $0x788] sm:$0xff] }
 0x5df   : > { %10076 = vmatprep.subr.bf16.mxu1 %v9574_v41  ;;  %v8556_v28 = vpop.f32.mrb[90].mxu0 }
 0x5e0   : > { %9812 = vmatpush1.bf16.msra.mxu0 %v9571_v29  ;;  %v18038_v7 = vpack.c.bf16 %v8556_v28, %v8552_v27  ;;  %v8558_v0 = vpop.f32.mrb[91].mxu0  ;;  %v8605_v33 = vpop.f32.mrb[88].mxu1  ;;  %v9579_v28 = vunpack.c.h.s8.bf16 %v9339_v39 }
 0x5e1   : > { %9813 = vmatprep.subr.bf16.mxu0 %v9576_v5  ;;  %v18040_v18 = vpack.c.bf16 %v8558_v0, %v8554_v4  ;;  %v8607_v34 = vpop.f32.mrb[89].mxu1  ;;  %v9584_v4 = vunpack.c.l.s8.bf16 %v9344_v3 }
 0x5e2   : > { %19195 = vst [vmem:[#allocation49_spill] sm:$0xff] %v18038_v7  ;;  %10077 = vmatpush1.bf16.msra.mxu1 %v9573_v12  ;;  %v8609_v41 = vpop.f32.mrb[90].mxu1  ;;  %v9346_v7 = vld [vmem:[%s17811_s22 + $0x798] sm:$0xff]  ;;  %v9581_v12 = vunpack.c.h.s8.bf16 %v9341_v48  ;;  %v9585_v48 = vunpack.c.l.s8.bf16 %v9345_v52 }
 0x5e3   : > { %19196 = vst [vmem:[#allocation51_spill] sm:$0xff] %v18040_v18  ;;  %10078 = vmatprep.subr.bf16.mxu1 %v9578_v50  ;;  %v18043_v29 = vpack.c.bf16 %v8609_v41, %v8605_v33  ;;  %v8611_v27 = vpop.f32.mrb[91].mxu1  ;;  %v9586_v50 = vunpack.c.l.s8.bf16 %v9346_v7  ;;  %v9583_v33 = vunpack.c.l.s8.bf16 %v9343_v31 }
 0x5e4   : > { %9814 = vmatpush1.bf16.msra.mxu0 %v9575_v44  ;;  %v18046_v22 = vpack.c.bf16 %v8611_v27, %v8607_v34 }
 0x5e5   : > { %9815 = vmatprep.subr.bf16.mxu0 %v9580_v10  ;;  %v8562_v5 = vpop.f32.mrb[92].mxu0  ;;  %v9588_v10 = vunpack.c.h.s8.bf16 %v9344_v3  ;;  %v9587_v3 = vunpack.c.h.s8.bf16 %v9343_v31 }
 0x5e6   : > { %19197 = vst [vmem:[#allocation7_spill] sm:$0xff] %v18046_v22  ;;  %10079 = vmatpush1.bf16.msra.mxu1 %v9577_v56  ;;  %v8564_v0 = vpop.f32.mrb[93].mxu0  ;;  %v9348_v56 = vld [vmem:[%s17811_s22 + $0x7a8] sm:$0xff] }
 0x5e7   : > { %10080 = vmatprep.subr.bf16.mxu1 %v9582_v51  ;;  %v8566_v18 = vpop.f32.mrb[94].mxu0  ;;  %v9596_v31 = vunpack.c.h.s8.bf16 %v9348_v56 }
 0x5e8   : > { %9816 = vmatpush1.bf16.msra.mxu0 %v9579_v28  ;;  %v18050_v41 = vpack.c.bf16 %v8566_v18, %v8562_v5  ;;  %v8568_v39 = vpop.f32.mrb[95].mxu0  ;;  %v8615_v44 = vpop.f32.mrb[92].mxu1  ;;  %v9590_v28 = vunpack.c.h.s8.bf16 %v9346_v7  ;;  %v9589_v7 = vunpack.c.h.s8.bf16 %v9345_v52  ;;  %v9354_v52 = vld [vmem:[%s17811_s22 + $0x7d8] sm:$0xff] }
 0x5e9   : > { %9838 = vmatprep.subr.bf16.mxu0 %v9584_v4  ;;  %v18052_v34 = vpack.c.bf16 %v8568_v39, %v8564_v0  ;;  %v8617_v27 = vpop.f32.mrb[93].mxu1  ;;  %v9350_v4 = vld [vmem:[%s17811_s22 + $0x7b8] sm:$0xff]  ;;  %v9347_v0 = vld [vmem:[%s17811_s22 + $0x7a0] sm:$0xff]  ;;  %v9349_v39 = vld [vmem:[%s17811_s22 + $0x7b0] sm:$0xff] }
 0x5ea   : > { %10081 = vmatpush1.bf16.msra.mxu1 %v9581_v12  ;;  %v8619_v51 = vpop.f32.mrb[94].mxu1  ;;  %v9592_v12 = vunpack.c.l.s8.bf16 %v9348_v56  ;;  %v9597_v56 = vunpack.c.h.s8.bf16 %v9349_v39 }
 0x5eb   : > { %9818 = vmatmul.mubr.bf16.vlgmr.msra.gmra.mrb[104].mxu0 %v17897_v1  ;;  %10103 = vmatprep.subr.bf16.mxu1 %v9586_v50  ;;  %v18056_v22 = vpack.c.bf16 %v8619_v51, %v8615_v44  ;;  %v8621_v18 = vpop.f32.mrb[95].mxu1  ;;  %v9594_v50 = vunpack.c.l.s8.bf16 %v9350_v4  ;;  %v9593_v44 = vunpack.c.l.s8.bf16 %v9349_v39  ;;  %v9602_v51 = vunpack.c.l.s8.bf16 %v9354_v52 }
 0x5ec   : > { %9827 = vmatprep.mubr.bf16.mxu0 %v17912_v57  ;;  %9839 = vmatpush1.bf16.msra.mxu0 %v9583_v33  ;;  %v18060_v5 = vpack.c.bf16 %v8621_v18, %v8617_v27  ;;  %v9591_v33 = vunpack.c.l.s8.bf16 %v9347_v0 }
 0x5ed   : > { %10083 = vmatmul.mubr.bf16.vlgmr.msra.gmra.mrb[104].mxu1 %v17897_v1  ;;  %9840 = vmatprep.subr.bf16.mxu0 %v9588_v10  ;;  %v9352_v1 = vld [vmem:[%s17811_s22 + $0x7c8] sm:$0xff]  ;;  %v9598_v10 = vunpack.c.h.s8.bf16 %v9350_v4 }
 0x5ee   : > { %19198 = vst [vmem:[#allocation10_spill] sm:$0xff] %v18060_v5  ;;  %10092 = vmatprep.mubr.bf16.mxu1 %v17912_v57  ;;  %10104 = vmatpush1.bf16.msra.mxu1 %v9585_v48  ;;  %v9595_v57 = vunpack.c.h.s8.bf16 %v9347_v0  ;;  %v9600_v27 = vunpack.c.l.s8.bf16 %v9352_v1  ;;  %v9351_v48 = vld [vmem:[%s17811_s22 + $0x7c0] sm:$0xff]  ;;  %v9362_v5 = vld [vmem:[%s17811_s22 + $0x818] sm:$0xff] }
 0x5ef   : > { %10105 = vmatprep.subr.bf16.mxu1 %v9590_v28  ;;  %v9353_v28 = vld [vmem:[%s17811_s22 + $0x7d0] sm:$0xff]  ;;  %v9599_v18 = vunpack.c.l.s8.bf16 %v9351_v48  ;;  %v9603_v0 = vunpack.c.h.s8.bf16 %v9351_v48 }
 0x5f0   : > { %9841 = vmatpush1.bf16.msra.mxu0 %v9587_v3  ;;  %v9604_v3 = vunpack.c.h.s8.bf16 %v9352_v1  ;;  %v9601_v4 = vunpack.c.l.s8.bf16 %v9353_v28  ;;  %v9357_v1 = vld [vmem:[%s17811_s22 + $0x7f0] sm:$0xff] }
 0x5f1   : > { %9842 = vmatprep.subr.bf16.mxu0 %v9592_v12  ;;  %v9606_v12 = vunpack.c.h.s8.bf16 %v9354_v52 }
 0x5f2   : > { %10106 = vmatpush1.bf16.msra.mxu1 %v9589_v7  ;;  %v9358_v7 = vld [vmem:[%s17811_s22 + $0x7f8] sm:$0xff] }
 0x5f3   : > { %9828 = vmatmul.mubr.bf16.gmra.mrb[108].mxu0 %v17909_v21  ;;  %10107 = vmatprep.subr.bf16.mxu1 %v9594_v50  ;;  %v9355_v50 = vld [vmem:[%s17811_s22 + $0x7e0] sm:$0xff] }
 0x5f4   : > { %9843 = vmatpush1.bf16.msra.mxu0 %v9591_v33  ;;  %9870 = vmatprep.mubr.bf16.mxu0 %v17934_v13  ;;  %v9605_v33 = vunpack.c.h.s8.bf16 %v9353_v28  ;;  %v9609_v28 = vunpack.c.l.s8.bf16 %v9357_v1 }
 0x5f5   : > { %10093 = vmatmul.mubr.bf16.gmra.mrb[108].mxu1 %v17909_v21  ;;  %9844 = vmatprep.subr.bf16.mxu0 %v9596_v31  ;;  %v9356_v21 = vld [vmem:[%s17811_s22 + $0x7e8] sm:$0xff] }
 0x5f6   : > { %10108 = vmatpush1.bf16.msra.mxu1 %v9593_v44  ;;  %10135 = vmatprep.mubr.bf16.mxu1 %v17934_v13  ;;  %v9608_v13 = vunpack.c.l.s8.bf16 %v9356_v21  ;;  %v9610_v44 = vunpack.c.l.s8.bf16 %v9358_v7 }
 0x5f7   : > { %10109 = vmatprep.subr.bf16.mxu1 %v9598_v10 }
 0x5f8   : > { %9845 = vmatpush1.bf16.msra.mxu0 %v9595_v57  ;;  %v9607_v57 = vunpack.c.l.s8.bf16 %v9355_v50 }
 0x5f9   : > { %9846 = vmatprep.subr.bf16.mxu0 %v9600_v27 }
 0x5fa   : > { %10110 = vmatpush1.bf16.msra.mxu1 %v9597_v56  ;;  %v9612_v56 = vunpack.c.h.s8.bf16 %v9356_v21 }
 0x5fb   : > { %10111 = vmatprep.subr.bf16.mxu1 %v9602_v51 }
 0x5fc   : > { %9847 = vmatpush1.bf16.msra.mxu0 %v9599_v18 }
 0x5fd   : > { %9848 = vmatprep.subr.bf16.mxu0 %v9604_v3  ;;  %v8691_v39 = vpop.f32.mrb[96].mxu0  ;;  %v9360_v3 = vld [vmem:[%s17811_s22 + $0x808] sm:$0xff] }
 0x5fe   : > { %10112 = vmatpush1.bf16.msra.mxu1 %v9601_v4  ;;  %v8693_v31 = vpop.f32.mrb[97].mxu0  ;;  %v9616_v21 = vunpack.c.l.s8.bf16 %v9360_v3 }
 0x5ff   : > { %10113 = vmatprep.subr.bf16.mxu1 %v9606_v12  ;;  %v8695_v10 = vpop.f32.mrb[98].mxu0  ;;  %v9614_v12 = vunpack.c.h.s8.bf16 %v9358_v7  ;;  %v9361_v7 = vld [vmem:[%s17811_s22 + $0x810] sm:$0xff] }
 0x600   : > { %9849 = vmatpush1.bf16.msra.mxu0 %v9603_v0  ;;  %v18078_v27 = vpack.c.bf16 %v8695_v10, %v8691_v39  ;;  %v8697_v52 = vpop.f32.mrb[99].mxu0  ;;  %v8744_v48 = vpop.f32.mrb[96].mxu1  ;;  %v9611_v10 = vunpack.c.h.s8.bf16 %v9355_v50 }
 0x601   : > { %9850 = vmatprep.subr.bf16.mxu0 %v9608_v13  ;;  %v18080_v51 = vpack.c.bf16 %v8697_v52, %v8693_v31  ;;  %v8746_v18 = vpop.f32.mrb[97].mxu1  ;;  %v9359_v13 = vld [vmem:[%s17811_s22 + $0x800] sm:$0xff] }
 0x602   : > { %19199 = vst [vmem:[#allocation14_spill] sm:$0xff] %v18078_v27  ;;  %10114 = vmatpush1.bf16.msra.mxu1 %v9605_v33  ;;  %v8748_v4 = vpop.f32.mrb[98].mxu1  ;;  %v9613_v33 = vunpack.c.h.s8.bf16 %v9357_v1  ;;  %v9617_v1 = vunpack.c.l.s8.bf16 %v9361_v7 }
 0x603   : > { %19200 = vst [vmem:[#allocation11_spill] sm:$0xff] %v18080_v51  ;;  %10115 = vmatprep.subr.bf16.mxu1 %v9610_v44  ;;  %v18083_v0 = vpack.c.bf16 %v8748_v4, %v8744_v48  ;;  %v8750_v39 = vpop.f32.mrb[99].mxu1  ;;  %v9618_v44 = vunpack.c.l.s8.bf16 %v9362_v5  ;;  %v9615_v48 = vunpack.c.l.s8.bf16 %v9359_v13 }
 0x604   : > { %9851 = vmatpush1.bf16.msra.mxu0 %v9607_v57  ;;  %v18086_v27 = vpack.c.bf16 %v8750_v39, %v8746_v18  ;;  %v9364_v39 = vld [vmem:[%s17811_s22 + $0x828] sm:$0xff] }
 0x605   : > { %19201 = vst [vmem:[#allocation15_spill] sm:$0xff] %v18083_v0  ;;  %9852 = vmatprep.subr.bf16.mxu0 %v9612_v56  ;;  %v8701_v31 = vpop.f32.mrb[100].mxu0  ;;  %v9620_v56 = vunpack.c.h.s8.bf16 %v9360_v3  ;;  %v9366_v0 = vld [vmem:[%s17811_s22 + $0x838] sm:$0xff]  ;;  %v9624_v3 = vunpack.c.l.s8.bf16 %v9364_v39 }
 0x606   : > { %19202 = vst [vmem:[#allocation8_spill] sm:$0xff] %v18086_v27  ;;  %10116 = vmatpush1.bf16.msra.mxu1 %v9609_v28  ;;  %v8703_v52 = vpop.f32.mrb[101].mxu0  ;;  %v9622_v27 = vunpack.c.h.s8.bf16 %v9362_v5 }
 0x607   : > { %10117 = vmatprep.subr.bf16.mxu1 %v9614_v12  ;;  %v8705_v51 = vpop.f32.mrb[102].mxu0 }
 0x608   : > { %9853 = vmatpush1.bf16.msra.mxu0 %v9611_v10  ;;  %v18090_v4 = vpack.c.bf16 %v8705_v51, %v8701_v31  ;;  %v8707_v50 = vpop.f32.mrb[103].mxu0  ;;  %v8754_v57 = vpop.f32.mrb[100].mxu1  ;;  %v9619_v31 = vunpack.c.h.s8.bf16 %v9359_v13 }
 0x609   : > { %9854 = vmatprep.subr.bf16.mxu0 %v9616_v21  ;;  %v18092_v18 = vpack.c.bf16 %v8707_v50, %v8703_v52  ;;  %v8756_v28 = vpop.f32.mrb[101].mxu1  ;;  %v9363_v52 = vld [vmem:[%s17811_s22 + $0x820] sm:$0xff]  ;;  %v9626_v50 = vunpack.c.l.s8.bf16 %v9366_v0 }
 0x60a   : > { %10118 = vmatpush1.bf16.msra.mxu1 %v9613_v33  ;;  %v8758_v12 = vpop.f32.mrb[102].mxu1  ;;  %v9621_v33 = vunpack.c.h.s8.bf16 %v9361_v7  ;;  %v9623_v5 = vunpack.c.l.s8.bf16 %v9363_v52 }
 0x60b   : > { %10119 = vmatprep.subr.bf16.mxu1 %v9618_v44  ;;  %v18095_v10 = vpack.c.bf16 %v8758_v12, %v8754_v57  ;;  %v8760_v51 = vpop.f32.mrb[103].mxu1  ;;  %v9365_v44 = vld [vmem:[%s17811_s22 + $0x830] sm:$0xff]  ;;  %v9628_v57 = vunpack.c.h.s8.bf16 %v9364_v39 }
 0x60c   : > { %9855 = vmatpush1.bf16.msra.mxu0 %v9615_v48  ;;  %v18098_v21 = vpack.c.bf16 %v8760_v51, %v8756_v28  ;;  %v9625_v13 = vunpack.c.l.s8.bf16 %v9365_v44  ;;  %v9368_v48 = vld [vmem:[%s17811_s22 + $0x848] sm:$0xff]  ;;  %v9630_v28 = vunpack.c.h.s8.bf16 %v9366_v0  ;;  %v9629_v12 = vunpack.c.h.s8.bf16 %v9365_v44  ;;  %v9369_v39 = vld [vmem:[%s17811_s22 + $0x850] sm:$0xff] }
 0x60d   : > { %9856 = vmatprep.subr.bf16.mxu0 %v9620_v56  ;;  %v9627_v56 = vunpack.c.h.s8.bf16 %v9363_v52  ;;  %v9632_v7 = vunpack.c.l.s8.bf16 %v9368_v48  ;;  %v9633_v0 = vunpack.c.l.s8.bf16 %v9369_v39  ;;  %v9372_v52 = vld [vmem:[%s17811_s22 + $0x868] sm:$0xff] }
 0x60e   : > { %10120 = vmatpush1.bf16.msra.mxu1 %v9617_v1  ;;  %v9370_v1 = vld [vmem:[%s17811_s22 + $0x858] sm:$0xff]  ;;  %v9640_v44 = vunpack.c.l.s8.bf16 %v9372_v52 }
 0x60f   : > { %10121 = vmatprep.subr.bf16.mxu1 %v9622_v27  ;;  %v9367_v27 = vld [vmem:[%s17811_s22 + $0x840] sm:$0xff]  ;;  %v9634_v51 = vunpack.c.l.s8.bf16 %v9370_v1 }
 0x610   : > { %9857 = vmatpush1.bf16.msra.mxu0 %v9619_v31  ;;  %v9631_v31 = vunpack.c.l.s8.bf16 %v9367_v27 }
 0x611   : > { %9858 = vmatprep.subr.bf16.mxu0 %v9624_v3  ;;  %v9636_v3 = vunpack.c.h.s8.bf16 %v9368_v48  ;;  %v9373_v48 = vld [vmem:[%s17811_s22 + $0x870] sm:$0xff] }
 0x612   : > { %10122 = vmatpush1.bf16.msra.mxu1 %v9621_v33  ;;  %v9638_v33 = vunpack.c.h.s8.bf16 %v9370_v1  ;;  %v9641_v1 = vunpack.c.l.s8.bf16 %v9373_v48 }
 0x613   : > { %10123 = vmatprep.subr.bf16.mxu1 %v9626_v50  ;;  %v9635_v50 = vunpack.c.h.s8.bf16 %v9367_v27  ;;  %v9376_v27 = vld [vmem:[%s17811_s22 + $0x888] sm:$0xff] }
 0x614   : > { %9859 = vmatpush1.bf16.msra.mxu0 %v9623_v5  ;;  %v9374_v5 = vld [vmem:[%s17811_s22 + $0x878] sm:$0xff] }
 0x615   : > { %9860 = vmatprep.subr.bf16.mxu0 %v9628_v57  ;;  %v9371_v57 = vld [vmem:[%s17811_s22 + $0x860] sm:$0xff] }
 0x616   : > { %10124 = vmatpush1.bf16.msra.mxu1 %v9625_v13  ;;  %v9637_v13 = vunpack.c.h.s8.bf16 %v9369_v39  ;;  %v9648_v39 = vunpack.c.l.s8.bf16 %v9376_v27 }
 0x617   : > { %10125 = vmatprep.subr.bf16.mxu1 %v9630_v28  ;;  %v9642_v28 = vunpack.c.l.s8.bf16 %v9374_v5 }
 0x618   : > { %9861 = vmatpush1.bf16.msra.mxu0 %v9627_v56  ;;  %v9639_v56 = vunpack.c.l.s8.bf16 %v9371_v57 }
 0x619   : > { %9862 = vmatprep.subr.bf16.mxu0 %v9632_v7  ;;  %v9644_v7 = vunpack.c.h.s8.bf16 %v9372_v52 }
 0x61a   : > { %10126 = vmatpush1.bf16.msra.mxu1 %v9629_v12  ;;  %v9646_v12 = vunpack.c.h.s8.bf16 %v9374_v5 }
 0x61b   : > { %10127 = vmatprep.subr.bf16.mxu1 %v9634_v51  ;;  %v9643_v51 = vunpack.c.h.s8.bf16 %v9371_v57 }
 0x61c   : > { %9863 = vmatpush1.bf16.msra.mxu0 %v9631_v31  ;;  %v9378_v31 = vld [vmem:[%s17811_s22 + $0x898] sm:$0xff] }
 0x61d   : > { %9864 = vmatprep.subr.bf16.mxu0 %v9636_v3  ;;  %v9375_v3 = vld [vmem:[%s17811_s22 + $0x880] sm:$0xff]  ;;  %v9654_v57 = vunpack.c.h.s8.bf16 %v9378_v31 }
 0x61e   : > { %10128 = vmatpush1.bf16.msra.mxu1 %v9633_v0  ;;  %v9645_v0 = vunpack.c.h.s8.bf16 %v9373_v48  ;;  %v9647_v52 = vunpack.c.l.s8.bf16 %v9375_v3  ;;  %v9382_v48 = vld [vmem:[%s17811_s22 + $0x8b8] sm:$0xff] }
 0x61f   : > { %10129 = vmatprep.subr.bf16.mxu1 %v9638_v33  ;;  %v9650_v33 = vunpack.c.l.s8.bf16 %v9378_v31 }
 0x620   : > { %9865 = vmatpush1.bf16.msra.mxu0 %v9635_v50  ;;  %v9377_v50 = vld [vmem:[%s17811_s22 + $0x890] sm:$0xff] }
 0x621   : > { %9866 = vmatprep.subr.bf16.mxu0 %v9640_v44  ;;  %v9652_v44 = vunpack.c.h.s8.bf16 %v9376_v27  ;;  %v9649_v5 = vunpack.c.l.s8.bf16 %v9377_v50  ;;  %v9658_v27 = vunpack.c.l.s8.bf16 %v9382_v48 }
 0x622   : > { %10130 = vmatpush1.bf16.msra.mxu1 %v9637_v13  ;;  %v9380_v13 = vld [vmem:[%s17811_s22 + $0x8a8] sm:$0xff] }
 0x623   : > { %10131 = vmatprep.subr.bf16.mxu1 %v9642_v28  ;;  %v9651_v28 = vunpack.c.h.s8.bf16 %v9375_v3  ;;  %v9660_v31 = vunpack.c.h.s8.bf16 %v9380_v13  ;;  %v9662_v3 = vunpack.c.h.s8.bf16 %v9382_v48  ;;  %v9388_v48 = vld [vmem:[%s17811_s22 + $0x8e8] sm:$0xff] }
 0x624   : > { %9867 = vmatpush1.bf16.msra.mxu0 %v9639_v56  ;;  %v9656_v56 = vunpack.c.l.s8.bf16 %v9380_v13  ;;  %v9385_v13 = vld [vmem:[%s17811_s22 + $0x8d0] sm:$0xff] }
 0x625   : > { %9868 = vmatprep.subr.bf16.mxu0 %v9644_v7  ;;  %v9379_v7 = vld [vmem:[%s17811_s22 + $0x8a0] sm:$0xff] }
 0x626   : > { %10132 = vmatpush1.bf16.msra.mxu1 %v9641_v1  ;;  %v9653_v1 = vunpack.c.h.s8.bf16 %v9377_v50 }
 0x627   : > { %10133 = vmatprep.subr.bf16.mxu1 %v9646_v12  ;;  %v9381_v12 = vld [vmem:[%s17811_s22 + $0x8b0] sm:$0xff] }
 0x628   : > { %9869 = vmatpush1.bf16.msra.mxu0 %v9643_v51  ;;  %v9655_v51 = vunpack.c.l.s8.bf16 %v9379_v7 }
 0x629   : > { %9891 = vmatprep.subr.bf16.mxu0 %v9648_v39  ;;  %v9657_v39 = vunpack.c.l.s8.bf16 %v9381_v12 }
 0x62a   : > { %10134 = vmatpush1.bf16.msra.mxu1 %v9645_v0  ;;  %v9386_v0 = vld [vmem:[%s17811_s22 + $0x8d8] sm:$0xff] }
 0x62b   : > { %9871 = vmatmul.mubr.bf16.vlgmr.msra.gmra.mrb[104].mxu0 %v17903_v14  ;;  %10156 = vmatprep.subr.bf16.mxu1 %v9650_v33  ;;  %v19203_v33 = vmov 0  }
 0x62c   : > { %9880 = vmatprep.mubr.bf16.mxu0 %v17946_v2  ;;  %9892 = vmatpush1.bf16.msra.mxu0 %v9647_v52  ;;  %v9383_v52 = vld [vmem:[%s17811_s22 + $0x8c0] sm:$0xff] }
 0x62d   : > { %10136 = vmatmul.mubr.bf16.vlgmr.msra.gmra.mrb[104].mxu1 %v17903_v14  ;;  %9893 = vmatprep.subr.bf16.mxu0 %v9652_v44  ;;  %v9384_v14 = vld [vmem:[%s17811_s22 + $0x8c8] sm:$0xff]  ;;  %v9661_v44 = vunpack.c.h.s8.bf16 %v9381_v12  ;;  %v9387_v12 = vld [vmem:[%s17811_s22 + $0x8e0] sm:$0xff] }
 0x62e   : > { %10145 = vmatprep.mubr.bf16.mxu1 %v17946_v2  ;;  %10157 = vmatpush1.bf16.msra.mxu1 %v9649_v5  ;;  %v9659_v2 = vunpack.c.h.s8.bf16 %v9379_v7  ;;  %v9664_v50 = vunpack.c.l.s8.bf16 %v9384_v14  ;;  %v9666_v5 = vunpack.c.l.s8.bf16 %v9386_v0  ;;  %v9667_v7 = vunpack.c.h.s8.bf16 %v9383_v52 }
 0x62f   : > { %10158 = vmatprep.subr.bf16.mxu1 %v9654_v57  ;;  %v9663_v57 = vunpack.c.l.s8.bf16 %v9383_v52  ;;  %v9675_v52 = vunpack.c.h.s8.bf16 %v9387_v12 }
 0x630   : > { %9894 = vmatpush1.bf16.msra.mxu0 %v9651_v28  ;;  %v9668_v28 = vunpack.c.h.s8.bf16 %v9384_v14  ;;  %v9671_v14 = vunpack.c.l.s8.bf16 %v9387_v12 }
 0x631   : > { %9895 = vmatprep.subr.bf16.mxu0 %v9656_v56  ;;  %v9670_v56 = vunpack.c.h.s8.bf16 %v9386_v0  ;;  %v8798_v0 = vld [vmem:[%s17811_s22 + $0x8] sm:$0xff] }
 0x632   : > { %10159 = vmatpush1.bf16.msra.mxu1 %v9653_v1  ;;  %v9390_v1 = vld [vmem:[%s17811_s22 + $0x8f8] sm:$0xff] }
 0x633   : > { %9881 = vmatmul.mubr.bf16.gmra.mrb[108].mxu0 %v17917_v47  ;;  %10160 = vmatprep.subr.bf16.mxu1 %v9658_v27  ;;  %v9672_v27 = vunpack.c.l.s8.bf16 %v9388_v48 }
 0x634   : > { %9896 = vmatpush1.bf16.msra.mxu0 %v9655_v51  ;;  %9923 = vmatprep.mubr.bf16.mxu0 %v19203_v33  ;;  %v9669_v51 = vunpack.c.h.s8.bf16 %v9385_v13 }
 0x635   : > { %10146 = vmatmul.mubr.bf16.gmra.mrb[108].mxu1 %v17917_v47  ;;  %9897 = vmatprep.subr.bf16.mxu0 %v9660_v31  ;;  %v9665_v47 = vunpack.c.l.s8.bf16 %v9385_v13  ;;  %v9674_v31 = vunpack.c.l.s8.bf16 %v9390_v1  ;;  %v8797_v13 = vld [vmem:[%s17811_s22] sm:$0xff] }
 0x636   : > { %10161 = vmatpush1.bf16.msra.mxu1 %v9657_v39  ;;  %10188 = vmatprep.mubr.bf16.mxu1 %v19203_v33  ;;  %v9389_v39 = vld [vmem:[%s17811_s22 + $0x8f0] sm:$0xff]  ;;  %v8945_v12 = vunpack.c.h.s8.bf16 %v8797_v13 }
 0x637   : > { %10162 = vmatprep.subr.bf16.mxu1 %v9662_v3  ;;  %v9676_v3 = vunpack.c.h.s8.bf16 %v9388_v48  ;;  %v8941_v48 = vunpack.c.l.s8.bf16 %v8797_v13  ;;  %v8808_v13 = vld [vmem:[%s17811_s22 + $0x58] sm:$0xff] }
 0x638   : > { %9898 = vmatpush1.bf16.msra.mxu0 %v9659_v2  ;;  %v9673_v2 = vunpack.c.l.s8.bf16 %v9389_v39 }
 0x639   : > { %9899 = vmatprep.subr.bf16.mxu0 %v9664_v50  ;;  %v9678_v50 = vunpack.c.h.s8.bf16 %v9390_v1  ;;  %v8802_v1 = vld [vmem:[%s17811_s22 + $0x28] sm:$0xff] }
 0x63a   : > { %10163 = vmatpush1.bf16.msra.mxu1 %v9661_v44  ;;  %v8800_v44 = vld [vmem:[%s17811_s22 + $0x18] sm:$0xff] }
 0x63b   : > { %10164 = vmatprep.subr.bf16.mxu1 %v9666_v5  ;;  %v8942_v5 = vunpack.c.l.s8.bf16 %v8798_v0 }
 0x63c   : > { %9900 = vmatpush1.bf16.msra.mxu0 %v9663_v57  ;;  %v9677_v57 = vunpack.c.h.s8.bf16 %v9389_v39  ;;  %v8801_v39 = vld [vmem:[%s17811_s22 + $0x20] sm:$0xff] }
 0x63d   : > { %9901 = vmatprep.subr.bf16.mxu0 %v9668_v28  ;;  %v8944_v28 = vunpack.c.l.s8.bf16 %v8800_v44 }
 0x63e   : > { %10165 = vmatpush1.bf16.msra.mxu1 %v9665_v47  ;;  %v8799_v47 = vld [vmem:[%s17811_s22 + $0x10] sm:$0xff] }
 0x63f   : > { %10166 = vmatprep.subr.bf16.mxu1 %v9670_v56  ;;  %v8946_v56 = vunpack.c.h.s8.bf16 %v8798_v0  ;;  %v8949_v0 = vunpack.c.l.s8.bf16 %v8801_v39 }
 0x640   : > { %9902 = vmatpush1.bf16.msra.mxu0 %v9667_v7  ;;  %v8943_v7 = vunpack.c.l.s8.bf16 %v8799_v47 }
 0x641   : > { %9903 = vmatprep.subr.bf16.mxu0 %v9672_v27  ;;  %v8948_v27 = vunpack.c.h.s8.bf16 %v8800_v44 }
 0x642   : > { %10167 = vmatpush1.bf16.msra.mxu1 %v9669_v51  ;;  %v8804_v51 = vld [vmem:[%s17811_s22 + $0x38] sm:$0xff] }
 0x643   : > { %10168 = vmatprep.subr.bf16.mxu1 %v9674_v31  ;;  %v8950_v31 = vunpack.c.l.s8.bf16 %v8802_v1  ;;  %v8956_v44 = vunpack.c.h.s8.bf16 %v8804_v51 }
 0x644   : > { %9904 = vmatpush1.bf16.msra.mxu0 %v9671_v14  ;;  %v8947_v14 = vunpack.c.h.s8.bf16 %v8799_v47 }
 0x645   : > { %9905 = vmatprep.subr.bf16.mxu0 %v9676_v3  ;;  %v8952_v3 = vunpack.c.l.s8.bf16 %v8804_v51 }
 0x646   : > { %10169 = vmatpush1.bf16.msra.mxu1 %v9673_v2  ;;  %v8803_v2 = vld [vmem:[%s17811_s22 + $0x30] sm:$0xff] }
 0x647   : > { %10170 = vmatprep.subr.bf16.mxu1 %v9678_v50  ;;  %v8954_v50 = vunpack.c.h.s8.bf16 %v8802_v1  ;;  %v8955_v47 = vunpack.c.h.s8.bf16 %v8803_v2 }
 0x648   : > { %9906 = vmatpush1.bf16.msra.mxu0 %v9675_v52  ;;  %v8951_v52 = vunpack.c.l.s8.bf16 %v8803_v2  ;;  %v8811_v2 = vld [vmem:[%s17811_s22 + $0x70] sm:$0xff] }
 0x649   : > { %10209 = vmatprep.subr.bf16.mxu0 %v8942_v5  ;;  %v8953_v5 = vunpack.c.h.s8.bf16 %v8801_v39  ;;  %v8809_v39 = vld [vmem:[%s17811_s22 + $0x60] sm:$0xff] }
 0x64a   : > { %10171 = vmatpush1.bf16.msra.mxu1 %v9677_v57 }
 0x64b   : > { %9924 = vmatmul.mubr.bf16.vlgmr.msra.gmra.mrb[104].mxu0 %v17937_v8  ;;  %10474 = vmatprep.subr.bf16.mxu1 %v8944_v28  ;;  %v8805_v28 = vld [vmem:[%s17811_s22 + $0x40] sm:$0xff] }
 0x64c   : > { %10210 = vmatpush1.bf16.msra.mxu0 %v8941_v48  ;;  %9933 = vmatprep.mubr.bf16.mxu0 %v19203_v33  ;;  %v8960_v48 = vunpack.c.l.s8.bf16 %v8808_v13  ;;  %v8961_v51 = vunpack.c.h.s8.bf16 %v8805_v28 }
 0x64d   : > { %10189 = vmatmul.mubr.bf16.vlgmr.msra.gmra.mrb[104].mxu1 %v17937_v8  ;;  %10211 = vmatprep.subr.bf16.mxu0 %v8946_v56  ;;  %v8806_v8 = vld [vmem:[%s17811_s22 + $0x48] sm:$0xff]  ;;  %v8807_v56 = vld [vmem:[%s17811_s22 + $0x50] sm:$0xff] }
 0x64e   : > { %10475 = vmatpush1.bf16.msra.mxu1 %v8943_v7  ;;  %10198 = vmatprep.mubr.bf16.mxu1 %v19203_v33  ;;  %v8958_v57 = vunpack.c.l.s8.bf16 %v8806_v8  ;;  %v8957_v7 = vunpack.c.l.s8.bf16 %v8805_v28  ;;  %v8962_v1 = vunpack.c.h.s8.bf16 %v8806_v8  ;;  %v8814_v8 = vld [vmem:[%s17811_s22 + $0x88] sm:$0xff]  ;;  %v8813_v28 = vld [vmem:[%s17811_s22 + $0x80] sm:$0xff] }
 0x64f   : > { %10476 = vmatprep.subr.bf16.mxu1 %v8948_v27  ;;  %v8810_v27 = vld [vmem:[%s17811_s22 + $0x68] sm:$0xff] }
 0x650   : > { %10212 = vmatpush1.bf16.msra.mxu0 %v8945_v12  ;;  %v8964_v12 = vunpack.c.h.s8.bf16 %v8808_v13  ;;  %v8816_v13 = vld [vmem:[%s17811_s22 + $0x98] sm:$0xff] }
 0x651   : > { %10213 = vmatprep.subr.bf16.mxu0 %v8950_v31  ;;  %v8966_v31 = vunpack.c.l.s8.bf16 %v8810_v27 }
 0x652   : > { %10477 = vmatpush1.bf16.msra.mxu1 %v8947_v14  ;;  %v8963_v14 = vunpack.c.h.s8.bf16 %v8807_v56 }
 0x653   : > { %9934 = vmatmul.mubr.bf16.gmra.mrb[108].mxu0 %v17949_v20  ;;  %10478 = vmatprep.subr.bf16.mxu1 %v8952_v3 }
 0x654   : > { %10214 = vmatpush1.bf16.msra.mxu0 %v8949_v0  ;;  %10241 = vmatprep.mubr.bf16.mxu0 %v17750_v16  ;;  %v8965_v0 = vunpack.c.l.s8.bf16 %v8809_v39 }
 0x655   : > { %10199 = vmatmul.mubr.bf16.gmra.mrb[108].mxu1 %v17949_v20  ;;  %10215 = vmatprep.subr.bf16.mxu0 %v8954_v50  ;;  %v8959_v20 = vunpack.c.l.s8.bf16 %v8807_v56  ;;  %v8970_v50 = vunpack.c.h.s8.bf16 %v8810_v27  ;;  %v8815_v56 = vld [vmem:[%s17811_s22 + $0x90] sm:$0xff]  ;;  %v8818_v27 = vld [vmem:[%s17811_s22 + $0xa8] sm:$0xff] }
 0x656   : > { %10479 = vmatpush1.bf16.msra.mxu1 %v8951_v52  ;;  %10506 = vmatprep.mubr.bf16.mxu1 %v17750_v16  ;;  %v8812_v16 = vld [vmem:[%s17811_s22 + $0x78] sm:$0xff]  ;;  %v8967_v52 = vunpack.c.l.s8.bf16 %v8811_v2 }
 0x657   : > { %10480 = vmatprep.subr.bf16.mxu1 %v8956_v44  ;;  %v8968_v3 = vunpack.c.l.s8.bf16 %v8812_v16  ;;  %v8972_v44 = vunpack.c.h.s8.bf16 %v8812_v16  ;;  %v8820_v16 = vld [vmem:[%s17811_s22 + $0xb8] sm:$0xff] }
 0x658   : > { %10216 = vmatpush1.bf16.msra.mxu0 %v8953_v5  ;;  %v8969_v5 = vunpack.c.h.s8.bf16 %v8809_v39  ;;  %v8817_v39 = vld [vmem:[%s17811_s22 + $0xa0] sm:$0xff] }
 0x659   : > { %10217 = vmatprep.subr.bf16.mxu0 %v8958_v57  ;;  %v8974_v57 = vunpack.c.l.s8.bf16 %v8814_v8 }
 0x65a   : > { %10481 = vmatpush1.bf16.msra.mxu1 %v8955_v47  ;;  %v8971_v47 = vunpack.c.h.s8.bf16 %v8811_v2  ;;  %v8819_v2 = vld [vmem:[%s17811_s22 + $0xb0] sm:$0xff] }
 0x65b   : > { %10482 = vmatprep.subr.bf16.mxu1 %v8960_v48  ;;  %v8976_v48 = vunpack.c.l.s8.bf16 %v8816_v13 }
 0x65c   : > { %10218 = vmatpush1.bf16.msra.mxu0 %v8957_v7  ;;  %v8973_v7 = vunpack.c.l.s8.bf16 %v8813_v28 }
 0x65d   : > { %10219 = vmatprep.subr.bf16.mxu0 %v8962_v1  ;;  %v8978_v1 = vunpack.c.h.s8.bf16 %v8814_v8  ;;  %v8822_v8 = vld [vmem:[%s17811_s22 + $0xc8] sm:$0xff] }
 0x65e   : > { %10483 = vmatpush1.bf16.msra.mxu1 %v8959_v20  ;;  %v8975_v20 = vunpack.c.l.s8.bf16 %v8815_v56 }
 0x65f   : > { %10484 = vmatprep.subr.bf16.mxu1 %v8964_v12  ;;  %v8980_v12 = vunpack.c.h.s8.bf16 %v8816_v13  ;;  %v8824_v13 = vld [vmem:[%s17811_s22 + $0xd8] sm:$0xff] }
 0x660   : > { %10220 = vmatpush1.bf16.msra.mxu0 %v8961_v51  ;;  %v8977_v51 = vunpack.c.h.s8.bf16 %v8813_v28  ;;  %v8821_v28 = vld [vmem:[%s17811_s22 + $0xc0] sm:$0xff] }
 0x661   : > { %10221 = vmatprep.subr.bf16.mxu0 %v8966_v31  ;;  %v8982_v31 = vunpack.c.l.s8.bf16 %v8818_v27 }
 0x662   : > { %10485 = vmatpush1.bf16.msra.mxu1 %v8963_v14  ;;  %v8979_v14 = vunpack.c.h.s8.bf16 %v8815_v56  ;;  %v8823_v56 = vld [vmem:[%s17811_s22 + $0xd0] sm:$0xff] }
 0x663   : > { %10486 = vmatprep.subr.bf16.mxu1 %v8968_v3  ;;  %v8984_v3 = vunpack.c.l.s8.bf16 %v8820_v16 }
 0x664   : > { %10222 = vmatpush1.bf16.msra.mxu0 %v8965_v0  ;;  %v8981_v0 = vunpack.c.l.s8.bf16 %v8817_v39 }
 0x665   : > { %10223 = vmatprep.subr.bf16.mxu0 %v8970_v50  ;;  %v8986_v50 = vunpack.c.h.s8.bf16 %v8818_v27  ;;  %v8826_v27 = vld [vmem:[%s17811_s22 + $0xe8] sm:$0xff] }
 0x666   : > { %10487 = vmatpush1.bf16.msra.mxu1 %v8967_v52  ;;  %v8983_v52 = vunpack.c.l.s8.bf16 %v8819_v2 }
 0x667   : > { %10488 = vmatprep.subr.bf16.mxu1 %v8972_v44  ;;  %v8988_v44 = vunpack.c.h.s8.bf16 %v8820_v16  ;;  %v8828_v16 = vld [vmem:[%s17811_s22 + $0xf8] sm:$0xff] }
 0x668   : > { %10224 = vmatpush1.bf16.msra.mxu0 %v8969_v5  ;;  %v8985_v5 = vunpack.c.h.s8.bf16 %v8817_v39  ;;  %v8825_v39 = vld [vmem:[%s17811_s22 + $0xe0] sm:$0xff] }
 0x669   : > { %10225 = vmatprep.subr.bf16.mxu0 %v8974_v57  ;;  %v8990_v57 = vunpack.c.l.s8.bf16 %v8822_v8 }
 0x66a   : > { %10489 = vmatpush1.bf16.msra.mxu1 %v8971_v47  ;;  %v8987_v47 = vunpack.c.h.s8.bf16 %v8819_v2  ;;  %v8827_v2 = vld [vmem:[%s17811_s22 + $0xf0] sm:$0xff] }
 0x66b   : > { %10490 = vmatprep.subr.bf16.mxu1 %v8976_v48  ;;  %v8992_v48 = vunpack.c.l.s8.bf16 %v8824_v13 }
 0x66c   : > { %10226 = vmatpush1.bf16.msra.mxu0 %v8973_v7  ;;  %v8989_v7 = vunpack.c.l.s8.bf16 %v8821_v28 }
 0x66d   : > { %10227 = vmatprep.subr.bf16.mxu0 %v8978_v1  ;;  %v8994_v1 = vunpack.c.h.s8.bf16 %v8822_v8  ;;  %v8830_v8 = vld [vmem:[%s17811_s22 + $0x108] sm:$0xff] }
 0x66e   : > { %10491 = vmatpush1.bf16.msra.mxu1 %v8975_v20  ;;  %v8991_v20 = vunpack.c.l.s8.bf16 %v8823_v56 }
 0x66f   : > { %10492 = vmatprep.subr.bf16.mxu1 %v8980_v12  ;;  %v8996_v12 = vunpack.c.h.s8.bf16 %v8824_v13  ;;  %v8832_v13 = vld [vmem:[%s17811_s22 + $0x118] sm:$0xff] }
 0x670   : > { %10228 = vmatpush1.bf16.msra.mxu0 %v8977_v51  ;;  %v8993_v51 = vunpack.c.h.s8.bf16 %v8821_v28  ;;  %v8829_v28 = vld [vmem:[%s17811_s22 + $0x100] sm:$0xff] }
 0x671   : > { %10229 = vmatprep.subr.bf16.mxu0 %v8982_v31  ;;  %v8998_v31 = vunpack.c.l.s8.bf16 %v8826_v27 }
 0x672   : > { %10493 = vmatpush1.bf16.msra.mxu1 %v8979_v14  ;;  %v8995_v14 = vunpack.c.h.s8.bf16 %v8823_v56  ;;  %v8831_v56 = vld [vmem:[%s17811_s22 + $0x110] sm:$0xff] }
 0x673   : > { %10494 = vmatprep.subr.bf16.mxu1 %v8984_v3  ;;  %v9000_v3 = vunpack.c.l.s8.bf16 %v8828_v16 }
 0x674   : > { %10230 = vmatpush1.bf16.msra.mxu0 %v8981_v0  ;;  %v8997_v0 = vunpack.c.l.s8.bf16 %v8825_v39 }
 0x675   : > { %10231 = vmatprep.subr.bf16.mxu0 %v8986_v50  ;;  %v9002_v50 = vunpack.c.h.s8.bf16 %v8826_v27  ;;  %v8834_v27 = vld [vmem:[%s17811_s22 + $0x128] sm:$0xff] }
 0x676   : > { %10495 = vmatpush1.bf16.msra.mxu1 %v8983_v52  ;;  %v8999_v52 = vunpack.c.l.s8.bf16 %v8827_v2 }
 0x677   : > { %10496 = vmatprep.subr.bf16.mxu1 %v8988_v44  ;;  %v9004_v44 = vunpack.c.h.s8.bf16 %v8828_v16  ;;  %v8836_v16 = vld [vmem:[%s17811_s22 + $0x138] sm:$0xff] }
 0x678   : > { %10232 = vmatpush1.bf16.msra.mxu0 %v8985_v5  ;;  %v9001_v5 = vunpack.c.h.s8.bf16 %v8825_v39  ;;  %v8833_v39 = vld [vmem:[%s17811_s22 + $0x120] sm:$0xff] }
 0x679   : > { %10233 = vmatprep.subr.bf16.mxu0 %v8990_v57  ;;  %v9006_v57 = vunpack.c.l.s8.bf16 %v8830_v8 }
 0x67a   : > { %10497 = vmatpush1.bf16.msra.mxu1 %v8987_v47  ;;  %v9003_v47 = vunpack.c.h.s8.bf16 %v8827_v2  ;;  %v8835_v2 = vld [vmem:[%s17811_s22 + $0x130] sm:$0xff] }
 0x67b   : > { %10498 = vmatprep.subr.bf16.mxu1 %v8992_v48  ;;  %v9008_v48 = vunpack.c.l.s8.bf16 %v8832_v13 }
 0x67c   : > { %10234 = vmatpush1.bf16.msra.mxu0 %v8989_v7  ;;  %v9005_v7 = vunpack.c.l.s8.bf16 %v8829_v28 }
 0x67d   : > { %10235 = vmatprep.subr.bf16.mxu0 %v8994_v1  ;;  %v9010_v1 = vunpack.c.h.s8.bf16 %v8830_v8  ;;  %v9020_v8 = vunpack.c.h.s8.bf16 %v8836_v16 }
 0x67e   : > { %10499 = vmatpush1.bf16.msra.mxu1 %v8991_v20  ;;  %v9007_v20 = vunpack.c.l.s8.bf16 %v8831_v56 }
 0x67f   : > { %10500 = vmatprep.subr.bf16.mxu1 %v8996_v12  ;;  %v9012_v12 = vunpack.c.h.s8.bf16 %v8832_v13  ;;  %v8837_v13 = vld [vmem:[%s17811_s22 + $0x140] sm:$0xff] }
 0x680   : > { %10236 = vmatpush1.bf16.msra.mxu0 %v8993_v51  ;;  %v9009_v51 = vunpack.c.h.s8.bf16 %v8829_v28 }
 0x681   : > { %10237 = vmatprep.subr.bf16.mxu0 %v8998_v31  ;;  %v9014_v31 = vunpack.c.l.s8.bf16 %v8834_v27 }
 0x682   : > { %10501 = vmatpush1.bf16.msra.mxu1 %v8995_v14  ;;  %v9011_v14 = vunpack.c.h.s8.bf16 %v8831_v56 }
 0x683   : > { %10502 = vmatprep.subr.bf16.mxu1 %v9000_v3  ;;  %v9016_v3 = vunpack.c.l.s8.bf16 %v8836_v16 }
 0x684   : > { %10238 = vmatpush1.bf16.msra.mxu0 %v8997_v0  ;;  %v9013_v0 = vunpack.c.l.s8.bf16 %v8833_v39 }
 0x685   : > { %10239 = vmatprep.subr.bf16.mxu0 %v9002_v50  ;;  %v9018_v50 = vunpack.c.h.s8.bf16 %v8834_v27 }
 0x686   : > { %10503 = vmatpush1.bf16.msra.mxu1 %v8999_v52  ;;  %v9015_v52 = vunpack.c.l.s8.bf16 %v8835_v2 }
 0x687   : > { %10504 = vmatprep.subr.bf16.mxu1 %v9004_v44  ;;  %v8840_v44 = vld [vmem:[%s17811_s22 + $0x158] sm:$0xff] }
 0x688   : > { %10240 = vmatpush1.bf16.msra.mxu0 %v9001_v5  ;;  %v9024_v28 = vunpack.c.l.s8.bf16 %v8840_v44 }
 0x689   : > { %10262 = vmatprep.subr.bf16.mxu0 %v9006_v57  ;;  %v9019_v57 = vunpack.c.h.s8.bf16 %v8835_v2  ;;  %v8846_v2 = vld [vmem:[%s17811_s22 + $0x188] sm:$0xff] }
 0x68a   : > { %10505 = vmatpush1.bf16.msra.mxu1 %v9003_v47  ;;  %v8839_v47 = vld [vmem:[%s17811_s22 + $0x150] sm:$0xff] }
 0x68b   : > { %10242 = vmatmul.mubr.bf16.vlgmr.msra.gmra.mrb[104].mxu0 %v17748_v15  ;;  %10527 = vmatprep.subr.bf16.mxu1 %v9008_v48  ;;  %v9021_v48 = vunpack.c.l.s8.bf16 %v8837_v13 }
 0x68c   : > { %10251 = vmatprep.mubr.bf16.mxu0 %v17769_v62  ;;  %10263 = vmatpush1.bf16.msra.mxu0 %v9005_v7  ;;  %v8842_v7 = vld [vmem:[%s17811_s22 + $0x168] sm:$0xff] }
 0x68d   : > { %10507 = vmatmul.mubr.bf16.vlgmr.msra.gmra.mrb[104].mxu1 %v17748_v15  ;;  %10264 = vmatprep.subr.bf16.mxu0 %v9010_v1  ;;  %v8838_v15 = vld [vmem:[%s17811_s22 + $0x148] sm:$0xff]  ;;  %v9028_v1 = vunpack.c.h.s8.bf16 %v8840_v44  ;;  %v9030_v27 = vunpack.c.l.s8.bf16 %v8842_v7 }
 0x68e   : > { %10516 = vmatprep.mubr.bf16.mxu1 %v17769_v62  ;;  %10528 = vmatpush1.bf16.msra.mxu1 %v9007_v20  ;;  %v9017_v62 = vunpack.c.h.s8.bf16 %v8833_v39  ;;  %v9022_v5 = vunpack.c.l.s8.bf16 %v8838_v15  ;;  %v9026_v56 = vunpack.c.h.s8.bf16 %v8838_v15  ;;  %v9025_v20 = vunpack.c.h.s8.bf16 %v8837_v13 }
 0x68f   : > { %10529 = vmatprep.subr.bf16.mxu1 %v9012_v12  ;;  %v8841_v12 = vld [vmem:[%s17811_s22 + $0x160] sm:$0xff]  ;;  %v9038_v15 = vunpack.c.l.s8.bf16 %v8846_v2 }
 0x690   : > { %10265 = vmatpush1.bf16.msra.mxu0 %v9009_v51  ;;  %v9027_v51 = vunpack.c.h.s8.bf16 %v8839_v47  ;;  %v9029_v39 = vunpack.c.l.s8.bf16 %v8841_v12 }
 0x691   : > { %10266 = vmatprep.subr.bf16.mxu0 %v9014_v31  ;;  %v8843_v31 = vld [vmem:[%s17811_s22 + $0x170] sm:$0xff] }
 0x692   : > { %10530 = vmatpush1.bf16.msra.mxu1 %v9011_v14  ;;  %v9034_v14 = vunpack.c.h.s8.bf16 %v8842_v7 }
 0x693   : > { %10252 = vmatmul.mubr.bf16.gmra.mrb[108].mxu0 %v17767_v26  ;;  %10531 = vmatprep.subr.bf16.mxu1 %v9016_v3  ;;  %v9031_v3 = vunpack.c.l.s8.bf16 %v8843_v31 }
 0x694   : > { %10267 = vmatpush1.bf16.msra.mxu0 %v9013_v0  ;;  %10294 = vmatprep.mubr.bf16.mxu0 %v17758_v60 }
 0x695   : > { %10517 = vmatmul.mubr.bf16.gmra.mrb[108].mxu1 %v17767_v26  ;;  %10268 = vmatprep.subr.bf16.mxu0 %v9018_v50  ;;  %v9023_v26 = vunpack.c.l.s8.bf16 %v8839_v47  ;;  %v9033_v50 = vunpack.c.h.s8.bf16 %v8841_v12  ;;  %v8850_v47 = vld [vmem:[%s17811_s22 + $0x1a8] sm:$0xff] }
 0x696   : > { %10532 = vmatpush1.bf16.msra.mxu1 %v9015_v52  ;;  %10559 = vmatprep.mubr.bf16.mxu1 %v17758_v60  ;;  %v8844_v60 = vld [vmem:[%s17811_s22 + $0x178] sm:$0xff]  ;;  %v9046_v7 = vunpack.c.l.s8.bf16 %v8850_v47 }
 0x697   : > { %10533 = vmatprep.subr.bf16.mxu1 %v9020_v8  ;;  %v9032_v16 = vunpack.c.l.s8.bf16 %v8844_v60  ;;  %v9036_v0 = vunpack.c.h.s8.bf16 %v8844_v60  ;;  %v8848_v52 = vld [vmem:[%s17811_s22 + $0x198] sm:$0xff]  ;;  %v8845_v8 = vld [vmem:[%s17811_s22 + $0x180] sm:$0xff] }
 0x698   : > { %10269 = vmatpush1.bf16.msra.mxu0 %v9017_v62  ;;  %v9035_v62 = vunpack.c.h.s8.bf16 %v8843_v31  ;;  %v9040_v44 = vunpack.c.l.s8.bf16 %v8848_v52  ;;  %v9037_v13 = vunpack.c.l.s8.bf16 %v8845_v8  ;;  %v8854_v31 = vld [vmem:[%s17811_s22 + $0x1c8] sm:$0xff] }
 0x699   : > { %10270 = vmatprep.subr.bf16.mxu0 %v9022_v5  ;;  %v8847_v5 = vld [vmem:[%s17811_s22 + $0x190] sm:$0xff] }
 0x69a   : > { %10534 = vmatpush1.bf16.msra.mxu1 %v9019_v57  ;;  %v9042_v57 = vunpack.c.h.s8.bf16 %v8846_v2  ;;  %v9054_v2 = vunpack.c.l.s8.bf16 %v8854_v31 }
 0x69b   : > { %10535 = vmatprep.subr.bf16.mxu1 %v9024_v28  ;;  %v9039_v28 = vunpack.c.l.s8.bf16 %v8847_v5 }
 0x69c   : > { %10271 = vmatpush1.bf16.msra.mxu0 %v9021_v48  ;;  %v9044_v48 = vunpack.c.h.s8.bf16 %v8848_v52 }
 0x69d   : > { %10272 = vmatprep.subr.bf16.mxu0 %v9026_v56  ;;  %v9041_v56 = vunpack.c.h.s8.bf16 %v8845_v8 }
 0x69e   : > { %10536 = vmatpush1.bf16.msra.mxu1 %v9023_v26  ;;  %v8852_v26 = vld [vmem:[%s17811_s22 + $0x1b8] sm:$0xff] }
 0x69f   : > { %10537 = vmatprep.subr.bf16.mxu1 %v9028_v1  ;;  %v8849_v1 = vld [vmem:[%s17811_s22 + $0x1a0] sm:$0xff]  ;;  %v9048_v60 = vunpack.c.l.s8.bf16 %v8852_v26 }
 0x6a0   : > { %10273 = vmatpush1.bf16.msra.mxu0 %v9025_v20  ;;  %v9043_v20 = vunpack.c.h.s8.bf16 %v8847_v5  ;;  %v9045_v12 = vunpack.c.l.s8.bf16 %v8849_v1  ;;  %v8858_v5 = vld [vmem:[%s17811_s22 + $0x1e8] sm:$0xff] }
 0x6a1   : > { %10274 = vmatprep.subr.bf16.mxu0 %v9030_v27  ;;  %v8851_v27 = vld [vmem:[%s17811_s22 + $0x1b0] sm:$0xff] }
 0x6a2   : > { %10538 = vmatpush1.bf16.msra.mxu1 %v9027_v51  ;;  %v9050_v51 = vunpack.c.h.s8.bf16 %v8850_v47  ;;  %v9062_v47 = vunpack.c.l.s8.bf16 %v8858_v5 }
 0x6a3   : > { %10539 = vmatprep.subr.bf16.mxu1 %v9032_v16  ;;  %v9047_v16 = vunpack.c.l.s8.bf16 %v8851_v27 }
 0x6a4   : > { %10275 = vmatpush1.bf16.msra.mxu0 %v9029_v39  ;;  %v9052_v39 = vunpack.c.h.s8.bf16 %v8852_v26 }
 0x6a5   : > { %10276 = vmatprep.subr.bf16.mxu0 %v9034_v14  ;;  %v9049_v14 = vunpack.c.h.s8.bf16 %v8849_v1 }
 0x6a6   : > { %10540 = vmatpush1.bf16.msra.mxu1 %v9031_v3  ;;  %v8856_v3 = vld [vmem:[%s17811_s22 + $0x1d8] sm:$0xff] }
 0x6a7   : > { %10541 = vmatprep.subr.bf16.mxu1 %v9036_v0  ;;  %v8853_v0 = vld [vmem:[%s17811_s22 + $0x1c0] sm:$0xff]  ;;  %v9056_v52 = vunpack.c.l.s8.bf16 %v8856_v3 }
 0x6a8   : > { %10277 = vmatpush1.bf16.msra.mxu0 %v9033_v50  ;;  %v9051_v50 = vunpack.c.h.s8.bf16 %v8851_v27  ;;  %v9053_v8 = vunpack.c.l.s8.bf16 %v8853_v0  ;;  %v8862_v27 = vld [vmem:[%s17811_s22 + $0x208] sm:$0xff] }
 0x6a9   : > { %10278 = vmatprep.subr.bf16.mxu0 %v9038_v15  ;;  %v8855_v15 = vld [vmem:[%s17811_s22 + $0x1d0] sm:$0xff] }
 0x6aa   : > { %10542 = vmatpush1.bf16.msra.mxu1 %v9035_v62  ;;  %v9058_v62 = vunpack.c.h.s8.bf16 %v8854_v31  ;;  %v9070_v31 = vunpack.c.l.s8.bf16 %v8862_v27 }
 0x6ab   : > { %10543 = vmatprep.subr.bf16.mxu1 %v9040_v44  ;;  %v9055_v44 = vunpack.c.l.s8.bf16 %v8855_v15 }
 0x6ac   : > { %10279 = vmatpush1.bf16.msra.mxu0 %v9037_v13  ;;  %v9060_v13 = vunpack.c.h.s8.bf16 %v8856_v3 }
 0x6ad   : > { %10280 = vmatprep.subr.bf16.mxu0 %v9042_v57  ;;  %v9057_v57 = vunpack.c.h.s8.bf16 %v8853_v0 }
 0x6ae   : > { %10544 = vmatpush1.bf16.msra.mxu1 %v9039_v28  ;;  %v8860_v28 = vld [vmem:[%s17811_s22 + $0x1f8] sm:$0xff] }
 0x6af   : > { %10545 = vmatprep.subr.bf16.mxu1 %v9044_v48  ;;  %v8857_v48 = vld [vmem:[%s17811_s22 + $0x1e0] sm:$0xff]  ;;  %v9064_v26 = vunpack.c.l.s8.bf16 %v8860_v28 }
 0x6b0   : > { %10281 = vmatpush1.bf16.msra.mxu0 %v9041_v56  ;;  %v9059_v56 = vunpack.c.h.s8.bf16 %v8855_v15  ;;  %v9061_v1 = vunpack.c.l.s8.bf16 %v8857_v48  ;;  %v8866_v15 = vld [vmem:[%s17811_s22 + $0x228] sm:$0xff] }
 0x6b1   : > { %10282 = vmatprep.subr.bf16.mxu0 %v9046_v7  ;;  %v8859_v7 = vld [vmem:[%s17811_s22 + $0x1f0] sm:$0xff] }
 0x6b2   : > { %10546 = vmatpush1.bf16.msra.mxu1 %v9043_v20  ;;  %v9066_v20 = vunpack.c.h.s8.bf16 %v8858_v5  ;;  %v9078_v5 = vunpack.c.l.s8.bf16 %v8866_v15 }
 0x6b3   : > { %10547 = vmatprep.subr.bf16.mxu1 %v9048_v60  ;;  %v9063_v60 = vunpack.c.l.s8.bf16 %v8859_v7 }
 0x6b4   : > { %10283 = vmatpush1.bf16.msra.mxu0 %v9045_v12  ;;  %v9068_v12 = vunpack.c.h.s8.bf16 %v8860_v28 }
 0x6b5   : > { %10284 = vmatprep.subr.bf16.mxu0 %v9050_v51  ;;  %v9065_v51 = vunpack.c.h.s8.bf16 %v8857_v48 }
 0x6b6   : > { %10548 = vmatpush1.bf16.msra.mxu1 %v9047_v16  ;;  %v8864_v16 = vld [vmem:[%s17811_s22 + $0x218] sm:$0xff] }
 0x6b7   : > { %10549 = vmatprep.subr.bf16.mxu1 %v9052_v39  ;;  %v8861_v39 = vld [vmem:[%s17811_s22 + $0x200] sm:$0xff]  ;;  %v9072_v3 = vunpack.c.l.s8.bf16 %v8864_v16 }
 0x6b8   : > { %10285 = vmatpush1.bf16.msra.mxu0 %v9049_v14  ;;  %v9067_v14 = vunpack.c.h.s8.bf16 %v8859_v7  ;;  %v9069_v0 = vunpack.c.l.s8.bf16 %v8861_v39 }
 0x6b9   : > { %10286 = vmatprep.subr.bf16.mxu0 %v9054_v2  ;;  %v8863_v2 = vld [vmem:[%s17811_s22 + $0x210] sm:$0xff] }
 0x6ba   : > { %10550 = vmatpush1.bf16.msra.mxu1 %v9051_v50  ;;  %v9074_v50 = vunpack.c.h.s8.bf16 %v8862_v27 }
 0x6bb   : > { %10551 = vmatprep.subr.bf16.mxu1 %v9056_v52  ;;  %v9071_v52 = vunpack.c.l.s8.bf16 %v8863_v2 }
 0x6bc   : > { %10287 = vmatpush1.bf16.msra.mxu0 %v9053_v8  ;;  %v9076_v8 = vunpack.c.h.s8.bf16 %v8864_v16 }
 0x6bd   : > { %10288 = vmatprep.subr.bf16.mxu0 %v9058_v62  ;;  %v9073_v62 = vunpack.c.h.s8.bf16 %v8861_v39  ;;  %v8874_v39 = vld [vmem:[%s17811_s22 + $0x268] sm:$0xff] }
 0x6be   : > { %10552 = vmatpush1.bf16.msra.mxu1 %v9055_v44  ;;  %v8868_v44 = vld [vmem:[%s17811_s22 + $0x238] sm:$0xff] }
 0x6bf   : > { %10553 = vmatprep.subr.bf16.mxu1 %v9060_v13  ;;  %v8865_v13 = vld [vmem:[%s17811_s22 + $0x220] sm:$0xff]  ;;  %v9080_v28 = vunpack.c.l.s8.bf16 %v8868_v44  ;;  %v9084_v7 = vunpack.c.h.s8.bf16 %v8868_v44 }
 0x6c0   : > { %10289 = vmatpush1.bf16.msra.mxu0 %v9057_v57  ;;  %v9075_v57 = vunpack.c.h.s8.bf16 %v8863_v2  ;;  %v9077_v48 = vunpack.c.l.s8.bf16 %v8865_v13  ;;  %v9094_v2 = vunpack.c.l.s8.bf16 %v8874_v39 }
 0x6c1   : > { %10290 = vmatprep.subr.bf16.mxu0 %v9062_v47  ;;  %v8867_v47 = vld [vmem:[%s17811_s22 + $0x230] sm:$0xff] }
 0x6c2   : > { %10554 = vmatpush1.bf16.msra.mxu1 %v9059_v56  ;;  %v9082_v56 = vunpack.c.h.s8.bf16 %v8866_v15  ;;  %v9083_v27 = vunpack.c.h.s8.bf16 %v8867_v47  ;;  %v8875_v15 = vld [vmem:[%s17811_s22 + $0x270] sm:$0xff] }
 0x6c3   : > { %10555 = vmatprep.subr.bf16.mxu1 %v9064_v26  ;;  %v9079_v26 = vunpack.c.l.s8.bf16 %v8867_v47  ;;  %v9095_v44 = vunpack.c.l.s8.bf16 %v8875_v15 }
 0x6c4   : > { %10291 = vmatpush1.bf16.msra.mxu0 %v9061_v1  ;;  %v8872_v1 = vld [vmem:[%s17811_s22 + $0x258] sm:$0xff] }
 0x6c5   : > { %10292 = vmatprep.subr.bf16.mxu0 %v9066_v20 }
 0x6c6   : > { %10556 = vmatpush1.bf16.msra.mxu1 %v9063_v60  ;;  %v8869_v60 = vld [vmem:[%s17811_s22 + $0x240] sm:$0xff] }
 0x6c7   : > { %10557 = vmatprep.subr.bf16.mxu1 %v9068_v12  ;;  %v9088_v12 = vunpack.c.l.s8.bf16 %v8872_v1  ;;  %v9085_v16 = vunpack.c.l.s8.bf16 %v8869_v60 }
 0x6c8   : > { %10293 = vmatpush1.bf16.msra.mxu0 %v9065_v51  ;;  %v8871_v51 = vld [vmem:[%s17811_s22 + $0x250] sm:$0xff] }
 0x6c9   : > { %10315 = vmatprep.subr.bf16.mxu0 %v9070_v31 }
 0x6ca   : > { %10558 = vmatpush1.bf16.msra.mxu1 %v9067_v14  ;;  %v9092_v14 = vunpack.c.h.s8.bf16 %v8872_v1 }
 0x6cb   : > { %10295 = vmatmul.mubr.bf16.vlgmr.msra.gmra.mrb[104].mxu0 %v17755_v59  ;;  %10580 = vmatprep.subr.bf16.mxu1 %v9072_v3  ;;  %v9089_v3 = vunpack.c.h.s8.bf16 %v8869_v60 }
 0x6cc   : > { %10304 = vmatprep.mubr.bf16.mxu0 %v17778_v46  ;;  %10316 = vmatpush1.bf16.msra.mxu0 %v9069_v0  ;;  %v8873_v0 = vld [vmem:[%s17811_s22 + $0x260] sm:$0xff] }
 0x6cd   : > { %10560 = vmatmul.mubr.bf16.vlgmr.msra.gmra.mrb[104].mxu1 %v17755_v59  ;;  %10317 = vmatprep.subr.bf16.mxu0 %v9074_v50  ;;  %v8870_v59 = vld [vmem:[%s17811_s22 + $0x248] sm:$0xff]  ;;  %v9091_v50 = vunpack.c.h.s8.bf16 %v8871_v51 }
 0x6ce   : > { %10569 = vmatprep.mubr.bf16.mxu1 %v17778_v46  ;;  %10581 = vmatpush1.bf16.msra.mxu1 %v9071_v52  ;;  %v9081_v46 = vunpack.c.h.s8.bf16 %v8865_v13  ;;  %v9086_v20 = vunpack.c.l.s8.bf16 %v8870_v59  ;;  %v9090_v31 = vunpack.c.h.s8.bf16 %v8870_v59  ;;  %v8879_v59 = vld [vmem:[%s17811_s22 + $0x290] sm:$0xff] }
 0x6cf   : > { %10582 = vmatprep.subr.bf16.mxu1 %v9076_v8  ;;  %v9093_v8 = vunpack.c.l.s8.bf16 %v8873_v0  ;;  %v9103_v1 = vunpack.c.l.s8.bf16 %v8879_v59 }
 0x6d0   : > { %10318 = vmatpush1.bf16.msra.mxu0 %v9073_v62  ;;  %v9098_v62 = vunpack.c.h.s8.bf16 %v8874_v39  ;;  %v8883_v39 = vld [vmem:[%s17811_s22 + $0x2b0] sm:$0xff] }
 0x6d1   : > { %10319 = vmatprep.subr.bf16.mxu0 %v9078_v5  ;;  %v8878_v5 = vld [vmem:[%s17811_s22 + $0x288] sm:$0xff] }
 0x6d2   : > { %10583 = vmatpush1.bf16.msra.mxu1 %v9075_v57  ;;  %v9097_v57 = vunpack.c.h.s8.bf16 %v8873_v0  ;;  %v9102_v47 = vunpack.c.l.s8.bf16 %v8878_v5 }
 0x6d3   : > { %10305 = vmatmul.mubr.bf16.gmra.mrb[108].mxu0 %v17774_v25  ;;  %10584 = vmatprep.subr.bf16.mxu1 %v9080_v28  ;;  %v8880_v28 = vld [vmem:[%s17811_s22 + $0x298] sm:$0xff] }
 0x6d4   : > { %10320 = vmatpush1.bf16.msra.mxu0 %v9077_v48  ;;  %10347 = vmatprep.mubr.bf16.mxu0 %v17819_v40  ;;  %v8877_v48 = vld [vmem:[%s17811_s22 + $0x280] sm:$0xff]  ;;  %v9108_v60 = vunpack.c.h.s8.bf16 %v8880_v28 }
 0x6d5   : > { %10570 = vmatmul.mubr.bf16.gmra.mrb[108].mxu1 %v17774_v25  ;;  %10321 = vmatprep.subr.bf16.mxu0 %v9082_v56  ;;  %v9087_v25 = vunpack.c.l.s8.bf16 %v8871_v51  ;;  %v9099_v56 = vunpack.c.h.s8.bf16 %v8875_v15 }
 0x6d6   : > { %10585 = vmatpush1.bf16.msra.mxu1 %v9079_v26  ;;  %10612 = vmatprep.mubr.bf16.mxu1 %v17819_v40  ;;  %v8876_v40 = vld [vmem:[%s17811_s22 + $0x278] sm:$0xff]  ;;  %v9104_v26 = vunpack.c.l.s8.bf16 %v8880_v28 }
 0x6d7   : > { %10586 = vmatprep.subr.bf16.mxu1 %v9084_v7  ;;  %v9096_v52 = vunpack.c.l.s8.bf16 %v8876_v40  ;;  %v9100_v13 = vunpack.c.h.s8.bf16 %v8876_v40  ;;  %v9101_v7 = vunpack.c.l.s8.bf16 %v8877_v48  ;;  %v9111_v40 = vunpack.c.l.s8.bf16 %v8883_v39 }
 0x6d8   : > { %10322 = vmatpush1.bf16.msra.mxu0 %v9081_v46  ;;  %v9106_v46 = vunpack.c.h.s8.bf16 %v8878_v5  ;;  %v8887_v5 = vld [vmem:[%s17811_s22 + $0x2d0] sm:$0xff] }
 0x6d9   : > { %10323 = vmatprep.subr.bf16.mxu0 %v9086_v20  ;;  %v8882_v20 = vld [vmem:[%s17811_s22 + $0x2a8] sm:$0xff]  ;;  %v9119_v28 = vunpack.c.l.s8.bf16 %v8887_v5 }
 0x6da   : > { %10587 = vmatpush1.bf16.msra.mxu1 %v9083_v27  ;;  %v9105_v27 = vunpack.c.h.s8.bf16 %v8877_v48  ;;  %v9110_v51 = vunpack.c.l.s8.bf16 %v8882_v20 }
 0x6db   : > { %10588 = vmatprep.subr.bf16.mxu1 %v9088_v12  ;;  %v8884_v12 = vld [vmem:[%s17811_s22 + $0x2b8] sm:$0xff] }
 0x6dc   : > { %10324 = vmatpush1.bf16.msra.mxu0 %v9085_v16  ;;  %v8881_v16 = vld [vmem:[%s17811_s22 + $0x2a0] sm:$0xff]  ;;  %v9116_v0 = vunpack.c.h.s8.bf16 %v8884_v12 }
 0x6dd   : > { %10325 = vmatprep.subr.bf16.mxu0 %v9090_v31  ;;  %v9107_v31 = vunpack.c.h.s8.bf16 %v8879_v59 }
 0x6de   : > { %10589 = vmatpush1.bf16.msra.mxu1 %v9087_v25  ;;  %v9112_v25 = vunpack.c.l.s8.bf16 %v8884_v12 }
 0x6df   : > { %10590 = vmatprep.subr.bf16.mxu1 %v9092_v14  ;;  %v9109_v14 = vunpack.c.l.s8.bf16 %v8881_v16 }
 0x6e0   : > { %10326 = vmatpush1.bf16.msra.mxu0 %v9089_v3  ;;  %v9114_v3 = vunpack.c.h.s8.bf16 %v8882_v20  ;;  %v8891_v20 = vld [vmem:[%s17811_s22 + $0x2f0] sm:$0xff] }
 0x6e1   : > { %10327 = vmatprep.subr.bf16.mxu0 %v9094_v2  ;;  %v8886_v2 = vld [vmem:[%s17811_s22 + $0x2c8] sm:$0xff]  ;;  %v9127_v12 = vunpack.c.l.s8.bf16 %v8891_v20 }
 0x6e2   : > { %10591 = vmatpush1.bf16.msra.mxu1 %v9091_v50  ;;  %v9113_v50 = vunpack.c.h.s8.bf16 %v8881_v16  ;;  %v9118_v15 = vunpack.c.l.s8.bf16 %v8886_v2 }
 0x6e3   : > { %10592 = vmatprep.subr.bf16.mxu1 %v9096_v52  ;;  %v8888_v52 = vld [vmem:[%s17811_s22 + $0x2d8] sm:$0xff] }
 0x6e4   : > { %10328 = vmatpush1.bf16.msra.mxu0 %v9093_v8  ;;  %v8885_v8 = vld [vmem:[%s17811_s22 + $0x2c0] sm:$0xff]  ;;  %v9124_v48 = vunpack.c.h.s8.bf16 %v8888_v52 }
 0x6e5   : > { %10329 = vmatprep.subr.bf16.mxu0 %v9098_v62  ;;  %v9115_v62 = vunpack.c.h.s8.bf16 %v8883_v39 }
 0x6e6   : > { %10593 = vmatpush1.bf16.msra.mxu1 %v9095_v44  ;;  %v9120_v44 = vunpack.c.l.s8.bf16 %v8888_v52 }
 0x6e7   : > { %10594 = vmatprep.subr.bf16.mxu1 %v9100_v13  ;;  %v9117_v13 = vunpack.c.l.s8.bf16 %v8885_v8 }
 0x6e8   : > { %10330 = vmatpush1.bf16.msra.mxu0 %v9097_v57  ;;  %v9122_v57 = vunpack.c.h.s8.bf16 %v8886_v2  ;;  %v8895_v2 = vld [vmem:[%s17811_s22 + $0x310] sm:$0xff] }
 0x6e9   : > { %10331 = vmatprep.subr.bf16.mxu0 %v9102_v47  ;;  %v8890_v47 = vld [vmem:[%s17811_s22 + $0x2e8] sm:$0xff]  ;;  %v9135_v52 = vunpack.c.l.s8.bf16 %v8895_v2 }
 0x6ea   : > { %10595 = vmatpush1.bf16.msra.mxu1 %v9099_v56  ;;  %v9121_v56 = vunpack.c.h.s8.bf16 %v8885_v8  ;;  %v9126_v59 = vunpack.c.l.s8.bf16 %v8890_v47 }
 0x6eb   : > { %10596 = vmatprep.subr.bf16.mxu1 %v9104_v26  ;;  %v8892_v26 = vld [vmem:[%s17811_s22 + $0x2f8] sm:$0xff] }
 0x6ec   : > { %10332 = vmatpush1.bf16.msra.mxu0 %v9101_v7  ;;  %v8889_v7 = vld [vmem:[%s17811_s22 + $0x2e0] sm:$0xff]  ;;  %v9132_v16 = vunpack.c.h.s8.bf16 %v8892_v26 }
 0x6ed   : > { %10333 = vmatprep.subr.bf16.mxu0 %v9106_v46  ;;  %v9123_v46 = vunpack.c.h.s8.bf16 %v8887_v5 }
 0x6ee   : > { %10597 = vmatpush1.bf16.msra.mxu1 %v9103_v1  ;;  %v9128_v1 = vunpack.c.l.s8.bf16 %v8892_v26 }
 0x6ef   : > { %10598 = vmatprep.subr.bf16.mxu1 %v9108_v60  ;;  %v9125_v60 = vunpack.c.l.s8.bf16 %v8889_v7 }
 0x6f0   : > { %10334 = vmatpush1.bf16.msra.mxu0 %v9105_v27  ;;  %v9130_v27 = vunpack.c.h.s8.bf16 %v8890_v47  ;;  %v8899_v47 = vld [vmem:[%s17811_s22 + $0x330] sm:$0xff] }
 0x6f1   : > { %10335 = vmatprep.subr.bf16.mxu0 %v9110_v51  ;;  %v8894_v51 = vld [vmem:[%s17811_s22 + $0x308] sm:$0xff]  ;;  %v9143_v26 = vunpack.c.l.s8.bf16 %v8899_v47 }
 0x6f2   : > { %10599 = vmatpush1.bf16.msra.mxu1 %v9107_v31  ;;  %v9129_v31 = vunpack.c.h.s8.bf16 %v8889_v7  ;;  %v9134_v39 = vunpack.c.l.s8.bf16 %v8894_v51  ;;  %v8904_v7 = vld [vmem:[%s17811_s22 + $0x358] sm:$0xff] }
 0x6f3   : > { %10600 = vmatprep.subr.bf16.mxu1 %v9112_v25  ;;  %v8896_v25 = vld [vmem:[%s17811_s22 + $0x318] sm:$0xff] }
 0x6f4   : > { %10336 = vmatpush1.bf16.msra.mxu0 %v9109_v14  ;;  %v8893_v14 = vld [vmem:[%s17811_s22 + $0x300] sm:$0xff]  ;;  %v9140_v8 = vunpack.c.h.s8.bf16 %v8896_v25 }
 0x6f5   : > { %10337 = vmatprep.subr.bf16.mxu0 %v9114_v3  ;;  %v9131_v3 = vunpack.c.h.s8.bf16 %v8891_v20  ;;  %v9147_v20 = vunpack.c.h.s8.bf16 %v8899_v47  ;;  %v8911_v47 = vld [vmem:[%s17811_s22 + $0x390] sm:$0xff] }
 0x6f6   : > { %10601 = vmatpush1.bf16.msra.mxu1 %v9111_v40  ;;  %v9136_v40 = vunpack.c.l.s8.bf16 %v8896_v25 }
 0x6f7   : > { %10602 = vmatprep.subr.bf16.mxu1 %v9116_v0  ;;  %v9133_v0 = vunpack.c.l.s8.bf16 %v8893_v14 }
 0x6f8   : > { %10338 = vmatpush1.bf16.msra.mxu0 %v9113_v50  ;;  %v9138_v50 = vunpack.c.h.s8.bf16 %v8894_v51 }
 0x6f9   : > { %10339 = vmatprep.subr.bf16.mxu0 %v9118_v15  ;;  %v8898_v15 = vld [vmem:[%s17811_s22 + $0x328] sm:$0xff] }
 0x6fa   : > { %10603 = vmatpush1.bf16.msra.mxu1 %v9115_v62  ;;  %v9137_v62 = vunpack.c.h.s8.bf16 %v8893_v14  ;;  %v9142_v5 = vunpack.c.l.s8.bf16 %v8898_v15  ;;  %v8905_v14 = vld [vmem:[%s17811_s22 + $0x360] sm:$0xff] }
 0x6fb   : > { %10604 = vmatprep.subr.bf16.mxu1 %v9120_v44  ;;  %v8900_v44 = vld [vmem:[%s17811_s22 + $0x338] sm:$0xff] }
 0x6fc   : > { %10340 = vmatpush1.bf16.msra.mxu0 %v9117_v13  ;;  %v8897_v13 = vld [vmem:[%s17811_s22 + $0x320] sm:$0xff] }
 0x6fd   : > { %10341 = vmatprep.subr.bf16.mxu0 %v9122_v57  ;;  %v9139_v57 = vunpack.c.h.s8.bf16 %v8895_v2  ;;  %v8907_v2 = vld [vmem:[%s17811_s22 + $0x370] sm:$0xff] }
 0x6fe   : > { %10605 = vmatpush1.bf16.msra.mxu1 %v9119_v28  ;;  %v9144_v28 = vunpack.c.l.s8.bf16 %v8900_v44 }
 0x6ff   : > { %10606 = vmatprep.subr.bf16.mxu1 %v9124_v48  ;;  %v9141_v48 = vunpack.c.l.s8.bf16 %v8897_v13 }
 0x700   : > { %10342 = vmatpush1.bf16.msra.mxu0 %v9121_v56  ;;  %v9146_v56 = vunpack.c.h.s8.bf16 %v8898_v15  ;;  %v8910_v15 = vld [vmem:[%s17811_s22 + $0x388] sm:$0xff] }
 0x701   : > { %10343 = vmatprep.subr.bf16.mxu0 %v9126_v59  ;;  %v9148_v59 = vunpack.c.h.s8.bf16 %v8900_v44  ;;  %v8912_v44 = vld [vmem:[%s17811_s22 + $0x398] sm:$0xff] }
 0x702   : > { %10607 = vmatpush1.bf16.msra.mxu1 %v9123_v46 }
 0x703   : > { %10608 = vmatprep.subr.bf16.mxu1 %v9128_v1  ;;  %v8901_v1 = vld [vmem:[%s17811_s22 + $0x340] sm:$0xff] }
 0x704   : > { %10344 = vmatpush1.bf16.msra.mxu0 %v9125_v60  ;;  %v9152_v60 = vunpack.c.l.s8.bf16 %v8904_v7  ;;  %v9153_v25 = vunpack.c.h.s8.bf16 %v8901_v1 }
 0x705   : > { %10345 = vmatprep.subr.bf16.mxu0 %v9130_v27  ;;  %v8903_v27 = vld [vmem:[%s17811_s22 + $0x350] sm:$0xff] }
 0x706   : > { %10609 = vmatpush1.bf16.msra.mxu1 %v9127_v12  ;;  %v9149_v12 = vunpack.c.l.s8.bf16 %v8901_v1  ;;  %v8913_v1 = vld [vmem:[%s17811_s22 + $0x3a0] sm:$0xff] }
 0x707   : > { %10610 = vmatprep.subr.bf16.mxu1 %v9132_v16  ;;  %v8906_v16 = vld [vmem:[%s17811_s22 + $0x368] sm:$0xff] }
 0x708   : > { %10346 = vmatpush1.bf16.msra.mxu0 %v9129_v31  ;;  %v9156_v31 = vunpack.c.h.s8.bf16 %v8904_v7  ;;  %v8916_v7 = vld [vmem:[%s17811_s22 + $0x3b8] sm:$0xff] }
 0x709   : > { %10368 = vmatprep.subr.bf16.mxu0 %v9134_v39  ;;  %v9158_v39 = vunpack.c.l.s8.bf16 %v8906_v16 }
 0x70a   : > { %10611 = vmatpush1.bf16.msra.mxu1 %v9131_v3  ;;  %v9155_v3 = vunpack.c.h.s8.bf16 %v8903_v27 }
 0x70b   : > { %10348 = vmatmul.mubr.bf16.vlgmr.msra.gmra.mrb[104].mxu0 %v17816_v36  ;;  %10633 = vmatprep.subr.bf16.mxu1 %v9136_v40 }
 0x70c   : > { %10357 = vmatprep.mubr.bf16.mxu0 %v17841_v42  ;;  %10369 = vmatpush1.bf16.msra.mxu0 %v9133_v0  ;;  %v9157_v0 = vunpack.c.l.s8.bf16 %v8905_v14 }
 0x70d   : > { %10613 = vmatmul.mubr.bf16.vlgmr.msra.gmra.mrb[104].mxu1 %v17816_v36  ;;  %10370 = vmatprep.subr.bf16.mxu0 %v9138_v50  ;;  %v8902_v36 = vld [vmem:[%s17811_s22 + $0x348] sm:$0xff]  ;;  %v9162_v50 = vunpack.c.h.s8.bf16 %v8906_v16 }
 0x70e   : > { %10622 = vmatprep.mubr.bf16.mxu1 %v17841_v42  ;;  %10634 = vmatpush1.bf16.msra.mxu1 %v9135_v52  ;;  %v9145_v42 = vunpack.c.h.s8.bf16 %v8897_v13  ;;  %v9150_v46 = vunpack.c.l.s8.bf16 %v8902_v36  ;;  %v9154_v51 = vunpack.c.h.s8.bf16 %v8902_v36  ;;  %v9159_v52 = vunpack.c.l.s8.bf16 %v8907_v2  ;;  %v8909_v13 = vld [vmem:[%s17811_s22 + $0x380] sm:$0xff]  ;;  %v8914_v36 = vld [vmem:[%s17811_s22 + $0x3a8] sm:$0xff] }
 0x70f   : > { %10635 = vmatprep.subr.bf16.mxu1 %v9140_v8  ;;  %v8918_v16 = vld [vmem:[%s17811_s22 + $0x3c8] sm:$0xff] }
 0x710   : > { %10371 = vmatpush1.bf16.msra.mxu0 %v9137_v62  ;;  %v9161_v62 = vunpack.c.h.s8.bf16 %v8905_v14  ;;  %v8917_v14 = vld [vmem:[%s17811_s22 + $0x3c0] sm:$0xff] }
 0x711   : > { %10372 = vmatprep.subr.bf16.mxu0 %v9142_v5  ;;  %v9166_v5 = vunpack.c.l.s8.bf16 %v8910_v15 }
 0x712   : > { %10636 = vmatpush1.bf16.msra.mxu1 %v9139_v57  ;;  %v9163_v57 = vunpack.c.h.s8.bf16 %v8907_v2  ;;  %v8919_v2 = vld [vmem:[%s17811_s22 + $0x3d0] sm:$0xff] }
 0x713   : > { %10358 = vmatmul.mubr.bf16.gmra.mrb[108].mxu0 %v17838_v55  ;;  %10637 = vmatprep.subr.bf16.mxu1 %v9144_v28  ;;  %v9168_v28 = vunpack.c.l.s8.bf16 %v8912_v44 }
 0x714   : > { %10373 = vmatpush1.bf16.msra.mxu0 %v9141_v48  ;;  %10400 = vmatprep.mubr.bf16.mxu0 %v17829_v30  ;;  %v9165_v48 = vunpack.c.l.s8.bf16 %v8909_v13 }
 0x715   : > { %10623 = vmatmul.mubr.bf16.gmra.mrb[108].mxu1 %v17838_v55  ;;  %10374 = vmatprep.subr.bf16.mxu0 %v9146_v56  ;;  %v9151_v55 = vunpack.c.l.s8.bf16 %v8903_v27  ;;  %v9170_v56 = vunpack.c.h.s8.bf16 %v8910_v15  ;;  %v8915_v27 = vld [vmem:[%s17811_s22 + $0x3b0] sm:$0xff]  ;;  %v8922_v15 = vld [vmem:[%s17811_s22 + $0x3e8] sm:$0xff] }
 0x716   : > { %10638 = vmatpush1.bf16.msra.mxu1 %v9143_v26  ;;  %10665 = vmatprep.mubr.bf16.mxu1 %v17829_v30  ;;  %v8908_v30 = vld [vmem:[%s17811_s22 + $0x378] sm:$0xff]  ;;  %v9167_v26 = vunpack.c.l.s8.bf16 %v8911_v47 }
 0x717   : > { %10639 = vmatprep.subr.bf16.mxu1 %v9148_v59  ;;  %v9160_v40 = vunpack.c.l.s8.bf16 %v8908_v30  ;;  %v9164_v8 = vunpack.c.h.s8.bf16 %v8908_v30  ;;  %v9172_v59 = vunpack.c.h.s8.bf16 %v8912_v44  ;;  %v8920_v30 = vld [vmem:[%s17811_s22 + $0x3d8] sm:$0xff] }
 0x718   : > { %10375 = vmatpush1.bf16.msra.mxu0 %v9145_v42  ;;  %v9169_v42 = vunpack.c.h.s8.bf16 %v8909_v13  ;;  %v8924_v44 = vld [vmem:[%s17811_s22 + $0x3f8] sm:$0xff]  ;;  %v8921_v13 = vld [vmem:[%s17811_s22 + $0x3e0] sm:$0xff] }
 0x719   : > { %10376 = vmatprep.subr.bf16.mxu0 %v9150_v46  ;;  %v9174_v46 = vunpack.c.l.s8.bf16 %v8914_v36 }
 0x71a   : > { %10640 = vmatpush1.bf16.msra.mxu1 %v9147_v20  ;;  %v9171_v20 = vunpack.c.h.s8.bf16 %v8911_v47  ;;  %v8923_v47 = vld [vmem:[%s17811_s22 + $0x3f0] sm:$0xff] }
 0x71b   : > { %10641 = vmatprep.subr.bf16.mxu1 %v9152_v60  ;;  %v9176_v60 = vunpack.c.l.s8.bf16 %v8916_v7 }
 0x71c   : > { %10377 = vmatpush1.bf16.msra.mxu0 %v9149_v12  ;;  %v9173_v12 = vunpack.c.l.s8.bf16 %v8913_v1 }
 0x71d   : > { %10378 = vmatprep.subr.bf16.mxu0 %v9154_v51  ;;  %v9178_v51 = vunpack.c.h.s8.bf16 %v8914_v36  ;;  %v8926_v36 = vld [vmem:[%s17811_s22 + $0x408] sm:$0xff] }
 0x71e   : > { %10642 = vmatpush1.bf16.msra.mxu1 %v9151_v55  ;;  %v9175_v55 = vunpack.c.l.s8.bf16 %v8915_v27 }
 0x71f   : > { %10643 = vmatprep.subr.bf16.mxu1 %v9156_v31  ;;  %v9180_v31 = vunpack.c.h.s8.bf16 %v8916_v7  ;;  %v8928_v7 = vld [vmem:[%s17811_s22 + $0x418] sm:$0xff] }
 0x720   : > { %10379 = vmatpush1.bf16.msra.mxu0 %v9153_v25  ;;  %v9177_v25 = vunpack.c.h.s8.bf16 %v8913_v1  ;;  %v8925_v1 = vld [vmem:[%s17811_s22 + $0x400] sm:$0xff] }
 0x721   : > { %10380 = vmatprep.subr.bf16.mxu0 %v9158_v39  ;;  %v9182_v39 = vunpack.c.l.s8.bf16 %v8918_v16 }
 0x722   : > { %10644 = vmatpush1.bf16.msra.mxu1 %v9155_v3  ;;  %v9179_v3 = vunpack.c.h.s8.bf16 %v8915_v27  ;;  %v8927_v27 = vld [vmem:[%s17811_s22 + $0x410] sm:$0xff] }
 0x723   : > { %10645 = vmatprep.subr.bf16.mxu1 %v9160_v40  ;;  %v9184_v40 = vunpack.c.l.s8.bf16 %v8920_v30 }
 0x724   : > { %10381 = vmatpush1.bf16.msra.mxu0 %v9157_v0  ;;  %v9181_v0 = vunpack.c.l.s8.bf16 %v8917_v14 }
 0x725   : > { %10382 = vmatprep.subr.bf16.mxu0 %v9162_v50  ;;  %v9186_v50 = vunpack.c.h.s8.bf16 %v8918_v16  ;;  %v8930_v16 = vld [vmem:[%s17811_s22 + $0x428] sm:$0xff] }
 0x726   : > { %10646 = vmatpush1.bf16.msra.mxu1 %v9159_v52  ;;  %v9183_v52 = vunpack.c.l.s8.bf16 %v8919_v2 }
 0x727   : > { %10647 = vmatprep.subr.bf16.mxu1 %v9164_v8  ;;  %v9188_v8 = vunpack.c.h.s8.bf16 %v8920_v30  ;;  %v8932_v30 = vld [vmem:[%s17811_s22 + $0x438] sm:$0xff] }
 0x728   : > { %10383 = vmatpush1.bf16.msra.mxu0 %v9161_v62  ;;  %v9185_v62 = vunpack.c.h.s8.bf16 %v8917_v14  ;;  %v8929_v14 = vld [vmem:[%s17811_s22 + $0x420] sm:$0xff] }
 0x729   : > { %10384 = vmatprep.subr.bf16.mxu0 %v9166_v5  ;;  %v9190_v5 = vunpack.c.l.s8.bf16 %v8922_v15 }
 0x72a   : > { %10648 = vmatpush1.bf16.msra.mxu1 %v9163_v57  ;;  %v9187_v57 = vunpack.c.h.s8.bf16 %v8919_v2  ;;  %v8931_v2 = vld [vmem:[%s17811_s22 + $0x430] sm:$0xff] }
 0x72b   : > { %10649 = vmatprep.subr.bf16.mxu1 %v9168_v28  ;;  %v9192_v28 = vunpack.c.l.s8.bf16 %v8924_v44 }
 0x72c   : > { %10385 = vmatpush1.bf16.msra.mxu0 %v9165_v48  ;;  %v9189_v48 = vunpack.c.l.s8.bf16 %v8921_v13 }
 0x72d   : > { %10386 = vmatprep.subr.bf16.mxu0 %v9170_v56  ;;  %v9194_v56 = vunpack.c.h.s8.bf16 %v8922_v15  ;;  %v9212_v15 = vunpack.c.h.s8.bf16 %v8932_v30 }
 0x72e   : > { %10650 = vmatpush1.bf16.msra.mxu1 %v9167_v26  ;;  %v9191_v26 = vunpack.c.l.s8.bf16 %v8923_v47 }
 0x72f   : > { %10651 = vmatprep.subr.bf16.mxu1 %v9172_v59  ;;  %v9196_v59 = vunpack.c.h.s8.bf16 %v8924_v44  ;;  %v8933_v44 = vld [vmem:[%s17811_s22 + $0x440] sm:$0xff] }
 0x730   : > { %10387 = vmatpush1.bf16.msra.mxu0 %v9169_v42  ;;  %v9193_v42 = vunpack.c.h.s8.bf16 %v8921_v13 }
 0x731   : > { %10388 = vmatprep.subr.bf16.mxu0 %v9174_v46  ;;  %v9198_v46 = vunpack.c.l.s8.bf16 %v8926_v36 }
 0x732   : > { %10652 = vmatpush1.bf16.msra.mxu1 %v9171_v20  ;;  %v9195_v20 = vunpack.c.h.s8.bf16 %v8923_v47 }
 0x733   : > { %10653 = vmatprep.subr.bf16.mxu1 %v9176_v60  ;;  %v9200_v60 = vunpack.c.l.s8.bf16 %v8928_v7 }
 0x734   : > { %10389 = vmatpush1.bf16.msra.mxu0 %v9173_v12  ;;  %v9197_v12 = vunpack.c.l.s8.bf16 %v8925_v1 }
 0x735   : > { %10390 = vmatprep.subr.bf16.mxu0 %v9178_v51  ;;  %v9202_v51 = vunpack.c.h.s8.bf16 %v8926_v36  ;;  %v8940_v36 = vld [vmem:[%s17811_s22 + $0x478] sm:$0xff] }
 0x736   : > { %10654 = vmatpush1.bf16.msra.mxu1 %v9175_v55  ;;  %v9199_v55 = vunpack.c.l.s8.bf16 %v8927_v27 }
 0x737   : > { %10655 = vmatprep.subr.bf16.mxu1 %v9180_v31  ;;  %v9204_v31 = vunpack.c.h.s8.bf16 %v8928_v7 }
 0x738   : > { %10391 = vmatpush1.bf16.msra.mxu0 %v9177_v25  ;;  %v9201_v25 = vunpack.c.h.s8.bf16 %v8925_v1  ;;  %v8939_v1 = vld [vmem:[%s17811_s22 + $0x470] sm:$0xff] }
 0x739   : > { %10392 = vmatprep.subr.bf16.mxu0 %v9182_v39  ;;  %v9206_v39 = vunpack.c.l.s8.bf16 %v8930_v16 }
 0x73a   : > { %10656 = vmatpush1.bf16.msra.mxu1 %v9179_v3  ;;  %v9203_v3 = vunpack.c.h.s8.bf16 %v8927_v27  ;;  %v9223_v27 = vunpack.c.l.s8.bf16 %v8939_v1 }
 0x73b   : > { %10657 = vmatprep.subr.bf16.mxu1 %v9184_v40  ;;  %v9208_v40 = vunpack.c.l.s8.bf16 %v8932_v30  ;;  %v9227_v30 = vunpack.c.h.s8.bf16 %v8939_v1 }
 0x73c   : > { %10393 = vmatpush1.bf16.msra.mxu0 %v9181_v0  ;;  %v9205_v0 = vunpack.c.l.s8.bf16 %v8929_v14 }
 0x73d   : > { %10394 = vmatprep.subr.bf16.mxu0 %v9186_v50  ;;  %v9210_v50 = vunpack.c.h.s8.bf16 %v8930_v16  ;;  %v10760_v16 = vld [vmem:[%s17811_s22 + $0x918] sm:$0xff] }
 0x73e   : > { %10658 = vmatpush1.bf16.msra.mxu1 %v9183_v52  ;;  %v9207_v52 = vunpack.c.l.s8.bf16 %v8931_v2 }
 0x73f   : > { %10659 = vmatprep.subr.bf16.mxu1 %v9188_v8  ;;  %v8936_v8 = vld [vmem:[%s17811_s22 + $0x458] sm:$0xff] }
 0x740   : > { %10395 = vmatpush1.bf16.msra.mxu0 %v9185_v62  ;;  %v9216_v13 = vunpack.c.l.s8.bf16 %v8936_v8 }
 0x741   : > { %10396 = vmatprep.subr.bf16.mxu0 %v9190_v5  ;;  %v9211_v5 = vunpack.c.h.s8.bf16 %v8931_v2 }
 0x742   : > { %10660 = vmatpush1.bf16.msra.mxu1 %v9187_v57  ;;  %v8935_v57 = vld [vmem:[%s17811_s22 + $0x450] sm:$0xff] }
 0x743   : > { %10661 = vmatprep.subr.bf16.mxu1 %v9192_v28  ;;  %v9213_v28 = vunpack.c.l.s8.bf16 %v8933_v44  ;;  %v9219_v7 = vunpack.c.h.s8.bf16 %v8935_v57 }
 0x744   : > { %10397 = vmatpush1.bf16.msra.mxu0 %v9189_v48  ;;  %v8938_v48 = vld [vmem:[%s17811_s22 + $0x468] sm:$0xff] }
 0x745   : > { %10398 = vmatprep.subr.bf16.mxu0 %v9194_v56  ;;  %v9220_v56 = vunpack.c.h.s8.bf16 %v8936_v8 }
 0x746   : > { %10662 = vmatpush1.bf16.msra.mxu1 %v9191_v26  ;;  %v9217_v26 = vunpack.c.h.s8.bf16 %v8933_v44  ;;  %v10763_v44 = vld [vmem:[%s17811_s22 + $0x930] sm:$0xff] }
 0x747   : > { %10663 = vmatprep.subr.bf16.mxu1 %v9196_v59  ;;  %v9222_v59 = vunpack.c.l.s8.bf16 %v8938_v48 }
 0x748   : > { %10399 = vmatpush1.bf16.msra.mxu0 %v9193_v42  ;;  %v8937_v42 = vld [vmem:[%s17811_s22 + $0x460] sm:$0xff] }
 0x749   : > { %10421 = vmatprep.subr.bf16.mxu0 %v9198_v46  ;;  %v9224_v46 = vunpack.c.l.s8.bf16 %v8940_v36 }
 0x74a   : > { %10664 = vmatpush1.bf16.msra.mxu1 %v9195_v20  ;;  %v9221_v20 = vunpack.c.l.s8.bf16 %v8937_v42 }
 0x74b   : > { %10401 = vmatmul.mubr.bf16.vlgmr.msra.gmra.mrb[104].mxu0 %v17824_v11  ;;  %10686 = vmatprep.subr.bf16.mxu1 %v9200_v60  ;;  %v9226_v60 = vunpack.c.h.s8.bf16 %v8938_v48 }
 0x74c   : > { %10410 = vmatprep.mubr.bf16.mxu0 %v17848_v37  ;;  %10422 = vmatpush1.bf16.msra.mxu0 %v9197_v12  ;;  %v10758_v12 = vld [vmem:[%s17811_s22 + $0x908] sm:$0xff] }
 0x74d   : > { %10666 = vmatmul.mubr.bf16.vlgmr.msra.gmra.mrb[104].mxu1 %v17824_v11  ;;  %10423 = vmatprep.subr.bf16.mxu0 %v9202_v51  ;;  %v8934_v11 = vld [vmem:[%s17811_s22 + $0x448] sm:$0xff]  ;;  %v9228_v51 = vunpack.c.h.s8.bf16 %v8940_v36 }
 0x74e   : > { %10675 = vmatprep.mubr.bf16.mxu1 %v17848_v37  ;;  %10687 = vmatpush1.bf16.msra.mxu1 %v9199_v55  ;;  %v9209_v37 = vunpack.c.h.s8.bf16 %v8929_v14  ;;  %v9214_v62 = vunpack.c.l.s8.bf16 %v8934_v11  ;;  %v9218_v47 = vunpack.c.h.s8.bf16 %v8934_v11  ;;  %v9225_v55 = vunpack.c.h.s8.bf16 %v8937_v42  ;;  %v10759_v14 = vld [vmem:[%s17811_s22 + $0x910] sm:$0xff]  ;;  %v10764_v11 = vld [vmem:[%s17811_s22 + $0x938] sm:$0xff] }
 0x74f   : > { %10688 = vmatprep.subr.bf16.mxu1 %v9204_v31  ;;  %v10902_v31 = vunpack.c.l.s8.bf16 %v10758_v12  ;;  %v10903_v2 = vunpack.c.l.s8.bf16 %v10759_v14  ;;  %v10907_v8 = vunpack.c.h.s8.bf16 %v10759_v14 }
 0x750   : > { %10424 = vmatpush1.bf16.msra.mxu0 %v9201_v25  ;;  %v10757_v25 = vld [vmem:[%s17811_s22 + $0x900] sm:$0xff] }
 0x751   : > { %10425 = vmatprep.subr.bf16.mxu0 %v9206_v39  ;;  %v10904_v39 = vunpack.c.l.s8.bf16 %v10760_v16 }
 0x752   : > { %10689 = vmatpush1.bf16.msra.mxu1 %v9203_v3  ;;  %v10901_v3 = vunpack.c.l.s8.bf16 %v10757_v25 }
 0x753   : > { %10411 = vmatmul.mubr.bf16.gmra.mrb[108].mxu0 %v17844_v9  ;;  %10690 = vmatprep.subr.bf16.mxu1 %v9208_v40  ;;  %v10906_v40 = vunpack.c.h.s8.bf16 %v10758_v12 }
 0x754   : > { %10426 = vmatpush1.bf16.msra.mxu0 %v9205_v0  ;;  %10453 = vmatprep.mubr.bf16.mxu0 %v19203_v33  ;;  %v10762_v0 = vld [vmem:[%s17811_s22 + $0x928] sm:$0xff] }
 0x755   : > { %10676 = vmatmul.mubr.bf16.gmra.mrb[108].mxu1 %v17844_v9  ;;  %10427 = vmatprep.subr.bf16.mxu0 %v9210_v50  ;;  %v9215_v9 = vunpack.c.l.s8.bf16 %v8935_v57  ;;  %v10908_v50 = vunpack.c.h.s8.bf16 %v10760_v16  ;;  %v10911_v57 = vunpack.c.l.s8.bf16 %v10763_v44 }
 0x756   : > { %10691 = vmatpush1.bf16.msra.mxu1 %v9207_v52  ;;  %10718 = vmatprep.mubr.bf16.mxu1 %v19203_v33  ;;  %v10905_v52 = vunpack.c.h.s8.bf16 %v10757_v25 }
 0x757   : > { %10692 = vmatprep.subr.bf16.mxu1 %v9212_v15  ;;  %v10910_v15 = vunpack.c.l.s8.bf16 %v10762_v0 }
 0x758   : > { %10428 = vmatpush1.bf16.msra.mxu0 %v9209_v37  ;;  %v10761_v37 = vld [vmem:[%s17811_s22 + $0x920] sm:$0xff] }
 0x759   : > { %10429 = vmatprep.subr.bf16.mxu0 %v9214_v62  ;;  %v10912_v62 = vunpack.c.l.s8.bf16 %v10764_v11 }
 0x75a   : > { %10693 = vmatpush1.bf16.msra.mxu1 %v9211_v5  ;;  %v10909_v5 = vunpack.c.l.s8.bf16 %v10761_v37 }
 0x75b   : > { %10694 = vmatprep.subr.bf16.mxu1 %v9216_v13  ;;  %v10914_v13 = vunpack.c.h.s8.bf16 %v10762_v0 }
 0x75c   : > { %10430 = vmatpush1.bf16.msra.mxu0 %v9213_v28  ;;  %v10916_v28 = vunpack.c.h.s8.bf16 %v10764_v11 }
 0x75d   : > { %10431 = vmatprep.subr.bf16.mxu0 %v9218_v47  ;;  %v10913_v47 = vunpack.c.h.s8.bf16 %v10761_v37 }
 0x75e   : > { %10695 = vmatpush1.bf16.msra.mxu1 %v9215_v9  ;;  %v10768_v9 = vld [vmem:[%s17811_s22 + $0x958] sm:$0xff] }
 0x75f   : > { %10696 = vmatprep.subr.bf16.mxu1 %v9220_v56  ;;  %v10765_v56 = vld [vmem:[%s17811_s22 + $0x940] sm:$0xff]  ;;  %v10920_v36 = vunpack.c.l.s8.bf16 %v10768_v9  ;;  %v10924_v1 = vunpack.c.h.s8.bf16 %v10768_v9 }
 0x760   : > { %10432 = vmatpush1.bf16.msra.mxu0 %v9217_v26  ;;  %v10915_v26 = vunpack.c.h.s8.bf16 %v10763_v44  ;;  %v10917_v42 = vunpack.c.l.s8.bf16 %v10765_v56 }
 0x761   : > { %10433 = vmatprep.subr.bf16.mxu0 %v9222_v59  ;;  %v10767_v59 = vld [vmem:[%s17811_s22 + $0x950] sm:$0xff] }
 0x762   : > { %10697 = vmatpush1.bf16.msra.mxu1 %v9219_v7  ;;  %v10923_v12 = vunpack.c.h.s8.bf16 %v10767_v59 }
 0x763   : > { %10698 = vmatprep.subr.bf16.mxu1 %v9224_v46  ;;  %v10770_v46 = vld [vmem:[%s17811_s22 + $0x968] sm:$0xff] }
 0x764   : > { %10434 = vmatpush1.bf16.msra.mxu0 %v9221_v20  ;;  %v10921_v20 = vunpack.c.h.s8.bf16 %v10765_v56 }
 0x765   : > { %10435 = vmatprep.subr.bf16.mxu0 %v9226_v60  ;;  %v10926_v60 = vunpack.c.l.s8.bf16 %v10770_v46 }
 0x766   : > { %10699 = vmatpush1.bf16.msra.mxu1 %v9223_v27  ;;  %v10769_v27 = vld [vmem:[%s17811_s22 + $0x960] sm:$0xff] }
 0x767   : > { %10700 = vmatprep.subr.bf16.mxu1 %v9228_v51  ;;  %v10925_v16 = vunpack.c.l.s8.bf16 %v10769_v27  ;;  %v10929_v14 = vunpack.c.h.s8.bf16 %v10769_v27 }
 0x768   : > { %10436 = vmatpush1.bf16.msra.mxu0 %v9225_v55  ;;  %v10771_v55 = vld [vmem:[%s17811_s22 + $0x970] sm:$0xff] }
 0x769   : > { %11189 = vmatprep.subr.bf16.mxu0 %v10902_v31  ;;  %v10930_v31 = vunpack.c.h.s8.bf16 %v10770_v46  ;;  %v10927_v25 = vunpack.c.l.s8.bf16 %v10771_v55  ;;  %v10931_v0 = vunpack.c.h.s8.bf16 %v10771_v55 }
 0x76a   : > { %10701 = vmatpush1.bf16.msra.mxu1 %v9227_v30  ;;  %v10774_v30 = vld [vmem:[%s17811_s22 + $0x988] sm:$0xff] }
 0x76b   : > { %10454 = vmatmul.mubr.bf16.vlgmr.msra.gmra.mrb[104].mxu0 %v17864_v45  ;;  %11454 = vmatprep.subr.bf16.mxu1 %v10904_v39 }
 0x76c   : > { %11190 = vmatpush1.bf16.msra.mxu0 %v10901_v3  ;;  %10463 = vmatprep.mubr.bf16.mxu0 %v19203_v33  ;;  %v10776_v3 = vld [vmem:[%s17811_s22 + $0x998] sm:$0xff] }
 0x76d   : > { %10719 = vmatmul.mubr.bf16.vlgmr.msra.gmra.mrb[104].mxu1 %v17864_v45  ;;  %11191 = vmatprep.subr.bf16.mxu0 %v10906_v40  ;;  %v10766_v45 = vld [vmem:[%s17811_s22 + $0x948] sm:$0xff]  ;;  %v10934_v40 = vunpack.c.l.s8.bf16 %v10774_v30 }
 0x76e   : > { %11455 = vmatpush1.bf16.msra.mxu1 %v10903_v2  ;;  %10728 = vmatprep.mubr.bf16.mxu1 %v19203_v33  ;;  %v10918_v48 = vunpack.c.l.s8.bf16 %v10766_v45  ;;  %v10922_v7 = vunpack.c.h.s8.bf16 %v10766_v45  ;;  %v10773_v2 = vld [vmem:[%s17811_s22 + $0x980] sm:$0xff] }
 0x76f   : > { %11456 = vmatprep.subr.bf16.mxu1 %v10908_v50  ;;  %v10936_v50 = vunpack.c.l.s8.bf16 %v10776_v3  ;;  %v10933_v11 = vunpack.c.l.s8.bf16 %v10773_v2  ;;  %v10937_v44 = vunpack.c.h.s8.bf16 %v10773_v2 }
 0x770   : > { %11192 = vmatpush1.bf16.msra.mxu0 %v10905_v52  ;;  %v10775_v52 = vld [vmem:[%s17811_s22 + $0x990] sm:$0xff] }
 0x771   : > { %11193 = vmatprep.subr.bf16.mxu0 %v10910_v15  ;;  %v10938_v15 = vunpack.c.h.s8.bf16 %v10774_v30  ;;  %v10935_v37 = vunpack.c.l.s8.bf16 %v10775_v52  ;;  %v10939_v45 = vunpack.c.h.s8.bf16 %v10775_v52 }
 0x772   : > { %11457 = vmatpush1.bf16.msra.mxu1 %v10907_v8  ;;  %v10778_v8 = vld [vmem:[%s17811_s22 + $0x9a8] sm:$0xff] }
 0x773   : > { %10464 = vmatmul.mubr.bf16.gmra.mrb[108].mxu0 %v17874_v53  ;;  %11458 = vmatprep.subr.bf16.mxu1 %v10912_v62  ;;  %v10940_v62 = vunpack.c.h.s8.bf16 %v10776_v3 }
 0x774   : > { %11194 = vmatpush1.bf16.msra.mxu0 %v10909_v5  ;;  %11221 = vmatprep.mubr.bf16.mxu0 %v17943_v43  ;;  %v10780_v5 = vld [vmem:[%s17811_s22 + $0x9b8] sm:$0xff] }
 0x775   : > { %10729 = vmatmul.mubr.bf16.gmra.mrb[108].mxu1 %v17874_v53  ;;  %11195 = vmatprep.subr.bf16.mxu0 %v10914_v13  ;;  %v10919_v53 = vunpack.c.l.s8.bf16 %v10767_v59  ;;  %v10942_v13 = vunpack.c.l.s8.bf16 %v10778_v8 }
 0x776   : > { %11459 = vmatpush1.bf16.msra.mxu1 %v10911_v57  ;;  %11486 = vmatprep.mubr.bf16.mxu1 %v17943_v43  ;;  %v10772_v43 = vld [vmem:[%s17811_s22 + $0x978] sm:$0xff]  ;;  %v10777_v57 = vld [vmem:[%s17811_s22 + $0x9a0] sm:$0xff] }
 0x777   : > { %11460 = vmatprep.subr.bf16.mxu1 %v10916_v28  ;;  %v10928_v51 = vunpack.c.l.s8.bf16 %v10772_v43  ;;  %v10932_v39 = vunpack.c.h.s8.bf16 %v10772_v43  ;;  %v10944_v28 = vunpack.c.l.s8.bf16 %v10780_v5  ;;  %v10941_v9 = vunpack.c.l.s8.bf16 %v10777_v57 }
 0x778   : > { %11196 = vmatpush1.bf16.msra.mxu0 %v10913_v47  ;;  %v10779_v47 = vld [vmem:[%s17811_s22 + $0x9b0] sm:$0xff]  ;;  %v10945_v59 = vunpack.c.h.s8.bf16 %v10777_v57 }
 0x779   : > { %11197 = vmatprep.subr.bf16.mxu0 %v10918_v48  ;;  %v10946_v48 = vunpack.c.h.s8.bf16 %v10778_v8  ;;  %v10943_v56 = vunpack.c.l.s8.bf16 %v10779_v47  ;;  %v10947_v46 = vunpack.c.h.s8.bf16 %v10779_v47 }
 0x77a   : > { %11461 = vmatpush1.bf16.msra.mxu1 %v10915_v26  ;;  %v10782_v26 = vld [vmem:[%s17811_s22 + $0x9c8] sm:$0xff] }
 0x77b   : > { %11462 = vmatprep.subr.bf16.mxu1 %v10920_v36  ;;  %v10948_v36 = vunpack.c.h.s8.bf16 %v10780_v5 }
 0x77c   : > { %11198 = vmatpush1.bf16.msra.mxu0 %v10917_v42  ;;  %v10784_v42 = vld [vmem:[%s17811_s22 + $0x9d8] sm:$0xff] }
 0x77d   : > { %11199 = vmatprep.subr.bf16.mxu0 %v10922_v7  ;;  %v10950_v7 = vunpack.c.l.s8.bf16 %v10782_v26 }
 0x77e   : > { %11463 = vmatpush1.bf16.msra.mxu1 %v10919_v53  ;;  %v10781_v53 = vld [vmem:[%s17811_s22 + $0x9c0] sm:$0xff] }
 0x77f   : > { %11464 = vmatprep.subr.bf16.mxu1 %v10924_v1  ;;  %v10952_v1 = vunpack.c.l.s8.bf16 %v10784_v42  ;;  %v10949_v43 = vunpack.c.l.s8.bf16 %v10781_v53  ;;  %v10953_v55 = vunpack.c.h.s8.bf16 %v10781_v53 }
 0x780   : > { %11200 = vmatpush1.bf16.msra.mxu0 %v10921_v20  ;;  %v10783_v20 = vld [vmem:[%s17811_s22 + $0x9d0] sm:$0xff] }
 0x781   : > { %11201 = vmatprep.subr.bf16.mxu0 %v10926_v60  ;;  %v10954_v60 = vunpack.c.h.s8.bf16 %v10782_v26  ;;  %v10951_v27 = vunpack.c.l.s8.bf16 %v10783_v20  ;;  %v10955_v30 = vunpack.c.h.s8.bf16 %v10783_v20 }
 0x782   : > { %11465 = vmatpush1.bf16.msra.mxu1 %v10923_v12  ;;  %v10786_v12 = vld [vmem:[%s17811_s22 + $0x9e8] sm:$0xff] }
 0x783   : > { %11466 = vmatprep.subr.bf16.mxu1 %v10928_v51  ;;  %v10956_v51 = vunpack.c.h.s8.bf16 %v10784_v42 }
 0x784   : > { %11202 = vmatpush1.bf16.msra.mxu0 %v10925_v16  ;;  %v10788_v16 = vld [vmem:[%s17811_s22 + $0x9f8] sm:$0xff] }
 0x785   : > { %11203 = vmatprep.subr.bf16.mxu0 %v10930_v31  ;;  %v10958_v31 = vunpack.c.l.s8.bf16 %v10786_v12 }
 0x786   : > { %11467 = vmatpush1.bf16.msra.mxu1 %v10927_v25  ;;  %v10785_v25 = vld [vmem:[%s17811_s22 + $0x9e0] sm:$0xff] }
 0x787   : > { %11468 = vmatprep.subr.bf16.mxu1 %v10932_v39  ;;  %v10960_v39 = vunpack.c.l.s8.bf16 %v10788_v16  ;;  %v10957_v3 = vunpack.c.l.s8.bf16 %v10785_v25  ;;  %v10961_v52 = vunpack.c.h.s8.bf16 %v10785_v25 }
 0x788   : > { %11204 = vmatpush1.bf16.msra.mxu0 %v10929_v14  ;;  %v10787_v14 = vld [vmem:[%s17811_s22 + $0x9f0] sm:$0xff] }
 0x789   : > { %11205 = vmatprep.subr.bf16.mxu0 %v10934_v40  ;;  %v10962_v40 = vunpack.c.h.s8.bf16 %v10786_v12  ;;  %v10959_v2 = vunpack.c.l.s8.bf16 %v10787_v14  ;;  %v10963_v8 = vunpack.c.h.s8.bf16 %v10787_v14  ;;  %v10799_v12 = vld [vmem:[%s17811_s22 + $0xa50] sm:$0xff] }
 0x78a   : > { %11469 = vmatpush1.bf16.msra.mxu1 %v10931_v0  ;;  %v10790_v0 = vld [vmem:[%s17811_s22 + $0xa08] sm:$0xff]  ;;  %v10987_v14 = vunpack.c.h.s8.bf16 %v10799_v12 }
 0x78b   : > { %11470 = vmatprep.subr.bf16.mxu1 %v10936_v50  ;;  %v10964_v50 = vunpack.c.h.s8.bf16 %v10788_v16  ;;  %v10802_v16 = vld [vmem:[%s17811_s22 + $0xa68] sm:$0xff] }
 0x78c   : > { %11206 = vmatpush1.bf16.msra.mxu0 %v10933_v11  ;;  %v10792_v11 = vld [vmem:[%s17811_s22 + $0xa18] sm:$0xff] }
 0x78d   : > { %11207 = vmatprep.subr.bf16.mxu0 %v10938_v15  ;;  %v10966_v15 = vunpack.c.l.s8.bf16 %v10790_v0 }
 0x78e   : > { %11471 = vmatpush1.bf16.msra.mxu1 %v10935_v37  ;;  %v10789_v37 = vld [vmem:[%s17811_s22 + $0xa00] sm:$0xff] }
 0x78f   : > { %11472 = vmatprep.subr.bf16.mxu1 %v10940_v62  ;;  %v10968_v62 = vunpack.c.l.s8.bf16 %v10792_v11  ;;  %v10965_v5 = vunpack.c.l.s8.bf16 %v10789_v37  ;;  %v10969_v47 = vunpack.c.h.s8.bf16 %v10789_v37  ;;  %v10808_v37 = vld [vmem:[%s17811_s22 + $0xa98] sm:$0xff] }
 0x790   : > { %11208 = vmatpush1.bf16.msra.mxu0 %v10937_v44  ;;  %v10791_v44 = vld [vmem:[%s17811_s22 + $0xa10] sm:$0xff] }
 0x791   : > { %11209 = vmatprep.subr.bf16.mxu0 %v10942_v13  ;;  %v10970_v13 = vunpack.c.h.s8.bf16 %v10790_v0  ;;  %v10967_v57 = vunpack.c.l.s8.bf16 %v10791_v44  ;;  %v10971_v26 = vunpack.c.h.s8.bf16 %v10791_v44  ;;  %v10994_v0 = vunpack.c.h.s8.bf16 %v10802_v16 }
 0x792   : > { %11473 = vmatpush1.bf16.msra.mxu1 %v10939_v45  ;;  %v10794_v45 = vld [vmem:[%s17811_s22 + $0xa28] sm:$0xff] }
 0x793   : > { %11474 = vmatprep.subr.bf16.mxu1 %v10944_v28  ;;  %v10972_v28 = vunpack.c.h.s8.bf16 %v10792_v11 }
 0x794   : > { %11210 = vmatpush1.bf16.msra.mxu0 %v10941_v9  ;;  %v10796_v9 = vld [vmem:[%s17811_s22 + $0xa38] sm:$0xff] }
 0x795   : > { %11211 = vmatprep.subr.bf16.mxu0 %v10946_v48  ;;  %v10974_v48 = vunpack.c.l.s8.bf16 %v10794_v45 }
 0x796   : > { %11475 = vmatpush1.bf16.msra.mxu1 %v10943_v56  ;;  %v10793_v56 = vld [vmem:[%s17811_s22 + $0xa20] sm:$0xff] }
 0x797   : > { %11476 = vmatprep.subr.bf16.mxu1 %v10948_v36  ;;  %v10976_v36 = vunpack.c.l.s8.bf16 %v10796_v9  ;;  %v10973_v42 = vunpack.c.l.s8.bf16 %v10793_v56 }
 0x798   : > { %11212 = vmatpush1.bf16.msra.mxu0 %v10945_v59  ;;  %v10795_v59 = vld [vmem:[%s17811_s22 + $0xa30] sm:$0xff] }
 0x799   : > { %11213 = vmatprep.subr.bf16.mxu0 %v10950_v7  ;;  %v10978_v7 = vunpack.c.h.s8.bf16 %v10794_v45  ;;  %v10975_v53 = vunpack.c.l.s8.bf16 %v10795_v59 }
 0x79a   : > { %11477 = vmatpush1.bf16.msra.mxu1 %v10947_v46  ;;  %v10980_v46 = vunpack.c.h.s8.bf16 %v10796_v9  ;;  %v11004_v9 = vunpack.c.h.s8.bf16 %v10808_v37 }
 0x79b   : > { %11478 = vmatprep.subr.bf16.mxu1 %v10952_v1  ;;  %v10800_v1 = vld [vmem:[%s17811_s22 + $0xa58] sm:$0xff] }
 0x79c   : > { %11214 = vmatpush1.bf16.msra.mxu0 %v10949_v43  ;;  %v10797_v43 = vld [vmem:[%s17811_s22 + $0xa40] sm:$0xff] }
 0x79d   : > { %11215 = vmatprep.subr.bf16.mxu0 %v10954_v60  ;;  %v10979_v60 = vunpack.c.h.s8.bf16 %v10795_v59  ;;  %v10985_v25 = vunpack.c.h.s8.bf16 %v10797_v43 }
 0x79e   : > { %11479 = vmatpush1.bf16.msra.mxu1 %v10951_v27  ;;  %v10984_v27 = vunpack.c.l.s8.bf16 %v10800_v1 }
 0x79f   : > { %11480 = vmatprep.subr.bf16.mxu1 %v10956_v51  ;;  %v10981_v51 = vunpack.c.l.s8.bf16 %v10797_v43  ;;  %v10816_v43 = vld [vmem:[%s17811_s22 + $0xad8] sm:$0xff] }
 0x7a0   : > { %11216 = vmatpush1.bf16.msra.mxu0 %v10953_v55 }
 0x7a1   : > { %11217 = vmatprep.subr.bf16.mxu0 %v10958_v31  ;;  %v10988_v31 = vunpack.c.h.s8.bf16 %v10800_v1 }
 0x7a2   : > { %11481 = vmatpush1.bf16.msra.mxu1 %v10955_v30  ;;  %v10990_v30 = vunpack.c.l.s8.bf16 %v10802_v16 }
 0x7a3   : > { %11482 = vmatprep.subr.bf16.mxu1 %v10960_v39  ;;  %v10801_v39 = vld [vmem:[%s17811_s22 + $0xa60] sm:$0xff] }
 0x7a4   : > { %11218 = vmatpush1.bf16.msra.mxu0 %v10957_v3 }
 0x7a5   : > { %11219 = vmatprep.subr.bf16.mxu0 %v10962_v40  ;;  %v10803_v40 = vld [vmem:[%s17811_s22 + $0xa70] sm:$0xff] }
 0x7a6   : > { %11483 = vmatpush1.bf16.msra.mxu1 %v10959_v2  ;;  %v10989_v2 = vunpack.c.l.s8.bf16 %v10801_v39  ;;  %v10995_v44 = vunpack.c.h.s8.bf16 %v10803_v40 }
 0x7a7   : > { %11484 = vmatprep.subr.bf16.mxu1 %v10964_v50  ;;  %v10991_v50 = vunpack.c.l.s8.bf16 %v10803_v40 }
 0x7a8   : > { %11220 = vmatpush1.bf16.msra.mxu0 %v10961_v52  ;;  %v10806_v52 = vld [vmem:[%s17811_s22 + $0xa88] sm:$0xff] }
 0x7a9   : > { %11242 = vmatprep.subr.bf16.mxu0 %v10966_v15  ;;  %v10993_v15 = vunpack.c.h.s8.bf16 %v10801_v39  ;;  %v11002_v45 = vunpack.c.h.s8.bf16 %v10806_v52  ;;  %v10820_v39 = vld [vmem:[%s17811_s22 + $0xaf8] sm:$0xff] }
 0x7aa   : > { %11485 = vmatpush1.bf16.msra.mxu1 %v10963_v8  ;;  %v10998_v8 = vunpack.c.l.s8.bf16 %v10806_v52 }
 0x7ab   : > { %11222 = vmatmul.mubr.bf16.vlgmr.msra.gmra.mrb[104].mxu0 %v17939_v38  ;;  %11507 = vmatprep.subr.bf16.mxu1 %v10968_v62  ;;  %v10805_v62 = vld [vmem:[%s17811_s22 + $0xa80] sm:$0xff] }
 0x7ac   : > { %11231 = vmatprep.mubr.bf16.mxu0 %v17955_v17  ;;  %11243 = vmatpush1.bf16.msra.mxu0 %v10965_v5  ;;  %v11000_v5 = vunpack.c.l.s8.bf16 %v10808_v37  ;;  %v11028_v37 = vunpack.c.h.s8.bf16 %v10820_v39 }
 0x7ad   : > { %11487 = vmatmul.mubr.bf16.vlgmr.msra.gmra.mrb[104].mxu1 %v17939_v38  ;;  %11244 = vmatprep.subr.bf16.mxu0 %v10970_v13  ;;  %v10798_v38 = vld [vmem:[%s17811_s22 + $0xa48] sm:$0xff]  ;;  %v10807_v13 = vld [vmem:[%s17811_s22 + $0xa90] sm:$0xff] }
 0x7ae   : > { %11496 = vmatprep.mubr.bf16.mxu1 %v17955_v17  ;;  %11508 = vmatpush1.bf16.msra.mxu1 %v10967_v57  ;;  %v10977_v17 = vunpack.c.h.s8.bf16 %v10793_v56  ;;  %v10982_v20 = vunpack.c.l.s8.bf16 %v10798_v38  ;;  %v10986_v55 = vunpack.c.h.s8.bf16 %v10798_v38  ;;  %v10997_v57 = vunpack.c.l.s8.bf16 %v10805_v62  ;;  %v10812_v56 = vld [vmem:[%s17811_s22 + $0xab8] sm:$0xff] }
 0x7af   : > { %11509 = vmatprep.subr.bf16.mxu1 %v10972_v28  ;;  %v10999_v28 = vunpack.c.l.s8.bf16 %v10807_v13  ;;  %v11003_v59 = vunpack.c.h.s8.bf16 %v10807_v13  ;;  %v11012_v1 = vunpack.c.h.s8.bf16 %v10812_v56 }
 0x7b0   : > { %11245 = vmatpush1.bf16.msra.mxu0 %v10969_v47  ;;  %v10810_v47 = vld [vmem:[%s17811_s22 + $0xaa8] sm:$0xff] }
 0x7b1   : > { %11246 = vmatprep.subr.bf16.mxu0 %v10974_v48  ;;  %v11001_v48 = vunpack.c.h.s8.bf16 %v10805_v62  ;;  %v11010_v38 = vunpack.c.h.s8.bf16 %v10810_v47  ;;  %v10824_v62 = vld [vmem:[%s17811_s22 + $0xb18] sm:$0xff] }
 0x7b2   : > { %11510 = vmatpush1.bf16.msra.mxu1 %v10971_v26  ;;  %v11006_v26 = vunpack.c.l.s8.bf16 %v10810_v47 }
 0x7b3   : > { %11232 = vmatmul.mubr.bf16.gmra.mrb[108].mxu0 %v17951_v32  ;;  %11511 = vmatprep.subr.bf16.mxu1 %v10976_v36  ;;  %v10809_v36 = vld [vmem:[%s17811_s22 + $0xaa0] sm:$0xff] }
 0x7b4   : > { %11247 = vmatpush1.bf16.msra.mxu0 %v10973_v42  ;;  %11274 = vmatprep.mubr.bf16.mxu0 %v17969_v58  ;;  %v11008_v42 = vunpack.c.l.s8.bf16 %v10812_v56  ;;  %v11036_v56 = vunpack.c.h.s8.bf16 %v10824_v62 }
 0x7b5   : > { %11497 = vmatmul.mubr.bf16.gmra.mrb[108].mxu1 %v17951_v32  ;;  %11248 = vmatprep.subr.bf16.mxu0 %v10978_v7  ;;  %v10983_v32 = vunpack.c.l.s8.bf16 %v10799_v12  ;;  %v10811_v7 = vld [vmem:[%s17811_s22 + $0xab0] sm:$0xff] }
 0x7b6   : > { %11512 = vmatpush1.bf16.msra.mxu1 %v10975_v53  ;;  %11539 = vmatprep.mubr.bf16.mxu1 %v17969_v58  ;;  %v10804_v58 = vld [vmem:[%s17811_s22 + $0xa78] sm:$0xff]  ;;  %v11005_v53 = vunpack.c.l.s8.bf16 %v10809_v36  ;;  %v11011_v12 = vunpack.c.h.s8.bf16 %v10811_v7 }
 0x7b7   : > { %11513 = vmatprep.subr.bf16.mxu1 %v10980_v46  ;;  %v10992_v3 = vunpack.c.l.s8.bf16 %v10804_v58  ;;  %v10996_v11 = vunpack.c.h.s8.bf16 %v10804_v58  ;;  %v11007_v46 = vunpack.c.l.s8.bf16 %v10811_v7  ;;  %v11020_v58 = vunpack.c.h.s8.bf16 %v10816_v43 }
 0x7b8   : > { %11249 = vmatpush1.bf16.msra.mxu0 %v10977_v17  ;;  %v10814_v17 = vld [vmem:[%s17811_s22 + $0xac8] sm:$0xff] }
 0x7b9   : > { %11250 = vmatprep.subr.bf16.mxu0 %v10982_v20  ;;  %v11009_v20 = vunpack.c.h.s8.bf16 %v10809_v36  ;;  %v11018_v16 = vunpack.c.h.s8.bf16 %v10814_v17  ;;  %v10828_v36 = vld [vmem:[%s17811_s22 + $0xb38] sm:$0xff] }
 0x7ba   : > { %11514 = vmatpush1.bf16.msra.mxu1 %v10979_v60  ;;  %v11014_v60 = vunpack.c.l.s8.bf16 %v10814_v17 }
 0x7bb   : > { %11515 = vmatprep.subr.bf16.mxu1 %v10984_v27  ;;  %v10813_v27 = vld [vmem:[%s17811_s22 + $0xac0] sm:$0xff] }
 0x7bc   : > { %11251 = vmatpush1.bf16.msra.mxu0 %v10981_v51  ;;  %v11016_v51 = vunpack.c.l.s8.bf16 %v10816_v43  ;;  %v10832_v43 = vld [vmem:[%s17811_s22 + $0xb58] sm:$0xff] }
 0x7bd   : > { %11252 = vmatprep.subr.bf16.mxu0 %v10986_v55  ;;  %v10815_v55 = vld [vmem:[%s17811_s22 + $0xad0] sm:$0xff] }
 0x7be   : > { %11516 = vmatpush1.bf16.msra.mxu1 %v10983_v32  ;;  %v11013_v32 = vunpack.c.l.s8.bf16 %v10813_v27  ;;  %v11019_v40 = vunpack.c.h.s8.bf16 %v10815_v55 }
 0x7bf   : > { %11517 = vmatprep.subr.bf16.mxu1 %v10988_v31  ;;  %v11015_v31 = vunpack.c.l.s8.bf16 %v10815_v55  ;;  %v10831_v55 = vld [vmem:[%s17811_s22 + $0xb50] sm:$0xff] }
 0x7c0   : > { %11253 = vmatpush1.bf16.msra.mxu0 %v10985_v25  ;;  %v10818_v25 = vld [vmem:[%s17811_s22 + $0xae8] sm:$0xff] }
 0x7c1   : > { %11254 = vmatprep.subr.bf16.mxu0 %v10990_v30  ;;  %v11017_v30 = vunpack.c.h.s8.bf16 %v10813_v27  ;;  %v11026_v52 = vunpack.c.h.s8.bf16 %v10818_v25  ;;  %v10829_v27 = vld [vmem:[%s17811_s22 + $0xb40] sm:$0xff] }
 0x7c2   : > { %11518 = vmatpush1.bf16.msra.mxu1 %v10987_v14  ;;  %v11022_v14 = vunpack.c.l.s8.bf16 %v10818_v25  ;;  %v11052_v25 = vunpack.c.h.s8.bf16 %v10832_v43 }
 0x7c3   : > { %11519 = vmatprep.subr.bf16.mxu1 %v10992_v3  ;;  %v10817_v3 = vld [vmem:[%s17811_s22 + $0xae0] sm:$0xff] }
 0x7c4   : > { %11255 = vmatpush1.bf16.msra.mxu0 %v10989_v2  ;;  %v11024_v2 = vunpack.c.l.s8.bf16 %v10820_v39  ;;  %v10833_v39 = vld [vmem:[%s17811_s22 + $0xb60] sm:$0xff] }
 0x7c5   : > { %11256 = vmatprep.subr.bf16.mxu0 %v10994_v0  ;;  %v10819_v0 = vld [vmem:[%s17811_s22 + $0xaf0] sm:$0xff] }
 0x7c6   : > { %11520 = vmatpush1.bf16.msra.mxu1 %v10991_v50  ;;  %v11021_v50 = vunpack.c.l.s8.bf16 %v10817_v3  ;;  %v11027_v13 = vunpack.c.h.s8.bf16 %v10819_v0 }
 0x7c7   : > { %11521 = vmatprep.subr.bf16.mxu1 %v10996_v11  ;;  %v11023_v11 = vunpack.c.l.s8.bf16 %v10819_v0 }
 0x7c8   : > { %11257 = vmatpush1.bf16.msra.mxu0 %v10993_v15  ;;  %v10822_v15 = vld [vmem:[%s17811_s22 + $0xb08] sm:$0xff] }
 0x7c9   : > { %11258 = vmatprep.subr.bf16.mxu0 %v10998_v8  ;;  %v11025_v8 = vunpack.c.h.s8.bf16 %v10817_v3  ;;  %v11034_v47 = vunpack.c.h.s8.bf16 %v10822_v15 }
 0x7ca   : > { %11522 = vmatpush1.bf16.msra.mxu1 %v10995_v44  ;;  %v11030_v44 = vunpack.c.l.s8.bf16 %v10822_v15  ;;  %v11057_v15 = vunpack.c.h.s8.bf16 %v10833_v39 }
 0x7cb   : > { %11523 = vmatprep.subr.bf16.mxu1 %v11000_v5  ;;  %v10821_v5 = vld [vmem:[%s17811_s22 + $0xb00] sm:$0xff] }
 0x7cc   : > { %11259 = vmatpush1.bf16.msra.mxu0 %v10997_v57  ;;  %v11032_v57 = vunpack.c.l.s8.bf16 %v10824_v62  ;;  %v10837_v62 = vld [vmem:[%s17811_s22 + $0xb80] sm:$0xff] }
 0x7cd   : > { %11260 = vmatprep.subr.bf16.mxu0 %v11002_v45  ;;  %v10823_v45 = vld [vmem:[%s17811_s22 + $0xb10] sm:$0xff] }
 0x7ce   : > { %11524 = vmatpush1.bf16.msra.mxu1 %v10999_v28  ;;  %v11029_v28 = vunpack.c.l.s8.bf16 %v10821_v5  ;;  %v11035_v7 = vunpack.c.h.s8.bf16 %v10823_v45 }
 0x7cf   : > { %11525 = vmatprep.subr.bf16.mxu1 %v11004_v9  ;;  %v11031_v9 = vunpack.c.l.s8.bf16 %v10823_v45 }
 0x7d0   : > { %11261 = vmatpush1.bf16.msra.mxu0 %v11001_v48  ;;  %v10826_v48 = vld [vmem:[%s17811_s22 + $0xb28] sm:$0xff] }
 0x7d1   : > { %11262 = vmatprep.subr.bf16.mxu0 %v11006_v26  ;;  %v11033_v26 = vunpack.c.h.s8.bf16 %v10821_v5  ;;  %v11042_v17 = vunpack.c.h.s8.bf16 %v10826_v48 }
 0x7d2   : > { %11526 = vmatpush1.bf16.msra.mxu1 %v11003_v59  ;;  %v11038_v59 = vunpack.c.l.s8.bf16 %v10826_v48  ;;  %v11065_v48 = vunpack.c.h.s8.bf16 %v10837_v62 }
 0x7d3   : > { %11527 = vmatprep.subr.bf16.mxu1 %v11008_v42  ;;  %v10825_v42 = vld [vmem:[%s17811_s22 + $0xb20] sm:$0xff] }
 0x7d4   : > { %11263 = vmatpush1.bf16.msra.mxu0 %v11005_v53  ;;  %v11040_v53 = vunpack.c.l.s8.bf16 %v10828_v36 }
 0x7d5   : > { %11264 = vmatprep.subr.bf16.mxu0 %v11010_v38  ;;  %v10827_v38 = vld [vmem:[%s17811_s22 + $0xb30] sm:$0xff] }
 0x7d6   : > { %11528 = vmatpush1.bf16.msra.mxu1 %v11007_v46  ;;  %v11037_v46 = vunpack.c.l.s8.bf16 %v10825_v42 }
 0x7d7   : > { %11529 = vmatprep.subr.bf16.mxu1 %v11012_v1  ;;  %v11039_v1 = vunpack.c.l.s8.bf16 %v10827_v38 }
 0x7d8   : > { %11265 = vmatpush1.bf16.msra.mxu0 %v11009_v20  ;;  %v11044_v20 = vunpack.c.h.s8.bf16 %v10828_v36  ;;  %v10841_v36 = vld [vmem:[%s17811_s22 + $0xba0] sm:$0xff] }
 0x7d9   : > { %11266 = vmatprep.subr.bf16.mxu0 %v11014_v60 }
 0x7da   : > { %11530 = vmatpush1.bf16.msra.mxu1 %v11011_v12  ;;  %v11043_v12 = vunpack.c.h.s8.bf16 %v10827_v38 }
 0x7db   : > { %11531 = vmatprep.subr.bf16.mxu1 %v11016_v51  ;;  %v11048_v51 = vunpack.c.l.s8.bf16 %v10832_v43  ;;  %v10845_v43 = vld [vmem:[%s17811_s22 + $0xbc0] sm:$0xff] }
 0x7dc   : > { %11267 = vmatpush1.bf16.msra.mxu0 %v11013_v32  ;;  %v11045_v32 = vunpack.c.l.s8.bf16 %v10829_v27 }
 0x7dd   : > { %11268 = vmatprep.subr.bf16.mxu0 %v11018_v16 }
 0x7de   : > { %11532 = vmatpush1.bf16.msra.mxu1 %v11015_v31  ;;  %v10834_v31 = vld [vmem:[%s17811_s22 + $0xb68] sm:$0xff] }
 0x7df   : > { %11533 = vmatprep.subr.bf16.mxu1 %v11020_v58  ;;  %v11049_v58 = vunpack.c.h.s8.bf16 %v10829_v27  ;;  %v11058_v0 = vunpack.c.h.s8.bf16 %v10834_v31 }
 0x7e0   : > { %11269 = vmatpush1.bf16.msra.mxu0 %v11017_v30  ;;  %v11054_v30 = vunpack.c.l.s8.bf16 %v10834_v31  ;;  %v11081_v31 = vunpack.c.h.s8.bf16 %v10845_v43 }
 0x7e1   : > { %11270 = vmatprep.subr.bf16.mxu0 %v11022_v14  ;;  %v11051_v14 = vunpack.c.h.s8.bf16 %v10831_v55 }
 0x7e2   : > { %11534 = vmatpush1.bf16.msra.mxu1 %v11019_v40  ;;  %v10835_v40 = vld [vmem:[%s17811_s22 + $0xb70] sm:$0xff] }
 0x7e3   : > { %11535 = vmatprep.subr.bf16.mxu1 %v11024_v2  ;;  %v11053_v2 = vunpack.c.l.s8.bf16 %v10833_v39 }
 0x7e4   : > { %11271 = vmatpush1.bf16.msra.mxu0 %v11021_v50  ;;  %v11055_v50 = vunpack.c.l.s8.bf16 %v10835_v40 }
 0x7e5   : > { %11272 = vmatprep.subr.bf16.mxu0 %v11026_v52  ;;  %v10838_v52 = vld [vmem:[%s17811_s22 + $0xb88] sm:$0xff] }
 0x7e6   : > { %11536 = vmatpush1.bf16.msra.mxu1 %v11023_v11  ;;  %v11066_v45 = vunpack.c.h.s8.bf16 %v10838_v52 }
 0x7e7   : > { %11537 = vmatprep.subr.bf16.mxu1 %v11028_v37  ;;  %v10840_v37 = vld [vmem:[%s17811_s22 + $0xb98] sm:$0xff] }
 0x7e8   : > { %11273 = vmatpush1.bf16.msra.mxu0 %v11025_v8  ;;  %v11062_v8 = vunpack.c.l.s8.bf16 %v10838_v52  ;;  %v11064_v5 = vunpack.c.l.s8.bf16 %v10840_v37 }
 0x7e9   : > { %11295 = vmatprep.subr.bf16.mxu0 %v11030_v44  ;;  %v11059_v44 = vunpack.c.h.s8.bf16 %v10835_v40 }
 0x7ea   : > { %11538 = vmatpush1.bf16.msra.mxu1 %v11027_v13  ;;  %v10839_v13 = vld [vmem:[%s17811_s22 + $0xb90] sm:$0xff] }
 0x7eb   : > { %11275 = vmatmul.mubr.bf16.vlgmr.msra.gmra.mrb[104].mxu0 %v17966_v54  ;;  %11560 = vmatprep.subr.bf16.mxu1 %v11032_v57  ;;  %v11061_v57 = vunpack.c.l.s8.bf16 %v10837_v62 }
 0x7ec   : > { %11284 = vmatprep.mubr.bf16.mxu0 %v17980_v19  ;;  %11296 = vmatpush1.bf16.msra.mxu0 %v11029_v28  ;;  %v11063_v28 = vunpack.c.l.s8.bf16 %v10839_v13 }
 0x7ed   : > { %11540 = vmatmul.mubr.bf16.vlgmr.msra.gmra.mrb[104].mxu1 %v17966_v54  ;;  %11297 = vmatprep.subr.bf16.mxu0 %v11034_v47  ;;  %v10830_v54 = vld [vmem:[%s17811_s22 + $0xb48] sm:$0xff] }
 0x7ee   : > { %11549 = vmatprep.mubr.bf16.mxu1 %v17980_v19  ;;  %11561 = vmatpush1.bf16.msra.mxu1 %v11031_v9  ;;  %v11041_v19 = vunpack.c.h.s8.bf16 %v10825_v42  ;;  %v11046_v60 = vunpack.c.l.s8.bf16 %v10830_v54  ;;  %v11050_v16 = vunpack.c.h.s8.bf16 %v10830_v54  ;;  %v10842_v47 = vld [vmem:[%s17811_s22 + $0xba8] sm:$0xff]  ;;  %v11068_v9 = vunpack.c.h.s8.bf16 %v10840_v37  ;;  %v10853_v37 = vld [vmem:[%s17811_s22 + $0xc00] sm:$0xff] }
 0x7ef   : > { %11562 = vmatprep.subr.bf16.mxu1 %v11036_v56  ;;  %v10844_v56 = vld [vmem:[%s17811_s22 + $0xbb8] sm:$0xff]  ;;  %v11074_v38 = vunpack.c.h.s8.bf16 %v10842_v47  ;;  %v11073_v54 = vunpack.c.h.s8.bf16 %v10841_v36 }
 0x7f0   : > { %11298 = vmatpush1.bf16.msra.mxu0 %v11033_v26  ;;  %v11070_v26 = vunpack.c.l.s8.bf16 %v10842_v47  ;;  %v11072_v42 = vunpack.c.l.s8.bf16 %v10844_v56  ;;  %v11097_v47 = vunpack.c.h.s8.bf16 %v10853_v37 }
 0x7f1   : > { %11299 = vmatprep.subr.bf16.mxu0 %v11038_v59  ;;  %v11067_v59 = vunpack.c.h.s8.bf16 %v10839_v13 }
 0x7f2   : > { %11563 = vmatpush1.bf16.msra.mxu1 %v11035_v7  ;;  %v10843_v7 = vld [vmem:[%s17811_s22 + $0xbb0] sm:$0xff] }
 0x7f3   : > { %11285 = vmatmul.mubr.bf16.gmra.mrb[108].mxu0 %v17978_v6  ;;  %11564 = vmatprep.subr.bf16.mxu1 %v11040_v53  ;;  %v11069_v53 = vunpack.c.l.s8.bf16 %v10841_v36 }
 0x7f4   : > { %11300 = vmatpush1.bf16.msra.mxu0 %v11037_v46  ;;  %11327 = vmatprep.mubr.bf16.mxu0 %v17974_v61  ;;  %v11071_v46 = vunpack.c.l.s8.bf16 %v10843_v7 }
 0x7f5   : > { %11550 = vmatmul.mubr.bf16.gmra.mrb[108].mxu1 %v17978_v6  ;;  %11301 = vmatprep.subr.bf16.mxu0 %v11042_v17  ;;  %v11047_v6 = vunpack.c.l.s8.bf16 %v10831_v55  ;;  %v10846_v17 = vld [vmem:[%s17811_s22 + $0xbc8] sm:$0xff] }
 0x7f6   : > { %11565 = vmatpush1.bf16.msra.mxu1 %v11039_v1  ;;  %11592 = vmatprep.mubr.bf16.mxu1 %v17974_v61  ;;  %v10836_v61 = vld [vmem:[%s17811_s22 + $0xb78] sm:$0xff]  ;;  %v11076_v1 = vunpack.c.h.s8.bf16 %v10844_v56  ;;  %v11082_v55 = vunpack.c.h.s8.bf16 %v10846_v17  ;;  %v10857_v56 = vld [vmem:[%s17811_s22 + $0xc20] sm:$0xff] }
 0x7f7   : > { %11566 = vmatprep.subr.bf16.mxu1 %v11044_v20  ;;  %v11056_v3 = vunpack.c.l.s8.bf16 %v10836_v61  ;;  %v11060_v11 = vunpack.c.h.s8.bf16 %v10836_v61  ;;  %v10848_v20 = vld [vmem:[%s17811_s22 + $0xbd8] sm:$0xff]  ;;  %v10849_v61 = vld [vmem:[%s17811_s22 + $0xbe0] sm:$0xff] }
 0x7f8   : > { %11302 = vmatpush1.bf16.msra.mxu0 %v11041_v19  ;;  %v11078_v19 = vunpack.c.l.s8.bf16 %v10846_v17  ;;  %v11080_v27 = vunpack.c.l.s8.bf16 %v10848_v20  ;;  %v11089_v52 = vunpack.c.h.s8.bf16 %v10849_v61 }
 0x7f9   : > { %11303 = vmatprep.subr.bf16.mxu0 %v11046_v60  ;;  %v11075_v60 = vunpack.c.h.s8.bf16 %v10843_v7 }
 0x7fa   : > { %11567 = vmatpush1.bf16.msra.mxu1 %v11043_v12  ;;  %v10847_v12 = vld [vmem:[%s17811_s22 + $0xbd0] sm:$0xff] }
 0x7fb   : > { %11568 = vmatprep.subr.bf16.mxu1 %v11048_v51  ;;  %v11077_v51 = vunpack.c.l.s8.bf16 %v10845_v43 }
 0x7fc   : > { %11304 = vmatpush1.bf16.msra.mxu0 %v11045_v32  ;;  %v11079_v32 = vunpack.c.l.s8.bf16 %v10847_v12 }
 0x7fd   : > { %11305 = vmatprep.subr.bf16.mxu0 %v11050_v16  ;;  %v10850_v16 = vld [vmem:[%s17811_s22 + $0xbe8] sm:$0xff] }
 0x7fe   : > { %11569 = vmatpush1.bf16.msra.mxu1 %v11047_v6  ;;  %v11084_v6 = vunpack.c.h.s8.bf16 %v10848_v20  ;;  %v11090_v40 = vunpack.c.h.s8.bf16 %v10850_v16 }
 0x7ff   : > { %11570 = vmatprep.subr.bf16.mxu1 %v11052_v25  ;;  %v10852_v25 = vld [vmem:[%s17811_s22 + $0xbf8] sm:$0xff] }
 0x800   : > { %11306 = vmatpush1.bf16.msra.mxu0 %v11049_v58  ;;  %v11086_v58 = vunpack.c.l.s8.bf16 %v10850_v16  ;;  %v11088_v39 = vunpack.c.l.s8.bf16 %v10852_v25 }
 0x801   : > { %11307 = vmatprep.subr.bf16.mxu0 %v11054_v30  ;;  %v11083_v30 = vunpack.c.h.s8.bf16 %v10847_v12 }
 0x802   : > { %11571 = vmatpush1.bf16.msra.mxu1 %v11051_v14  ;;  %v10851_v14 = vld [vmem:[%s17811_s22 + $0xbf0] sm:$0xff] }
 0x803   : > { %11572 = vmatprep.subr.bf16.mxu1 %v11056_v3  ;;  %v11085_v3 = vunpack.c.l.s8.bf16 %v10849_v61 }
 0x804   : > { %11308 = vmatpush1.bf16.msra.mxu0 %v11053_v2  ;;  %v11087_v2 = vunpack.c.l.s8.bf16 %v10851_v14 }
 0x805   : > { %11309 = vmatprep.subr.bf16.mxu0 %v11058_v0  ;;  %v10854_v0 = vld [vmem:[%s17811_s22 + $0xc08] sm:$0xff] }
 0x806   : > { %11573 = vmatpush1.bf16.msra.mxu1 %v11055_v50  ;;  %v11092_v50 = vunpack.c.h.s8.bf16 %v10852_v25  ;;  %v11098_v13 = vunpack.c.h.s8.bf16 %v10854_v0 }
 0x807   : > { %11574 = vmatprep.subr.bf16.mxu1 %v11060_v11  ;;  %v10856_v11 = vld [vmem:[%s17811_s22 + $0xc18] sm:$0xff] }
 0x808   : > { %11310 = vmatpush1.bf16.msra.mxu0 %v11057_v15  ;;  %v11094_v15 = vunpack.c.l.s8.bf16 %v10854_v0  ;;  %v11096_v62 = vunpack.c.l.s8.bf16 %v10856_v11 }
 0x809   : > { %11311 = vmatprep.subr.bf16.mxu0 %v11062_v8  ;;  %v11091_v8 = vunpack.c.h.s8.bf16 %v10851_v14 }
 0x80a   : > { %11575 = vmatpush1.bf16.msra.mxu1 %v11059_v44  ;;  %v10855_v44 = vld [vmem:[%s17811_s22 + $0xc10] sm:$0xff] }
 0x80b   : > { %11576 = vmatprep.subr.bf16.mxu1 %v11064_v5  ;;  %v11093_v5 = vunpack.c.l.s8.bf16 %v10853_v37 }
 0x80c   : > { %11312 = vmatpush1.bf16.msra.mxu0 %v11061_v57  ;;  %v11095_v57 = vunpack.c.l.s8.bf16 %v10855_v44 }
 0x80d   : > { %11313 = vmatprep.subr.bf16.mxu0 %v11066_v45  ;;  %v10858_v45 = vld [vmem:[%s17811_s22 + $0xc28] sm:$0xff] }
 0x80e   : > { %11577 = vmatpush1.bf16.msra.mxu1 %v11063_v28  ;;  %v11100_v28 = vunpack.c.h.s8.bf16 %v10856_v11  ;;  %v11106_v7 = vunpack.c.h.s8.bf16 %v10858_v45 }
 0x80f   : > { %11578 = vmatprep.subr.bf16.mxu1 %v11068_v9  ;;  %v10860_v9 = vld [vmem:[%s17811_s22 + $0xc38] sm:$0xff] }
 0x810   : > { %11314 = vmatpush1.bf16.msra.mxu0 %v11065_v48  ;;  %v11102_v48 = vunpack.c.l.s8.bf16 %v10858_v45  ;;  %v11104_v36 = vunpack.c.l.s8.bf16 %v10860_v9 }
 0x811   : > { %11315 = vmatprep.subr.bf16.mxu0 %v11070_v26  ;;  %v11099_v26 = vunpack.c.h.s8.bf16 %v10855_v44 }
 0x812   : > { %11579 = vmatpush1.bf16.msra.mxu1 %v11067_v59  ;;  %v10859_v59 = vld [vmem:[%s17811_s22 + $0xc30] sm:$0xff] }
 0x813   : > { %11580 = vmatprep.subr.bf16.mxu1 %v11072_v42  ;;  %v11101_v42 = vunpack.c.l.s8.bf16 %v10857_v56 }
 0x814   : > { %11316 = vmatpush1.bf16.msra.mxu0 %v11069_v53  ;;  %v11103_v53 = vunpack.c.l.s8.bf16 %v10859_v59 }
 0x815   : > { %11317 = vmatprep.subr.bf16.mxu0 %v11074_v38  ;;  %v11108_v38 = vunpack.c.h.s8.bf16 %v10860_v9 }
 0x816   : > { %11581 = vmatpush1.bf16.msra.mxu1 %v11071_v46  ;;  %v10864_v46 = vld [vmem:[%s17811_s22 + $0xc58] sm:$0xff] }
 0x817   : > { %11582 = vmatprep.subr.bf16.mxu1 %v11076_v1  ;;  %v10861_v1 = vld [vmem:[%s17811_s22 + $0xc40] sm:$0xff]  ;;  %v11112_v20 = vunpack.c.l.s8.bf16 %v10864_v46  ;;  %v11116_v12 = vunpack.c.h.s8.bf16 %v10864_v46 }
 0x818   : > { %11318 = vmatpush1.bf16.msra.mxu0 %v11073_v54  ;;  %v11107_v54 = vunpack.c.h.s8.bf16 %v10859_v59  ;;  %v11109_v43 = vunpack.c.l.s8.bf16 %v10861_v1 }
 0x819   : > { %11319 = vmatprep.subr.bf16.mxu0 %v11078_v19  ;;  %v10863_v19 = vld [vmem:[%s17811_s22 + $0xc50] sm:$0xff] }
 0x81a   : > { %11583 = vmatpush1.bf16.msra.mxu1 %v11075_v60  ;;  %v11115_v16 = vunpack.c.h.s8.bf16 %v10863_v19 }
 0x81b   : > { %11584 = vmatprep.subr.bf16.mxu1 %v11080_v27  ;;  %v10866_v27 = vld [vmem:[%s17811_s22 + $0xc68] sm:$0xff] }
 0x81c   : > { %11320 = vmatpush1.bf16.msra.mxu0 %v11077_v51  ;;  %v11113_v51 = vunpack.c.h.s8.bf16 %v10861_v1 }
 0x81d   : > { %11321 = vmatprep.subr.bf16.mxu0 %v11082_v55  ;;  %v11118_v55 = vunpack.c.l.s8.bf16 %v10866_v27 }
 0x81e   : > { %11585 = vmatpush1.bf16.msra.mxu1 %v11079_v32  ;;  %v10865_v32 = vld [vmem:[%s17811_s22 + $0xc60] sm:$0xff] }
 0x81f   : > { %11586 = vmatprep.subr.bf16.mxu1 %v11084_v6  ;;  %v11117_v25 = vunpack.c.l.s8.bf16 %v10865_v32  ;;  %v11121_v14 = vunpack.c.h.s8.bf16 %v10865_v32 }
 0x820   : > { %11322 = vmatpush1.bf16.msra.mxu0 %v11081_v31  ;;  %v10867_v31 = vld [vmem:[%s17811_s22 + $0xc70] sm:$0xff] }
 0x821   : > { %11323 = vmatprep.subr.bf16.mxu0 %v11086_v58  ;;  %v11122_v58 = vunpack.c.h.s8.bf16 %v10866_v27  ;;  %v11119_v61 = vunpack.c.l.s8.bf16 %v10867_v31  ;;  %v11123_v0 = vunpack.c.h.s8.bf16 %v10867_v31 }
 0x822   : > { %11587 = vmatpush1.bf16.msra.mxu1 %v11083_v30  ;;  %v10870_v30 = vld [vmem:[%s17811_s22 + $0xc88] sm:$0xff] }
 0x823   : > { %11588 = vmatprep.subr.bf16.mxu1 %v11088_v39 }
 0x824   : > { %11324 = vmatpush1.bf16.msra.mxu0 %v11085_v3  ;;  %v10872_v3 = vld [vmem:[%s17811_s22 + $0xc98] sm:$0xff] }
 0x825   : > { %11325 = vmatprep.subr.bf16.mxu0 %v11090_v40  ;;  %v11126_v40 = vunpack.c.l.s8.bf16 %v10870_v30 }
 0x826   : > { %11589 = vmatpush1.bf16.msra.mxu1 %v11087_v2  ;;  %v10869_v2 = vld [vmem:[%s17811_s22 + $0xc80] sm:$0xff] }
 0x827   : > { %11590 = vmatprep.subr.bf16.mxu1 %v11092_v50  ;;  %v11128_v50 = vunpack.c.l.s8.bf16 %v10872_v3  ;;  %v11125_v11 = vunpack.c.l.s8.bf16 %v10869_v2  ;;  %v11129_v44 = vunpack.c.h.s8.bf16 %v10869_v2 }
 0x828   : > { %11326 = vmatpush1.bf16.msra.mxu0 %v11089_v52  ;;  %v10871_v52 = vld [vmem:[%s17811_s22 + $0xc90] sm:$0xff] }
 0x829   : > { %11348 = vmatprep.subr.bf16.mxu0 %v11094_v15  ;;  %v11130_v15 = vunpack.c.h.s8.bf16 %v10870_v30  ;;  %v11127_v37 = vunpack.c.l.s8.bf16 %v10871_v52  ;;  %v11131_v45 = vunpack.c.h.s8.bf16 %v10871_v52  ;;  %v19204_v52 = vld [vmem:[#allocation47_spill] sm:$0xff] }
 0x82a   : > { %11591 = vmatpush1.bf16.msra.mxu1 %v11091_v8  ;;  %v10874_v8 = vld [vmem:[%s17811_s22 + $0xca8] sm:$0xff] }
 0x82b   : > { %11328 = vmatmul.mubr.bf16.vlgmr.msra.gmra.mrb[104].mxu0 %v17971_v35  ;;  %11613 = vmatprep.subr.bf16.mxu1 %v11096_v62  ;;  %v11132_v62 = vunpack.c.h.s8.bf16 %v10872_v3 }
 0x82c   : > { %11337 = vmatprep.mubr.bf16.mxu0 %v17988_v49  ;;  %11349 = vmatpush1.bf16.msra.mxu0 %v11093_v5  ;;  %v10876_v5 = vld [vmem:[%s17811_s22 + $0xcb8] sm:$0xff] }
 0x82d   : > { %11593 = vmatmul.mubr.bf16.vlgmr.msra.gmra.mrb[104].mxu1 %v17971_v35  ;;  %11350 = vmatprep.subr.bf16.mxu0 %v11098_v13  ;;  %v10862_v35 = vld [vmem:[%s17811_s22 + $0xc48] sm:$0xff]  ;;  %v11134_v13 = vunpack.c.l.s8.bf16 %v10874_v8 }
 0x82e   : > { %11602 = vmatprep.mubr.bf16.mxu1 %v17988_v49  ;;  %11614 = vmatpush1.bf16.msra.mxu1 %v11095_v57  ;;  %v11105_v49 = vunpack.c.h.s8.bf16 %v10857_v56  ;;  %v11110_v17 = vunpack.c.l.s8.bf16 %v10862_v35  ;;  %v11114_v60 = vunpack.c.h.s8.bf16 %v10862_v35  ;;  %v10873_v57 = vld [vmem:[%s17811_s22 + $0xca0] sm:$0xff] }
 0x82f   : > { %11615 = vmatprep.subr.bf16.mxu1 %v11100_v28  ;;  %v11136_v28 = vunpack.c.l.s8.bf16 %v10876_v5  ;;  %v11133_v9 = vunpack.c.l.s8.bf16 %v10873_v57  ;;  %v11137_v59 = vunpack.c.h.s8.bf16 %v10873_v57 }
 0x830   : > { %11351 = vmatpush1.bf16.msra.mxu0 %v11097_v47  ;;  %v10875_v47 = vld [vmem:[%s17811_s22 + $0xcb0] sm:$0xff] }
 0x831   : > { %11352 = vmatprep.subr.bf16.mxu0 %v11102_v48  ;;  %v11138_v48 = vunpack.c.h.s8.bf16 %v10874_v8  ;;  %v11135_v56 = vunpack.c.l.s8.bf16 %v10875_v47  ;;  %v11139_v35 = vunpack.c.h.s8.bf16 %v10875_v47  ;;  %v10889_v8 = vld [vmem:[%s17811_s22 + $0xd20] sm:$0xff] }
 0x832   : > { %11616 = vmatpush1.bf16.msra.mxu1 %v11099_v26  ;;  %v10878_v26 = vld [vmem:[%s17811_s22 + $0xcc8] sm:$0xff] }
 0x833   : > { %11338 = vmatmul.mubr.bf16.gmra.mrb[108].mxu0 %v17985_v63  ;;  %11617 = vmatprep.subr.bf16.mxu1 %v11104_v36  ;;  %v11140_v36 = vunpack.c.h.s8.bf16 %v10876_v5  ;;  %v10891_v5 = vld [vmem:[%s17811_s22 + $0xd30] sm:$0xff] }
 0x834   : > { %11353 = vmatpush1.bf16.msra.mxu0 %v11101_v42  ;;  %11380 = vmatprep.mubr.bf16.mxu0 %v18008_v24  ;;  %v10880_v42 = vld [vmem:[%s17811_s22 + $0xcd8] sm:$0xff] }
 0x835   : > { %11603 = vmatmul.mubr.bf16.gmra.mrb[108].mxu1 %v17985_v63  ;;  %11354 = vmatprep.subr.bf16.mxu0 %v11106_v7  ;;  %v11111_v63 = vunpack.c.l.s8.bf16 %v10863_v19  ;;  %v11142_v7 = vunpack.c.l.s8.bf16 %v10878_v26 }
 0x836   : > { %11618 = vmatpush1.bf16.msra.mxu1 %v11103_v53  ;;  %11645 = vmatprep.mubr.bf16.mxu1 %v18008_v24  ;;  %v10868_v24 = vld [vmem:[%s17811_s22 + $0xc78] sm:$0xff]  ;;  %v10877_v53 = vld [vmem:[%s17811_s22 + $0xcc0] sm:$0xff] }
 0x837   : > { %11619 = vmatprep.subr.bf16.mxu1 %v11108_v38  ;;  %v11120_v6 = vunpack.c.l.s8.bf16 %v10868_v24  ;;  %v11124_v39 = vunpack.c.h.s8.bf16 %v10868_v24  ;;  %v11144_v38 = vunpack.c.l.s8.bf16 %v10880_v42  ;;  %v11141_v46 = vunpack.c.l.s8.bf16 %v10877_v53 }
 0x838   : > { %11355 = vmatpush1.bf16.msra.mxu0 %v11105_v49  ;;  %v10879_v49 = vld [vmem:[%s17811_s22 + $0xcd0] sm:$0xff]  ;;  %v11145_v19 = vunpack.c.h.s8.bf16 %v10877_v53 }
 0x839   : > { %11356 = vmatprep.subr.bf16.mxu0 %v11110_v17  ;;  %v11146_v17 = vunpack.c.h.s8.bf16 %v10878_v26  ;;  %v11143_v1 = vunpack.c.l.s8.bf16 %v10879_v49  ;;  %v11147_v27 = vunpack.c.h.s8.bf16 %v10879_v49  ;;  %v10893_v26 = vld [vmem:[%s17811_s22 + $0xd40] sm:$0xff] }
 0x83a   : > { %11620 = vmatpush1.bf16.msra.mxu1 %v11107_v54  ;;  %v10882_v54 = vld [vmem:[%s17811_s22 + $0xce8] sm:$0xff] }
 0x83b   : > { %11621 = vmatprep.subr.bf16.mxu1 %v11112_v20  ;;  %v11148_v20 = vunpack.c.h.s8.bf16 %v10880_v42  ;;  %v10895_v42 = vld [vmem:[%s17811_s22 + $0xd50] sm:$0xff] }
 0x83c   : > { %11357 = vmatpush1.bf16.msra.mxu0 %v11109_v43  ;;  %v10884_v43 = vld [vmem:[%s17811_s22 + $0xcf8] sm:$0xff] }
 0x83d   : > { %11358 = vmatprep.subr.bf16.mxu0 %v11114_v60  ;;  %v11150_v60 = vunpack.c.l.s8.bf16 %v10882_v54 }
 0x83e   : > { %11622 = vmatpush1.bf16.msra.mxu1 %v11111_v63  ;;  %v10881_v63 = vld [vmem:[%s17811_s22 + $0xce0] sm:$0xff] }
 0x83f   : > { %11623 = vmatprep.subr.bf16.mxu1 %v11116_v12  ;;  %v11152_v12 = vunpack.c.l.s8.bf16 %v10884_v43  ;;  %v11149_v24 = vunpack.c.l.s8.bf16 %v10881_v63  ;;  %v11153_v31 = vunpack.c.h.s8.bf16 %v10881_v63 }
 0x840   : > { %11359 = vmatpush1.bf16.msra.mxu0 %v11113_v51  ;;  %v10883_v51 = vld [vmem:[%s17811_s22 + $0xcf0] sm:$0xff] }
 0x841   : > { %11360 = vmatprep.subr.bf16.mxu0 %v11118_v55  ;;  %v11154_v55 = vunpack.c.h.s8.bf16 %v10882_v54  ;;  %v11151_v32 = vunpack.c.l.s8.bf16 %v10883_v51  ;;  %v11155_v30 = vunpack.c.h.s8.bf16 %v10883_v51  ;;  %v10897_v54 = vld [vmem:[%s17811_s22 + $0xd60] sm:$0xff] }
 0x842   : > { %11624 = vmatpush1.bf16.msra.mxu1 %v11115_v16  ;;  %v10886_v16 = vld [vmem:[%s17811_s22 + $0xd08] sm:$0xff] }
 0x843   : > { %11625 = vmatprep.subr.bf16.mxu1 %v11120_v6  ;;  %v11156_v6 = vunpack.c.h.s8.bf16 %v10884_v43  ;;  %v10899_v43 = vld [vmem:[%s17811_s22 + $0xd70] sm:$0xff] }
 0x844   : > { %11361 = vmatpush1.bf16.msra.mxu0 %v11117_v25  ;;  %v10888_v25 = vld [vmem:[%s17811_s22 + $0xd18] sm:$0xff] }
 0x845   : > { %11362 = vmatprep.subr.bf16.mxu0 %v11122_v58  ;;  %v11158_v58 = vunpack.c.l.s8.bf16 %v10886_v16 }
 0x846   : > { %11626 = vmatpush1.bf16.msra.mxu1 %v11119_v61  ;;  %v10885_v61 = vld [vmem:[%s17811_s22 + $0xd00] sm:$0xff] }
 0x847   : > { %11627 = vmatprep.subr.bf16.mxu1 %v11124_v39  ;;  %v11160_v39 = vunpack.c.l.s8.bf16 %v10888_v25  ;;  %v11157_v3 = vunpack.c.l.s8.bf16 %v10885_v61 }
 0x848   : > { %11363 = vmatpush1.bf16.msra.mxu0 %v11121_v14  ;;  %v10887_v14 = vld [vmem:[%s17811_s22 + $0xd10] sm:$0xff] }
 0x849   : > { %11364 = vmatprep.subr.bf16.mxu0 %v11126_v40  ;;  %v11162_v40 = vunpack.c.h.s8.bf16 %v10886_v16  ;;  %v11159_v2 = vunpack.c.l.s8.bf16 %v10887_v14  ;;  %v11753_v16 = vld [vmem:[%s17811_s22 + $0xd80] sm:$0xff] }
 0x84a   : > { %11628 = vmatpush1.bf16.msra.mxu1 %v11123_v0  ;;  %v10890_v0 = vld [vmem:[%s17811_s22 + $0xd28] sm:$0xff] }
 0x84b   : > { %11629 = vmatprep.subr.bf16.mxu1 %v11128_v50  ;;  %v11164_v50 = vunpack.c.h.s8.bf16 %v10888_v25  ;;  %v11170_v57 = vunpack.c.h.s8.bf16 %v10890_v0  ;;  %v11755_v25 = vld [vmem:[%s17811_s22 + $0xd90] sm:$0xff] }
 0x84c   : > { %11365 = vmatpush1.bf16.msra.mxu0 %v11125_v11  ;;  %v11161_v11 = vunpack.c.h.s8.bf16 %v10885_v61 }
 0x84d   : > { %11366 = vmatprep.subr.bf16.mxu0 %v11130_v15  ;;  %v10892_v15 = vld [vmem:[%s17811_s22 + $0xd38] sm:$0xff] }
 0x84e   : > { %11630 = vmatpush1.bf16.msra.mxu1 %v11127_v37  ;;  %v11166_v37 = vunpack.c.l.s8.bf16 %v10890_v0  ;;  %v11172_v47 = vunpack.c.h.s8.bf16 %v10892_v15 }
 0x84f   : > { %11631 = vmatprep.subr.bf16.mxu1 %v11132_v62  ;;  %v11163_v62 = vunpack.c.h.s8.bf16 %v10887_v14  ;;  %v19206_v14 = vld [vmem:[#allocation44_spill] sm:$0xff] }
 0x850   : > { %11367 = vmatpush1.bf16.msra.mxu0 %v11129_v44  ;;  %v11168_v44 = vunpack.c.l.s8.bf16 %v10892_v15  ;;  %v11759_v15 = vld [vmem:[%s17811_s22 + $0xdb0] sm:$0xff] }
 0x851   : > { %11368 = vmatprep.subr.bf16.mxu0 %v11134_v13  ;;  %v11165_v13 = vunpack.c.l.s8.bf16 %v10889_v8 }
 0x852   : > { %11632 = vmatpush1.bf16.msra.mxu1 %v11131_v45  ;;  %v11167_v45 = vunpack.c.l.s8.bf16 %v10891_v5 }
 0x853   : > { %11633 = vmatprep.subr.bf16.mxu1 %v11136_v28  ;;  %v19205_v28 = vld [vmem:[#allocation46_spill] sm:$0xff] }
 0x854   : > { %11369 = vmatpush1.bf16.msra.mxu0 %v11133_v9  ;;  %v11169_v9 = vunpack.c.h.s8.bf16 %v10889_v8 }
 0x855   : > { %11370 = vmatprep.subr.bf16.mxu0 %v11138_v48  ;;  %v10896_v48 = vld [vmem:[%s17811_s22 + $0xd58] sm:$0xff] }
 0x856   : > { %11634 = vmatpush1.bf16.msra.mxu1 %v11135_v56  ;;  %v11180_v49 = vunpack.c.h.s8.bf16 %v10896_v48 }
 0x857   : > { %11635 = vmatprep.subr.bf16.mxu1 %v11140_v36  ;;  %v11171_v36 = vunpack.c.h.s8.bf16 %v10891_v5  ;;  %v19207_v5 = vld [vmem:[#allocation48_spill] sm:$0xff] }
 0x858   : > { %11371 = vmatpush1.bf16.msra.mxu0 %v11137_v59  ;;  %v11176_v59 = vunpack.c.l.s8.bf16 %v10896_v48 }
 0x859   : > { %11372 = vmatprep.subr.bf16.mxu0 %v11142_v7  ;;  %v11173_v7 = vunpack.c.l.s8.bf16 %v10893_v26 }
 0x85a   : > { %11636 = vmatpush1.bf16.msra.mxu1 %v11139_v35  ;;  %v11175_v35 = vunpack.c.l.s8.bf16 %v10895_v42 }
 0x85b   : > { %11637 = vmatprep.subr.bf16.mxu1 %v11144_v38  ;;  %v10898_v38 = vld [vmem:[%s17811_s22 + $0xd68] sm:$0xff] }
 0x85c   : > { %11373 = vmatpush1.bf16.msra.mxu0 %v11141_v46  ;;  %v11177_v46 = vunpack.c.h.s8.bf16 %v10893_v26  ;;  %v11186_v63 = vunpack.c.h.s8.bf16 %v10898_v38 }
 0x85d   : > { %11374 = vmatprep.subr.bf16.mxu0 %v11146_v17  ;;  %v10900_v17 = vld [vmem:[%s17811_s22 + $0xd78] sm:$0xff] }
 0x85e   : > { %11638 = vmatpush1.bf16.msra.mxu1 %v11143_v1  ;;  %v11182_v1 = vunpack.c.l.s8.bf16 %v10898_v38  ;;  %v11188_v51 = vunpack.c.h.s8.bf16 %v10900_v17 }
 0x85f   : > { %11639 = vmatprep.subr.bf16.mxu1 %v11148_v20  ;;  %v11179_v20 = vunpack.c.h.s8.bf16 %v10895_v42  ;;  %v11766_v42 = vld [vmem:[%s17811_s22 + $0xde8] sm:$0xff] }
 0x860   : > { %11375 = vmatpush1.bf16.msra.mxu0 %v11145_v19  ;;  %v11184_v19 = vunpack.c.l.s8.bf16 %v10900_v17  ;;  %v11922_v38 = vunpack.c.l.s8.bf16 %v11766_v42 }
 0x861   : > { %11376 = vmatprep.subr.bf16.mxu0 %v11150_v60  ;;  %v11181_v60 = vunpack.c.l.s8.bf16 %v10897_v54 }
 0x862   : > { %11640 = vmatpush1.bf16.msra.mxu1 %v11147_v27  ;;  %v11183_v27 = vunpack.c.l.s8.bf16 %v10899_v43 }
 0x863   : > { %11641 = vmatprep.subr.bf16.mxu1 %v11152_v12  ;;  %v11754_v12 = vld [vmem:[%s17811_s22 + $0xd88] sm:$0xff] }
 0x864   : > { %11377 = vmatpush1.bf16.msra.mxu0 %v11149_v24  ;;  %v11185_v24 = vunpack.c.h.s8.bf16 %v10897_v54  ;;  %v11902_v61 = vunpack.c.h.s8.bf16 %v11754_v12 }
 0x865   : > { %11378 = vmatprep.subr.bf16.mxu0 %v11154_v55  ;;  %v11756_v55 = vld [vmem:[%s17811_s22 + $0xd98] sm:$0xff] }
 0x866   : > { %11642 = vmatpush1.bf16.msra.mxu1 %v11151_v32  ;;  %v11898_v32 = vunpack.c.l.s8.bf16 %v11754_v12 }
 0x867   : > { %11643 = vmatprep.subr.bf16.mxu1 %v11156_v6  ;;  %v11187_v6 = vunpack.c.h.s8.bf16 %v10899_v43  ;;  %v11770_v43 = vld [vmem:[%s17811_s22 + $0xe08] sm:$0xff] }
 0x868   : > { %11379 = vmatpush1.bf16.msra.mxu0 %v11153_v31  ;;  %v11900_v31 = vunpack.c.l.s8.bf16 %v11756_v55  ;;  %v11930_v12 = vunpack.c.l.s8.bf16 %v11770_v43 }
 0x869   : > { %11401 = vmatprep.subr.bf16.mxu0 %v11158_v58  ;;  %v11897_v58 = vunpack.c.l.s8.bf16 %v11753_v16 }
 0x86a   : > { %11644 = vmatpush1.bf16.msra.mxu1 %v11155_v30  ;;  %v11899_v30 = vunpack.c.l.s8.bf16 %v11755_v25 }
 0x86b   : > { %11381 = vmatmul.mubr.bf16.vlgmr.msra.gmra.mrb[104].mxu0 %v18006_v23  ;;  %11666 = vmatprep.subr.bf16.mxu1 %v11160_v39  ;;  %v11758_v39 = vld [vmem:[%s17811_s22 + $0xda8] sm:$0xff] }
 0x86c   : > { %11390 = vmatprep.mubr.bf16.mxu0 %v19204_v52  ;;  %11402 = vmatpush1.bf16.msra.mxu0 %v11157_v3  ;;  %v11904_v3 = vunpack.c.h.s8.bf16 %v11756_v55  ;;  %v11906_v0 = vunpack.c.l.s8.bf16 %v11758_v39  ;;  %v11910_v8 = vunpack.c.h.s8.bf16 %v11758_v39 }
 0x86d   : > { %11646 = vmatmul.mubr.bf16.vlgmr.msra.gmra.mrb[104].mxu1 %v18006_v23  ;;  %11403 = vmatprep.subr.bf16.mxu0 %v11162_v40  ;;  %v10894_v23 = vld [vmem:[%s17811_s22 + $0xd48] sm:$0xff]  ;;  %v11901_v40 = vunpack.c.h.s8.bf16 %v11753_v16 }
 0x86e   : > { %11655 = vmatprep.mubr.bf16.mxu1 %v19204_v52  ;;  %11667 = vmatpush1.bf16.msra.mxu1 %v11159_v2  ;;  %v11174_v56 = vunpack.c.l.s8.bf16 %v10894_v23  ;;  %v11178_v53 = vunpack.c.h.s8.bf16 %v10894_v23  ;;  %v11760_v2 = vld [vmem:[%s17811_s22 + $0xdb8] sm:$0xff]  ;;  %v11903_v52 = vunpack.c.h.s8.bf16 %v11755_v25  ;;  %v11774_v25 = vld [vmem:[%s17811_s22 + $0xe28] sm:$0xff] }
 0x86f   : > { %11668 = vmatprep.subr.bf16.mxu1 %v11164_v50  ;;  %v11757_v50 = vld [vmem:[%s17811_s22 + $0xda0] sm:$0xff]  ;;  %v11764_v23 = vld [vmem:[%s17811_s22 + $0xdd8] sm:$0xff]  ;;  %v11938_v39 = vunpack.c.l.s8.bf16 %v11774_v25 }
 0x870   : > { %11404 = vmatpush1.bf16.msra.mxu0 %v11161_v11  ;;  %v11908_v11 = vunpack.c.l.s8.bf16 %v11760_v2  ;;  %v11916_v48 = vunpack.c.l.s8.bf16 %v11764_v23 }
 0x871   : > { %11405 = vmatprep.subr.bf16.mxu0 %v11166_v37  ;;  %v11905_v37 = vunpack.c.l.s8.bf16 %v11757_v50 }
 0x872   : > { %11669 = vmatpush1.bf16.msra.mxu1 %v11163_v62  ;;  %v11907_v62 = vunpack.c.l.s8.bf16 %v11759_v15 }
 0x873   : > { %11391 = vmatmul.mubr.bf16.gmra.mrb[108].mxu0 %v19205_v28  ;;  %11670 = vmatprep.subr.bf16.mxu1 %v11168_v44  ;;  %v11762_v44 = vld [vmem:[%s17811_s22 + $0xdc8] sm:$0xff] }
 0x874   : > { %11406 = vmatpush1.bf16.msra.mxu0 %v11165_v13  ;;  %11433 = vmatprep.mubr.bf16.mxu0 %v19203_v33  ;;  %v11912_v13 = vunpack.c.h.s8.bf16 %v11760_v2  ;;  %v11775_v2 = vld [vmem:[%s17811_s22 + $0xe30] sm:$0xff] }
 0x875   : > { %11656 = vmatmul.mubr.bf16.gmra.mrb[108].mxu1 %v19205_v28  ;;  %11407 = vmatprep.subr.bf16.mxu0 %v11170_v57  ;;  %v19208_v57 = vld [vmem:[#allocation49_spill] sm:$0xff]  ;;  %v11914_v28 = vunpack.c.l.s8.bf16 %v11762_v44 }
 0x876   : > { %11671 = vmatpush1.bf16.msra.mxu1 %v11167_v45  ;;  %11698 = vmatprep.mubr.bf16.mxu1 %v19203_v33  ;;  %v11909_v45 = vunpack.c.h.s8.bf16 %v11757_v50  ;;  %v11942_v50 = vunpack.c.h.s8.bf16 %v11774_v25 }
 0x877   : > { %11672 = vmatprep.subr.bf16.mxu1 %v11172_v47  ;;  %v11761_v47 = vld [vmem:[%s17811_s22 + $0xdc0] sm:$0xff] }
 0x878   : > { %11408 = vmatpush1.bf16.msra.mxu0 %v11169_v9  ;;  %v11911_v9 = vunpack.c.h.s8.bf16 %v11759_v15  ;;  %v11913_v26 = vunpack.c.l.s8.bf16 %v11761_v47 }
 0x879   : > { %11409 = vmatprep.subr.bf16.mxu0 %v11174_v56  ;;  %v11763_v56 = vld [vmem:[%s17811_s22 + $0xdd0] sm:$0xff] }
 0x87a   : > { %11673 = vmatpush1.bf16.msra.mxu1 %v11171_v36  ;;  %v11918_v36 = vunpack.c.h.s8.bf16 %v11762_v44  ;;  %v11777_v44 = vld [vmem:[%s17811_s22 + $0xe40] sm:$0xff] }
 0x87b   : > { %11674 = vmatprep.subr.bf16.mxu1 %v11176_v59  ;;  %v11915_v59 = vunpack.c.l.s8.bf16 %v11763_v56 }
 0x87c   : > { %11410 = vmatpush1.bf16.msra.mxu0 %v11173_v7  ;;  %v11920_v7 = vunpack.c.h.s8.bf16 %v11764_v23 }
 0x87d   : > { %11411 = vmatprep.subr.bf16.mxu0 %v11178_v53  ;;  %v11917_v53 = vunpack.c.h.s8.bf16 %v11761_v47  ;;  %v11782_v47 = vld [vmem:[%s17811_s22 + $0xe68] sm:$0xff] }
 0x87e   : > { %11675 = vmatpush1.bf16.msra.mxu1 %v11175_v35  ;;  %v11768_v35 = vld [vmem:[%s17811_s22 + $0xdf8] sm:$0xff] }
 0x87f   : > { %11676 = vmatprep.subr.bf16.mxu1 %v11180_v49  ;;  %v11765_v49 = vld [vmem:[%s17811_s22 + $0xde0] sm:$0xff]  ;;  %v11924_v17 = vunpack.c.l.s8.bf16 %v11768_v35 }
 0x880   : > { %11412 = vmatpush1.bf16.msra.mxu0 %v11177_v46  ;;  %v11919_v46 = vunpack.c.h.s8.bf16 %v11763_v56  ;;  %v11921_v54 = vunpack.c.l.s8.bf16 %v11765_v49  ;;  %v11784_v56 = vld [vmem:[%s17811_s22 + $0xe78] sm:$0xff] }
 0x881   : > { %11413 = vmatprep.subr.bf16.mxu0 %v11182_v1  ;;  %v11767_v1 = vld [vmem:[%s17811_s22 + $0xdf0] sm:$0xff] }
 0x882   : > { %11677 = vmatpush1.bf16.msra.mxu1 %v11179_v20  ;;  %v11926_v20 = vunpack.c.h.s8.bf16 %v11766_v42  ;;  %v11956_v42 = vunpack.c.l.s8.bf16 %v11784_v56 }
 0x883   : > { %11678 = vmatprep.subr.bf16.mxu1 %v11184_v19  ;;  %v11923_v19 = vunpack.c.l.s8.bf16 %v11767_v1 }
 0x884   : > { %11414 = vmatpush1.bf16.msra.mxu0 %v11181_v60  ;;  %v11928_v60 = vunpack.c.h.s8.bf16 %v11768_v35  ;;  %v11958_v35 = vunpack.c.h.s8.bf16 %v11782_v47 }
 0x885   : > { %11415 = vmatprep.subr.bf16.mxu0 %v11186_v63  ;;  %v11925_v63 = vunpack.c.h.s8.bf16 %v11765_v49  ;;  %v11786_v49 = vld [vmem:[%s17811_s22 + $0xe88] sm:$0xff] }
 0x886   : > { %11679 = vmatpush1.bf16.msra.mxu1 %v11183_v27  ;;  %v11772_v27 = vld [vmem:[%s17811_s22 + $0xe18] sm:$0xff] }
 0x887   : > { %11680 = vmatprep.subr.bf16.mxu1 %v11188_v51  ;;  %v11769_v51 = vld [vmem:[%s17811_s22 + $0xe00] sm:$0xff]  ;;  %v11932_v55 = vunpack.c.l.s8.bf16 %v11772_v27 }
 0x888   : > { %11416 = vmatpush1.bf16.msra.mxu0 %v11185_v24  ;;  %v11927_v24 = vunpack.c.h.s8.bf16 %v11767_v1  ;;  %v11929_v16 = vunpack.c.l.s8.bf16 %v11769_v51  ;;  %v11788_v1 = vld [vmem:[%s17811_s22 + $0xe98] sm:$0xff] }
 0x889   : > { %12185 = vmatprep.subr.bf16.mxu0 %v11898_v32  ;;  %v11771_v32 = vld [vmem:[%s17811_s22 + $0xe10] sm:$0xff] }
 0x88a   : > { %11681 = vmatpush1.bf16.msra.mxu1 %v11187_v6  ;;  %v11934_v6 = vunpack.c.h.s8.bf16 %v11770_v43  ;;  %v11964_v43 = vunpack.c.l.s8.bf16 %v11788_v1 }
 0x88b   : > { %11434 = vmatmul.mubr.bf16.vlgmr.msra.gmra.mrb[104].mxu0 %v19206_v14  ;;  %12450 = vmatprep.subr.bf16.mxu1 %v11900_v31  ;;  %v11931_v31 = vunpack.c.l.s8.bf16 %v11771_v32 }
 0x88c   : > { %12186 = vmatpush1.bf16.msra.mxu0 %v11897_v58  ;;  %11443 = vmatprep.mubr.bf16.mxu0 %v19203_v33  ;;  %v11936_v58 = vunpack.c.h.s8.bf16 %v11772_v27  ;;  %v11966_v27 = vunpack.c.h.s8.bf16 %v11786_v49 }
 0x88d   : > { %11699 = vmatmul.mubr.bf16.vlgmr.msra.gmra.mrb[104].mxu1 %v19206_v14  ;;  %12187 = vmatprep.subr.bf16.mxu0 %v11902_v61  ;;  %v11933_v61 = vunpack.c.h.s8.bf16 %v11769_v51  ;;  %v11773_v14 = vld [vmem:[%s17811_s22 + $0xe20] sm:$0xff]  ;;  %v11790_v51 = vld [vmem:[%s17811_s22 + $0xea8] sm:$0xff] }
 0x88e   : > { %12451 = vmatpush1.bf16.msra.mxu1 %v11899_v30  ;;  %11708 = vmatprep.mubr.bf16.mxu1 %v19203_v33  ;;  %v11776_v30 = vld [vmem:[%s17811_s22 + $0xe38] sm:$0xff] }
 0x88f   : > { %12452 = vmatprep.subr.bf16.mxu1 %v11904_v3  ;;  %v11935_v3 = vunpack.c.h.s8.bf16 %v11771_v32  ;;  %v11944_v15 = vunpack.c.h.s8.bf16 %v11776_v30 }
 0x890   : > { %12188 = vmatpush1.bf16.msra.mxu0 %v11901_v40  ;;  %v11940_v40 = vunpack.c.l.s8.bf16 %v11776_v30 }
 0x891   : > { %12189 = vmatprep.subr.bf16.mxu0 %v11906_v0  ;;  %v11937_v0 = vunpack.c.l.s8.bf16 %v11773_v14 }
 0x892   : > { %12453 = vmatpush1.bf16.msra.mxu1 %v11903_v52  ;;  %v11939_v52 = vunpack.c.l.s8.bf16 %v11775_v2 }
 0x893   : > { %11444 = vmatmul.mubr.bf16.gmra.mrb[108].mxu0 %v19207_v5  ;;  %12454 = vmatprep.subr.bf16.mxu1 %v11908_v11  ;;  %v11778_v11 = vld [vmem:[%s17811_s22 + $0xe48] sm:$0xff] }
 0x894   : > { %12190 = vmatpush1.bf16.msra.mxu0 %v11905_v37  ;;  %12217 = vmatprep.mubr.bf16.mxu0 %v19208_v57  ;;  %v11941_v37 = vunpack.c.h.s8.bf16 %v11773_v14  ;;  %v11950_v23 = vunpack.c.h.s8.bf16 %v11778_v11 }
 0x895   : > { %11709 = vmatmul.mubr.bf16.gmra.mrb[108].mxu1 %v19207_v5  ;;  %12191 = vmatprep.subr.bf16.mxu0 %v11910_v8  ;;  %v11780_v8 = vld [vmem:[%s17811_s22 + $0xe58] sm:$0xff]  ;;  %v11943_v5 = vunpack.c.h.s8.bf16 %v11775_v2 }
 0x896   : > { %12455 = vmatpush1.bf16.msra.mxu1 %v11907_v62  ;;  %12482 = vmatprep.mubr.bf16.mxu1 %v19208_v57  ;;  %v11946_v62 = vunpack.c.l.s8.bf16 %v11778_v11  ;;  %v11779_v57 = vld [vmem:[%s17811_s22 + $0xe50] sm:$0xff] }
 0x897   : > { %12456 = vmatprep.subr.bf16.mxu1 %v11912_v13  ;;  %v11948_v13 = vunpack.c.l.s8.bf16 %v11780_v8 }
 0x898   : > { %12192 = vmatpush1.bf16.msra.mxu0 %v11909_v45  ;;  %v11945_v45 = vunpack.c.l.s8.bf16 %v11777_v44 }
 0x899   : > { %12193 = vmatprep.subr.bf16.mxu0 %v11914_v28  ;;  %v11947_v28 = vunpack.c.l.s8.bf16 %v11779_v57 }
 0x89a   : > { %12457 = vmatpush1.bf16.msra.mxu1 %v11911_v9  ;;  %v11952_v9 = vunpack.c.h.s8.bf16 %v11780_v8 }
 0x89b   : > { %12458 = vmatprep.subr.bf16.mxu1 %v11916_v48  ;;  %v11949_v48 = vunpack.c.h.s8.bf16 %v11777_v44 }
 0x89c   : > { %12194 = vmatpush1.bf16.msra.mxu0 %v11913_v26  ;;  %v11954_v26 = vunpack.c.l.s8.bf16 %v11782_v47 }
 0x89d   : > { %12195 = vmatprep.subr.bf16.mxu0 %v11918_v36  ;;  %v11781_v36 = vld [vmem:[%s17811_s22 + $0xe60] sm:$0xff] }
 0x89e   : > { %12459 = vmatpush1.bf16.msra.mxu1 %v11915_v59  ;;  %v11951_v59 = vunpack.c.h.s8.bf16 %v11779_v57 }
 0x89f   : > { %12460 = vmatprep.subr.bf16.mxu1 %v11920_v7  ;;  %v11783_v7 = vld [vmem:[%s17811_s22 + $0xe70] sm:$0xff] }
 0x8a0   : > { %12196 = vmatpush1.bf16.msra.mxu0 %v11917_v53  ;;  %v11953_v53 = vunpack.c.l.s8.bf16 %v11781_v36 }
 0x8a1   : > { %12197 = vmatprep.subr.bf16.mxu0 %v11922_v38  ;;  %v11955_v38 = vunpack.c.l.s8.bf16 %v11783_v7 }
 0x8a2   : > { %12461 = vmatpush1.bf16.msra.mxu1 %v11919_v46  ;;  %v11960_v46 = vunpack.c.h.s8.bf16 %v11784_v56 }
 0x8a3   : > { %12462 = vmatprep.subr.bf16.mxu1 %v11924_v17  ;;  %v11957_v17 = vunpack.c.h.s8.bf16 %v11781_v36  ;;  %v11802_v36 = vld [vmem:[%s17811_s22 + $0xf08] sm:$0xff] }
 0x8a4   : > { %12198 = vmatpush1.bf16.msra.mxu0 %v11921_v54  ;;  %v11962_v54 = vunpack.c.l.s8.bf16 %v11786_v49 }
 0x8a5   : > { %12199 = vmatprep.subr.bf16.mxu0 %v11926_v20  ;;  %v11785_v20 = vld [vmem:[%s17811_s22 + $0xe80] sm:$0xff] }
 0x8a6   : > { %12463 = vmatpush1.bf16.msra.mxu1 %v11923_v19  ;;  %v11959_v19 = vunpack.c.h.s8.bf16 %v11783_v7  ;;  %v11965_v32 = vunpack.c.h.s8.bf16 %v11785_v20  ;;  %v11804_v7 = vld [vmem:[%s17811_s22 + $0xf18] sm:$0xff] }
 0x8a7   : > { %12464 = vmatprep.subr.bf16.mxu1 %v11928_v60  ;;  %v11787_v60 = vld [vmem:[%s17811_s22 + $0xe90] sm:$0xff]  ;;  %v11996_v49 = vunpack.c.l.s8.bf16 %v11804_v7 }
 0x8a8   : > { %12200 = vmatpush1.bf16.msra.mxu0 %v11925_v63  ;;  %v11961_v63 = vunpack.c.l.s8.bf16 %v11785_v20  ;;  %v11967_v25 = vunpack.c.h.s8.bf16 %v11787_v60  ;;  %v11806_v20 = vld [vmem:[%s17811_s22 + $0xf28] sm:$0xff] }
 0x8a9   : > { %12201 = vmatprep.subr.bf16.mxu0 %v11930_v12  ;;  %v11963_v12 = vunpack.c.l.s8.bf16 %v11787_v60  ;;  %v11808_v60 = vld [vmem:[%s17811_s22 + $0xf38] sm:$0xff] }
 0x8aa   : > { %12465 = vmatpush1.bf16.msra.mxu1 %v11927_v24  ;;  %v19209_v24 = vld [vmem:[#allocation45_spill] sm:$0xff] }
 0x8ab   : > { %12466 = vmatprep.subr.bf16.mxu1 %v11932_v55  ;;  %v11968_v55 = vunpack.c.h.s8.bf16 %v11788_v1  ;;  %v11998_v1 = vunpack.c.h.s8.bf16 %v11802_v36 }
 0x8ac   : > { %12202 = vmatpush1.bf16.msra.mxu0 %v11929_v16  ;;  %v11792_v16 = vld [vmem:[%s17811_s22 + $0xeb8] sm:$0xff] }
 0x8ad   : > { %12203 = vmatprep.subr.bf16.mxu0 %v11934_v6  ;;  %v11970_v6 = vunpack.c.l.s8.bf16 %v11790_v51  ;;  %v11976_v2 = vunpack.c.h.s8.bf16 %v11792_v16 }
 0x8ae   : > { %12467 = vmatpush1.bf16.msra.mxu1 %v11931_v31  ;;  %v11789_v31 = vld [vmem:[%s17811_s22 + $0xea0] sm:$0xff] }
 0x8af   : > { %12468 = vmatprep.subr.bf16.mxu1 %v11936_v58  ;;  %v11972_v58 = vunpack.c.l.s8.bf16 %v11792_v16  ;;  %v11969_v30 = vunpack.c.l.s8.bf16 %v11789_v31 }
 0x8b0   : > { %12204 = vmatpush1.bf16.msra.mxu0 %v11933_v61  ;;  %v11791_v61 = vld [vmem:[%s17811_s22 + $0xeb0] sm:$0xff] }
 0x8b1   : > { %12205 = vmatprep.subr.bf16.mxu0 %v11938_v39  ;;  %v11974_v39 = vunpack.c.h.s8.bf16 %v11790_v51  ;;  %v11971_v14 = vunpack.c.l.s8.bf16 %v11791_v61  ;;  %v11975_v11 = vunpack.c.h.s8.bf16 %v11791_v61  ;;  %v12004_v51 = vunpack.c.l.s8.bf16 %v11808_v60 }
 0x8b2   : > { %12469 = vmatpush1.bf16.msra.mxu1 %v11935_v3  ;;  %v11794_v3 = vld [vmem:[%s17811_s22 + $0xec8] sm:$0xff] }
 0x8b3   : > { %12470 = vmatprep.subr.bf16.mxu1 %v11940_v40  ;;  %v19210_v40 = vld [vmem:[#allocation50_spill] sm:$0xff] }
 0x8b4   : > { %12206 = vmatpush1.bf16.msra.mxu0 %v11937_v0  ;;  %v11796_v0 = vld [vmem:[%s17811_s22 + $0xed8] sm:$0xff] }
 0x8b5   : > { %12207 = vmatprep.subr.bf16.mxu0 %v11942_v50  ;;  %v11978_v50 = vunpack.c.l.s8.bf16 %v11794_v3 }
 0x8b6   : > { %12471 = vmatpush1.bf16.msra.mxu1 %v11939_v52  ;;  %v11793_v52 = vld [vmem:[%s17811_s22 + $0xec0] sm:$0xff] }
 0x8b7   : > { %12472 = vmatprep.subr.bf16.mxu1 %v11944_v15  ;;  %v11980_v15 = vunpack.c.l.s8.bf16 %v11796_v0  ;;  %v11977_v8 = vunpack.c.l.s8.bf16 %v11793_v52  ;;  %v11981_v57 = vunpack.c.h.s8.bf16 %v11793_v52 }
 0x8b8   : > { %12208 = vmatpush1.bf16.msra.mxu0 %v11941_v37  ;;  %v11795_v37 = vld [vmem:[%s17811_s22 + $0xed0] sm:$0xff] }
 0x8b9   : > { %12209 = vmatprep.subr.bf16.mxu0 %v11946_v62  ;;  %v11982_v62 = vunpack.c.h.s8.bf16 %v11794_v3  ;;  %v11979_v44 = vunpack.c.l.s8.bf16 %v11795_v37  ;;  %v11811_v3 = vld [vmem:[%s17811_s22 + $0xf50] sm:$0xff] }
 0x8ba   : > { %12473 = vmatpush1.bf16.msra.mxu1 %v11943_v5  ;;  %v11798_v5 = vld [vmem:[%s17811_s22 + $0xee8] sm:$0xff] }
 0x8bb   : > { %12474 = vmatprep.subr.bf16.mxu1 %v11948_v13  ;;  %v11984_v13 = vunpack.c.h.s8.bf16 %v11796_v0  ;;  %v11990_v56 = vunpack.c.h.s8.bf16 %v11798_v5  ;;  %v11814_v0 = vld [vmem:[%s17811_s22 + $0xf68] sm:$0xff] }
 0x8bc   : > { %12210 = vmatpush1.bf16.msra.mxu0 %v11945_v45  ;;  %v11986_v45 = vunpack.c.l.s8.bf16 %v11798_v5 }
 0x8bd   : > { %12211 = vmatprep.subr.bf16.mxu0 %v11950_v23  ;;  %v11797_v23 = vld [vmem:[%s17811_s22 + $0xee0] sm:$0xff] }
 0x8be   : > { %12475 = vmatpush1.bf16.msra.mxu1 %v11947_v28  ;;  %v11983_v28 = vunpack.c.h.s8.bf16 %v11795_v37  ;;  %v11813_v37 = vld [vmem:[%s17811_s22 + $0xf60] sm:$0xff] }
 0x8bf   : > { %12476 = vmatprep.subr.bf16.mxu1 %v11952_v9  ;;  %v11799_v9 = vld [vmem:[%s17811_s22 + $0xef0] sm:$0xff]  ;;  %v12017_v5 = vunpack.c.l.s8.bf16 %v11813_v37 }
 0x8c0   : > { %12212 = vmatpush1.bf16.msra.mxu0 %v11949_v48  ;;  %v11985_v48 = vunpack.c.l.s8.bf16 %v11797_v23 }
 0x8c1   : > { %12213 = vmatprep.subr.bf16.mxu0 %v11954_v26  ;;  %v11987_v26 = vunpack.c.l.s8.bf16 %v11799_v9 }
 0x8c2   : > { %12477 = vmatpush1.bf16.msra.mxu1 %v11951_v59 }
 0x8c3   : > { %12478 = vmatprep.subr.bf16.mxu1 %v11956_v42  ;;  %v11989_v42 = vunpack.c.h.s8.bf16 %v11797_v23  ;;  %v12021_v23 = vunpack.c.h.s8.bf16 %v11813_v37 }
 0x8c4   : > { %12214 = vmatpush1.bf16.msra.mxu0 %v11953_v53  ;;  %v11994_v53 = vunpack.c.l.s8.bf16 %v11802_v36 }
 0x8c5   : > { %12215 = vmatprep.subr.bf16.mxu0 %v11958_v35  ;;  %v11801_v35 = vld [vmem:[%s17811_s22 + $0xf00] sm:$0xff] }
 0x8c6   : > { %12479 = vmatpush1.bf16.msra.mxu1 %v11955_v38  ;;  %v11991_v38 = vunpack.c.h.s8.bf16 %v11799_v9  ;;  %v11817_v9 = vld [vmem:[%s17811_s22 + $0xf80] sm:$0xff] }
 0x8c7   : > { %12480 = vmatprep.subr.bf16.mxu1 %v11960_v46  ;;  %v11803_v46 = vld [vmem:[%s17811_s22 + $0xf10] sm:$0xff]  ;;  %v12025_v36 = vunpack.c.l.s8.bf16 %v11817_v9 }
 0x8c8   : > { %12216 = vmatpush1.bf16.msra.mxu0 %v11957_v17  ;;  %v11993_v17 = vunpack.c.l.s8.bf16 %v11801_v35 }
 0x8c9   : > { %12238 = vmatprep.subr.bf16.mxu0 %v11962_v54  ;;  %v11995_v54 = vunpack.c.l.s8.bf16 %v11803_v46 }
 0x8ca   : > { %12481 = vmatpush1.bf16.msra.mxu1 %v11959_v19  ;;  %v12000_v19 = vunpack.c.h.s8.bf16 %v11804_v7  ;;  %v11822_v7 = vld [vmem:[%s17811_s22 + $0xfa8] sm:$0xff] }
 0x8cb   : > { %12218 = vmatmul.mubr.bf16.vlgmr.msra.gmra.mrb[104].mxu0 %v19209_v24  ;;  %12503 = vmatprep.subr.bf16.mxu1 %v11964_v43  ;;  %v11997_v43 = vunpack.c.h.s8.bf16 %v11801_v35 }
 0x8cc   : > { %12227 = vmatprep.mubr.bf16.mxu0 %v18050_v41  ;;  %12239 = vmatpush1.bf16.msra.mxu0 %v11961_v63  ;;  %v12002_v63 = vunpack.c.l.s8.bf16 %v11806_v20 }
 0x8cd   : > { %12483 = vmatmul.mubr.bf16.vlgmr.msra.gmra.mrb[104].mxu1 %v19209_v24  ;;  %12240 = vmatprep.subr.bf16.mxu0 %v11966_v27  ;;  %v11805_v27 = vld [vmem:[%s17811_s22 + $0xf20] sm:$0xff]  ;;  %v11807_v24 = vld [vmem:[%s17811_s22 + $0xf30] sm:$0xff] }
 0x8ce   : > { %12492 = vmatprep.mubr.bf16.mxu1 %v18050_v41  ;;  %12504 = vmatpush1.bf16.msra.mxu1 %v11963_v12  ;;  %v11973_v41 = vunpack.c.h.s8.bf16 %v11789_v31  ;;  %v11999_v12 = vunpack.c.h.s8.bf16 %v11803_v46  ;;  %v12003_v16 = vunpack.c.l.s8.bf16 %v11807_v24  ;;  %v12008_v31 = vunpack.c.h.s8.bf16 %v11808_v60 }
 0x8cf   : > { %12505 = vmatprep.subr.bf16.mxu1 %v11968_v55  ;;  %v12001_v55 = vunpack.c.l.s8.bf16 %v11805_v27  ;;  %v12034_v46 = vunpack.c.l.s8.bf16 %v11822_v7 }
 0x8d0   : > { %12241 = vmatpush1.bf16.msra.mxu0 %v11965_v32  ;;  %v12006_v32 = vunpack.c.h.s8.bf16 %v11806_v20  ;;  %v11823_v20 = vld [vmem:[%s17811_s22 + $0xfb0] sm:$0xff] }
 0x8d1   : > { %12242 = vmatprep.subr.bf16.mxu0 %v11970_v6  ;;  %v11810_v6 = vld [vmem:[%s17811_s22 + $0xf48] sm:$0xff]  ;;  %v12035_v60 = vunpack.c.l.s8.bf16 %v11823_v20 }
 0x8d2   : > { %12506 = vmatpush1.bf16.msra.mxu1 %v11967_v25  ;;  %v12005_v25 = vunpack.c.h.s8.bf16 %v11805_v27  ;;  %v12010_v61 = vunpack.c.l.s8.bf16 %v11810_v6 }
 0x8d3   : > { %12228 = vmatmul.mubr.bf16.gmra.mrb[108].mxu0 %v19210_v40  ;;  %12507 = vmatprep.subr.bf16.mxu1 %v11972_v58  ;;  %v11812_v58 = vld [vmem:[%s17811_s22 + $0xf58] sm:$0xff] }
 0x8d4   : > { %12243 = vmatpush1.bf16.msra.mxu0 %v11969_v30  ;;  %12270 = vmatprep.mubr.bf16.mxu0 %v18043_v29  ;;  %v11809_v30 = vld [vmem:[%s17811_s22 + $0xf40] sm:$0xff] }
 0x8d5   : > { %12493 = vmatmul.mubr.bf16.gmra.mrb[108].mxu1 %v19210_v40  ;;  %12244 = vmatprep.subr.bf16.mxu0 %v11974_v39  ;;  %v12007_v39 = vunpack.c.h.s8.bf16 %v11807_v24  ;;  %v12009_v40 = vunpack.c.l.s8.bf16 %v11809_v30  ;;  %v12013_v52 = vunpack.c.h.s8.bf16 %v11809_v30 }
 0x8d6   : > { %12508 = vmatpush1.bf16.msra.mxu1 %v11971_v14  ;;  %12535 = vmatprep.mubr.bf16.mxu1 %v18043_v29  ;;  %v11800_v29 = vld [vmem:[%s17811_s22 + $0xef8] sm:$0xff]  ;;  %v12012_v14 = vunpack.c.l.s8.bf16 %v11812_v58 }
 0x8d7   : > { %12509 = vmatprep.subr.bf16.mxu1 %v11976_v2  ;;  %v11988_v47 = vunpack.c.l.s8.bf16 %v11800_v29  ;;  %v11992_v59 = vunpack.c.h.s8.bf16 %v11800_v29  ;;  %v12014_v2 = vunpack.c.h.s8.bf16 %v11810_v6  ;;  %v11818_v29 = vld [vmem:[%s17811_s22 + $0xf88] sm:$0xff]  ;;  %v11827_v6 = vld [vmem:[%s17811_s22 + $0xfd0] sm:$0xff] }
 0x8d8   : > { %12245 = vmatpush1.bf16.msra.mxu0 %v11973_v41  ;;  %v12011_v41 = vunpack.c.l.s8.bf16 %v11811_v3 }
 0x8d9   : > { %12246 = vmatprep.subr.bf16.mxu0 %v11978_v50  ;;  %v12016_v50 = vunpack.c.h.s8.bf16 %v11812_v58  ;;  %v11830_v58 = vld [vmem:[%s17811_s22 + $0xfe8] sm:$0xff] }
 0x8da   : > { %12510 = vmatpush1.bf16.msra.mxu1 %v11975_v11  ;;  %v11816_v11 = vld [vmem:[%s17811_s22 + $0xf78] sm:$0xff] }
 0x8db   : > { %12511 = vmatprep.subr.bf16.mxu1 %v11980_v15  ;;  %v12018_v15 = vunpack.c.l.s8.bf16 %v11814_v0 }
 0x8dc   : > { %12247 = vmatpush1.bf16.msra.mxu0 %v11977_v8  ;;  %v12015_v8 = vunpack.c.h.s8.bf16 %v11811_v3  ;;  %v11829_v3 = vld [vmem:[%s17811_s22 + $0xfe0] sm:$0xff] }
 0x8dd   : > { %12248 = vmatprep.subr.bf16.mxu0 %v11982_v62  ;;  %v12020_v62 = vunpack.c.l.s8.bf16 %v11816_v11  ;;  %v12053_v37 = vunpack.c.h.s8.bf16 %v11829_v3 }
 0x8de   : > { %12512 = vmatpush1.bf16.msra.mxu1 %v11979_v44  ;;  %v11815_v44 = vld [vmem:[%s17811_s22 + $0xf70] sm:$0xff] }
 0x8df   : > { %12513 = vmatprep.subr.bf16.mxu1 %v11984_v13  ;;  %v12022_v13 = vunpack.c.h.s8.bf16 %v11814_v0  ;;  %v12049_v0 = vunpack.c.l.s8.bf16 %v11829_v3 }
 0x8e0   : > { %12249 = vmatpush1.bf16.msra.mxu0 %v11981_v57  ;;  %v12019_v57 = vunpack.c.l.s8.bf16 %v11815_v44 }
 0x8e1   : > { %12250 = vmatprep.subr.bf16.mxu0 %v11986_v45  ;;  %v12024_v45 = vunpack.c.h.s8.bf16 %v11816_v11  ;;  %v11834_v11 = vld [vmem:[%s17811_s22 + $0x1008] sm:$0xff] }
 0x8e2   : > { %12514 = vmatpush1.bf16.msra.mxu1 %v11983_v28  ;;  %v11820_v28 = vld [vmem:[%s17811_s22 + $0xf98] sm:$0xff] }
 0x8e3   : > { %12515 = vmatprep.subr.bf16.mxu1 %v11988_v47  ;;  %v12026_v47 = vunpack.c.l.s8.bf16 %v11818_v29  ;;  %v12032_v35 = vunpack.c.h.s8.bf16 %v11820_v28 }
 0x8e4   : > { %12251 = vmatpush1.bf16.msra.mxu0 %v11985_v48  ;;  %v12023_v48 = vunpack.c.h.s8.bf16 %v11815_v44  ;;  %v11833_v44 = vld [vmem:[%s17811_s22 + $0x1000] sm:$0xff] }
 0x8e5   : > { %12252 = vmatprep.subr.bf16.mxu0 %v11990_v56  ;;  %v12028_v56 = vunpack.c.l.s8.bf16 %v11820_v28  ;;  %v11838_v28 = vld [vmem:[%s17811_s22 + $0x1028] sm:$0xff] }
 0x8e6   : > { %12516 = vmatpush1.bf16.msra.mxu1 %v11987_v26  ;;  %v11819_v26 = vld [vmem:[%s17811_s22 + $0xf90] sm:$0xff] }
 0x8e7   : > { %12517 = vmatprep.subr.bf16.mxu1 %v11992_v59  ;;  %v12030_v59 = vunpack.c.h.s8.bf16 %v11818_v29  ;;  %v12057_v29 = vunpack.c.l.s8.bf16 %v11833_v44 }
 0x8e8   : > { %12253 = vmatpush1.bf16.msra.mxu0 %v11989_v42  ;;  %v12027_v42 = vunpack.c.l.s8.bf16 %v11819_v26 }
 0x8e9   : > { %12254 = vmatprep.subr.bf16.mxu0 %v11994_v53  ;;  %v19211_v53 = vld [vmem:[#allocation51_spill] sm:$0xff] }
 0x8ea   : > { %12518 = vmatpush1.bf16.msra.mxu1 %v11991_v38  ;;  %v12029_v38 = vunpack.c.h.s8.bf16 %v11817_v9  ;;  %v12061_v9 = vunpack.c.h.s8.bf16 %v11833_v44  ;;  %v11856_v44 = vld [vmem:[%s17811_s22 + $0x10b8] sm:$0xff] }
 0x8eb   : > { %12519 = vmatprep.subr.bf16.mxu1 %v11996_v49  ;;  %v11824_v49 = vld [vmem:[%s17811_s22 + $0xfb8] sm:$0xff] }
 0x8ec   : > { %12255 = vmatpush1.bf16.msra.mxu0 %v11993_v17  ;;  %v11821_v17 = vld [vmem:[%s17811_s22 + $0xfa0] sm:$0xff]  ;;  %v12040_v27 = vunpack.c.h.s8.bf16 %v11824_v49 }
 0x8ed   : > { %12256 = vmatprep.subr.bf16.mxu0 %v11998_v1  ;;  %v12031_v1 = vunpack.c.h.s8.bf16 %v11819_v26  ;;  %v11837_v26 = vld [vmem:[%s17811_s22 + $0x1020] sm:$0xff] }
 0x8ee   : > { %12520 = vmatpush1.bf16.msra.mxu1 %v11995_v54  ;;  %v12036_v54 = vunpack.c.l.s8.bf16 %v11824_v49 }
 0x8ef   : > { %12521 = vmatprep.subr.bf16.mxu1 %v12000_v19  ;;  %v12033_v19 = vunpack.c.l.s8.bf16 %v11821_v17 }
 0x8f0   : > { %12257 = vmatpush1.bf16.msra.mxu0 %v11997_v43  ;;  %v12038_v43 = vunpack.c.h.s8.bf16 %v11822_v7  ;;  %v12065_v7 = vunpack.c.l.s8.bf16 %v11837_v26 }
 0x8f1   : > { %12258 = vmatprep.subr.bf16.mxu0 %v12002_v63  ;;  %v11826_v63 = vld [vmem:[%s17811_s22 + $0xfc8] sm:$0xff] }
 0x8f2   : > { %12522 = vmatpush1.bf16.msra.mxu1 %v11999_v12  ;;  %v12037_v12 = vunpack.c.h.s8.bf16 %v11821_v17  ;;  %v12042_v24 = vunpack.c.l.s8.bf16 %v11826_v63  ;;  %v11844_v17 = vld [vmem:[%s17811_s22 + $0x1058] sm:$0xff] }
 0x8f3   : > { %12523 = vmatprep.subr.bf16.mxu1 %v12004_v51  ;;  %v11828_v51 = vld [vmem:[%s17811_s22 + $0xfd8] sm:$0xff] }
 0x8f4   : > { %12259 = vmatpush1.bf16.msra.mxu0 %v12001_v55  ;;  %v11825_v55 = vld [vmem:[%s17811_s22 + $0xfc0] sm:$0xff] }
 0x8f5   : > { %12260 = vmatprep.subr.bf16.mxu0 %v12006_v32  ;;  %v12039_v32 = vunpack.c.h.s8.bf16 %v11823_v20  ;;  %v12045_v30 = vunpack.c.h.s8.bf16 %v11825_v55 }
 0x8f6   : > { %12524 = vmatpush1.bf16.msra.mxu1 %v12003_v16  ;;  %v12044_v16 = vunpack.c.l.s8.bf16 %v11828_v51 }
 0x8f7   : > { %12525 = vmatprep.subr.bf16.mxu1 %v12008_v31  ;;  %v12041_v31 = vunpack.c.l.s8.bf16 %v11825_v55 }
 0x8f8   : > { %12261 = vmatpush1.bf16.msra.mxu0 %v12005_v25  ;;  %v12046_v25 = vunpack.c.h.s8.bf16 %v11826_v63 }
 0x8f9   : > { %12262 = vmatprep.subr.bf16.mxu0 %v12010_v61  ;;  %v12048_v61 = vunpack.c.h.s8.bf16 %v11828_v51 }
 0x8fa   : > { %12526 = vmatpush1.bf16.msra.mxu1 %v12007_v39  ;;  %v11832_v39 = vld [vmem:[%s17811_s22 + $0xff8] sm:$0xff] }
 0x8fb   : > { %12527 = vmatprep.subr.bf16.mxu1 %v12012_v14  ;;  %v12050_v14 = vunpack.c.l.s8.bf16 %v11830_v58 }
 0x8fc   : > { %12263 = vmatpush1.bf16.msra.mxu0 %v12009_v40  ;;  %v12047_v40 = vunpack.c.h.s8.bf16 %v11827_v6 }
 0x8fd   : > { %12264 = vmatprep.subr.bf16.mxu0 %v12014_v2  ;;  %v12052_v2 = vunpack.c.l.s8.bf16 %v11832_v39 }
 0x8fe   : > { %12528 = vmatpush1.bf16.msra.mxu1 %v12011_v41  ;;  %v11831_v41 = vld [vmem:[%s17811_s22 + $0xff0] sm:$0xff] }
 0x8ff   : > { %12529 = vmatprep.subr.bf16.mxu1 %v12016_v50  ;;  %v12054_v50 = vunpack.c.h.s8.bf16 %v11830_v58 }
 0x900   : > { %12265 = vmatpush1.bf16.msra.mxu0 %v12013_v52  ;;  %v12051_v52 = vunpack.c.l.s8.bf16 %v11831_v41 }
 0x901   : > { %12266 = vmatprep.subr.bf16.mxu0 %v12018_v15  ;;  %v12056_v15 = vunpack.c.h.s8.bf16 %v11832_v39 }
 0x902   : > { %12530 = vmatpush1.bf16.msra.mxu1 %v12015_v8  ;;  %v11836_v8 = vld [vmem:[%s17811_s22 + $0x1018] sm:$0xff] }
 0x903   : > { %12531 = vmatprep.subr.bf16.mxu1 %v12020_v62  ;;  %v12058_v62 = vunpack.c.l.s8.bf16 %v11834_v11 }
 0x904   : > { %12267 = vmatpush1.bf16.msra.mxu0 %v12017_v5  ;;  %v12055_v5 = vunpack.c.h.s8.bf16 %v11831_v41 }
 0x905   : > { %12268 = vmatprep.subr.bf16.mxu0 %v12022_v13  ;;  %v12060_v13 = vunpack.c.l.s8.bf16 %v11836_v8 }
 0x906   : > { %12532 = vmatpush1.bf16.msra.mxu1 %v12019_v57  ;;  %v11835_v57 = vld [vmem:[%s17811_s22 + $0x1010] sm:$0xff] }
 0x907   : > { %12533 = vmatprep.subr.bf16.mxu1 %v12024_v45  ;;  %v12062_v45 = vunpack.c.h.s8.bf16 %v11834_v11 }
 0x908   : > { %12269 = vmatpush1.bf16.msra.mxu0 %v12021_v23  ;;  %v12059_v23 = vunpack.c.l.s8.bf16 %v11835_v57 }
 0x909   : > { %12291 = vmatprep.subr.bf16.mxu0 %v12026_v47  ;;  %v12064_v47 = vunpack.c.h.s8.bf16 %v11836_v8 }
 0x90a   : > { %12534 = vmatpush1.bf16.msra.mxu1 %v12023_v48  ;;  %v11840_v48 = vld [vmem:[%s17811_s22 + $0x1038] sm:$0xff] }
 0x90b   : > { %12271 = vmatmul.mubr.bf16.vlgmr.msra.gmra.mrb[104].mxu0 %v19211_v53  ;;  %12556 = vmatprep.subr.bf16.mxu1 %v12028_v56  ;;  %v12066_v56 = vunpack.c.l.s8.bf16 %v11838_v28  ;;  %v12072_v49 = vunpack.c.h.s8.bf16 %v11840_v48 }
 0x90c   : > { %12280 = vmatprep.mubr.bf16.mxu0 %v18056_v22  ;;  %12292 = vmatpush1.bf16.msra.mxu0 %v12025_v36  ;;  %v12063_v36 = vunpack.c.h.s8.bf16 %v11835_v57 }
 0x90d   : > { %12536 = vmatmul.mubr.bf16.vlgmr.msra.gmra.mrb[104].mxu1 %v19211_v53  ;;  %12293 = vmatprep.subr.bf16.mxu0 %v12030_v59  ;;  %v12068_v59 = vunpack.c.l.s8.bf16 %v11840_v48  ;;  %v12070_v53 = vunpack.c.h.s8.bf16 %v11838_v28  ;;  %v19214_v48 = vld [vmem:[#allocation10_spill] sm:$0xff] }
 0x90e   : > { %12545 = vmatprep.mubr.bf16.mxu1 %v18056_v22  ;;  %12557 = vmatpush1.bf16.msra.mxu1 %v12027_v42  ;;  %v19212_v22 = vld [vmem:[#allocation14_spill] sm:$0xff]  ;;  %v11839_v42 = vld [vmem:[%s17811_s22 + $0x1030] sm:$0xff] }
 0x90f   : > { %12558 = vmatprep.subr.bf16.mxu1 %v12032_v35  ;;  %v12067_v35 = vunpack.c.l.s8.bf16 %v11839_v42  ;;  %v12071_v20 = vunpack.c.h.s8.bf16 %v11839_v42  ;;  %v11857_v42 = vld [vmem:[%s17811_s22 + $0x10c0] sm:$0xff] }
 0x910   : > { %12294 = vmatpush1.bf16.msra.mxu0 %v12029_v38  ;;  %v11842_v38 = vld [vmem:[%s17811_s22 + $0x1048] sm:$0xff] }
 0x911   : > { %12295 = vmatprep.subr.bf16.mxu0 %v12034_v46  ;;  %v12069_v46 = vunpack.c.h.s8.bf16 %v11837_v26  ;;  %v12078_v63 = vunpack.c.h.s8.bf16 %v11842_v38 }
 0x912   : > { %12559 = vmatpush1.bf16.msra.mxu1 %v12031_v1  ;;  %v12074_v1 = vunpack.c.l.s8.bf16 %v11842_v38  ;;  %v12105_v38 = vunpack.c.l.s8.bf16 %v11857_v42 }
 0x913   : > { %12281 = vmatmul.mubr.bf16.gmra.mrb[108].mxu0 %v18052_v34  ;;  %12560 = vmatprep.subr.bf16.mxu1 %v12036_v54  ;;  %v11841_v54 = vld [vmem:[%s17811_s22 + $0x1040] sm:$0xff] }
 0x914   : > { %12296 = vmatpush1.bf16.msra.mxu0 %v12033_v19  ;;  %12323 = vmatprep.mubr.bf16.mxu0 %v19212_v22  ;;  %v12076_v19 = vunpack.c.l.s8.bf16 %v11844_v17  ;;  %v12077_v51 = vunpack.c.h.s8.bf16 %v11841_v54 }
 0x915   : > { %12546 = vmatmul.mubr.bf16.gmra.mrb[108].mxu1 %v18052_v34  ;;  %12297 = vmatprep.subr.bf16.mxu0 %v12038_v43  ;;  %v12043_v34 = vunpack.c.l.s8.bf16 %v11827_v6  ;;  %v11843_v43 = vld [vmem:[%s17811_s22 + $0x1050] sm:$0xff] }
 0x916   : > { %12561 = vmatpush1.bf16.msra.mxu1 %v12035_v60  ;;  %12588 = vmatprep.mubr.bf16.mxu1 %v19212_v22  ;;  %v12073_v60 = vunpack.c.l.s8.bf16 %v11841_v54  ;;  %v11846_v22 = vld [vmem:[%s17811_s22 + $0x1068] sm:$0xff]  ;;  %v12109_v54 = vunpack.c.h.s8.bf16 %v11857_v42  ;;  %v11877_v42 = vld [vmem:[%s17811_s22 + $0x1160] sm:$0xff] }
 0x917   : > { %12562 = vmatprep.subr.bf16.mxu1 %v12040_v27  ;;  %v12075_v27 = vunpack.c.l.s8.bf16 %v11843_v43  ;;  %v12082_v55 = vunpack.c.l.s8.bf16 %v11846_v22 }
 0x918   : > { %12298 = vmatpush1.bf16.msra.mxu0 %v12037_v12  ;;  %v12080_v12 = vunpack.c.h.s8.bf16 %v11844_v17  ;;  %v11862_v17 = vld [vmem:[%s17811_s22 + $0x10e8] sm:$0xff] }
 0x919   : > { %12299 = vmatprep.subr.bf16.mxu0 %v12042_v24  ;;  %v11848_v24 = vld [vmem:[%s17811_s22 + $0x1078] sm:$0xff] }
 0x91a   : > { %12563 = vmatpush1.bf16.msra.mxu1 %v12039_v32  ;;  %v11845_v32 = vld [vmem:[%s17811_s22 + $0x1060] sm:$0xff]  ;;  %v12084_v6 = vunpack.c.l.s8.bf16 %v11848_v24 }
 0x91b   : > { %12564 = vmatprep.subr.bf16.mxu1 %v12044_v16  ;;  %v12079_v16 = vunpack.c.h.s8.bf16 %v11843_v43  ;;  %v12085_v39 = vunpack.c.h.s8.bf16 %v11845_v32  ;;  %v11861_v43 = vld [vmem:[%s17811_s22 + $0x10e0] sm:$0xff] }
 0x91c   : > { %12300 = vmatpush1.bf16.msra.mxu0 %v12041_v31  ;;  %v11847_v31 = vld [vmem:[%s17811_s22 + $0x1070] sm:$0xff] }
 0x91d   : > { %12301 = vmatprep.subr.bf16.mxu0 %v12046_v25  ;;  %v12081_v25 = vunpack.c.l.s8.bf16 %v11845_v32  ;;  %v12083_v58 = vunpack.c.l.s8.bf16 %v11847_v31  ;;  %v12117_v32 = vunpack.c.h.s8.bf16 %v11861_v43 }
 0x91e   : > { %12565 = vmatpush1.bf16.msra.mxu1 %v12043_v34  ;;  %v12086_v34 = vunpack.c.h.s8.bf16 %v11846_v22  ;;  %v12113_v22 = vunpack.c.l.s8.bf16 %v11861_v43  ;;  %v11881_v43 = vld [vmem:[%s17811_s22 + $0x1180] sm:$0xff] }
 0x91f   : > { %12566 = vmatprep.subr.bf16.mxu1 %v12048_v61  ;;  %v11850_v61 = vld [vmem:[%s17811_s22 + $0x1088] sm:$0xff] }
 0x920   : > { %12302 = vmatpush1.bf16.msra.mxu0 %v12045_v30  ;;  %v12088_v30 = vunpack.c.h.s8.bf16 %v11848_v24  ;;  %v12090_v3 = vunpack.c.l.s8.bf16 %v11850_v61  ;;  %v11866_v24 = vld [vmem:[%s17811_s22 + $0x1108] sm:$0xff] }
 0x921   : > { %12303 = vmatprep.subr.bf16.mxu0 %v12050_v14  ;;  %v11852_v14 = vld [vmem:[%s17811_s22 + $0x1098] sm:$0xff] }
 0x922   : > { %12567 = vmatpush1.bf16.msra.mxu1 %v12047_v40  ;;  %v11849_v40 = vld [vmem:[%s17811_s22 + $0x1080] sm:$0xff]  ;;  %v12092_v41 = vunpack.c.l.s8.bf16 %v11852_v14  ;;  %v12096_v8 = vunpack.c.h.s8.bf16 %v11852_v14  ;;  %v11870_v14 = vld [vmem:[%s17811_s22 + $0x1128] sm:$0xff] }
 0x923   : > { %12568 = vmatprep.subr.bf16.mxu1 %v12052_v2  ;;  %v12087_v2 = vunpack.c.h.s8.bf16 %v11847_v31  ;;  %v11865_v31 = vld [vmem:[%s17811_s22 + $0x1100] sm:$0xff] }
 0x924   : > { %12304 = vmatpush1.bf16.msra.mxu0 %v12049_v0  ;;  %v11851_v0 = vld [vmem:[%s17811_s22 + $0x1090] sm:$0xff] }
 0x925   : > { %12305 = vmatprep.subr.bf16.mxu0 %v12054_v50  ;;  %v12089_v50 = vunpack.c.l.s8.bf16 %v11849_v40  ;;  %v12091_v11 = vunpack.c.l.s8.bf16 %v11851_v0  ;;  %v12095_v57 = vunpack.c.h.s8.bf16 %v11851_v0  ;;  %v11869_v0 = vld [vmem:[%s17811_s22 + $0x1120] sm:$0xff] }
 0x926   : > { %12569 = vmatpush1.bf16.msra.mxu1 %v12051_v52  ;;  %v12094_v52 = vunpack.c.h.s8.bf16 %v11850_v61  ;;  %v12121_v61 = vunpack.c.l.s8.bf16 %v11865_v31 }
 0x927   : > { %12570 = vmatprep.subr.bf16.mxu1 %v12056_v15  ;;  %v11854_v15 = vld [vmem:[%s17811_s22 + $0x10a8] sm:$0xff] }
 0x928   : > { %12306 = vmatpush1.bf16.msra.mxu0 %v12053_v37  ;;  %v19213_v37 = vld [vmem:[#allocation7_spill] sm:$0xff]  ;;  %v12102_v28 = vunpack.c.h.s8.bf16 %v11854_v15 }
 0x929   : > { %12307 = vmatprep.subr.bf16.mxu0 %v12058_v62  ;;  %v12093_v62 = vunpack.c.h.s8.bf16 %v11849_v40  ;;  %v12125_v40 = vunpack.c.h.s8.bf16 %v11865_v31 }
 0x92a   : > { %12571 = vmatpush1.bf16.msra.mxu1 %v12055_v5  ;;  %v12098_v5 = vunpack.c.l.s8.bf16 %v11854_v15  ;;  %v12129_v15 = vunpack.c.l.s8.bf16 %v11869_v0 }
 0x92b   : > { %12572 = vmatprep.subr.bf16.mxu1 %v12060_v13  ;;  %v11853_v13 = vld [vmem:[%s17811_s22 + $0x10a0] sm:$0xff] }
 0x92c   : > { %12308 = vmatpush1.bf16.msra.mxu0 %v12057_v29  ;;  %v12100_v29 = vunpack.c.l.s8.bf16 %v11856_v44  ;;  %v12101_v26 = vunpack.c.h.s8.bf16 %v11853_v13 }
 0x92d   : > { %12309 = vmatprep.subr.bf16.mxu0 %v12062_v45  ;;  %v11855_v45 = vld [vmem:[%s17811_s22 + $0x10b0] sm:$0xff] }
 0x92e   : > { %12573 = vmatpush1.bf16.msra.mxu1 %v12059_v23  ;;  %v12097_v23 = vunpack.c.l.s8.bf16 %v11853_v13  ;;  %v11876_v13 = vld [vmem:[%s17811_s22 + $0x1158] sm:$0xff] }
 0x92f   : > { %12574 = vmatprep.subr.bf16.mxu1 %v12064_v47  ;;  %v12099_v47 = vunpack.c.l.s8.bf16 %v11855_v45 }
 0x930   : > { %12310 = vmatpush1.bf16.msra.mxu0 %v12061_v9  ;;  %v11858_v9 = vld [vmem:[%s17811_s22 + $0x10c8] sm:$0xff] }
 0x931   : > { %12311 = vmatprep.subr.bf16.mxu0 %v12066_v56  ;;  %v12104_v56 = vunpack.c.h.s8.bf16 %v11856_v44 }
 0x932   : > { %12575 = vmatpush1.bf16.msra.mxu1 %v12063_v36  ;;  %v11860_v36 = vld [vmem:[%s17811_s22 + $0x10d8] sm:$0xff] }
 0x933   : > { %12576 = vmatprep.subr.bf16.mxu1 %v12068_v59  ;;  %v12106_v59 = vunpack.c.l.s8.bf16 %v11858_v9 }
 0x934   : > { %12312 = vmatpush1.bf16.msra.mxu0 %v12065_v7  ;;  %v12103_v7 = vunpack.c.h.s8.bf16 %v11855_v45 }
 0x935   : > { %12313 = vmatprep.subr.bf16.mxu0 %v12070_v53  ;;  %v12108_v53 = vunpack.c.l.s8.bf16 %v11860_v36 }
 0x936   : > { %12577 = vmatpush1.bf16.msra.mxu1 %v12067_v35  ;;  %v11859_v35 = vld [vmem:[%s17811_s22 + $0x10d0] sm:$0xff] }
 0x937   : > { %12578 = vmatprep.subr.bf16.mxu1 %v12072_v49  ;;  %v12110_v49 = vunpack.c.h.s8.bf16 %v11858_v9 }
 0x938   : > { %12314 = vmatpush1.bf16.msra.mxu0 %v12069_v46  ;;  %v12107_v46 = vunpack.c.l.s8.bf16 %v11859_v35 }
 0x939   : > { %12315 = vmatprep.subr.bf16.mxu0 %v12074_v1  ;;  %v12112_v1 = vunpack.c.h.s8.bf16 %v11860_v36  ;;  %v11880_v36 = vld [vmem:[%s17811_s22 + $0x1178] sm:$0xff] }
 0x93a   : > { %12579 = vmatpush1.bf16.msra.mxu1 %v12071_v20  ;;  %v11864_v20 = vld [vmem:[%s17811_s22 + $0x10f8] sm:$0xff] }
 0x93b   : > { %12580 = vmatprep.subr.bf16.mxu1 %v12076_v19  ;;  %v12114_v19 = vunpack.c.l.s8.bf16 %v11862_v17 }
 0x93c   : > { %12316 = vmatpush1.bf16.msra.mxu0 %v12073_v60  ;;  %v12111_v60 = vunpack.c.h.s8.bf16 %v11859_v35  ;;  %v11879_v35 = vld [vmem:[%s17811_s22 + $0x1170] sm:$0xff] }
 0x93d   : > { %12317 = vmatprep.subr.bf16.mxu0 %v12078_v63  ;;  %v12116_v63 = vunpack.c.l.s8.bf16 %v11864_v20 }
 0x93e   : > { %12581 = vmatpush1.bf16.msra.mxu1 %v12075_v27  ;;  %v11863_v27 = vld [vmem:[%s17811_s22 + $0x10f0] sm:$0xff] }
 0x93f   : > { %12582 = vmatprep.subr.bf16.mxu1 %v12080_v12  ;;  %v12118_v12 = vunpack.c.h.s8.bf16 %v11862_v17  ;;  %v11882_v17 = vld [vmem:[%s17811_s22 + $0x1188] sm:$0xff] }
 0x940   : > { %12318 = vmatpush1.bf16.msra.mxu0 %v12077_v51  ;;  %v12115_v51 = vunpack.c.l.s8.bf16 %v11863_v27 }
 0x941   : > { %12319 = vmatprep.subr.bf16.mxu0 %v12082_v55  ;;  %v12120_v55 = vunpack.c.h.s8.bf16 %v11864_v20  ;;  %v11884_v20 = vld [vmem:[%s17811_s22 + $0x1198] sm:$0xff] }
 0x942   : > { %12583 = vmatpush1.bf16.msra.mxu1 %v12079_v16  ;;  %v11868_v16 = vld [vmem:[%s17811_s22 + $0x1118] sm:$0xff] }
 0x943   : > { %12584 = vmatprep.subr.bf16.mxu1 %v12084_v6  ;;  %v12122_v6 = vunpack.c.l.s8.bf16 %v11866_v24 }
 0x944   : > { %12320 = vmatpush1.bf16.msra.mxu0 %v12081_v25  ;;  %v12119_v25 = vunpack.c.h.s8.bf16 %v11863_v27  ;;  %v11883_v27 = vld [vmem:[%s17811_s22 + $0x1190] sm:$0xff] }
 0x945   : > { %12321 = vmatprep.subr.bf16.mxu0 %v12086_v34  ;;  %v12124_v34 = vunpack.c.l.s8.bf16 %v11868_v16 }
 0x946   : > { %12585 = vmatpush1.bf16.msra.mxu1 %v12083_v58  ;;  %v11867_v58 = vld [vmem:[%s17811_s22 + $0x1110] sm:$0xff] }
 0x947   : > { %12586 = vmatprep.subr.bf16.mxu1 %v12088_v30  ;;  %v12126_v30 = vunpack.c.h.s8.bf16 %v11866_v24  ;;  %v11886_v24 = vld [vmem:[%s17811_s22 + $0x11a8] sm:$0xff] }
 0x948   : > { %12322 = vmatpush1.bf16.msra.mxu0 %v12085_v39  ;;  %v12123_v39 = vunpack.c.l.s8.bf16 %v11867_v58  ;;  %v12162_v31 = vunpack.c.l.s8.bf16 %v11886_v24 }
 0x949   : > { %12344 = vmatprep.subr.bf16.mxu0 %v12090_v3  ;;  %v12128_v3 = vunpack.c.h.s8.bf16 %v11868_v16  ;;  %v12157_v16 = vunpack.c.h.s8.bf16 %v11881_v43 }
 0x94a   : > { %12587 = vmatpush1.bf16.msra.mxu1 %v12087_v2  ;;  %v11872_v2 = vld [vmem:[%s17811_s22 + $0x1138] sm:$0xff] }
 0x94b   : > { %12324 = vmatmul.mubr.bf16.vlgmr.msra.gmra.mrb[104].mxu0 %v19213_v37  ;;  %12609 = vmatprep.subr.bf16.mxu1 %v12092_v41  ;;  %v12130_v41 = vunpack.c.l.s8.bf16 %v11870_v14  ;;  %v12136_v44 = vunpack.c.h.s8.bf16 %v11872_v2 }
 0x94c   : > { %12333 = vmatprep.mubr.bf16.mxu0 %v18090_v4  ;;  %12345 = vmatpush1.bf16.msra.mxu0 %v12089_v50  ;;  %v12127_v50 = vunpack.c.h.s8.bf16 %v11867_v58 }
 0x94d   : > { %12589 = vmatmul.mubr.bf16.vlgmr.msra.gmra.mrb[104].mxu1 %v19213_v37  ;;  %12346 = vmatprep.subr.bf16.mxu0 %v12094_v52  ;;  %v12132_v52 = vunpack.c.l.s8.bf16 %v11872_v2  ;;  %v12134_v37 = vunpack.c.h.s8.bf16 %v11870_v14  ;;  %v11892_v2 = vld [vmem:[%s17811_s22 + $0x11d8] sm:$0xff] }
 0x94e   : > { %12598 = vmatprep.mubr.bf16.mxu1 %v18090_v4  ;;  %12610 = vmatpush1.bf16.msra.mxu1 %v12091_v11  ;;  %v19215_v4 = vld [vmem:[#allocation15_spill] sm:$0xff]  ;;  %v11871_v11 = vld [vmem:[%s17811_s22 + $0x1130] sm:$0xff] }
 0x94f   : > { %12611 = vmatprep.subr.bf16.mxu1 %v12096_v8  ;;  %v12131_v8 = vunpack.c.l.s8.bf16 %v11871_v11  ;;  %v12135_v45 = vunpack.c.h.s8.bf16 %v11871_v11  ;;  %v11891_v11 = vld [vmem:[%s17811_s22 + $0x11d0] sm:$0xff] }
 0x950   : > { %12347 = vmatpush1.bf16.msra.mxu0 %v12093_v62  ;;  %v11874_v62 = vld [vmem:[%s17811_s22 + $0x1148] sm:$0xff] }
 0x951   : > { %12348 = vmatprep.subr.bf16.mxu0 %v12098_v5  ;;  %v12133_v5 = vunpack.c.h.s8.bf16 %v11869_v0  ;;  %v12142_v9 = vunpack.c.h.s8.bf16 %v11874_v62  ;;  %v11889_v0 = vld [vmem:[%s17811_s22 + $0x11c0] sm:$0xff] }
 0x952   : > { %12612 = vmatpush1.bf16.msra.mxu1 %v12095_v57  ;;  %v12138_v57 = vunpack.c.l.s8.bf16 %v11874_v62  ;;  %v12176_v62 = vunpack.c.h.s8.bf16 %v11892_v2 }
 0x953   : > { %12334 = vmatmul.mubr.bf16.gmra.mrb[108].mxu0 %v19214_v48  ;;  %12613 = vmatprep.subr.bf16.mxu1 %v12100_v29  ;;  %v11873_v29 = vld [vmem:[%s17811_s22 + $0x1140] sm:$0xff] }
 0x954   : > { %12349 = vmatpush1.bf16.msra.mxu0 %v12097_v23  ;;  %12376 = vmatprep.mubr.bf16.mxu0 %v19215_v4  ;;  %v12140_v23 = vunpack.c.l.s8.bf16 %v11876_v13 }
 0x955   : > { %12599 = vmatmul.mubr.bf16.gmra.mrb[108].mxu1 %v19214_v48  ;;  %12350 = vmatprep.subr.bf16.mxu0 %v12102_v28  ;;  %v11875_v28 = vld [vmem:[%s17811_s22 + $0x1150] sm:$0xff] }
 0x956   : > { %12614 = vmatpush1.bf16.msra.mxu1 %v12099_v47  ;;  %12641 = vmatprep.mubr.bf16.mxu1 %v19215_v4  ;;  %v12137_v47 = vunpack.c.l.s8.bf16 %v11873_v29  ;;  %v12139_v48 = vunpack.c.l.s8.bf16 %v11875_v28  ;;  %v12144_v4 = vunpack.c.h.s8.bf16 %v11876_v13 }
 0x957   : > { %12615 = vmatprep.subr.bf16.mxu1 %v12104_v56  ;;  %v11878_v56 = vld [vmem:[%s17811_s22 + $0x1168] sm:$0xff] }
 0x958   : > { %12351 = vmatpush1.bf16.msra.mxu0 %v12101_v26  ;;  %v12141_v26 = vunpack.c.h.s8.bf16 %v11873_v29  ;;  %v12175_v29 = vunpack.c.h.s8.bf16 %v11891_v11 }
 0x959   : > { %12352 = vmatprep.subr.bf16.mxu0 %v12106_v59  ;;  %v12146_v59 = vunpack.c.l.s8.bf16 %v11878_v56 }
 0x95a   : > { %12616 = vmatpush1.bf16.msra.mxu1 %v12103_v7  ;;  %v12143_v7 = vunpack.c.h.s8.bf16 %v11875_v28 }
 0x95b   : > { %12617 = vmatprep.subr.bf16.mxu1 %v12108_v53  ;;  %v12148_v53 = vunpack.c.l.s8.bf16 %v11880_v36 }
 0x95c   : > { %12353 = vmatpush1.bf16.msra.mxu0 %v12105_v38  ;;  %v12145_v38 = vunpack.c.l.s8.bf16 %v11877_v42 }
 0x95d   : > { %12354 = vmatprep.subr.bf16.mxu0 %v12110_v49  ;;  %v12150_v49 = vunpack.c.h.s8.bf16 %v11878_v56 }
 0x95e   : > { %12618 = vmatpush1.bf16.msra.mxu1 %v12107_v46  ;;  %v12147_v46 = vunpack.c.l.s8.bf16 %v11879_v35 }
 0x95f   : > { %12619 = vmatprep.subr.bf16.mxu1 %v12112_v1  ;;  %v12152_v1 = vunpack.c.h.s8.bf16 %v11880_v36 }
 0x960   : > { %12355 = vmatpush1.bf16.msra.mxu0 %v12109_v54  ;;  %v12149_v54 = vunpack.c.h.s8.bf16 %v11877_v42 }
 0x961   : > { %12356 = vmatprep.subr.bf16.mxu0 %v12114_v19  ;;  %v12154_v19 = vunpack.c.l.s8.bf16 %v11882_v17 }
 0x962   : > { %12620 = vmatpush1.bf16.msra.mxu1 %v12111_v60  ;;  %v12151_v60 = vunpack.c.h.s8.bf16 %v11879_v35 }
 0x963   : > { %12621 = vmatprep.subr.bf16.mxu1 %v12116_v63  ;;  %v12156_v63 = vunpack.c.l.s8.bf16 %v11884_v20 }
 0x964   : > { %12357 = vmatpush1.bf16.msra.mxu0 %v12113_v22  ;;  %v12153_v22 = vunpack.c.l.s8.bf16 %v11881_v43 }
 0x965   : > { %12358 = vmatprep.subr.bf16.mxu0 %v12118_v12  ;;  %v12158_v12 = vunpack.c.h.s8.bf16 %v11882_v17 }
 0x966   : > { %12622 = vmatpush1.bf16.msra.mxu1 %v12115_v51  ;;  %v12155_v51 = vunpack.c.l.s8.bf16 %v11883_v27 }
 0x967   : > { %12623 = vmatprep.subr.bf16.mxu1 %v12120_v55  ;;  %v19216_v55 = vld [vmem:[#allocation11_spill] sm:$0xff] }
 0x968   : > { %12359 = vmatpush1.bf16.msra.mxu0 %v12117_v32  ;;  %v12160_v32 = vunpack.c.h.s8.bf16 %v11884_v20 }
 0x969   : > { %12360 = vmatprep.subr.bf16.mxu0 %v12122_v6  ;;  %v11888_v6 = vld [vmem:[%s17811_s22 + $0x11b8] sm:$0xff] }
 0x96a   : > { %12624 = vmatpush1.bf16.msra.mxu1 %v12119_v25  ;;  %v11885_v25 = vld [vmem:[%s17811_s22 + $0x11a0] sm:$0xff]  ;;  %v12164_v58 = vunpack.c.l.s8.bf16 %v11888_v6 }
 0x96b   : > { %12625 = vmatprep.subr.bf16.mxu1 %v12124_v34  ;;  %v12159_v34 = vunpack.c.h.s8.bf16 %v11883_v27 }
 0x96c   : > { %12361 = vmatpush1.bf16.msra.mxu0 %v12121_v61  ;;  %v11887_v61 = vld [vmem:[%s17811_s22 + $0x11b0] sm:$0xff] }
 0x96d   : > { %12362 = vmatprep.subr.bf16.mxu0 %v12126_v30  ;;  %v12161_v30 = vunpack.c.l.s8.bf16 %v11885_v25  ;;  %v12163_v14 = vunpack.c.l.s8.bf16 %v11887_v61 }
 0x96e   : > { %12626 = vmatpush1.bf16.msra.mxu1 %v12123_v39  ;;  %v12166_v39 = vunpack.c.h.s8.bf16 %v11886_v24 }
 0x96f   : > { %12627 = vmatprep.subr.bf16.mxu1 %v12128_v3  ;;  %v11890_v3 = vld [vmem:[%s17811_s22 + $0x11c8] sm:$0xff] }
 0x970   : > { %12363 = vmatpush1.bf16.msra.mxu0 %v12125_v40  ;;  %v12168_v40 = vunpack.c.h.s8.bf16 %v11888_v6 }
 0x971   : > { %12364 = vmatprep.subr.bf16.mxu0 %v12130_v41  ;;  %v12170_v41 = vunpack.c.l.s8.bf16 %v11890_v3 }
 0x972   : > { %12628 = vmatpush1.bf16.msra.mxu1 %v12127_v50  ;;  %v12167_v50 = vunpack.c.h.s8.bf16 %v11887_v61 }
 0x973   : > { %12629 = vmatprep.subr.bf16.mxu1 %v12132_v52  ;;  %v12172_v52 = vunpack.c.l.s8.bf16 %v11892_v2 }
 0x974   : > { %12365 = vmatpush1.bf16.msra.mxu0 %v12129_v15  ;;  %v12169_v15 = vunpack.c.l.s8.bf16 %v11889_v0 }
 0x975   : > { %12366 = vmatprep.subr.bf16.mxu0 %v12134_v37  ;;  %v12174_v37 = vunpack.c.h.s8.bf16 %v11890_v3 }
 0x976   : > { %12630 = vmatpush1.bf16.msra.mxu1 %v12131_v8  ;;  %v11894_v8 = vld [vmem:[%s17811_s22 + $0x11e8] sm:$0xff] }
 0x977   : > { %12631 = vmatprep.subr.bf16.mxu1 %v12136_v44  ;;  %v12173_v44 = vunpack.c.h.s8.bf16 %v11889_v0  ;;  %v12178_v13 = vunpack.c.l.s8.bf16 %v11894_v8 }
 0x978   : > { %12367 = vmatpush1.bf16.msra.mxu0 %v12133_v5  ;;  %v11896_v5 = vld [vmem:[%s17811_s22 + $0x11f8] sm:$0xff] }
 0x979   : > { %12368 = vmatprep.subr.bf16.mxu0 %v12138_v57  ;;  %v11893_v57 = vld [vmem:[%s17811_s22 + $0x11e0] sm:$0xff] }
 0x97a   : > { %12632 = vmatpush1.bf16.msra.mxu1 %v12135_v45  ;;  %v12180_v45 = vunpack.c.l.s8.bf16 %v11896_v5  ;;  %v12177_v28 = vunpack.c.l.s8.bf16 %v11893_v57  ;;  %v12181_v56 = vunpack.c.h.s8.bf16 %v11893_v57 }
 0x97b   : > { %12633 = vmatprep.subr.bf16.mxu1 %v12140_v23  ;;  %v11895_v23 = vld [vmem:[%s17811_s22 + $0x11f0] sm:$0xff] }
 0x97c   : > { %12369 = vmatpush1.bf16.msra.mxu0 %v12137_v47  ;;  %v12182_v47 = vunpack.c.h.s8.bf16 %v11894_v8 }
 0x97d   : > { %12370 = vmatprep.subr.bf16.mxu0 %v12142_v9  ;;  %v12179_v9 = vunpack.c.l.s8.bf16 %v11895_v23 }
 0x97e   : > { %12634 = vmatpush1.bf16.msra.mxu1 %v12139_v48  ;;  %v12184_v48 = vunpack.c.h.s8.bf16 %v11896_v5 }
 0x97f   : > { %12635 = vmatprep.subr.bf16.mxu1 %v12144_v4  ;;  %v12183_v4 = vunpack.c.h.s8.bf16 %v11895_v23 }
 0x980   : > { %12371 = vmatpush1.bf16.msra.mxu0 %v12141_v26  ;;  %v19217_v26 = vld [vmem:[#allocation8_spill] sm:$0xff] }
 0x981   : > { %12372 = vmatprep.subr.bf16.mxu0 %v12146_v59 }
 0x982   : > { %12636 = vmatpush1.bf16.msra.mxu1 %v12143_v7 }
 0x983   : > { %12637 = vmatprep.subr.bf16.mxu1 %v12148_v53 }
 0x984   : > { %12373 = vmatpush1.bf16.msra.mxu0 %v12145_v38 }
 0x985   : > { %12374 = vmatprep.subr.bf16.mxu0 %v12150_v49 }
 0x986   : > { %12638 = vmatpush1.bf16.msra.mxu1 %v12147_v46 }
 0x987   : > { %12639 = vmatprep.subr.bf16.mxu1 %v12152_v1 }
 0x988   : > { %12375 = vmatpush1.bf16.msra.mxu0 %v12149_v54 }
 0x989   : > { %12397 = vmatprep.subr.bf16.mxu0 %v12154_v19 }
 0x98a   : > { %12640 = vmatpush1.bf16.msra.mxu1 %v12151_v60 }
 0x98b   : > { %12377 = vmatmul.mubr.bf16.vlgmr.msra.gmra.mrb[104].mxu0 %v19216_v55  ;;  %12662 = vmatprep.subr.bf16.mxu1 %v12156_v63 }
 0x98c   : > { %12386 = vmatprep.mubr.bf16.mxu0 %v18095_v10  ;;  %12398 = vmatpush1.bf16.msra.mxu0 %v12153_v22 }
 0x98d   : > { %12642 = vmatmul.mubr.bf16.vlgmr.msra.gmra.mrb[104].mxu1 %v19216_v55  ;;  %12399 = vmatprep.subr.bf16.mxu0 %v12158_v12 }
 0x98e   : > { %12651 = vmatprep.mubr.bf16.mxu1 %v18095_v10  ;;  %12663 = vmatpush1.bf16.msra.mxu1 %v12155_v51  ;;  %v12165_v10 = vunpack.c.h.s8.bf16 %v11885_v25 }
 0x98f   : > { %12664 = vmatprep.subr.bf16.mxu1 %v12160_v32 }
 0x990   : > { %12400 = vmatpush1.bf16.msra.mxu0 %v12157_v16 }
 0x991   : > { %12401 = vmatprep.subr.bf16.mxu0 %v12162_v31 }
 0x992   : > { %12665 = vmatpush1.bf16.msra.mxu1 %v12159_v34 }
 0x993   : > { %12387 = vmatmul.mubr.bf16.gmra.mrb[108].mxu0 %v18092_v18  ;;  %12666 = vmatprep.subr.bf16.mxu1 %v12164_v58 }
 0x994   : > { %12402 = vmatpush1.bf16.msra.mxu0 %v12161_v30  ;;  %12429 = vmatprep.mubr.bf16.mxu0 %v19203_v33 }
 0x995   : > { %12652 = vmatmul.mubr.bf16.gmra.mrb[108].mxu1 %v18092_v18  ;;  %12403 = vmatprep.subr.bf16.mxu0 %v12166_v39  ;;  %v12171_v18 = vunpack.c.l.s8.bf16 %v11891_v11 }
 0x996   : > { %12667 = vmatpush1.bf16.msra.mxu1 %v12163_v14  ;;  %12694 = vmatprep.mubr.bf16.mxu1 %v19203_v33 }
 0x997   : > { %12668 = vmatprep.subr.bf16.mxu1 %v12168_v40 }
 0x998   : > { %12404 = vmatpush1.bf16.msra.mxu0 %v12165_v10 }
 0x999   : > { %12405 = vmatprep.subr.bf16.mxu0 %v12170_v41 }
 0x99a   : > { %12669 = vmatpush1.bf16.msra.mxu1 %v12167_v50 }
 0x99b   : > { %12670 = vmatprep.subr.bf16.mxu1 %v12172_v52 }
 0x99c   : > { %12406 = vmatpush1.bf16.msra.mxu0 %v12169_v15 }
 0x99d   : > { %12407 = vmatprep.subr.bf16.mxu0 %v12174_v37 }
 0x99e   : > { %12671 = vmatpush1.bf16.msra.mxu1 %v12171_v18 }
 0x99f   : > { %12672 = vmatprep.subr.bf16.mxu1 %v12176_v62 }
 0x9a0   : > { %12408 = vmatpush1.bf16.msra.mxu0 %v12173_v44 }
 0x9a1   : > { %12409 = vmatprep.subr.bf16.mxu0 %v12178_v13 }
 0x9a2   : > { %12673 = vmatpush1.bf16.msra.mxu1 %v12175_v29 }
 0x9a3   : > { %12674 = vmatprep.subr.bf16.mxu1 %v12180_v45 }
 0x9a4   : > { %12410 = vmatpush1.bf16.msra.mxu0 %v12177_v28 }
 0x9a5   : > { %12411 = vmatprep.subr.bf16.mxu0 %v12182_v47 }
 0x9a6   : > { %12675 = vmatpush1.bf16.msra.mxu1 %v12179_v9 }
 0x9a7   : > { %12676 = vmatprep.subr.bf16.mxu1 %v12184_v48 }
 0x9a8   : > { %12412 = vmatpush1.bf16.msra.mxu0 %v12181_v56 }
 0x9aa   : > { %12677 = vmatpush1.bf16.msra.mxu1 %v12183_v4 }
 0x9ab   : > { %12430 = vmatmul.mubr.bf16.vlgmr.msra.gmra.mrb[104].mxu0 %v19217_v26 }
 0x9ac   : > { %12439 = vmatprep.mubr.bf16.mxu0 %v19203_v33 }
 0x9ad   : > { %12695 = vmatmul.mubr.bf16.vlgmr.msra.gmra.mrb[104].mxu1 %v19217_v26 }
 0x9ae   : > { %12704 = vmatprep.mubr.bf16.mxu1 %v19203_v33 }
 0x9b3   : > { %12440 = vmatmul.mubr.bf16.gmra.mrb[108].mxu0 %v18098_v21 }
 0x9b5   : > { %12705 = vmatmul.mubr.bf16.gmra.mrb[108].mxu1 %v18098_v21 }
 0xa7e   : > { %v18692_v36 = vpop.f32.mrb[104].mxu0 }
 0xa7f   : > { %v18694_v59 = vpop.f32.mrb[105].mxu0  ;;  %v12772_v53 = vmul.f32 %v18692_v36, %v18692_v36 }
 0xa80   : > { %v18696_v42 = vpop.f32.mrb[104].mxu1  ;;  %v18698_v7 = vpop.f32.mrb[106].mxu0  ;;  %v12773_v49 = vmul.f32 %v18694_v59, %v18694_v59 }
 0xa81   : > { %v18702_v35 = vpop.f32.mrb[105].mxu1  ;;  %v12731_v33 = vadd.f32 %v18698_v7, %v18692_v36  ;;  %v12776_v38 = vmul.f32 %v18698_v7, %v18698_v7  ;;  %v18708_v21 = vpop.f32.mrb[107].mxu0  ;;  %v12774_v54 = vmul.f32 %v18696_v42, %v18696_v42 }
 0xa82   : > { %v18712_v46 = vpop.f32.mrb[106].mxu1  ;;  %v12740_v17 = vadd.f32 %v18708_v21, %v18694_v59  ;;  %v12777_v1 = vmul.f32 %v18708_v21, %v18708_v21  ;;  %v12775_v63 = vmul.f32 %v18702_v35, %v18702_v35 }
 0xa83   : > { %v12788_v20 = vadd.f32 %v12776_v38, %v12772_v53  ;;  %v12749_v19 = vadd.f32 %v18712_v46, %v18696_v42  ;;  %v12778_v43 = vmul.f32 %v18712_v46, %v18712_v46  ;;  %v18724_v60 = vpop.f32.mrb[107].mxu1 }
 0xa84   : > { %v12797_v27 = vadd.f32 %v12777_v1, %v12773_v49  ;;  %v12758_v22 = vadd.f32 %v18724_v60, %v18702_v35  ;;  %v12779_v12 = vmul.f32 %v18724_v60, %v18724_v60 }
 0xa85   : > { %v12806_v51 = vadd.f32 %v12778_v43, %v12774_v54 }
 0xa86   : > { %v12815_v24 = vadd.f32 %v12779_v12, %v12775_v63  ;;  %v18732_v55 = vpop.f32.mrb[108].mxu0 }
 0xa87   : > { %v12732_v32 = vadd.f32 %v12731_v33, %v18732_v55  ;;  %v12780_v16 = vmul.f32 %v18732_v55, %v18732_v55  ;;  %v18737_v6 = vpop.f32.mrb[109].mxu0 }
 0xa88   : > { %v18739_v31 = vpop.f32.mrb[108].mxu1  ;;  %v12741_v25 = vadd.f32 %v12740_v17, %v18737_v6  ;;  %v12781_v34 = vmul.f32 %v18737_v6, %v18737_v6  ;;  %v18744_v58 = vpop.f32.mrb[110].mxu0 }
 0xa89   : > { %v12789_v61 = vadd.f32 %v12788_v20, %v12780_v16  ;;  %v12750_v30 = vadd.f32 %v12749_v19, %v18739_v31  ;;  %v12782_v39 = vmul.f32 %v18739_v31, %v18739_v31  ;;  %v18749_v14 = vpop.f32.mrb[109].mxu1  ;;  %v12733_v3 = vadd.f32 %v12732_v32, %v18744_v58  ;;  %v18752_v40 = vpop.f32.mrb[111].mxu0 }
 0xa8a   : > { %v12798_v10 = vadd.f32 %v12797_v27, %v12781_v34  ;;  %v12759_v2 = vadd.f32 %v12758_v22, %v18749_v14  ;;  %v12783_v41 = vmul.f32 %v18749_v14, %v18749_v14  ;;  %v12784_v0 = vmul.f32 %v18744_v58, %v18744_v58  ;;  %v18759_v50 = vpop.f32.mrb[110].mxu1 }
 0xa8b   : > { %v12807_v52 = vadd.f32 %v12806_v51, %v12782_v39  ;;  %v12734_v11 = vrot.slane %v12733_v3, 4  ;;  %v12751_v15 = vadd.f32 %v12750_v30, %v18759_v50  ;;  %v12786_v37 = vmul.f32 %v18759_v50, %v18759_v50  ;;  %v18764_v18 = vpop.f32.mrb[111].mxu1 }
 0xa8c   : > { %v12816_v8 = vadd.f32 %v12815_v24, %v12783_v41  ;;  %v12790_v62 = vadd.f32 %v12789_v61, %v12784_v0  ;;  %v12742_v44 = vadd.f32 %v12741_v25, %v18752_v40  ;;  %v12785_v5 = vmul.f32 %v18752_v40, %v18752_v40 }
 0xa8d   : > { %v12735_v13 = vadd.f32 %v12734_v11, %v12733_v3  ;;  %v12752_v57 = vrot.slane %v12751_v15, 4  ;;  %v12808_v29 = vadd.f32 %v12807_v52, %v12786_v37  ;;  %v12760_v45 = vadd.f32 %v12759_v2, %v18764_v18 }
 0xa8e   : > { %v12791_v23 = vrot.slane %v12790_v62, 4  ;;  %v12743_v28 = vrot.slane %v12742_v44, 4  ;;  %v12799_v47 = vadd.f32 %v12798_v10, %v12785_v5  ;;  %v12787_v9 = vmul.f32 %v18764_v18, %v18764_v18 }
 0xa8f   : > { %v12736_v48 = vrot.slane %v12735_v13, 2  ;;  %v12753_v56 = vadd.f32 %v12752_v57, %v12751_v15  ;;  %v12809_v4 = vrot.slane %v12808_v29, 4  ;;  %v12761_v26 = vrot.slane %v12760_v45, 4 }
 0xa90   : > { %v12792_v53 = vadd.f32 %v12791_v23, %v12790_v62  ;;  %v12744_v33 = vadd.f32 %v12743_v28, %v12742_v44  ;;  %v12800_v38 = vrot.slane %v12799_v47, 4  ;;  %v12817_v49 = vadd.f32 %v12816_v8, %v12787_v9 }
 0xa91   : > { %v12737_v17 = vadd.f32 %v12736_v48, %v12735_v13  ;;  %v12754_v1 = vrot.slane %v12753_v56, 2  ;;  %v12810_v54 = vadd.f32 %v12809_v4, %v12808_v29  ;;  %v12762_v20 = vadd.f32 %v12761_v26, %v12760_v45 }
 0xa92   : > { %v12793_v19 = vrot.slane %v12792_v53, 2  ;;  %v12745_v43 = vrot.slane %v12744_v33, 2  ;;  %v12801_v63 = vadd.f32 %v12800_v38, %v12799_v47  ;;  %v12818_v27 = vrot.slane %v12817_v49, 4 }
 0xa93   : > { %v12738_v22 = vrot.slane %v12737_v17, 1  ;;  %v12755_v12 = vadd.f32 %v12754_v1, %v12753_v56  ;;  %v12811_v51 = vrot.slane %v12810_v54, 2  ;;  %v12763_v24 = vrot.slane %v12762_v20, 2 }
 0xa94   : > { %v12794_v32 = vadd.f32 %v12793_v19, %v12792_v53  ;;  %v12746_v16 = vadd.f32 %v12745_v43, %v12744_v33  ;;  %v12802_v25 = vrot.slane %v12801_v63, 2  ;;  %v12819_v34 = vadd.f32 %v12818_v27, %v12817_v49 }
 0xa95   : > { %v12739_v61 = vadd.f32 %v12738_v22, %v12737_v17  ;;  %v12756_v30 = vrot.slane %v12755_v12, 1  ;;  %v12812_v39 = vadd.f32 %v12811_v51, %v12810_v54  ;;  %v12764_v3 = vadd.f32 %v12763_v24, %v12762_v20 }
 0xa96   : > { %v12795_v10 = vrot.slane %v12794_v32, 1  ;;  %v12747_v2 = vrot.slane %v12746_v16, 1  ;;  %v12803_v41 = vadd.f32 %v12802_v25, %v12801_v63  ;;  %v12820_v0 = vrot.slane %v12819_v34, 2 }
 0xa97   : > { %v18772_v52 = vmul.f32 0.03125, %v12739_v61  ;;  %v12757_v11 = vadd.f32 %v12756_v30, %v12755_v12  ;;  %v12813_v15 = vrot.slane %v12812_v39, 1  ;;  %v12765_v37 = vrot.slane %v12764_v3, 1  ;;  %v19220_v61 = vld [vmem:[#allocation35_spill] sm:$0xff] }
 0xa98   : > { %v12796_v8 = vadd.f32 %v12795_v10, %v12794_v32  ;;  %v12748_v62 = vadd.f32 %v12747_v2, %v12746_v16  ;;  %v12804_v44 = vrot.slane %v12803_v41, 1  ;;  %v12821_v5 = vadd.f32 %v12820_v0, %v12819_v34  ;;  %v19219_v16 = vld [vmem:[#allocation32_spill] sm:$0xff]  ;;  %v19222_v2 = vld [vmem:[#allocation37_spill] sm:$0xff] }
 0xa99   : > { %v12828_v13 = vmul.f32 %v18772_v52, %v18772_v52  ;;  %v12848_v57 = vsub.f32 %v18744_v58, %v18772_v52  ;;  %v18779_v29 = vmul.f32 0.03125, %v12757_v11  ;;  %v12814_v45 = vadd.f32 %v12813_v15, %v12812_v39  ;;  %v19221_v39 = vld [vmem:[#allocation36_spill] sm:$0xff] }
 0xa9a   : > { %v12824_v23 = vmul.f32 0.03125, %v12796_v8  ;;  %v18781_v28 = vmul.f32 0.03125, %v12748_v62  ;;  %v12805_v47 = vadd.f32 %v12804_v44, %v12803_v41  ;;  %v12766_v9 = vadd.f32 %v12765_v37, %v12764_v3 }
 0xa9b   : > { %v12826_v48 = vmul.f32 0.03125, %v12814_v45  ;;  %v12830_v56 = vmul.f32 %v18779_v29, %v18779_v29  ;;  %v12850_v58 = vsub.f32 %v18759_v50, %v18779_v29  ;;  %v12822_v4 = vrot.slane %v12821_v5, 1 }
 0xa9c   : > { %v12832_v26 = vsub.f32 %v12824_v23, %v12828_v13  ;;  %v12825_v53 = vmul.f32 0.03125, %v12805_v47  ;;  %v12829_v33 = vmul.f32 %v18781_v28, %v18781_v28  ;;  %v12849_v38 = vsub.f32 %v18752_v40, %v18781_v28 }
 0xa9d   : > { %v12834_v49 = vsub.f32 %v12826_v48, %v12830_v56  ;;  %v18797_v17 = vmul.f32 0.03125, %v12766_v9  ;;  %v12823_v1 = vadd.f32 %v12822_v4, %v12821_v5  ;;  %v12844_v54 = vsub.f32 %v18732_v55, %v18772_v52 }
 0xa9e   : > { %v12852_v20 = vadd.f32 1e-05, %v12832_v26  ;;  %v12833_v19 = vsub.f32 %v12825_v53, %v12829_v33  ;;  %v12845_v50 = vsub.f32 %v18737_v6, %v18781_v28  ;;  %v12846_v43 = vsub.f32 %v18739_v31, %v18779_v29 }
 0xa9f   : > { %v12854_v63 = vadd.f32 1e-05, %v12834_v49  ;;  %v12827_v40 = vmul.f32 0.03125, %v12823_v1  ;;  %v12831_v27 = vmul.f32 %v18797_v17, %v18797_v17  ;;  %v12851_v22 = vsub.f32 %v18764_v18, %v18797_v17 }
 0xaa0   : > { %15895 = vrsqrt.f32 %v12852_v20  ;;  %v12853_v55 = vadd.f32 1e-05, %v12833_v19  ;;  %v12847_v12 = vsub.f32 %v18749_v14, %v18797_v17  ;;  %v12836_v6 = vsub.f32 %v18692_v36, %v18772_v52 }
 0xaa1   : > { %15897 = vrsqrt.f32 %v12854_v63  ;;  %v12835_v31 = vsub.f32 %v12827_v40, %v12831_v27  ;;  %v12837_v51 = vsub.f32 %v18694_v59, %v18781_v28  ;;  %v12838_v24 = vsub.f32 %v18696_v42, %v18779_v29 }
 0xaa2   : > { %15899 = vrsqrt.f32 %v12853_v55  ;;  %v12839_v18 = vsub.f32 %v18702_v35, %v18797_v17  ;;  %v12840_v32 = vsub.f32 %v18698_v7, %v18772_v52  ;;  %v12841_v14 = vsub.f32 %v18708_v21, %v18781_v28  ;;  %v12876_v7 = vld [vmem:[%s444_s11] sm:$0xf] }
 0xaa3   : > { %v12855_v36 = vadd.f32 1e-05, %v12835_v31  ;;  %v12842_v59 = vsub.f32 %v18712_v46, %v18779_v29  ;;  %v12843_v42 = vsub.f32 %v18724_v60, %v18797_v17  ;;  %v12914_v35 = vld [vmem:[%s449_s21] sm:$0xf]  ;;  %v18838_v25 = vrot.slane %v12876_v7, %v19219_v16 }
 0xaa4   : > { %v18841_v34 = vrot.slane %v12914_v35, %v19219_v16  ;;  %v18844_v30 = vrot.slane %v12876_v7, %v19220_v61  ;;  %v18847_v3 = vrot.slane %v12876_v7, %v19221_v39  ;;  %v18851_v10 = vrot.slane %v12914_v35, %v19221_v39 }
 0xaa5   : > { %15901 = vrsqrt.f32 %v12855_v36  ;;  %v18854_v41 = vrot.slane %v12876_v7, %v19222_v2  ;;  %v18857_v0 = vrot.slane %v12914_v35, %v19220_v61  ;;  %v18860_v52 = vrot.slane %v12914_v35, %v19222_v2  ;;  %v12993_v7 = vld [vmem:[%s18895_s15 + $0x48] sm:$0xff] }
 0xaaa   : > { %v15896_v46 = vpop.eup %15895 }
 0xaab   : > { %v15898_v11 = vpop.eup %15897  ;;  %v12872_v15 = vmul.f32 %v15896_v46, %v12848_v57  ;;  %v12868_v37 = vmul.f32 %v15896_v46, %v12844_v54  ;;  %v12860_v8 = vmul.f32 %v15896_v46, %v12836_v6  ;;  %v18862_v62 = vmul.f32 %v15896_v46, %v12840_v32 }
 0xaac   : > { %v18864_v44 = vpop.eup %15899  ;;  %v12874_v5 = vmul.f32 %v15898_v11, %v12850_v58  ;;  %v12870_v13 = vmul.f32 %v15898_v11, %v12846_v43  ;;  %v12862_v29 = vmul.f32 %v15898_v11, %v12838_v24  ;;  %v18866_v45 = vmul.f32 %v15898_v11, %v12842_v59 }
 0xaad   : > { %v12910_v23 = vmul.f32 %v18838_v25, %v12872_v15  ;;  %v12873_v47 = vmul.f32 %v18864_v44, %v12849_v38  ;;  %v12869_v9 = vmul.f32 %v18864_v44, %v12845_v50  ;;  %v12906_v57 = vmul.f32 %v18838_v25, %v12868_v37 }
 0xaae   : > { %v12912_v48 = vmul.f32 %v18844_v30, %v12874_v5  ;;  %v12908_v56 = vmul.f32 %v18844_v30, %v12870_v13  ;;  %v12861_v4 = vmul.f32 %v18864_v44, %v12837_v51  ;;  %v12898_v58 = vmul.f32 %v18838_v25, %v12860_v8 }
 0xaaf   : > { %v18876_v26 = vpop.eup %15901  ;;  %v18879_v53 = vadd.f32 %v18841_v34, %v12910_v23  ;;  %v12911_v33 = vmul.f32 %v18847_v3, %v12873_v47  ;;  %v12907_v38 = vmul.f32 %v18847_v3, %v12869_v9  ;;  %v12944_v49 = vadd.f32 %v18841_v34, %v12906_v57  ;;  %v12984_v23 = vld [vmem:[%s18895_s15] sm:$0xff]  ;;  %v12985_v47 = vld [vmem:[%s18895_s15 + $0x8] sm:$0xff] }
 0xab0   : > { %v12875_v1 = vmul.f32 %v18876_v26, %v12851_v22  ;;  %v12871_v54 = vmul.f32 %v18876_v26, %v12847_v12  ;;  %v12946_v20 = vadd.f32 %v18857_v0, %v12908_v56  ;;  %v12863_v19 = vmul.f32 %v18876_v26, %v12839_v18  ;;  %v12992_v22 = vld [vmem:[%s18895_s15 + $0x40] sm:$0xff]  ;;  %v12994_v18 = vld [vmem:[%s18895_s15 + $0x50] sm:$0xff]  ;;  %v12995_v56 = vld [vmem:[%s18895_s15 + $0x58] sm:$0xff] }
 0xab1   : > { %v18889_v50 = vadd.f32 %v18851_v10, %v12911_v33  ;;  %v12945_v43 = vadd.f32 %v18851_v10, %v12907_v38  ;;  %v12960_v63 = vmul.f32 0.2, %v12944_v49  ;;  %v12899_v40 = vmul.f32 %v18847_v3, %v12861_v4  ;;  %v12986_v33 = vld [vmem:[%s18895_s15 + $0x10] sm:$0xff] }
 0xab2   : > { %v12913_v27 = vmul.f32 %v18854_v41, %v12875_v1  ;;  %v12909_v55 = vmul.f32 %v18854_v41, %v12871_v54  ;;  %v12962_v6 = vmul.f32 0.2, %v12946_v20  ;;  %v12900_v12 = vmul.f32 %v18844_v30, %v12862_v29 }
 0xab3   : > { %v12965_v31 = vmul.f32 0.2, %v18889_v50  ;;  %v12961_v51 = vmul.f32 0.2, %v12945_v43  ;;  %v12976_v24 = vmax.f32 %v12944_v49, %v12960_v63  ;;  %v12901_v32 = vmul.f32 %v18854_v41, %v12863_v19  ;;  %v12987_v19 = vld [vmem:[%s18895_s15 + $0x18] sm:$0xff] }
 0xab4   : > { %v12947_v36 = vadd.f32 %v18860_v52, %v12909_v55  ;;  %v12978_v59 = vmax.f32 %v12946_v20, %v12962_v6  ;;  %v12936_v35 = vadd.f32 %v18841_v34, %v12898_v58  ;;  %v12937_v16 = vadd.f32 %v18851_v10, %v12899_v40 }
 0xab5   : > { %v12977_v61 = vmax.f32 %v12945_v43, %v12961_v51  ;;  %v13008_v39 = vmul.f32 %v12992_v22, %v12976_v24  ;;  %v12938_v46 = vadd.f32 %v18857_v0, %v12900_v12  ;;  %v12939_v2 = vadd.f32 %v18860_v52, %v12901_v32  ;;  %v12996_v12 = vld [vmem:[%s18895_s15 + $0x60] sm:$0xff]  ;;  %v12997_v51 = vld [vmem:[%s18895_s15 + $0x68] sm:$0xff] }
 0xab6   : > { %v12963_v11 = vmul.f32 0.2, %v12947_v36  ;;  %v13010_v15 = vmul.f32 %v12994_v18, %v12978_v59  ;;  %v12952_v37 = vmul.f32 0.2, %v12936_v35  ;;  %v12953_v8 = vmul.f32 0.2, %v12937_v16 }
 0xab7   : > { %v13009_v5 = vmul.f32 %v12993_v7, %v12977_v61  ;;  %v12954_v13 = vmul.f32 0.2, %v12938_v46  ;;  %v12955_v29 = vmul.f32 0.2, %v12939_v2  ;;  %v12950_v9 = vadd.f32 %v18857_v0, %v12912_v48  ;;  %v12998_v7 = vld [vmem:[%s18895_s15 + $0x70] sm:$0xff] }
 0xab8   : > { %v12979_v57 = vmax.f32 %v12947_v36, %v12963_v11  ;;  %v12968_v4 = vmax.f32 %v12936_v35, %v12952_v37  ;;  %v12969_v58 = vmax.f32 %v12937_v16, %v12953_v8  ;;  %v12951_v38 = vadd.f32 %v18860_v52, %v12913_v27  ;;  %v12988_v8 = vld [vmem:[%s18895_s15 + $0x20] sm:$0xff] }
 0xab9   : > { %v13026_v49 = vadd.f32 %v13009_v5, %v13008_v39  ;;  %v12970_v1 = vmax.f32 %v12938_v46, %v12954_v13  ;;  %v12971_v54 = vmax.f32 %v12939_v2, %v12955_v29  ;;  %v12964_v20 = vmul.f32 0.2, %v18879_v53 }
 0xaba   : > { %v13000_v43 = vmul.f32 %v12984_v23, %v12968_v4  ;;  %v13001_v63 = vmul.f32 %v12985_v47, %v12969_v58  ;;  %v12966_v40 = vmul.f32 0.2, %v12950_v9  ;;  %v13011_v48 = vmul.f32 %v12995_v56, %v12979_v57  ;;  %v12991_v47 = vld [vmem:[%s18895_s15 + $0x38] sm:$0xff] }
 0xabb   : > { %v13027_v55 = vadd.f32 %v13026_v49, %v13010_v15  ;;  %v13002_v6 = vmul.f32 %v12986_v33, %v12970_v1  ;;  %v12967_v22 = vmul.f32 0.2, %v12951_v38  ;;  %v12980_v27 = vmax.f32 %v18879_v53, %v12964_v20 }
 0xabc   : > { %v13016_v24 = vadd.f32 %v13001_v63, %v13000_v43  ;;  %v12981_v18 = vmax.f32 %v18889_v50, %v12965_v31  ;;  %v12982_v32 = vmax.f32 %v12950_v9, %v12966_v40  ;;  %v13003_v59 = vmul.f32 %v12987_v19, %v12971_v54  ;;  %v12999_v50 = vld [vmem:[%s18895_s15 + $0x78] sm:$0xff] }
 0xabd   : > { %v13028_v36 = vadd.f32 %v13027_v55, %v13011_v48  ;;  %v12865_v35 = vmul.f32 %v18864_v44, %v12841_v14  ;;  %v12867_v16 = vmul.f32 %v18876_v26, %v12843_v42  ;;  %v12983_v39 = vmax.f32 %v12951_v38, %v12967_v22 }
 0xabe   : > { %v13017_v61 = vadd.f32 %v13016_v24, %v13002_v6  ;;  %v13012_v46 = vmul.f32 %v12996_v12, %v12980_v27  ;;  %v13013_v53 = vmul.f32 %v12997_v51, %v12981_v18  ;;  %v12902_v31 = vmul.f32 %v18838_v25, %v18862_v62 }
 0xabf   : > { %13029 = vadd.xlane.f32.xlu1 %v13028_v36  ;;  %v12903_v2 = vmul.f32 %v18847_v3, %v12865_v35  ;;  %v12904_v21 = vmul.f32 %v18844_v30, %v18866_v45  ;;  %v13014_v14 = vmul.f32 %v12998_v7, %v12982_v32  ;;  %v12905_v17 = vmul.f32 %v18854_v41, %v12867_v16  ;;  %v12989_v41 = vld [vmem:[%s18895_s15 + $0x28] sm:$0xff] }
 0xac0   : > { %v13018_v28 = vadd.f32 %v13017_v61, %v13003_v59  ;;  %v13031_v60 = vadd.f32 %v13013_v53, %v13012_v46  ;;  %v12940_v42 = vadd.f32 %v18841_v34, %v12902_v31  ;;  %v13015_v25 = vmul.f32 %v12999_v50, %v12983_v39 }
 0xac1   : > { %v12941_v44 = vadd.f32 %v18851_v10, %v12903_v2  ;;  %v12942_v26 = vadd.f32 %v18857_v0, %v12904_v21  ;;  %v12943_v62 = vadd.f32 %v18860_v52, %v12905_v17  ;;  %v12990_v0 = vld [vmem:[%s18895_s15 + $0x30] sm:$0xff] }
 0xac2   : > { %13019 = vadd.xlane.f32.xlu0 %v13018_v28  ;;  %v13032_v3 = vadd.f32 %v13031_v60, %v13014_v14  ;;  %v12956_v30 = vmul.f32 0.2, %v12940_v42 }
 0xac3   : > { %v12957_v45 = vmul.f32 0.2, %v12941_v44  ;;  %v12958_v11 = vmul.f32 0.2, %v12942_v26  ;;  %v12959_v37 = vmul.f32 0.2, %v12943_v62 }
 0xac4   : > { %v13033_v15 = vadd.f32 %v13032_v3, %v13015_v25  ;;  %v12972_v34 = vmax.f32 %v12940_v42, %v12956_v30 }
 0xac5   : > { %v12973_v5 = vmax.f32 %v12941_v44, %v12957_v45  ;;  %v12974_v10 = vmax.f32 %v12942_v26, %v12958_v11  ;;  %v12975_v13 = vmax.f32 %v12943_v62, %v12959_v37 }
 0xac6   : > { %13034 = vadd.xlane.f32.xlu1 %v13033_v15  ;;  %v13004_v29 = vmul.f32 %v12988_v8, %v12972_v34 }
 0xac7   : > { %v13005_v23 = vmul.f32 %v12989_v41, %v12973_v5  ;;  %v13006_v9 = vmul.f32 %v12990_v0, %v12974_v10  ;;  %v13007_v57 = vmul.f32 %v12991_v47, %v12975_v13 }
 0xac9   : > { %v13021_v52 = vadd.f32 %v13005_v23, %v13004_v29 }
 0xacb   : > { %v13022_v56 = vadd.f32 %v13021_v52, %v13006_v9 }
 0xacd   : > { %v13023_v4 = vadd.f32 %v13022_v56, %v13007_v57 }
 0xacf   : > { %13024 = vadd.xlane.f32.xlu0 %v13023_v4 }
 0xb4c   : > { %v13030_v58 = vpop.xlane.xlu1 %13029 }
 0xb4d   : > { %13039 = vst.msk [vmem:[%s456_s24 + $0x10] sm:$0xff] %vm13036_vm0, %v13030_v58 }
 0xb4f   : > { %v13020_v33 = vpop.xlane.xlu0 %13019 }
 0xb50   : > { %13037 = vst.msk [vmem:[%s456_s24] sm:$0xff] %vm13036_vm0, %v13020_v33 }
 0xb53   : > { %v13035_v38 = vpop.xlane.xlu1 %13034 }
 0xb54   : > { %13040 = vst.msk [vmem:[%s456_s24 + $0x18] sm:$0xff] %vm13036_vm0, %v13035_v38 }
 0xb5c   : > { %v13025_v49 = vpop.xlane.xlu0 %13024 }
 0xb5d   : > { %13038 = vst.msk [vmem:[%s456_s24 + $0x8] sm:$0xff] %vm13036_vm0, %v13025_v49 }
 0xb5e PF: > { %p17_p13 = scmp.ge.s32.totalorder %s16032_s13, 4   ;;  %s19223_s30 = smov %s15953_s10 }
 0xb5f   : > { %s19224_s10 = smov %s16042_s16  ;;  %s19225_s11 = smov %s16032_s13 }
 0xb60   :  { %19 = sbr.rel (!%p17_p13) target bundleno = 2 (0x2), region = 136 }
 0xb67   :  { %13062 = vsyncpa [#allocation4], 1 }
 0xb68   :  { %13064 = vsyncpa [#allocation4 + $0x1], 1 }

</bundles_post_ra>
